<compile_context>
chip_gen: v7x
topology: tpu7x:2x2x1
jax: 0.10.0
libtpu: 0.0.40
codegen_flags: <defaults>
</compile_context>

<pallas_src>
import functools

import jax
import jax.numpy as jnp
from jax import lax
from jax.experimental import pallas as pl
from jax.experimental.pallas import tpu as pltpu


def spp_kernel(x_ref, w1_ref, s1_ref, b1_ref, w2_ref, s2_ref, b2_ref,
               o_ref, buf_ref, cat_ref, *, H, W, C1, n_pool, pool_k, pad_l):
    """One batch element per grid step.

    x_ref   : (1, H*W, C_in)              channels-last, compute dtype
    w1_ref  : (C_in, C1)                  cv1 weight (transposed), compute dtype
    s1/b1   : (1, C1)                     folded inference-BN affine of cv1 (f32)
    w2_ref  : ((n_pool+1)*C1, C_out)      cv2 weight (transposed), compute dtype
    s2/b2   : (1, C_out)                  folded inference-BN affine of cv2 (f32)
    o_ref   : (1, H*W, C_out)             output
    buf_ref : (H+2*pb, pad_l+W+8, C1)     padded spatial plane, compute dtype
    cat_ref : (H*W, (n_pool+1)*C1)        fused-cv2 branch staging, compute dtype
    """
    pb = pool_k // 2
    HW = H * W
    h_tot, w_tot = buf_ref.shape[0], buf_ref.shape[1]
    cdt = buf_ref.dtype

    # ---- cv1: 1x1 conv == channel matmul (MXU, f32 acc) + BN affine + SiLU
    y1 = jnp.dot(x_ref[0], w1_ref[...], preferred_element_type=jnp.float32)
    y1 = y1 * s1_ref[...] + b1_ref[...]
    y1 = y1 * jax.nn.sigmoid(y1)                               # (HW, C1) f32

    # ---- branch 0 (identity) into the fused-cv2 staging buffer
    cat_ref[:, 0:C1] = y1.astype(cdt)

    # ---- -inf halo: aligned 8-wide side bands + full-width top/bottom strips.
    #      Refilled every grid step (scratch persists across steps and the
    #      batch axis may be megacore-sharded, so no first-step gating).
    buf_ref[0:pb, :, :] = jnp.full((pb, w_tot, C1), -jnp.inf, cdt)
    buf_ref[pb + H:h_tot, :, :] = jnp.full((h_tot - pb - H, w_tot, C1),
                                           -jnp.inf, cdt)
    buf_ref[pb:pb + H, 0:pad_l, :] = jnp.full((H, pad_l, C1), -jnp.inf, cdt)
    buf_ref[pb:pb + H, pad_l + W:w_tot, :] = jnp.full(
        (H, w_tot - pad_l - W, C1), -jnp.inf, cdt)

    # interior sits at a sublane-aligned column offset (pad_l == 8)
    buf_ref[pb:pb + H, pad_l:pad_l + W, :] = y1.reshape(H, W, C1).astype(cdt)

    # ---- SPPF cascade: k -> 2k-1 -> 3k-2 (== 5, 9, 13 for k=5); identical to
    #      the independent pools because stride-1 max-pools compose under
    #      -inf padding.
    wlo = pad_l - pb
    for stage in range(n_pool):
        # vertical k-max: aligned leading-dim ref slices (pure addressing)
        vm = buf_ref[0:H, :, :]
        for dy in range(1, pool_k):
            vm = jnp.maximum(vm, buf_ref[dy:dy + H, :, :])
        # horizontal k-max: shifted value slices of the vertical max, in f32
        # (keeps all packed-dtype memory accesses aligned).
        vm = vm.astype(jnp.float32)
        pooled = vm[:, wlo:wlo + W, :]
        for dx in range(1, pool_k):
            pooled = jnp.maximum(pooled, vm[:, wlo + dx:wlo + dx + W, :])
        # stage this pyramid level for the single fused cv2 matmul
        cat_ref[:, (stage + 1) * C1:(stage + 2) * C1] = (
            pooled.reshape(HW, C1).astype(cdt))
        # feed the next cascade level (halo bands stay -inf)
        if stage + 1 < n_pool:
            buf_ref[pb:pb + H, pad_l:pad_l + W, :] = pooled.astype(cdt)

    # ---- cv2: ONE matmul over the concatenated branches (MXU, f32 acc)
    acc = jnp.dot(cat_ref[...], w2_ref[...],
                  preferred_element_type=jnp.float32)
    y2 = acc * s2_ref[...] + b2_ref[...]
    o_ref[0] = (y2 * jax.nn.sigmoid(y2)).astype(o_ref.dtype)


def spp_forward(x_nchw, w1, s1, b1, w2, s2, b2, ks=(5, 9, 13),
                compute_dtype=jnp.bfloat16, out_dtype=jnp.float32):
    """x_nchw: (N, C_in, H, W) f32 (PyTorch NCHW).  w1: (C1, C_in),
    w2: (C_out, (len(ks)+1)*C1), s*/b*: per-channel folded-BN vectors.
    Set out_dtype=jnp.bfloat16 if the consumer accepts bf16 (halves writeback).
    """
    N, C, H, W = x_nchw.shape
    C1 = w1.shape[0]
    C_out = w2.shape[0]
    n_pool = len(ks)
    pool_k = ks[0]
    pb = pool_k // 2
    # SPPF cascade requires k_i = k_0 + i*(k_0 - 1)  (true for (5, 9, 13)).
    assert all(ks[i] == pool_k + i * (pool_k - 1) for i in range(n_pool)), ks

    pad_l = 8                       # aligned left -inf band (>= pb)
    pad_r = 8                       # aligned right -inf band (>= pb)
    assert pb <= pad_l and pb <= pad_r
    w_tot = pad_l + W + pad_r
    h_tot = H + 2 * pb
    # NOTE: W a multiple of 8 keeps every scratch access sublane-aligned and
    # the (H*W, C1) <-> (H, W, C1) reshapes free; other W still lowers, slower.

    # glue: NCHW -> (N, H*W, C) channels-last; matmul operands in compute dtype
    x_flat = jnp.transpose(x_nchw, (0, 2, 3, 1)).reshape(N, H * W, C)
    x_flat = x_flat.astype(compute_dtype)
    w1_t = w1.T.astype(compute_dtype)
    w2_t = w2.T.astype(compute_dtype)

    # ---- explicit VMEM budget (double-buffered blocks + scratch + headroom),
    #      clamped generation-aware (v7x: 64 MiB/core; v5e/v6e: 128 MiB).
    def _pad(v, m):
        return ((v + m - 1) // m) * m
    isz = jnp.dtype(compute_dtype).itemsize
    osz = jnp.dtype(out_dtype).itemsize
    hw = H * W
    kc = (n_pool + 1) * C1
    vmem_bytes = (
        2 * _pad(hw, 8) * _pad(C, 128) * isz                          # x
        + 2 * _pad(hw, 8) * _pad(C_out, 128) * osz                    # out
        + 2 * (_pad(C, 8) * _pad(C1, 128)
               + _pad(kc, 8) * _pad(C_out, 128)) * isz                # w1, w2
        + 4 * 2 * 8 * 128 * 4                                         # s/b
        + h_tot * _pad(w_tot, 8) * _pad(C1, 128) * isz                # buf
        + _pad(hw, 8) * _pad(kc, 128) * isz                           # cat
    )
    vmem_limit = int(1.5 * vmem_bytes) + (8 << 20)   # headroom for temporaries
    try:
        info = pltpu.get_tpu_info()
        phys_vmem = int(getattr(info, "vmem_capacity_bytes", 64 << 20))
    except Exception:
        phys_vmem = 64 << 20
    cap = min(int(0.85 * phys_vmem), 100 << 20)
    vmem_limit = max(16 << 20, min(vmem_limit, cap))

    kernel = functools.partial(spp_kernel, H=H, W=W, C1=C1, n_pool=n_pool,
                               pool_k=pool_k, pad_l=pad_l)

    # NOTE: for C_out < 128 the output stores are lane-masked; at real SPP
    # sizes (C_out >= 128) the out block is lane-dense as required.
    out_flat = pl.pallas_call(
        kernel,
        out_shape=jax.ShapeDtypeStruct((N, H * W, C_out), out_dtype),
        grid_spec=pltpu.PrefetchScalarGridSpec(
            num_scalar_prefetch=0,
            grid=(N,),
            in_specs=[
                pl.BlockSpec((1, H * W, C), lambda n: (n, 0, 0)),
                pl.BlockSpec((C, C1), lambda n: (0, 0)),
                pl.BlockSpec((1, C1), lambda n: (0, 0)),
                pl.BlockSpec((1, C1), lambda n: (0, 0)),
                pl.BlockSpec((kc, C_out), lambda n: (0, 0)),
                pl.BlockSpec((1, C_out), lambda n: (0, 0)),
                pl.BlockSpec((1, C_out), lambda n: (0, 0)),
            ],
            out_specs=pl.BlockSpec((1, H * W, C_out), lambda n: (n, 0, 0)),
            scratch_shapes=[
                pltpu.VMEM((h_tot, w_tot, C1), compute_dtype),  # padded plane
                pltpu.VMEM((H * W, kc), compute_dtype),         # branch staging
            ],
        ),
        compiler_params=pltpu.CompilerParams(
            dimension_semantics=("parallel",),
            vmem_limit_bytes=vmem_limit),
    )(x_flat, w1_t,
      s1.reshape(1, -1).astype(jnp.float32), b1.reshape(1, -1).astype(jnp.float32),
      w2_t,
      s2.reshape(1, -1).astype(jnp.float32), b2.reshape(1, -1).astype(jnp.float32))

    # glue: (N, H*W, C_out) -> NCHW
    return jnp.transpose(out_flat.reshape(N, H, W, C_out), (0, 3, 1, 2))


def spp_reference(x, w1, s1, b1, w2, s2, b2, ks=(5, 9, 13)):
    """Pure-JAX f32 NCHW reference (inference-mode folded BN)."""
    hp = lax.Precision.HIGHEST
    y1 = jnp.einsum('oc,nchw->nohw', w1, x, precision=hp)
    y1 = y1 * s1[None, :, None, None] + b1[None, :, None, None]
    y1 = y1 * jax.nn.sigmoid(y1)
    branches = [y1]
    ninf = jnp.array(-jnp.inf, dtype=y1.dtype)
    for k in ks:
        branches.append(lax.reduce_window(
            y1, ninf, lax.max, (1, 1, k, k), (1, 1, 1, 1), 'SAME'))
    cat = jnp.concatenate(branches, axis=1)
    y2 = jnp.einsum('oc,nchw->nohw', w2, cat, precision=hp)
    y2 = y2 * s2[None, :, None, None] + b2[None, :, None, None]
    return y2 * jax.nn.sigmoid(y2)


if __name__ == "__main__":
    N, ch_in, ch_out, H, W = 2, 16, 32, 16, 16
    ks = (5, 9, 13)
    c_ = ch_in // 2
    eps = 1e-5

    key = jax.random.PRNGKey(0)
    k = jax.random.split(key, 11)

    x = jax.random.normal(k[0], (N, ch_in, H, W), jnp.float32)

    # cv1 params (1x1 conv weight (c_, ch_in); BN folded to scale/bias)
    w1 = jax.random.normal(k[1], (c_, ch_in), jnp.float32) * 0.25
    g1 = 1.0 + 0.1 * jax.random.normal(k[2], (c_,), jnp.float32)
    be1 = 0.1 * jax.random.normal(k[3], (c_,), jnp.float32)
    mu1 = 0.1 * jax.random.normal(k[4], (c_,), jnp.float32)
    var1 = jax.random.uniform(k[5], (c_,), jnp.float32, 0.5, 1.5)
    s1 = g1 / jnp.sqrt(var1 + eps)
    b1 = be1 - mu1 * s1

    # cv2 params
    w2 = jax.random.normal(k[6], (ch_out, (len(ks) + 1) * c_), jnp.float32) * 0.15
    g2 = 1.0 + 0.1 * jax.random.normal(k[7], (ch_out,), jnp.float32)
    be2 = 0.1 * jax.random.normal(k[8], (ch_out,), jnp.float32)
    mu2 = 0.1 * jax.random.normal(k[9], (ch_out,), jnp.float32)
    var2 = jax.random.uniform(k[10], (ch_out,), jnp.float32, 0.5, 1.5)
    s2 = g2 / jnp.sqrt(var2 + eps)
    b2 = be2 - mu2 * s2

    ref = spp_reference(x, w1, s1, b1, w2, s2, b2, ks=ks)

    # f32 compute path: tight structural check (SPPF cascade == 5/9/13 pools,
    # -inf padding, BN fold, SiLU, fused single-matmul cv2).
    out_f32 = jax.block_until_ready(
        spp_forward(x, w1, s1, b1, w2, s2, b2, ks=ks,
                    compute_dtype=jnp.float32))
    assert out_f32.shape == (N, ch_out, H, W), out_f32.shape
    assert jnp.allclose(out_f32, ref, rtol=2e-4, atol=2e-4), (
        float(jnp.max(jnp.abs(out_f32 - ref))))

    # bf16 matmul/scratch path (performance default): tolerance sized for
    # bf16 operands with f32 accumulation (intentionally loose).
    out_bf16 = jax.block_until_ready(
        spp_forward(x, w1, s1, b1, w2, s2, b2, ks=ks,
                    compute_dtype=jnp.bfloat16))
    assert out_bf16.shape == (N, ch_out, H, W), out_bf16.shape
    assert jnp.allclose(out_bf16, ref, rtol=2e-1, atol=2e-1), (
        float(jnp.max(jnp.abs(out_bf16 - ref))))

    print("KERNEL_OK")
</pallas_src>

<mosaic_0001>
module attributes {stable_mosaic.version = 11 : i64} {
  func.func @spp_kernel(%arg0: i32, %arg1: memref<1x256x16xf32, #tpu.memory_space<vmem>>, %arg2: memref<16x8xf32, #tpu.memory_space<vmem>>, %arg3: memref<1x8xf32, #tpu.memory_space<vmem>>, %arg4: memref<1x8xf32, #tpu.memory_space<vmem>>, %arg5: memref<32x32xf32, #tpu.memory_space<vmem>>, %arg6: memref<1x32xf32, #tpu.memory_space<vmem>>, %arg7: memref<1x32xf32, #tpu.memory_space<vmem>>, %arg8: memref<1x256x32xf32, #tpu.memory_space<vmem>>, %arg9: memref<20x32x8xf32, #tpu.memory_space<vmem>>, %arg10: memref<256x32xf32, #tpu.memory_space<vmem>>) attributes {dimension_semantics = [#tpu.dimension_semantics<parallel>], iteration_bounds = array<i64: 2>, scalar_prefetch = 0 : i64, scratch_operands = 2 : i64, tpu.core_type = #tpu.core_type<tc>, window_params = [{transform_indices = @transform_0, window_bounds = array<i64: 1, 256, 16>}, {pipeline_mode = #tpu.pipeline_mode<synchronous>, transform_indices = @transform_1, window_bounds = array<i64: 16, 8>}, {pipeline_mode = #tpu.pipeline_mode<synchronous>, transform_indices = @transform_2, window_bounds = array<i64: 1, 8>}, {pipeline_mode = #tpu.pipeline_mode<synchronous>, transform_indices = @transform_3, window_bounds = array<i64: 1, 8>}, {pipeline_mode = #tpu.pipeline_mode<synchronous>, transform_indices = @transform_4, window_bounds = array<i64: 32, 32>}, {pipeline_mode = #tpu.pipeline_mode<synchronous>, transform_indices = @transform_5, window_bounds = array<i64: 1, 32>}, {pipeline_mode = #tpu.pipeline_mode<synchronous>, transform_indices = @transform_6, window_bounds = array<i64: 1, 32>}, {transform_indices = @transform_7, window_bounds = array<i64: 1, 256, 32>}]} {
    %c0 = arith.constant 0 : index
    %c0_0 = arith.constant 0 : index
    %c0_1 = arith.constant 0 : index
    %0 = vector.load %arg1[%c0, %c0_0, %c0_1] : memref<1x256x16xf32, #tpu.memory_space<vmem>>, vector<1x256x16xf32>
    %1 = vector.shape_cast %0 : vector<1x256x16xf32> to vector<256x16xf32>
    %c0_2 = arith.constant 0 : index
    %c0_3 = arith.constant 0 : index
    %2 = vector.load %arg2[%c0_2, %c0_3] : memref<16x8xf32, #tpu.memory_space<vmem>>, vector<16x8xf32>
    %cst = arith.constant dense<0.000000e+00> : vector<256x8xf32>
    %3 = tpu.matmul %1, %2, %cst {dimension_numbers = #tpu.dot_dimension_numbers<[1], [0], [0], [1], [0, 0, 1, 1], [], []>} : vector<256x16xf32>, vector<16x8xf32>, vector<256x8xf32> -> vector<256x8xf32>
    %c0_4 = arith.constant 0 : index
    %c0_5 = arith.constant 0 : index
    %4 = vector.load %arg3[%c0_4, %c0_5] : memref<1x8xf32, #tpu.memory_space<vmem>>, vector<1x8xf32>
    %5 = vector.broadcast %4 : vector<1x8xf32> to vector<256x8xf32>
    %6 = arith.mulf %3, %5 : vector<256x8xf32>
    %c0_6 = arith.constant 0 : index
    %c0_7 = arith.constant 0 : index
    %7 = vector.load %arg4[%c0_6, %c0_7] : memref<1x8xf32, #tpu.memory_space<vmem>>, vector<1x8xf32>
    %8 = vector.broadcast %7 : vector<1x8xf32> to vector<256x8xf32>
    %9 = arith.addf %6, %8 : vector<256x8xf32>
    %10 = arith.negf %9 : vector<256x8xf32>
    %11 = math.exp %10 : vector<256x8xf32>
    %cst_8 = arith.constant 1.000000e+00 : f32
    %12 = vector.broadcast %cst_8 : f32 to vector<256x8xf32>
    %13 = arith.addf %12, %11 : vector<256x8xf32>
    %14 = arith.divf %12, %13 : vector<256x8xf32>
    %15 = arith.mulf %9, %14 : vector<256x8xf32>
    %c0_9 = arith.constant 0 : index
    %c0_10 = arith.constant 0 : index
    %16 = vector.load %arg10[%c0_9, %c0_10] : memref<256x32xf32, #tpu.memory_space<vmem>>, vector<256x8xf32>
    tpu.vector_store %arg10[%c0_9, %c0_10], %15 {strides = array<i32>} : memref<256x32xf32, #tpu.memory_space<vmem>>, vector<256x8xf32>,
    %cst_11 = arith.constant 0xFF800000 : f32
    %17 = vector.broadcast %cst_11 : f32 to vector<2x32x8xf32>
    %c0_12 = arith.constant 0 : index
    %c0_13 = arith.constant 0 : index
    %c0_14 = arith.constant 0 : index
    %18 = vector.load %arg9[%c0_12, %c0_13, %c0_14] : memref<20x32x8xf32, #tpu.memory_space<vmem>>, vector<2x32x8xf32>
    tpu.vector_store %arg9[%c0_12, %c0_13, %c0_14], %17 {strides = array<i32>} : memref<20x32x8xf32, #tpu.memory_space<vmem>>, vector<2x32x8xf32>,
    %cst_15 = arith.constant 0xFF800000 : f32
    %19 = vector.broadcast %cst_15 : f32 to vector<2x32x8xf32>
    %c18 = arith.constant 18 : index
    %c0_16 = arith.constant 0 : index
    %c0_17 = arith.constant 0 : index
    %20 = vector.load %arg9[%c18, %c0_16, %c0_17] : memref<20x32x8xf32, #tpu.memory_space<vmem>>, vector<2x32x8xf32>
    tpu.vector_store %arg9[%c18, %c0_16, %c0_17], %19 {strides = array<i32>} : memref<20x32x8xf32, #tpu.memory_space<vmem>>, vector<2x32x8xf32>,
    %cst_18 = arith.constant 0xFF800000 : f32
    %21 = vector.broadcast %cst_18 : f32 to vector<16x8x8xf32>
    %c2 = arith.constant 2 : index
    %c0_19 = arith.constant 0 : index
    %c0_20 = arith.constant 0 : index
    %22 = vector.load %arg9[%c2, %c0_19, %c0_20] : memref<20x32x8xf32, #tpu.memory_space<vmem>>, vector<16x8x8xf32>
    tpu.vector_store %arg9[%c2, %c0_19, %c0_20], %21 {strides = array<i32>} : memref<20x32x8xf32, #tpu.memory_space<vmem>>, vector<16x8x8xf32>,
    %cst_21 = arith.constant 0xFF800000 : f32
    %23 = vector.broadcast %cst_21 : f32 to vector<16x8x8xf32>
    %c2_22 = arith.constant 2 : index
    %c24 = arith.constant 24 : index
    %c0_23 = arith.constant 0 : index
    %24 = vector.load %arg9[%c2_22, %c24, %c0_23] : memref<20x32x8xf32, #tpu.memory_space<vmem>>, vector<16x8x8xf32>
    tpu.vector_store %arg9[%c2_22, %c24, %c0_23], %23 {strides = array<i32>} : memref<20x32x8xf32, #tpu.memory_space<vmem>>, vector<16x8x8xf32>,
    %25 = vector.shape_cast %15 : vector<256x8xf32> to vector<16x16x8xf32>
    %c2_24 = arith.constant 2 : index
    %c8 = arith.constant 8 : index
    %c0_25 = arith.constant 0 : index
    %26 = vector.load %arg9[%c2_24, %c8, %c0_25] : memref<20x32x8xf32, #tpu.memory_space<vmem>>, vector<16x16x8xf32>
    tpu.vector_store %arg9[%c2_24, %c8, %c0_25], %25 {strides = array<i32>} : memref<20x32x8xf32, #tpu.memory_space<vmem>>, vector<16x16x8xf32>,
    %c0_26 = arith.constant 0 : index
    %c0_27 = arith.constant 0 : index
    %c0_28 = arith.constant 0 : index
    %27 = vector.load %arg9[%c0_26, %c0_27, %c0_28] : memref<20x32x8xf32, #tpu.memory_space<vmem>>, vector<16x32x8xf32>
    %c1 = arith.constant 1 : index
    %c0_29 = arith.constant 0 : index
    %c0_30 = arith.constant 0 : index
    %28 = vector.load %arg9[%c1, %c0_29, %c0_30] : memref<20x32x8xf32, #tpu.memory_space<vmem>>, vector<16x32x8xf32>
    %29 = arith.maximumf %27, %28 : vector<16x32x8xf32>
    %c2_31 = arith.constant 2 : index
    %c0_32 = arith.constant 0 : index
    %c0_33 = arith.constant 0 : index
    %30 = vector.load %arg9[%c2_31, %c0_32, %c0_33] : memref<20x32x8xf32, #tpu.memory_space<vmem>>, vector<16x32x8xf32>
    %31 = arith.maximumf %29, %30 : vector<16x32x8xf32>
    %c3 = arith.constant 3 : index
    %c0_34 = arith.constant 0 : index
    %c0_35 = arith.constant 0 : index
    %32 = vector.load %arg9[%c3, %c0_34, %c0_35] : memref<20x32x8xf32, #tpu.memory_space<vmem>>, vector<16x32x8xf32>
    %33 = arith.maximumf %31, %32 : vector<16x32x8xf32>
    %c4 = arith.constant 4 : index
    %c0_36 = arith.constant 0 : index
    %c0_37 = arith.constant 0 : index
    %34 = vector.load %arg9[%c4, %c0_36, %c0_37] : memref<20x32x8xf32, #tpu.memory_space<vmem>>, vector<16x32x8xf32>
    %35 = arith.maximumf %33, %34 : vector<16x32x8xf32>
    %36 = vector.extract_strided_slice %35 {offsets = [0, 6, 0], sizes = [16, 16, 8], strides = [1, 1, 1]} : vector<16x32x8xf32> to vector<16x16x8xf32>
    %37 = vector.extract_strided_slice %35 {offsets = [0, 7, 0], sizes = [16, 16, 8], strides = [1, 1, 1]} : vector<16x32x8xf32> to vector<16x16x8xf32>
    %38 = arith.maximumf %36, %37 : vector<16x16x8xf32>
    %39 = vector.extract_strided_slice %35 {offsets = [0, 8, 0], sizes = [16, 16, 8], strides = [1, 1, 1]} : vector<16x32x8xf32> to vector<16x16x8xf32>
    %40 = arith.maximumf %38, %39 : vector<16x16x8xf32>
    %41 = vector.extract_strided_slice %35 {offsets = [0, 9, 0], sizes = [16, 16, 8], strides = [1, 1, 1]} : vector<16x32x8xf32> to vector<16x16x8xf32>
    %42 = arith.maximumf %40, %41 : vector<16x16x8xf32>
    %43 = vector.extract_strided_slice %35 {offsets = [0, 10, 0], sizes = [16, 16, 8], strides = [1, 1, 1]} : vector<16x32x8xf32> to vector<16x16x8xf32>
    %44 = arith.maximumf %42, %43 : vector<16x16x8xf32>
    %45 = vector.shape_cast %44 : vector<16x16x8xf32> to vector<256x8xf32>
    %c0_38 = arith.constant 0 : index
    %c8_39 = arith.constant 8 : index
    %46 = vector.load %arg10[%c0_38, %c8_39] : memref<256x32xf32, #tpu.memory_space<vmem>>, vector<256x8xf32>
    tpu.vector_store %arg10[%c0_38, %c8_39], %45 {strides = array<i32>} : memref<256x32xf32, #tpu.memory_space<vmem>>, vector<256x8xf32>,
    %c2_40 = arith.constant 2 : index
    %c8_41 = arith.constant 8 : index
    %c0_42 = arith.constant 0 : index
    %47 = vector.load %arg9[%c2_40, %c8_41, %c0_42] : memref<20x32x8xf32, #tpu.memory_space<vmem>>, vector<16x16x8xf32>
    tpu.vector_store %arg9[%c2_40, %c8_41, %c0_42], %44 {strides = array<i32>} : memref<20x32x8xf32, #tpu.memory_space<vmem>>, vector<16x16x8xf32>,
    %c0_43 = arith.constant 0 : index
    %c0_44 = arith.constant 0 : index
    %c0_45 = arith.constant 0 : index
    %48 = vector.load %arg9[%c0_43, %c0_44, %c0_45] : memref<20x32x8xf32, #tpu.memory_space<vmem>>, vector<16x32x8xf32>
    %c1_46 = arith.constant 1 : index
    %c0_47 = arith.constant 0 : index
    %c0_48 = arith.constant 0 : index
    %49 = vector.load %arg9[%c1_46, %c0_47, %c0_48] : memref<20x32x8xf32, #tpu.memory_space<vmem>>, vector<16x32x8xf32>
    %50 = arith.maximumf %48, %49 : vector<16x32x8xf32>
    %c2_49 = arith.constant 2 : index
    %c0_50 = arith.constant 0 : index
    %c0_51 = arith.constant 0 : index
    %51 = vector.load %arg9[%c2_49, %c0_50, %c0_51] : memref<20x32x8xf32, #tpu.memory_space<vmem>>, vector<16x32x8xf32>
    %52 = arith.maximumf %50, %51 : vector<16x32x8xf32>
    %c3_52 = arith.constant 3 : index
    %c0_53 = arith.constant 0 : index
    %c0_54 = arith.constant 0 : index
    %53 = vector.load %arg9[%c3_52, %c0_53, %c0_54] : memref<20x32x8xf32, #tpu.memory_space<vmem>>, vector<16x32x8xf32>
    %54 = arith.maximumf %52, %53 : vector<16x32x8xf32>
    %c4_55 = arith.constant 4 : index
    %c0_56 = arith.constant 0 : index
    %c0_57 = arith.constant 0 : index
    %55 = vector.load %arg9[%c4_55, %c0_56, %c0_57] : memref<20x32x8xf32, #tpu.memory_space<vmem>>, vector<16x32x8xf32>
    %56 = arith.maximumf %54, %55 : vector<16x32x8xf32>
    %57 = vector.extract_strided_slice %56 {offsets = [0, 6, 0], sizes = [16, 16, 8], strides = [1, 1, 1]} : vector<16x32x8xf32> to vector<16x16x8xf32>
    %58 = vector.extract_strided_slice %56 {offsets = [0, 7, 0], sizes = [16, 16, 8], strides = [1, 1, 1]} : vector<16x32x8xf32> to vector<16x16x8xf32>
    %59 = arith.maximumf %57, %58 : vector<16x16x8xf32>
    %60 = vector.extract_strided_slice %56 {offsets = [0, 8, 0], sizes = [16, 16, 8], strides = [1, 1, 1]} : vector<16x32x8xf32> to vector<16x16x8xf32>
    %61 = arith.maximumf %59, %60 : vector<16x16x8xf32>
    %62 = vector.extract_strided_slice %56 {offsets = [0, 9, 0], sizes = [16, 16, 8], strides = [1, 1, 1]} : vector<16x32x8xf32> to vector<16x16x8xf32>
    %63 = arith.maximumf %61, %62 : vector<16x16x8xf32>
    %64 = vector.extract_strided_slice %56 {offsets = [0, 10, 0], sizes = [16, 16, 8], strides = [1, 1, 1]} : vector<16x32x8xf32> to vector<16x16x8xf32>
    %65 = arith.maximumf %63, %64 : vector<16x16x8xf32>
    %66 = vector.shape_cast %65 : vector<16x16x8xf32> to vector<256x8xf32>
    %c0_58 = arith.constant 0 : index
    %c16 = arith.constant 16 : index
    %67 = vector.load %arg10[%c0_58, %c16] : memref<256x32xf32, #tpu.memory_space<vmem>>, vector<256x8xf32>
    tpu.vector_store %arg10[%c0_58, %c16], %66 {strides = array<i32>} : memref<256x32xf32, #tpu.memory_space<vmem>>, vector<256x8xf32>,
    %c2_59 = arith.constant 2 : index
    %c8_60 = arith.constant 8 : index
    %c0_61 = arith.constant 0 : index
    %68 = vector.load %arg9[%c2_59, %c8_60, %c0_61] : memref<20x32x8xf32, #tpu.memory_space<vmem>>, vector<16x16x8xf32>
    tpu.vector_store %arg9[%c2_59, %c8_60, %c0_61], %65 {strides = array<i32>} : memref<20x32x8xf32, #tpu.memory_space<vmem>>, vector<16x16x8xf32>,
    %c0_62 = arith.constant 0 : index
    %c0_63 = arith.constant 0 : index
    %c0_64 = arith.constant 0 : index
    %69 = vector.load %arg9[%c0_62, %c0_63, %c0_64] : memref<20x32x8xf32, #tpu.memory_space<vmem>>, vector<16x32x8xf32>
    %c1_65 = arith.constant 1 : index
    %c0_66 = arith.constant 0 : index
    %c0_67 = arith.constant 0 : index
    %70 = vector.load %arg9[%c1_65, %c0_66, %c0_67] : memref<20x32x8xf32, #tpu.memory_space<vmem>>, vector<16x32x8xf32>
    %71 = arith.maximumf %69, %70 : vector<16x32x8xf32>
    %c2_68 = arith.constant 2 : index
    %c0_69 = arith.constant 0 : index
    %c0_70 = arith.constant 0 : index
    %72 = vector.load %arg9[%c2_68, %c0_69, %c0_70] : memref<20x32x8xf32, #tpu.memory_space<vmem>>, vector<16x32x8xf32>
    %73 = arith.maximumf %71, %72 : vector<16x32x8xf32>
    %c3_71 = arith.constant 3 : index
    %c0_72 = arith.constant 0 : index
    %c0_73 = arith.constant 0 : index
    %74 = vector.load %arg9[%c3_71, %c0_72, %c0_73] : memref<20x32x8xf32, #tpu.memory_space<vmem>>, vector<16x32x8xf32>
    %75 = arith.maximumf %73, %74 : vector<16x32x8xf32>
    %c4_74 = arith.constant 4 : index
    %c0_75 = arith.constant 0 : index
    %c0_76 = arith.constant 0 : index
    %76 = vector.load %arg9[%c4_74, %c0_75, %c0_76] : memref<20x32x8xf32, #tpu.memory_space<vmem>>, vector<16x32x8xf32>
    %77 = arith.maximumf %75, %76 : vector<16x32x8xf32>
    %78 = vector.extract_strided_slice %77 {offsets = [0, 6, 0], sizes = [16, 16, 8], strides = [1, 1, 1]} : vector<16x32x8xf32> to vector<16x16x8xf32>
    %79 = vector.extract_strided_slice %77 {offsets = [0, 7, 0], sizes = [16, 16, 8], strides = [1, 1, 1]} : vector<16x32x8xf32> to vector<16x16x8xf32>
    %80 = arith.maximumf %78, %79 : vector<16x16x8xf32>
    %81 = vector.extract_strided_slice %77 {offsets = [0, 8, 0], sizes = [16, 16, 8], strides = [1, 1, 1]} : vector<16x32x8xf32> to vector<16x16x8xf32>
    %82 = arith.maximumf %80, %81 : vector<16x16x8xf32>
    %83 = vector.extract_strided_slice %77 {offsets = [0, 9, 0], sizes = [16, 16, 8], strides = [1, 1, 1]} : vector<16x32x8xf32> to vector<16x16x8xf32>
    %84 = arith.maximumf %82, %83 : vector<16x16x8xf32>
    %85 = vector.extract_strided_slice %77 {offsets = [0, 10, 0], sizes = [16, 16, 8], strides = [1, 1, 1]} : vector<16x32x8xf32> to vector<16x16x8xf32>
    %86 = arith.maximumf %84, %85 : vector<16x16x8xf32>
    %87 = vector.shape_cast %86 : vector<16x16x8xf32> to vector<256x8xf32>
    %c0_77 = arith.constant 0 : index
    %c24_78 = arith.constant 24 : index
    %88 = vector.load %arg10[%c0_77, %c24_78] : memref<256x32xf32, #tpu.memory_space<vmem>>, vector<256x8xf32>
    tpu.vector_store %arg10[%c0_77, %c24_78], %87 {strides = array<i32>} : memref<256x32xf32, #tpu.memory_space<vmem>>, vector<256x8xf32>,
    %c0_79 = arith.constant 0 : index
    %c0_80 = arith.constant 0 : index
    %89 = vector.load %arg10[%c0_79, %c0_80] : memref<256x32xf32, #tpu.memory_space<vmem>>, vector<256x32xf32>
    %c0_81 = arith.constant 0 : index
    %c0_82 = arith.constant 0 : index
    %90 = vector.load %arg5[%c0_81, %c0_82] : memref<32x32xf32, #tpu.memory_space<vmem>>, vector<32x32xf32>
    %cst_83 = arith.constant dense<0.000000e+00> : vector<256x32xf32>
    %91 = tpu.matmul %89, %90, %cst_83 {dimension_numbers = #tpu.dot_dimension_numbers<[1], [0], [0], [1], [0, 0, 1, 1], [], []>} : vector<256x32xf32>, vector<32x32xf32>, vector<256x32xf32> -> vector<256x32xf32>
    %c0_84 = arith.constant 0 : index
    %c0_85 = arith.constant 0 : index
    %92 = vector.load %arg6[%c0_84, %c0_85] : memref<1x32xf32, #tpu.memory_space<vmem>>, vector<1x32xf32>
    %93 = vector.broadcast %92 : vector<1x32xf32> to vector<256x32xf32>
    %94 = arith.mulf %91, %93 : vector<256x32xf32>
    %c0_86 = arith.constant 0 : index
    %c0_87 = arith.constant 0 : index
    %95 = vector.load %arg7[%c0_86, %c0_87] : memref<1x32xf32, #tpu.memory_space<vmem>>, vector<1x32xf32>
    %96 = vector.broadcast %95 : vector<1x32xf32> to vector<256x32xf32>
    %97 = arith.addf %94, %96 : vector<256x32xf32>
    %98 = arith.negf %97 : vector<256x32xf32>
    %99 = math.exp %98 : vector<256x32xf32>
    %cst_88 = arith.constant 1.000000e+00 : f32
    %100 = vector.broadcast %cst_88 : f32 to vector<256x32xf32>
    %101 = arith.addf %100, %99 : vector<256x32xf32>
    %102 = arith.divf %100, %101 : vector<256x32xf32>
    %103 = arith.mulf %97, %102 : vector<256x32xf32>
    %c0_89 = arith.constant 0 : index
    %c0_90 = arith.constant 0 : index
    %c0_91 = arith.constant 0 : index
    %104 = vector.load %arg8[%c0_89, %c0_90, %c0_91] : memref<1x256x32xf32, #tpu.memory_space<vmem>>, vector<1x256x32xf32>
    %105 = vector.shape_cast %104 : vector<1x256x32xf32> to vector<256x32xf32>
    %106 = vector.shape_cast %103 : vector<256x32xf32> to vector<1x256x32xf32>
    tpu.vector_store %arg8[%c0_89, %c0_90, %c0_91], %106 {strides = array<i32>} : memref<1x256x32xf32, #tpu.memory_space<vmem>>, vector<1x256x32xf32>,
    return
  }
  func.func @transform_0(%arg0: i32) -> (i32, i32, i32) {
    %c0_i32 = arith.constant 0 : i32
    %c0_i32_0 = arith.constant 0 : i32
    %c0_i32_1 = arith.constant 0 : i32
    return %arg0, %c0_i32, %c0_i32_0 : i32, i32, i32
  }
  func.func @transform_1(%arg0: i32) -> (i32, i32) {
    %c0_i32 = arith.constant 0 : i32
    %c0_i32_0 = arith.constant 0 : i32
    %c0_i32_1 = arith.constant 0 : i32
    return %c0_i32, %c0_i32_0 : i32, i32
  }
  func.func @transform_2(%arg0: i32) -> (i32, i32) {
    %c0_i32 = arith.constant 0 : i32
    %c0_i32_0 = arith.constant 0 : i32
    %c0_i32_1 = arith.constant 0 : i32
    return %c0_i32, %c0_i32_0 : i32, i32
  }
  func.func @transform_3(%arg0: i32) -> (i32, i32) {
    %c0_i32 = arith.constant 0 : i32
    %c0_i32_0 = arith.constant 0 : i32
    %c0_i32_1 = arith.constant 0 : i32
    return %c0_i32, %c0_i32_0 : i32, i32
  }
  func.func @transform_4(%arg0: i32) -> (i32, i32) {
    %c0_i32 = arith.constant 0 : i32
    %c0_i32_0 = arith.constant 0 : i32
    %c0_i32_1 = arith.constant 0 : i32
    return %c0_i32, %c0_i32_0 : i32, i32
  }
  func.func @transform_5(%arg0: i32) -> (i32, i32) {
    %c0_i32 = arith.constant 0 : i32
    %c0_i32_0 = arith.constant 0 : i32
    %c0_i32_1 = arith.constant 0 : i32
    return %c0_i32, %c0_i32_0 : i32, i32
  }
  func.func @transform_6(%arg0: i32) -> (i32, i32) {
    %c0_i32 = arith.constant 0 : i32
    %c0_i32_0 = arith.constant 0 : i32
    %c0_i32_1 = arith.constant 0 : i32
    return %c0_i32, %c0_i32_0 : i32, i32
  }
  func.func @transform_7(%arg0: i32) -> (i32, i32, i32) {
    %c0_i32 = arith.constant 0 : i32
    %c0_i32_0 = arith.constant 0 : i32
    %c0_i32_1 = arith.constant 0 : i32
    return %arg0, %c0_i32, %c0_i32_0 : i32, i32, i32
  }
}

</mosaic_0001>

<bundles_post_ra>
// kernel: tpu_custom_call.1
= control target key start
LH: loop header
LB: loop body
LE: loop exit
PB: predicated region body
PF: predicated region fallthrough
CT: control target
= control target key end

     0   :  { %s7283_s24 = smov 0   ;;  %s10472_s0 = inlined_call_operand.vmem [shape: f32[2,256,16], index: 0, kind: input, shape index: {}]   ;;  %s10473_s1 = inlined_call_operand.vmem [shape: f32[16,8], index: 1, kind: input, shape index: {}]   ;;  %s10474_s2 = inlined_call_operand.vmem [shape: f32[1,8], index: 2, kind: input, shape index: {}]   ;;  %s10475_s3 = inlined_call_operand.vmem [shape: f32[1,8], index: 3, kind: input, shape index: {}]   ;;  %s10476_s4 = inlined_call_operand.vmem [shape: f32[32,32], index: 4, kind: input, shape index: {}]   ;;  %s10477_s5 = inlined_call_operand.vmem [shape: f32[1,32], index: 5, kind: input, shape index: {}]   ;;  %s10478_s6 = inlined_call_operand.vmem [shape: f32[1,32], index: 6, kind: input, shape index: {}]   ;;  %s10479_s7 = inlined_call_operand.vmem [shape: f32[2,256,32], index: 7, kind: output, shape index: {}]  }
   0x1 LB: > { %s6612_s25 = sadd.s32 4294967295, %s7237_s24   ;;  %p6616_p0 = scmp.ge.s32.totalorder %s7237_s24, 1  ;;  %s7237_s24 = sphi %s7283_s24, %s17_s24  }
   0x2   : > { %p237_p1 = scmp.lt.s32.totalorder %s7237_s24, 3 }
   0x4   : > { %p238_p2 = pnand %p6616_p0, %p237_p1 }
   0x6   : > { %241 = sbr.rel (%p238_p2) target bundleno = 1275 (0x4fb), region = 48 }
   0xd   : > { %v311_v0 = vld [vmem:[%s10473_s1] sm:$0xff]  ;;  %v312_v1 = vld [vmem:[%s10473_s1 + $0x8] sm:$0xff]  ;;  %p269_p3 = scmp.lt.s32.totalorder %s6612_s25, 1  ;;  %vm313_vm0 = vcmask 130048   ;;  %vm937_vm1 = vcmask 64512   ;;  %v7239_v35 = vmov -inf  }
   0xe   : > { %v6935_v2 = vpack.c.bf16 %v312_v1, %v311_v0  ;;  %970 = vst.msk [vmem:[#allocation2] sm:$0xff] %vm937_vm1, %v7239_v35  ;;  %971 = vst.msk [vmem:[#allocation2 + $0x8] sm:$0xff] %vm937_vm1, %v7239_v35  ;;  %vm1679_vm2 = vcmask 1046528   ;;  %vm1856_vm3 = vcmask 1045504   ;;  %vm2017_vm4 = vcmask 1044480   ;;  %s7240_s15 = smov 8  }
   0xf   : > { %s10569_s25 = smov (!%p269_p3, %s6612_s25), 1  ;;  %972 = vst.msk [vmem:[#allocation2 + $0x10] sm:$0xff] %vm937_vm1, %v7239_v35  ;;  %974 = vst.msk [vmem:[#allocation2 + $0x20] sm:$0xff] %vm937_vm1, %v7239_v35  ;;  %vm2194_vm5 = vcmask 1043456   ;;  %vm2629_vm6 = vcmask 64518   ;;  %vm2419_vm7 = vcmask 1041408  }
  0x10   : > { %6936 = vmatprep.subr.bf16.mxu0 %v6935_v2  ;;  %s6755_s30 = sshll.u32 %s10569_s25, 8  ;;  %975 = vst.msk [vmem:[#allocation2 + $0x28] sm:$0xff] %vm937_vm1, %v7239_v35  ;;  %976 = vst.msk [vmem:[#allocation2 + $0x30] sm:$0xff] %vm937_vm1, %v7239_v35  ;;  %vm2632_vm8 = vcmask 62464   ;;  %s7241_s16 = smov 16   ;;  %vm2596_vm9 = vcmask 130112  }
  0x11   : > { %6938 = vmatpush3.bf16.msra.mxu0 %v6935_v2  ;;  %s7305_s10 = scalar_lea.vmem %s10472_s0, %s6755_s30  ;;  %988 = vst.msk [vmem:[#allocation2 + $0x40] sm:$0xff] %vm937_vm1, %v7239_v35  ;;  %989 = vst.msk [vmem:[#allocation2 + $0x60] sm:$0xff] %vm937_vm1, %v7239_v35  ;;  %s7242_s17 = smov 24   ;;  %vm4215_vm10 = vcmask 195712   ;;  %vm5832_vm11 = vcmask 261312   ;;  %vm5901_vm12 = vcmask 261120  }
  0x12   : > { %v279_v3 = vld [vmem:[%s7305_s10] sm:$0xff]  ;;  %v280_v4 = vld [vmem:[%s7305_s10 + $0x8] sm:$0xff]  ;;  %v281_v5 = vld [vmem:[%s7305_s10 + $0x10] sm:$0xff]  ;;  %990 = vst.msk [vmem:[#allocation2 + $0x80] sm:$0xff] %vm937_vm1, %v7239_v35  ;;  %s10336_s12 = scalar_lea.vmem %s10479_s7, %s6755_s30 }
  0x13   : > { %6831 = vmatprep.mubr.msk.f32.mxu0 %vm313_vm0, %v279_v3  ;;  %v282_v6 = vld [vmem:[%s7305_s10 + $0x18] sm:$0xff]  ;;  %v283_v7 = vld [vmem:[%s7305_s10 + $0x20] sm:$0xff]  ;;  %v284_v8 = vld [vmem:[%s7305_s10 + $0x28] sm:$0xff]  ;;  %973 = vst.msk [vmem:[#allocation2 + $0x18] sm:$0xff] %vm937_vm1, %v7239_v35 }
  0x14   : > { %6832 = vmatmul.mubr.msk.f32.vlgmr.msra.gmra.mrb[0].mxu0 %vm313_vm0, %v280_v4  ;;  %v285_v9 = vld [vmem:[%s7305_s10 + $0x30] sm:$0xff]  ;;  %v286_v10 = vld [vmem:[%s7305_s10 + $0x38] sm:$0xff]  ;;  %v287_v11 = vld [vmem:[%s7305_s10 + $0x40] sm:$0xff]  ;;  %977 = vst.msk [vmem:[#allocation2 + $0x38] sm:$0xff] %vm937_vm1, %v7239_v35 }
  0x15   : > { %6834 = vmatprep.mubr.msk.f32.mxu0 %vm313_vm0, %v281_v5  ;;  %v288_v12 = vld [vmem:[%s7305_s10 + $0x48] sm:$0xff]  ;;  %v289_v13 = vld [vmem:[%s7305_s10 + $0x50] sm:$0xff]  ;;  %v290_v14 = vld [vmem:[%s7305_s10 + $0x58] sm:$0xff]  ;;  %979 = vst.msk [vmem:[#allocation2 + $0x240] sm:$0xff] %vm937_vm1, %v7239_v35 }
  0x16   : > { %v291_v15 = vld [vmem:[%s7305_s10 + $0x60] sm:$0xff]  ;;  %v292_v16 = vld [vmem:[%s7305_s10 + $0x68] sm:$0xff]  ;;  %v293_v17 = vld [vmem:[%s7305_s10 + $0x70] sm:$0xff]  ;;  %980 = vst.msk [vmem:[#allocation2 + $0x248] sm:$0xff] %vm937_vm1, %v7239_v35 }
  0x17   : > { %v294_v18 = vld [vmem:[%s7305_s10 + $0x78] sm:$0xff]  ;;  %v295_v19 = vld [vmem:[%s7305_s10 + $0x80] sm:$0xff]  ;;  %v296_v20 = vld [vmem:[%s7305_s10 + $0x88] sm:$0xff]  ;;  %981 = vst.msk [vmem:[#allocation2 + $0x250] sm:$0xff] %vm937_vm1, %v7239_v35 }
  0x18   : > { %6835 = vmatmul.mubr.msk.f32.gmra.mrb[2].mxu0 %vm313_vm0, %v282_v6  ;;  %v297_v21 = vld [vmem:[%s7305_s10 + $0x90] sm:$0xff]  ;;  %v298_v22 = vld [vmem:[%s7305_s10 + $0x98] sm:$0xff]  ;;  %v299_v23 = vld [vmem:[%s7305_s10 + $0xa0] sm:$0xff]  ;;  %982 = vst.msk [vmem:[#allocation2 + $0x258] sm:$0xff] %vm937_vm1, %v7239_v35 }
  0x19   : > { %6837 = vmatprep.mubr.msk.f32.mxu0 %vm313_vm0, %v283_v7  ;;  %v300_v24 = vld [vmem:[%s7305_s10 + $0xa8] sm:$0xff]  ;;  %v301_v25 = vld [vmem:[%s7305_s10 + $0xb0] sm:$0xff]  ;;  %v302_v26 = vld [vmem:[%s7305_s10 + $0xb8] sm:$0xff]  ;;  %983 = vst.msk [vmem:[#allocation2 + $0x260] sm:$0xff] %vm937_vm1, %v7239_v35 }
  0x1a   : > { %v303_v27 = vld [vmem:[%s7305_s10 + $0xc0] sm:$0xff]  ;;  %v304_v28 = vld [vmem:[%s7305_s10 + $0xc8] sm:$0xff]  ;;  %v305_v29 = vld [vmem:[%s7305_s10 + $0xd0] sm:$0xff]  ;;  %984 = vst.msk [vmem:[#allocation2 + $0x268] sm:$0xff] %vm937_vm1, %v7239_v35 }
  0x1b   : > { %v306_v30 = vld [vmem:[%s7305_s10 + $0xd8] sm:$0xff]  ;;  %v307_v31 = vld [vmem:[%s7305_s10 + $0xe0] sm:$0xff]  ;;  %v308_v32 = vld [vmem:[%s7305_s10 + $0xe8] sm:$0xff]  ;;  %985 = vst.msk [vmem:[#allocation2 + $0x270] sm:$0xff] %vm937_vm1, %v7239_v35 }
  0x1c   : > { %6838 = vmatmul.mubr.msk.f32.gmra.mrb[4].mxu0 %vm313_vm0, %v284_v8  ;;  %v309_v33 = vld [vmem:[%s7305_s10 + $0xf0] sm:$0xff]  ;;  %v310_v34 = vld [vmem:[%s7305_s10 + $0xf8] sm:$0xff]  ;;  %986 = vst.msk [vmem:[#allocation2 + $0x278] sm:$0xff] %vm937_vm1, %v7239_v35  ;;  %991 = vst.msk [vmem:[#allocation2 + $0xa0] sm:$0xff] %vm937_vm1, %v7239_v35 }
  0x1d   : > { %6840 = vmatprep.mubr.msk.f32.mxu0 %vm313_vm0, %v285_v9  ;;  %992 = vst.msk [vmem:[#allocation2 + $0xc0] sm:$0xff] %vm937_vm1, %v7239_v35  ;;  %993 = vst.msk [vmem:[#allocation2 + $0xe0] sm:$0xff] %vm937_vm1, %v7239_v35  ;;  %v1052_v36 = vld [vmem:[#allocation2] sm:$0xff]  ;;  %v1055_v38 = vld [vmem:[#allocation2 + $0x18] sm:$0xff] }
  0x1e   : > { %994 = vst.msk [vmem:[#allocation2 + $0x100] sm:$0xff] %vm937_vm1, %v7239_v35  ;;  %995 = vst.msk [vmem:[#allocation2 + $0x120] sm:$0xff] %vm937_vm1, %v7239_v35  ;;  %v1117_v37 = vld [vmem:[#allocation2 + $0x20] sm:$0xff]  ;;  %v1120_v39 = vld [vmem:[#allocation2 + $0x38] sm:$0xff] }
  0x1f   : > { %996 = vst.msk [vmem:[#allocation2 + $0x140] sm:$0xff] %vm937_vm1, %v7239_v35  ;;  %997 = vst.msk [vmem:[#allocation2 + $0x160] sm:$0xff] %vm937_vm1, %v7239_v35  ;;  %v1181_v40 = vmax.f32 %v1052_v36, %v1117_v37  ;;  %v1245_v41 = vld [vmem:[#allocation2 + $0x40] sm:$0xff]  ;;  %v1184_v42 = vmax.f32 %v1055_v38, %v1120_v39 }
  0x20   : > { %6841 = vmatmul.mubr.msk.f32.gmra.mrb[6].mxu0 %vm313_vm0, %v286_v10  ;;  %998 = vst.msk [vmem:[#allocation2 + $0x180] sm:$0xff] %vm937_vm1, %v7239_v35  ;;  %999 = vst.msk [vmem:[#allocation2 + $0x1a0] sm:$0xff] %vm937_vm1, %v7239_v35  ;;  %v1185_v46 = vmax.f32 %v1117_v37, %v1245_v41  ;;  %v1374_v48 = vld [vmem:[#allocation2 + $0x60] sm:$0xff]  ;;  %v7421_v10 = vld [vmem:[#allocation2 + $0x10] sm:$0xff] }
  0x21   : > { %6843 = vmatprep.mubr.msk.f32.mxu0 %vm313_vm0, %v287_v11  ;;  %1000 = vst.msk [vmem:[#allocation2 + $0x1c0] sm:$0xff] %vm937_vm1, %v7239_v35  ;;  %1001 = vst.msk [vmem:[#allocation2 + $0x1e0] sm:$0xff] %vm937_vm1, %v7239_v35  ;;  %v1309_v47 = vmax.f32 %v1181_v40, %v1245_v41  ;;  %v1189_v52 = vmax.f32 %v1245_v41, %v1374_v48  ;;  %v1503_v54 = vld [vmem:[#allocation2 + $0x80] sm:$0xff]  ;;  %v7423_v11 = vld [vmem:[#allocation2 + $0x30] sm:$0xff] }
  0x22   : > { %1002 = vst.msk [vmem:[#allocation2 + $0x200] sm:$0xff] %vm937_vm1, %v7239_v35  ;;  %1003 = vst.msk [vmem:[#allocation2 + $0x220] sm:$0xff] %vm937_vm1, %v7239_v35  ;;  %v1313_v57 = vmax.f32 %v1185_v46, %v1374_v48  ;;  %v1193_v58 = vmax.f32 %v1374_v48, %v1503_v54  ;;  %v2746_v46 = vld [vmem:[#allocation2 + $0x38] sm:$0xff] }
  0x23   : > { %1004 = vst.msk [vmem:[#allocation2 + $0x58] sm:$0xff] %vm937_vm1, %v7239_v35  ;;  %1005 = vst.msk [vmem:[#allocation2 + $0x78] sm:$0xff] %vm937_vm1, %v7239_v35  ;;  %v1438_v60 = vmax.f32 %v1309_v47, %v1374_v48  ;;  %v1317_v63 = vmax.f32 %v1189_v52, %v1503_v54  ;;  %v1507_v2 = vld [vmem:[#allocation2 + $0xa0] sm:$0xff] }
  0x24   : > { %6844 = vmatmul.mubr.msk.f32.gmra.mrb[8].mxu0 %vm313_vm0, %v288_v12  ;;  %1006 = vst.msk [vmem:[#allocation2 + $0x98] sm:$0xff] %vm937_vm1, %v7239_v35  ;;  %1007 = vst.msk [vmem:[#allocation2 + $0xb8] sm:$0xff] %vm937_vm1, %v7239_v35  ;;  %v1442_v4 = vmax.f32 %v1313_v57, %v1503_v54  ;;  %v1321_v5 = vmax.f32 %v1193_v58, %v1507_v2  ;;  %v1197_v9 = vmax.f32 %v1503_v54, %v1507_v2 }
  0x25   : > { %6846 = vmatprep.mubr.msk.f32.mxu0 %vm313_vm0, %v289_v13  ;;  %1008 = vst.msk [vmem:[#allocation2 + $0xd8] sm:$0xff] %vm937_vm1, %v7239_v35  ;;  %1009 = vst.msk [vmem:[#allocation2 + $0xf8] sm:$0xff] %vm937_vm1, %v7239_v35  ;;  %v7419_v7 = vmax.f32 %v1438_v60, %v1503_v54  ;;  %v1446_v13 = vmax.f32 %v1317_v63, %v1507_v2  ;;  %v7479_v52 = vld [vmem:[#allocation2 + $0x100] sm:$0xff] }
  0x26   : > { %1010 = vst.msk [vmem:[#allocation2 + $0x118] sm:$0xff] %vm937_vm1, %v7239_v35  ;;  %1011 = vst.msk [vmem:[#allocation2 + $0x138] sm:$0xff] %vm937_vm1, %v7239_v35  ;;  %v7495_v63 = vld [vmem:[#allocation2 + $0x120] sm:$0xff] }
  0x27   : > { %1012 = vst.msk [vmem:[#allocation2 + $0x158] sm:$0xff] %vm937_vm1, %v7239_v35  ;;  %1013 = vst.msk [vmem:[#allocation2 + $0x178] sm:$0xff] %vm937_vm1, %v7239_v35 }
  0x28   : > { %6847 = vmatmul.mubr.msk.f32.gmra.mrb[10].mxu0 %vm313_vm0, %v290_v14  ;;  %1014 = vst.msk [vmem:[#allocation2 + $0x198] sm:$0xff] %vm937_vm1, %v7239_v35  ;;  %1015 = vst.msk [vmem:[#allocation2 + $0x1b8] sm:$0xff] %vm937_vm1, %v7239_v35  ;;  %v1511_v14 = vld [vmem:[#allocation2 + $0xc0] sm:$0xff] }
  0x29   : > { %6849 = vmatprep.mubr.msk.f32.mxu0 %vm313_vm0, %v291_v15  ;;  %1016 = vst.msk [vmem:[#allocation2 + $0x1d8] sm:$0xff] %vm937_vm1, %v7239_v35  ;;  %1017 = vst.msk [vmem:[#allocation2 + $0x1f8] sm:$0xff] %vm937_vm1, %v7239_v35 }
  0x2a   : > { %1018 = vst.msk [vmem:[#allocation2 + $0x218] sm:$0xff] %vm937_vm1, %v7239_v35  ;;  %1019 = vst.msk [vmem:[#allocation2 + $0x238] sm:$0xff] %vm937_vm1, %v7239_v35  ;;  %v1248_v43 = vld [vmem:[#allocation2 + $0x58] sm:$0xff] }
  0x2b   : > { %v1188_v44 = vmax.f32 %v1120_v39, %v1248_v43  ;;  %v1377_v45 = vld [vmem:[#allocation2 + $0x78] sm:$0xff]  ;;  %v1312_v51 = vmax.f32 %v1184_v42, %v1248_v43  ;;  %v7462_v39 = vld [vmem:[%s10475_s3] ss:$0 sm:$0xff] }
  0x2c   : > { %6850 = vmatmul.mubr.msk.f32.gmra.mrb[12].mxu0 %vm313_vm0, %v292_v16  ;;  %v1506_v49 = vld [vmem:[#allocation2 + $0x98] sm:$0xff]  ;;  %v1192_v50 = vmax.f32 %v1248_v43, %v1377_v45 }
  0x2d   : > { %6852 = vmatprep.mubr.msk.f32.mxu0 %vm313_vm0, %v293_v17  ;;  %v1196_v53 = vmax.f32 %v1377_v45, %v1506_v49  ;;  %v1316_v55 = vmax.f32 %v1188_v44, %v1377_v45  ;;  %v1510_v56 = vld [vmem:[#allocation2 + $0xb8] sm:$0xff]  ;;  %v1441_v62 = vmax.f32 %v1312_v51, %v1377_v45  ;;  %v2999_v51 = vld [vmem:[#allocation2 + $0x60] sm:$0xff] }
  0x2e   : > { %v1200_v59 = vmax.f32 %v1506_v49, %v1510_v56  ;;  %v1320_v61 = vmax.f32 %v1192_v50, %v1506_v49  ;;  %v1514_v3 = vld [vmem:[#allocation2 + $0xd8] sm:$0xff] }
  0x2f   : > { %v1324_v0 = vmax.f32 %v1196_v53, %v1510_v56  ;;  %v1445_v1 = vmax.f32 %v1316_v55, %v1506_v49  ;;  %v7425_v12 = vmax.f32 %v1441_v62, %v1506_v49  ;;  %v1204_v16 = vmax.f32 %v1510_v56, %v1514_v3 }
  0x30   : > { %6853 = vmatmul.mubr.msk.f32.gmra.mrb[14].mxu0 %vm313_vm0, %v294_v18  ;;  %v1328_v6 = vmax.f32 %v1200_v59, %v1514_v3  ;;  %v1449_v8 = vmax.f32 %v1320_v61, %v1510_v56  ;;  %v7429_v18 = vld [vmem:[#allocation2 + $0xf8] sm:$0xff] }
  0x31   : > { %6855 = vmatprep.mubr.msk.f32.mxu0 %vm313_vm0, %v295_v19  ;;  %v1453_v15 = vmax.f32 %v1324_v0, %v1514_v3  ;;  %v7427_v17 = vmax.f32 %v1445_v1, %v1510_v56  ;;  %v1201_v19 = vmax.f32 %v1507_v2, %v1511_v14  ;;  %v1208_v43 = vmax.f32 %v1514_v3, %v7429_v18  ;;  %v7486_v56 = vld [vmem:[#allocation2 + $0x138] sm:$0xff] }
  0x34   : > { %6856 = vmatmul.mubr.msk.f32.gmra.mrb[16].mxu0 %vm313_vm0, %v296_v20  ;;  %v7431_v20 = vmax.f32 %v1442_v4, %v1507_v2 }
  0x35   : > { %6858 = vmatprep.mubr.msk.f32.mxu0 %vm313_vm0, %v297_v21  ;;  %v1450_v21 = vmax.f32 %v1321_v5, %v1511_v14 }
  0x38   : > { %6859 = vmatmul.mubr.msk.f32.gmra.mrb[18].mxu0 %vm313_vm0, %v298_v22  ;;  %v1457_v22 = vmax.f32 %v1328_v6, %v7429_v18 }
  0x39   : > { %6861 = vmatprep.mubr.msk.f32.mxu0 %vm313_vm0, %v299_v23 }
  0x3c   : > { %6862 = vmatmul.mubr.msk.f32.gmra.mrb[20].mxu0 %vm313_vm0, %v300_v24 }
  0x3d   : > { %6864 = vmatprep.mubr.msk.f32.mxu0 %vm313_vm0, %v301_v25  ;;  %v7437_v25 = vmax.f32 %v1449_v8, %v1514_v3 }
  0x40   : > { %6865 = vmatmul.mubr.msk.f32.gmra.mrb[22].mxu0 %vm313_vm0, %v302_v26  ;;  %v7439_v26 = vld [vmem:[#allocation2 + $0xe0] sm:$0xff] }
  0x41   : > { %6867 = vmatprep.mubr.msk.f32.mxu0 %vm313_vm0, %v303_v27  ;;  %v7441_v27 = vld [vmem:[#allocation2 + $0x118] sm:$0xff]  ;;  %v1329_v37 = vmax.f32 %v1201_v19, %v7439_v26  ;;  %v7466_v41 = vmax.f32 %v1450_v21, %v7439_v26  ;;  %v1205_v58 = vmax.f32 %v1511_v14, %v7439_v26 }
  0x42   : > { %v7469_v42 = vmax.f32 %v1457_v22, %v7441_v27  ;;  %v1336_v0 = vmax.f32 %v1208_v43, %v7441_v27  ;;  %v1212_v19 = vmax.f32 %v7429_v18, %v7441_v27 }
  0x43   : > { %v1458_v57 = vmax.f32 %v1329_v37, %v7479_v52  ;;  %v1333_v5 = vmax.f32 %v1205_v58, %v7479_v52 }
  0x44   : > { %6868 = vmatmul.mubr.msk.f32.gmra.mrb[24].mxu0 %vm313_vm0, %v304_v28  ;;  %v1325_v28 = vmax.f32 %v1197_v9, %v1511_v14 }
  0x45   : > { %6870 = vmatprep.mubr.msk.f32.mxu0 %vm313_vm0, %v305_v29  ;;  %v7446_v29 = vld [vmem:[%s10474_s2] ss:$0 sm:$0xff] }
  0x46   : > { %v1454_v48 = vmax.f32 %v1325_v28, %v7439_v26  ;;  %v7564_v28 = vld [vmem:[#allocation2 + $0x28] sm:$0xff] }
  0x48   : > { %6871 = vmatmul.mubr.msk.f32.gmra.mrb[26].mxu0 %vm313_vm0, %v306_v30  ;;  %v7501_v4 = vmax.f32 %v1454_v48, %v7479_v52 }
  0x49   : > { %6873 = vmatprep.mubr.msk.f32.mxu0 %vm313_vm0, %v307_v31  ;;  %v7449_v31 = vmax.f32 %v1446_v13, %v1511_v14  ;;  %v1465_v13 = vmax.f32 %v1336_v0, %v7486_v56 }
  0x4c   : > { %6874 = vmatmul.mubr.msk.f32.gmra.mrb[28].mxu0 %vm313_vm0, %v308_v32  ;;  %v7452_v32 = vmax.f32 %v1453_v15, %v7429_v18  ;;  %v7514_v15 = vmax.f32 %v1458_v57, %v7495_v63  ;;  %v7535_v57 = vld [vmem:[#allocation2 + $0x28] sm:$0xff] }
  0x4d   : > { %6876 = vmatprep.mubr.msk.f32.mxu0 %vm313_vm0, %v309_v33  ;;  %v1332_v33 = vmax.f32 %v1204_v16, %v7429_v18  ;;  %v7516_v16 = vld [vmem:[#allocation2 + $0x158] sm:$0xff]  ;;  %v1340_v18 = vmax.f32 %v1212_v19, %v7486_v56 }
  0x4f   : > { %v1461_v53 = vmax.f32 %v1332_v33, %v7441_v27  ;;  %v1462_v33 = vmax.f32 %v1333_v5, %v7495_v63  ;;  %v2743_v5 = vld [vmem:[#allocation2 + $0x20] sm:$0xff] }
  0x50   : > { %6877 = vmatmul.mubr.msk.f32.gmra.mrb[30].mxu0 %vm313_vm0, %v310_v34  ;;  %v2874_v34 = vld [vmem:[#allocation2 + $0x58] sm:$0xff] }
  0x51   : > { %v7507_v9 = vmax.f32 %v1461_v53, %v7486_v56  ;;  %v7533_v53 = vld [vmem:[#allocation2 + $0x8] sm:$0xff] }
  0xe7   : > { %v6833_v38 = vpop.f32.mrb[0].mxu0 }
  0xe8   : > { %v643_v44 = vmul.f32 %v6833_v38, %v7446_v29  ;;  %v476_v45 = vpop.f32.mrb[1].mxu0 }
  0xe9   : > { %v642_v49 = vmul.f32 %v7446_v29, %v476_v45  ;;  %v7528_v45 = vld [vmem:[#allocation2 + $0x140] sm:$0xff] }
  0xea   : > { %v7483_v54 = vadd.f32 %v7462_v39, %v643_v44  ;;  %v7550_v19 = vmax.f32 %v1462_v33, %v7528_v45 }
  0xeb   : > { %v7491_v59 = vadd.f32 %v7462_v39, %v642_v49  ;;  %v6836_v60 = vpop.f32.mrb[2].mxu0 }
  0xec   : > { %v6656_v1 = vmul.f32 -1.442695, %v7483_v54  ;;  %v645_v2 = vmul.f32 %v6836_v60, %v7446_v29  ;;  %v486_v3 = vpop.f32.mrb[3].mxu0  ;;  %v7539_v60 = vmax.f32 %v1465_v13, %v7516_v16  ;;  %10503 = vst [vmem:[#allocation4_spill] sm:$0xff] %v7550_v19 }
  0xed   : > { %v6655_v6 = vmul.f32 -1.442695, %v7491_v59  ;;  %v644_v8 = vmul.f32 %v7446_v29, %v486_v3  ;;  %v2679_v3 = vld [vmem:[#allocation2] sm:$0xff] }
  0xee   : > { %6959 = vpow2.f32 %v6656_v1  ;;  %v7511_v14 = vadd.f32 %v7462_v39, %v645_v2  ;;  %v2807_v13 = vmax.f32 %v2679_v3, %v2743_v5  ;;  %v1469_v2 = vmax.f32 %v1340_v18, %v7516_v16  ;;  %v7557_v1 = vld [vmem:[#allocation2 + $0x8] sm:$0xff]  ;;  %v1534_v5 = vld [vmem:[#allocation2 + $0x178] sm:$0xff] }
  0xef   : > { %6961 = vpow2.f32 %v6655_v6  ;;  %v7521_v21 = vadd.f32 %v7462_v39, %v644_v8  ;;  %v6839_v22 = vpop.f32.mrb[4].mxu0 }
  0xf0   : > { %v6658_v37 = vmul.f32 -1.442695, %v7511_v14  ;;  %v647_v38 = vmul.f32 %v6839_v22, %v7446_v29  ;;  %v496_v43 = vpop.f32.mrb[5].mxu0  ;;  %v7572_v55 = vmax.f32 %v1469_v2, %v1534_v5 }
  0xf1   : > { %v6657_v48 = vmul.f32 -1.442695, %v7521_v21  ;;  %v646_v49 = vmul.f32 %v7446_v29, %v496_v43 }
  0xf2   : > { %6963 = vpow2.f32 %v6658_v37  ;;  %v7542_v0 = vadd.f32 %v7462_v39, %v647_v38  ;;  %10504 = vst [vmem:[#allocation5_spill] sm:$0xff] %v7572_v55 }
  0xf3   : > { %6965 = vpow2.f32 %v6657_v48  ;;  %v7547_v6 = vadd.f32 %v7462_v39, %v646_v49  ;;  %v6842_v8 = vpop.f32.mrb[6].mxu0  ;;  %v7559_v48 = vld [vmem:[#allocation2 + $0x10] sm:$0xff]  ;;  %v2871_v49 = vld [vmem:[#allocation2 + $0x40] sm:$0xff] }
  0xf4   : > { %v6660_v22 = vmul.f32 -1.442695, %v7542_v0  ;;  %v649_v37 = vmul.f32 %v6842_v8, %v7446_v29  ;;  %v506_v38 = vpop.f32.mrb[7].mxu0  ;;  %v7566_v8 = vld [vmem:[#allocation2 + $0x30] sm:$0xff]  ;;  %v2935_v44 = vmax.f32 %v2807_v13, %v2871_v49  ;;  %v1209_v49 = vmax.f32 %v7439_v26, %v7479_v52 }
  0xf5   : > { %v6659_v58 = vmul.f32 -1.442695, %v7547_v6  ;;  %v648_v33 = vmul.f32 %v7446_v29, %v506_v38 }
  0xf6   : > { %6967 = vpow2.f32 %v6660_v22  ;;  %v7569_v18 = vadd.f32 %v7462_v39, %v649_v37  ;;  %v3063_v47 = vmax.f32 %v2935_v44, %v2999_v51  ;;  %v2682_v44 = vld [vmem:[#allocation2 + $0x18] sm:$0xff] }
  0xf7   : > { %6969 = vpow2.f32 %v6659_v58  ;;  %v7575_v38 = vadd.f32 %v7462_v39, %v648_v33  ;;  %v6845_v3 = vpop.f32.mrb[8].mxu0  ;;  %v3127_v58 = vld [vmem:[#allocation2 + $0x80] sm:$0xff] }
  0xf8   : > { %v6960_v50 = vpop.eup %6959  ;;  %v6662_v13 = vmul.f32 -1.442695, %v7569_v18  ;;  %v651_v22 = vmul.f32 %v6845_v3, %v7446_v29  ;;  %v516_v37 = vpop.f32.mrb[9].mxu0  ;;  %v7595_v35 = vmax.f32 %v3063_v47, %v3127_v58 }
  0xf9   : > { %v6962_v5 = vpop.eup %6961  ;;  %v810_v33 = vadd.f32 1.0, %v6960_v50  ;;  %v6661_v62 = vmul.f32 -1.442695, %v7575_v38  ;;  %v650_v61 = vmul.f32 %v7446_v29, %v516_v37  ;;  %v2810_v37 = vmax.f32 %v2682_v44, %v2746_v46 }
  0xfa   : > { %v809_v36 = vadd.f32 1.0, %v6962_v5  ;;  %6971 = vpow2.f32 %v6662_v13  ;;  %v7588_v3 = vadd.f32 %v7462_v39, %v651_v22  ;;  %10505 = vst [vmem:[#allocation6_spill] sm:$0xff] %v7595_v35  ;;  %v1337_v22 = vmax.f32 %v1209_v49, %v7495_v63 }
  0xfb   : > { %6973 = vrcp.f32 %v810_v33  ;;  %v7593_v2 = vadd.f32 %v7462_v39, %v650_v61  ;;  %v6848_v50 = vpop.f32.mrb[10].mxu0 }
  0xfc   : > { %v6964_v40 = vpop.eup %6963  ;;  %6975 = vrcp.f32 %v809_v36  ;;  %v6664_v51 = vmul.f32 -1.442695, %v7588_v3  ;;  %v653_v13 = vmul.f32 %v6848_v50, %v7446_v29  ;;  %v526_v5 = vpop.f32.mrb[11].mxu0  ;;  %v1466_v44 = vmax.f32 %v1337_v22, %v7528_v45  ;;  %v3002_v36 = vld [vmem:[#allocation2 + $0x78] sm:$0xff] }
  0xfd   : > { %v6966_v30 = vpop.eup %6965  ;;  %v812_v26 = vadd.f32 1.0, %v6964_v40  ;;  %6977 = vpow2.f32 %v6661_v62  ;;  %v6663_v61 = vmul.f32 -1.442695, %v7593_v2  ;;  %v652_v33 = vmul.f32 %v7446_v29, %v526_v5  ;;  %v7610_v40 = vld [vmem:[#allocation2 + $0x160] sm:$0xff] }
  0xfe   : > { %v811_v47 = vadd.f32 1.0, %v6966_v30  ;;  %6979 = vpow2.f32 %v6664_v51  ;;  %v7603_v46 = vadd.f32 %v7462_v39, %v653_v13  ;;  %10506 = vst [vmem:[#allocation7_spill] sm:$0xff] %v7610_v40  ;;  %v2938_v62 = vmax.f32 %v2810_v37, %v2874_v34 }
  0xff   : > { %6981 = vrcp.f32 %v812_v26  ;;  %v7607_v58 = vadd.f32 %v7462_v39, %v652_v33  ;;  %v6851_v49 = vpop.f32.mrb[12].mxu0  ;;  %v7621_v37 = vmax.f32 %v1466_v44, %v7610_v40 }
 0x100   : > { %v6968_v50 = vpop.eup %6967  ;;  %6983 = vrcp.f32 %v811_v47  ;;  %v6666_v30 = vmul.f32 -1.442695, %v7603_v46  ;;  %v655_v51 = vmul.f32 %v6851_v49, %v7446_v29  ;;  %v536_v13 = vpop.f32.mrb[13].mxu0  ;;  %v3066_v5 = vmax.f32 %v2938_v62, %v3002_v36 }
 0x101   : > { %v6970_v26 = vpop.eup %6969  ;;  %v814_v24 = vadd.f32 1.0, %v6968_v50  ;;  %6985 = vpow2.f32 %v6663_v61  ;;  %v6665_v33 = vmul.f32 -1.442695, %v7607_v58  ;;  %v654_v22 = vmul.f32 %v7446_v29, %v536_v13  ;;  %10507 = vst [vmem:[#allocation8_spill] sm:$0xff] %v7621_v37  ;;  %v3130_v50 = vld [vmem:[#allocation2 + $0x98] sm:$0xff] }
 0x102   : > { %v813_v23 = vadd.f32 1.0, %v6970_v26  ;;  %6987 = vpow2.f32 %v6666_v30  ;;  %v7618_v34 = vadd.f32 %v7462_v39, %v655_v51  ;;  %v1213_v61 = vmax.f32 %v7479_v52, %v7495_v63 }
 0x103   : > { %6989 = vrcp.f32 %v814_v24  ;;  %v7624_v47 = vadd.f32 %v7462_v39, %v654_v22  ;;  %v6854_v49 = vpop.f32.mrb[14].mxu0  ;;  %v7637_v52 = vmax.f32 %v3066_v5, %v3130_v50 }
 0x104   : > { %v6972_v43 = vpop.eup %6971  ;;  %6991 = vrcp.f32 %v813_v23  ;;  %v6668_v30 = vmul.f32 -1.442695, %v7618_v34  ;;  %v657_v51 = vmul.f32 %v6854_v49, %v7446_v29  ;;  %v546_v13 = vpop.f32.mrb[15].mxu0  ;;  %v7644_v44 = vmax.f32 %v1213_v61, %v7528_v45 }
 0x105   : > { %v6974_v26 = vpop.eup %6973  ;;  %v816_v24 = vadd.f32 1.0, %v6972_v43  ;;  %6993 = vpow2.f32 %v6665_v33  ;;  %v6667_v22 = vmul.f32 -1.442695, %v7624_v47  ;;  %v656_v36 = vmul.f32 %v7446_v29, %v546_v13  ;;  %10508 = vst [vmem:[#allocation9_spill] sm:$0xff] %v7637_v52 }
 0x106   : > { %v6976_v62 = vpop.eup %6975  ;;  %v906_v35 = vmul.f32 %v6974_v26, %v7483_v54  ;;  %6995 = vpow2.f32 %v6668_v30  ;;  %v7635_v23 = vadd.f32 %v7462_v39, %v657_v51  ;;  %10509 = vst [vmem:[#allocation10_spill] sm:$0xff] %v7644_v44 }
 0x107   : > { %v6978_v63 = vpop.eup %6977  ;;  %v905_v49 = vmul.f32 %v6976_v62, %v7491_v59  ;;  %6997 = vrcp.f32 %v816_v24  ;;  %v7641_v43 = vadd.f32 %v7462_v39, %v656_v36  ;;  %v6857_v33 = vpop.f32.mrb[16].mxu0 }
 0x108   : > { %v6980_v13 = vpop.eup %6979  ;;  %1021 = vst.msk [vmem:[#allocation2 + $0x50] sm:$0xff] %vm937_vm1, %v906_v35  ;;  %939 = vst.msk [vmem:[#allocation3 + $0x8] sm:$0xff] %vm937_vm1, %v906_v35  ;;  %v815_v54 = vadd.f32 1.0, %v6978_v63  ;;  %6999 = vpow2.f32 %v6667_v22  ;;  %v6670_v5 = vmul.f32 -1.442695, %v7635_v23  ;;  %v659_v50 = vmul.f32 %v6857_v33, %v7446_v29  ;;  %v556_v59 = vpop.f32.mrb[17].mxu0 }
 0x109   : > { %v6982_v30 = vpop.eup %6981  ;;  %1020 = vst.msk [vmem:[#allocation2 + $0x48] sm:$0xff] %vm937_vm1, %v905_v49  ;;  %938 = vst.msk [vmem:[#allocation3] sm:$0xff] %vm937_vm1, %v905_v49  ;;  %v818_v51 = vadd.f32 1.0, %v6980_v13  ;;  %v6669_v45 = vmul.f32 -1.442695, %v7641_v43  ;;  %v658_v61 = vmul.f32 %v7446_v29, %v556_v59  ;;  %v1216_v13 = vmax.f32 %v7441_v27, %v7486_v56 }
 0x10a   : > { %v6984_v35 = vpop.eup %6983  ;;  %v908_v24 = vmul.f32 %v6982_v30, %v7511_v14  ;;  %7001 = vrcp.f32 %v815_v54  ;;  %v7657_v22 = vadd.f32 %v7462_v39, %v659_v50 }
 0x10b   : > { %v6986_v62 = vpop.eup %6985  ;;  %v907_v63 = vmul.f32 %v6984_v35, %v7521_v21  ;;  %7003 = vrcp.f32 %v818_v51  ;;  %v7662_v49 = vadd.f32 %v7462_v39, %v658_v61  ;;  %v6860_v33 = vpop.f32.mrb[18].mxu0 }
 0x10c   : > { %v6988_v59 = vpop.eup %6987  ;;  %1023 = vst.msk [vmem:[#allocation2 + $0x70] sm:$0xff] %vm937_vm1, %v908_v24  ;;  %941 = vst.msk [vmem:[#allocation3 + $0x18] sm:$0xff] %vm937_vm1, %v908_v24  ;;  %v817_v14 = vadd.f32 1.0, %v6986_v62  ;;  %7005 = vpow2.f32 %v6670_v5  ;;  %v6672_v54 = vmul.f32 -1.442695, %v7657_v22  ;;  %v661_v50 = vmul.f32 %v6860_v33, %v7446_v29  ;;  %v566_v21 = vpop.f32.mrb[19].mxu0 }
 0x10d   : > { %v6990_v30 = vpop.eup %6989  ;;  %1022 = vst.msk [vmem:[#allocation2 + $0x68] sm:$0xff] %vm937_vm1, %v907_v63  ;;  %940 = vst.msk [vmem:[#allocation3 + $0x10] sm:$0xff] %vm937_vm1, %v907_v63  ;;  %v820_v51 = vadd.f32 1.0, %v6988_v59  ;;  %7007 = vpow2.f32 %v6669_v45  ;;  %v6671_v27 = vmul.f32 -1.442695, %v7662_v49  ;;  %v660_v56 = vmul.f32 %v7446_v29, %v566_v21 }
 0x10e   : > { %v6992_v61 = vpop.eup %6991  ;;  %v910_v35 = vmul.f32 %v6990_v30, %v7542_v0  ;;  %7009 = vrcp.f32 %v817_v14  ;;  %v7676_v5 = vadd.f32 %v7462_v39, %v661_v50  ;;  %v7685_v59 = vmax.f32 %v1216_v13, %v7516_v16 }
 0x10f   : > { %v6994_v62 = vpop.eup %6993  ;;  %v909_v33 = vmul.f32 %v6992_v61, %v7547_v6  ;;  %7011 = vrcp.f32 %v820_v51  ;;  %v7682_v45 = vadd.f32 %v7462_v39, %v660_v56  ;;  %v6863_v63 = vpop.f32.mrb[20].mxu0  ;;  %v7693_v51 = vld [vmem:[#allocation2 + $0x50] sm:$0xff] }
 0x110   : > { %10510 = vst [vmem:[#allocation11_spill] sm:$0xff] %v7685_v59  ;;  %v6996_v21 = vpop.eup %6995  ;;  %1025 = vst.msk [vmem:[#allocation2 + $0x90] sm:$0xff] %vm937_vm1, %v910_v35  ;;  %v819_v0 = vadd.f32 1.0, %v6994_v62  ;;  %7013 = vpow2.f32 %v6672_v54  ;;  %v6674_v14 = vmul.f32 -1.442695, %v7676_v5  ;;  %v663_v50 = vmul.f32 %v6863_v63, %v7446_v29  ;;  %v576_v6 = vpop.f32.mrb[21].mxu0 }
 0x111   : > { %943 = vst.msk [vmem:[#allocation3 + $0x28] sm:$0xff] %vm937_vm1, %v910_v35  ;;  %v7691_v30 = vld [vmem:[#allocation2 + $0x48] sm:$0xff]  ;;  %v6998_v56 = vpop.eup %6997  ;;  %1024 = vst.msk [vmem:[#allocation2 + $0x88] sm:$0xff] %vm937_vm1, %v909_v33  ;;  %v822_v16 = vadd.f32 1.0, %v6996_v21  ;;  %7015 = vpow2.f32 %v6671_v27  ;;  %v6673_v13 = vmul.f32 -1.442695, %v7682_v45  ;;  %v662_v54 = vmul.f32 %v7446_v29, %v576_v6 }
 0x112   : > { %942 = vst.msk [vmem:[#allocation3 + $0x20] sm:$0xff] %vm937_vm1, %v909_v33  ;;  %v7000_v61 = vpop.eup %6999  ;;  %v912_v35 = vmul.f32 %v6998_v56, %v7569_v18  ;;  %7017 = vrcp.f32 %v819_v0  ;;  %v7701_v62 = vadd.f32 %v7462_v39, %v663_v50  ;;  %v10511_v63 = vmax.f32 %v7533_v53, %v7535_v57 }
 0x113   : > { %7019 = vrcp.f32 %v822_v16  ;;  %v821_v33 = vadd.f32 1.0, %v7000_v61  ;;  %v7708_v27 = vadd.f32 %v7462_v39, %v662_v54  ;;  %v6866_v21 = vpop.f32.mrb[22].mxu0  ;;  %v10512_v6 = vmax.f32 %v7421_v10, %v7423_v11  ;;  %v7714_v56 = vld [vmem:[#allocation2 + $0x70] sm:$0xff] }
 0x114   : > { %v1310_v24 = vmax.f32 %v10511_v63, %v7691_v30  ;;  %v7002_v0 = vpop.eup %7001  ;;  %v7716_v50 = vld [vmem:[#allocation2 + $0x68] sm:$0xff]  ;;  %1027 = vst.msk [vmem:[#allocation2 + $0xb0] sm:$0xff] %vm937_vm1, %v912_v35  ;;  %945 = vst.msk [vmem:[#allocation3 + $0x38] sm:$0xff] %vm937_vm1, %v912_v35  ;;  %7021 = vpow2.f32 %v6674_v14  ;;  %v6676_v53 = vmul.f32 -1.442695, %v7701_v62  ;;  %v665_v16 = vmul.f32 %v6866_v21, %v7446_v29  ;;  %v586_v54 = vpop.f32.mrb[23].mxu0 }
 0x115   : > { %v1311_v18 = vmax.f32 %v10512_v6, %v7693_v51  ;;  %v7004_v10 = vpop.eup %7003  ;;  %v911_v63 = vmul.f32 %v7002_v0, %v7575_v38  ;;  %7023 = vrcp.f32 %v821_v33  ;;  %v6675_v6 = vmul.f32 -1.442695, %v7708_v27 }
 0x116   : > { %v664_v36 = vmul.f32 %v7446_v29, %v586_v54  ;;  %v7006_v26 = vpop.eup %7005  ;;  %v914_v35 = vmul.f32 %v7004_v10, %v7588_v3  ;;  %7025 = vpow2.f32 %v6673_v13  ;;  %v7729_v14 = vadd.f32 %v7462_v39, %v665_v16 }
 0x117   : > { %v1439_v21 = vmax.f32 %v1310_v24, %v7716_v50  ;;  %v7008_v59 = vpop.eup %7007  ;;  %1026 = vst.msk [vmem:[#allocation2 + $0xa8] sm:$0xff] %vm937_vm1, %v911_v63  ;;  %944 = vst.msk [vmem:[#allocation3 + $0x30] sm:$0xff] %vm937_vm1, %v911_v63  ;;  %v824_v38 = vadd.f32 1.0, %v7006_v26  ;;  %7027 = vpow2.f32 %v6676_v53  ;;  %v6869_v0 = vpop.f32.mrb[24].mxu0  ;;  %v1440_v54 = vmax.f32 %v1311_v18, %v7714_v56 }
 0x118   : > { %v7735_v33 = vadd.f32 %v7462_v39, %v664_v36  ;;  %v7010_v3 = vpop.eup %7009  ;;  %1029 = vst.msk [vmem:[#allocation2 + $0xd0] sm:$0xff] %vm937_vm1, %v914_v35  ;;  %947 = vst.msk [vmem:[#allocation3 + $0x48] sm:$0xff] %vm937_vm1, %v914_v35  ;;  %v823_v24 = vadd.f32 1.0, %v7008_v59  ;;  %7029 = vpow2.f32 %v6675_v6  ;;  %v6678_v13 = vmul.f32 -1.442695, %v7729_v14  ;;  %v596_v26 = vpop.f32.mrb[25].mxu0 }
 0x119   : > { %v667_v16 = vmul.f32 %v6869_v0, %v7446_v29  ;;  %v7742_v53 = vld [vmem:[#allocation2 + $0x88] sm:$0xff]  ;;  %v7744_v36 = vld [vmem:[#allocation2 + $0x90] sm:$0xff]  ;;  %v7012_v10 = vpop.eup %7011  ;;  %v913_v18 = vmul.f32 %v7010_v3, %v7593_v2  ;;  %7031 = vrcp.f32 %v824_v38  ;;  %v666_v61 = vmul.f32 %v7446_v29, %v596_v26 }
 0x11a   : > { %v6677_v63 = vmul.f32 -1.442695, %v7735_v33  ;;  %v7014_v35 = vpop.eup %7013  ;;  %v916_v59 = vmul.f32 %v7012_v10, %v7603_v46  ;;  %7033 = vrcp.f32 %v823_v24  ;;  %v7754_v0 = vmax.f32 %v1439_v21, %v7742_v53 }
 0x11b   : > { %v7751_v6 = vadd.f32 %v7462_v39, %v667_v16  ;;  %v7016_v40 = vpop.eup %7015  ;;  %1028 = vst.msk [vmem:[#allocation2 + $0xc8] sm:$0xff] %vm937_vm1, %v913_v18  ;;  %946 = vst.msk [vmem:[#allocation3 + $0x40] sm:$0xff] %vm937_vm1, %v913_v18  ;;  %v826_v2 = vadd.f32 1.0, %v7014_v35  ;;  %7035 = vpow2.f32 %v6678_v13  ;;  %v7759_v38 = vadd.f32 %v7462_v39, %v666_v61  ;;  %v6872_v3 = vpop.f32.mrb[26].mxu0 }
 0x11c   : > { %v7762_v46 = vmax.f32 %v1440_v54, %v7744_v36  ;;  %v7018_v24 = vpop.eup %7017  ;;  %1031 = vst.msk [vmem:[#allocation2 + $0xf0] sm:$0xff] %vm937_vm1, %v916_v59  ;;  %949 = vst.msk [vmem:[#allocation3 + $0x58] sm:$0xff] %vm937_vm1, %v916_v59  ;;  %v825_v21 = vadd.f32 1.0, %v7016_v40  ;;  %7037 = vpow2.f32 %v6677_v63  ;;  %v669_v26 = vmul.f32 %v6872_v3, %v7446_v29  ;;  %v606_v10 = vpop.f32.mrb[27].mxu0 }
 0x11d   : > { %v6680_v16 = vmul.f32 -1.442695, %v7751_v6  ;;  %v7020_v13 = vpop.eup %7019  ;;  %v915_v61 = vmul.f32 %v7018_v24, %v7607_v58  ;;  %7039 = vrcp.f32 %v826_v2  ;;  %v6679_v18 = vmul.f32 -1.442695, %v7759_v38 }
 0x11e   : > { %v668_v54 = vmul.f32 %v7446_v29, %v606_v10  ;;  %v7022_v35 = vpop.eup %7021  ;;  %v918_v44 = vmul.f32 %v7020_v13, %v7618_v34  ;;  %7041 = vrcp.f32 %v825_v21  ;;  %v7773_v40 = vadd.f32 %v7462_v39, %v669_v26 }
 0x11f   : > { %v1681_v63 = vrot.slane %v7754_v0, 1  ;;  %v7024_v59 = vpop.eup %7023  ;;  %1030 = vst.msk [vmem:[#allocation2 + $0xe8] sm:$0xff] %vm937_vm1, %v915_v61  ;;  %948 = vst.msk [vmem:[#allocation3 + $0x50] sm:$0xff] %vm937_vm1, %v915_v61  ;;  %v828_v58 = vadd.f32 1.0, %v7022_v35  ;;  %7043 = vpow2.f32 %v6680_v16  ;;  %v6875_v3 = vpop.f32.mrb[28].mxu0  ;;  %v10514_v52 = vrot.slane %v7762_v46, 1 }
 0x120   : > { %v7779_v2 = vadd.f32 %v7462_v39, %v668_v54  ;;  %v7026_v34 = vpop.eup %7025  ;;  %1033 = vst.msk [vmem:[#allocation2 + $0x110] sm:$0xff] %vm937_vm1, %v918_v44  ;;  %951 = vst.msk [vmem:[#allocation3 + $0x68] sm:$0xff] %vm937_vm1, %v918_v44  ;;  %v917_v21 = vmul.f32 %v7024_v59, %v7624_v47  ;;  %7045 = vpow2.f32 %v6679_v18  ;;  %v6682_v26 = vmul.f32 -1.442695, %v7773_v40  ;;  %v616_v13 = vpop.f32.mrb[29].mxu0 }
 0x121   : > { %v671_v10 = vmul.f32 %v6875_v3, %v7446_v29  ;;  %v7028_v16 = vpop.eup %7027  ;;  %7047 = vrcp.f32 %v828_v58  ;;  %v827_v61 = vadd.f32 1.0, %v7026_v34  ;;  %v670_v35 = vmul.f32 %v7446_v29, %v616_v13 }
 0x122   : > { %v6681_v54 = vmul.f32 -1.442695, %v7779_v2  ;;  %v7030_v24 = vpop.eup %7029  ;;  %1032 = vst.msk [vmem:[#allocation2 + $0x108] sm:$0xff] %vm937_vm1, %v917_v21  ;;  %950 = vst.msk [vmem:[#allocation3 + $0x60] sm:$0xff] %vm937_vm1, %v917_v21  ;;  %v830_v47 = vadd.f32 1.0, %v7028_v16  ;;  %7049 = vpow2.f32 %v6682_v26  ;;  %v10513_v18 = vrot.slane %v7419_v7, 1 }
 0x123   : > { %v7792_v44 = vadd.f32 %v7462_v39, %v671_v10  ;;  %v7032_v58 = vpop.eup %7031  ;;  %7051 = vrcp.f32 %v827_v61  ;;  %v829_v3 = vadd.f32 1.0, %v7030_v24  ;;  %v7798_v34 = vadd.f32 %v7462_v39, %v670_v35  ;;  %v6878_v13 = vpop.f32.mrb[30].mxu0 }
 0x124   : > { %v1682_v59 = vsel %vm1679_vm2, %v10513_v18, %v1681_v63  ;;  %v1684_v21 = vsel %vm1679_vm2, %v1681_v63, %v10514_v52  ;;  %v7034_v26 = vpop.eup %7033  ;;  %v920_v10 = vmul.f32 %v7032_v58, %v7635_v23  ;;  %7053 = vrcp.f32 %v830_v47  ;;  %v626_v37 = vpop.f32.mrb[31].mxu0 }
 0x125   : > { %v6684_v16 = vmul.f32 -1.442695, %v7792_v44  ;;  %v673_v18 = vmul.f32 %v6878_v13, %v7446_v29  ;;  %v7036_v55 = vpop.eup %7035  ;;  %v919_v24 = vmul.f32 %v7034_v26, %v7641_v43  ;;  %7055 = vrcp.f32 %v829_v3 }
 0x126   : > { %v6683_v61 = vmul.f32 -1.442695, %v7798_v34  ;;  %v672_v35 = vmul.f32 %v7446_v29, %v626_v37  ;;  %v7038_v19 = vpop.eup %7037  ;;  %1035 = vst.msk [vmem:[#allocation2 + $0x130] sm:$0xff] %vm937_vm1, %v920_v10  ;;  %953 = vst.msk [vmem:[#allocation3 + $0x78] sm:$0xff] %vm937_vm1, %v920_v10  ;;  %v832_v23 = vadd.f32 1.0, %v7036_v55  ;;  %7057 = vpow2.f32 %v6681_v54 }
 0x127   : > { %v7812_v52 = vadd.f32 %v7462_v39, %v673_v18  ;;  %v1808_v63 = vmax.f32 %v7419_v7, %v1682_v59  ;;  %v7040_v43 = vpop.eup %7039  ;;  %1034 = vst.msk [vmem:[#allocation2 + $0x128] sm:$0xff] %vm937_vm1, %v919_v24  ;;  %952 = vst.msk [vmem:[#allocation3 + $0x70] sm:$0xff] %vm937_vm1, %v919_v24  ;;  %v831_v29 = vadd.f32 1.0, %v7038_v19  ;;  %7059 = vpow2.f32 %v6684_v16 }
 0x128   : > { %v7818_v37 = vadd.f32 %v7462_v39, %v672_v35  ;;  %v1809_v47 = vmax.f32 %v7754_v0, %v1684_v21  ;;  %v7042_v55 = vpop.eup %7041  ;;  %v922_v54 = vmul.f32 %v7040_v43, %v7657_v22  ;;  %7061 = vrcp.f32 %v832_v23 }
 0x129   : > { %v6686_v58 = vmul.f32 -1.442695, %v7812_v52  ;;  %v1857_v7 = vrot.slane %v7754_v0, 2  ;;  %v7044_v59 = vpop.eup %7043  ;;  %v921_v3 = vmul.f32 %v7042_v55, %v7662_v49  ;;  %7063 = vrcp.f32 %v831_v29 }
 0x12a   : > { %v6685_v19 = vmul.f32 -1.442695, %v7818_v37  ;;  %v1858_v13 = vrot.slane %v7762_v46, 2  ;;  %v7046_v39 = vpop.eup %7045  ;;  %1037 = vst.msk [vmem:[#allocation2 + $0x150] sm:$0xff] %vm937_vm1, %v922_v54  ;;  %955 = vst.msk [vmem:[#allocation3 + $0x88] sm:$0xff] %vm937_vm1, %v922_v54  ;;  %v834_v21 = vadd.f32 1.0, %v7044_v59  ;;  %7065 = vpow2.f32 %v6683_v61 }
 0x12b   : > { %v1953_v22 = vmax.f32 %v1808_v63, %v1857_v7  ;;  %v2018_v26 = vrot.slane %v7754_v0, 3  ;;  %v7048_v10 = vpop.eup %7047  ;;  %1036 = vst.msk [vmem:[#allocation2 + $0x148] sm:$0xff] %vm937_vm1, %v921_v3  ;;  %954 = vst.msk [vmem:[#allocation3 + $0x80] sm:$0xff] %vm937_vm1, %v921_v3  ;;  %v833_v49 = vadd.f32 1.0, %v7046_v39  ;;  %7067 = vpow2.f32 %v6686_v58 }
 0x12c   : > { %v1859_v16 = vsel %vm1856_vm3, %v1857_v7, %v1858_v13  ;;  %v2019_v18 = vrot.slane %v7762_v46, 3  ;;  %v7050_v24 = vpop.eup %7049  ;;  %v924_v35 = vmul.f32 %v7048_v10, %v7676_v5  ;;  %7069 = vrcp.f32 %v834_v21 }
 0x12d   : > { %v1954_v61 = vmax.f32 %v1809_v47, %v1859_v16  ;;  %v2146_v23 = vmax.f32 %v1953_v22, %v2018_v26  ;;  %v7052_v63 = vpop.eup %7051  ;;  %7071 = vrcp.f32 %v833_v49  ;;  %v836_v43 = vadd.f32 1.0, %v7050_v24 }
 0x12e   : > { %v2020_v29 = vsel %vm2017_vm4, %v2018_v26, %v2019_v18  ;;  %v2195_v55 = vrot.slane %v7754_v0, 4  ;;  %v7054_v54 = vpop.eup %7053  ;;  %1039 = vst.msk [vmem:[#allocation2 + $0x170] sm:$0xff] %vm937_vm1, %v924_v35  ;;  %957 = vst.msk [vmem:[#allocation3 + $0x98] sm:$0xff] %vm937_vm1, %v924_v35  ;;  %v923_v58 = vmul.f32 %v7052_v63, %v7682_v45  ;;  %7073 = vpow2.f32 %v6685_v19 }
 0x12f   : > { %v2147_v5 = vmax.f32 %v1954_v61, %v2020_v29  ;;  %v2196_v47 = vrot.slane %v7762_v46, 4  ;;  %v7056_v7 = vpop.eup %7055  ;;  %v926_v59 = vmul.f32 %v7054_v54, %v7701_v62  ;;  %7075 = vrcp.f32 %v836_v43  ;;  %v7870_v54 = vld [vmem:[#allocation2 + $0xa8] sm:$0xff] }
 0x130   : > { %v2323_v3 = vmax.f32 %v2146_v23, %v2195_v55  ;;  %v10515_v39 = vrot.slane %v7762_v46, 1  ;;  %v7058_v21 = vpop.eup %7057  ;;  %1038 = vst.msk [vmem:[#allocation2 + $0x168] sm:$0xff] %vm937_vm1, %v923_v58  ;;  %956 = vst.msk [vmem:[#allocation3 + $0x90] sm:$0xff] %vm937_vm1, %v923_v58  ;;  %v925_v45 = vmul.f32 %v7056_v7, %v7708_v27  ;;  %v10516_v22 = vrot.slane %v7425_v12, 3 }
 0x131   : > { %v2197_v19 = vsel %vm2194_vm5, %v2195_v55, %v2196_v47  ;;  %v10517_v62 = vrot.slane %v7425_v12, 4  ;;  %v7060_v49 = vpop.eup %7059  ;;  %1041 = vst.msk [vmem:[#allocation2 + $0x190] sm:$0xff] %vm937_vm1, %v926_v59  ;;  %959 = vst.msk [vmem:[#allocation3 + $0xa8] sm:$0xff] %vm937_vm1, %v926_v59  ;;  %v1187_v12 = vmax.f32 %v7423_v11, %v7693_v51  ;;  %v10518_v61 = vmax.f32 %v7535_v57, %v7691_v30  ;;  %v7878_v59 = vld [vmem:[#allocation2 + $0xb0] sm:$0xff] }
 0x132   : > { %v1810_v0 = vmax.f32 %v7762_v46, %v10515_v39  ;;  %v2022_v26 = vsel %vm2017_vm4, %v2019_v18, %v10516_v22  ;;  %v835_v46 = vadd.f32 1.0, %v7058_v21  ;;  %v2324_v16 = vmax.f32 %v2147_v5, %v2197_v19  ;;  %2630 = vst.msk [vmem:[#allocation2 + $0x42] sm:$0xc0] %vm2629_vm6, %v2323_v3  ;;  %v7062_v35 = vpop.eup %7061 }
 0x133   : > { %v2199_v10 = vsel %vm2194_vm5, %v2196_v47, %v10517_v62  ;;  %v2420_v24 = vrot.slane %v2323_v3, 6  ;;  %1040 = vst.msk [vmem:[#allocation2 + $0x188] sm:$0xff] %vm937_vm1, %v925_v45  ;;  %958 = vst.msk [vmem:[#allocation3 + $0xa0] sm:$0xff] %vm937_vm1, %v925_v45  ;;  %v838_v18 = vadd.f32 1.0, %v7060_v49  ;;  %v1314_v23 = vmax.f32 %v10518_v61, %v7716_v50  ;;  %v7064_v43 = vpop.eup %7063 }
 0x134   : > { %v1955_v27 = vmax.f32 %v1810_v0, %v1858_v13  ;;  %v1190_v63 = vmax.f32 %v7691_v30, %v7716_v50  ;;  %v928_v13 = vmul.f32 %v7062_v35, %v7729_v14  ;;  %7077 = vrcp.f32 %v835_v46  ;;  %2631 = vst.msk [vmem:[#allocation2 + $0x4a] sm:$0xff] %vm937_vm1, %v2324_v16  ;;  %v7066_v58 = vpop.eup %7065 }
 0x135   : > { %v2421_v29 = vrot.slane %v2324_v16, 6  ;;  %v927_v11 = vmul.f32 %v7064_v43, %v7735_v33  ;;  %7079 = vrcp.f32 %v838_v18  ;;  %v1315_v57 = vmax.f32 %v1187_v12, %v7714_v56  ;;  %v7068_v47 = vpop.eup %7067 }
 0x136   : > { %v2148_v55 = vmax.f32 %v1955_v27, %v2022_v26  ;;  %v1443_v5 = vmax.f32 %v1314_v23, %v7742_v53  ;;  %1043 = vst.msk [vmem:[#allocation2 + $0x1b0] sm:$0xff] %vm937_vm1, %v928_v13  ;;  %961 = vst.msk [vmem:[#allocation3 + $0xb8] sm:$0xff] %vm937_vm1, %v928_v13  ;;  %v837_v30 = vadd.f32 1.0, %v7066_v58  ;;  %v1191_v3 = vmax.f32 %v7693_v51, %v7714_v56  ;;  %v7070_v33 = vpop.eup %7069 }
 0x137   : > { %v2422_v14 = vsel %vm2419_vm7, %v2420_v24, %v2421_v29  ;;  %1042 = vst.msk [vmem:[#allocation2 + $0x1a8] sm:$0xff] %vm937_vm1, %v927_v11  ;;  %960 = vst.msk [vmem:[#allocation3 + $0xb0] sm:$0xff] %vm937_vm1, %v927_v11  ;;  %v840_v39 = vadd.f32 1.0, %v7068_v47  ;;  %v1444_v0 = vmax.f32 %v1315_v57, %v7744_v36  ;;  %v1318_v45 = vmax.f32 %v1190_v63, %v7742_v53  ;;  %v7072_v19 = vpop.eup %7071 }
 0x138   : > { %v2325_v7 = vmax.f32 %v2148_v55, %v2199_v10  ;;  %2500 = vrot.lane.b32.xlu0 %v2422_v14, %s7240_s15  ;;  %v7887_v21 = vmax.f32 %v1443_v5, %v7870_v54  ;;  %v930_v22 = vmul.f32 %v7070_v33, %v7751_v6  ;;  %7081 = vrcp.f32 %v837_v30  ;;  %v7074_v62 = vpop.eup %7073 }
 0x139   : > { %v1319_v26 = vmax.f32 %v1191_v3, %v7744_v36  ;;  %v929_v10 = vmul.f32 %v7072_v19, %v7759_v38  ;;  %7083 = vrcp.f32 %v840_v39  ;;  %v1573_v49 = vmax.f32 %v1444_v0, %v7878_v59  ;;  %v7076_v16 = vpop.eup %7075  ;;  %v7922_v3 = vld [vmem:[#allocation2 + $0xc8] sm:$0xff] }
 0x13a   : > { %v2423_v51 = vrot.slane %v2325_v7, 6  ;;  %2633 = vst.msk [vmem:[#allocation2 + $0x52] sm:$0x3f] %vm2632_vm8, %v2325_v7  ;;  %v1686_v46 = vrot.slane %v7887_v21, 1  ;;  %v839_v6 = vadd.f32 1.0, %v7074_v62  ;;  %v1860_v27 = vrot.slane %v7887_v21, 2 }
 0x13b   : > { %1045 = vst.msk [vmem:[#allocation2 + $0x1d0] sm:$0xff] %vm937_vm1, %v930_v22  ;;  %963 = vst.msk [vmem:[#allocation3 + $0xc8] sm:$0xff] %vm937_vm1, %v930_v22  ;;  %v2023_v35 = vrot.slane %v7887_v21, 3  ;;  %v932_v38 = vmul.f32 %v7076_v16, %v7773_v40  ;;  %v1688_v18 = vrot.slane %v1573_v49, 1  ;;  %v1861_v12 = vrot.slane %v1573_v49, 2  ;;  %v7927_v22 = vld [vmem:[#allocation2 + $0xd0] sm:$0xff] }
 0x13c   : > { %v2424_v24 = vsel %vm2419_vm7, %v2421_v29, %v2423_v51  ;;  %1044 = vst.msk [vmem:[#allocation2 + $0x1c8] sm:$0xff] %vm937_vm1, %v929_v10  ;;  %962 = vst.msk [vmem:[#allocation3 + $0xc0] sm:$0xff] %vm937_vm1, %v929_v10  ;;  %v2024_v61 = vrot.slane %v1573_v49, 3  ;;  %7085 = vrcp.f32 %v839_v6  ;;  %v2200_v23 = vrot.slane %v7887_v21, 4 }
 0x13d   : > { %2502 = vrot.lane.b32.xlu0 %v2424_v24, %s7240_s15  ;;  %v2201_v63 = vrot.slane %v1573_v49, 4  ;;  %v10519_v43 = vrot.slane %v7431_v20, 1  ;;  %1047 = vst.msk [vmem:[#allocation2 + $0x1f0] sm:$0xff] %vm937_vm1, %v932_v38  ;;  %965 = vst.msk [vmem:[#allocation3 + $0xd8] sm:$0xff] %vm937_vm1, %v932_v38  ;;  %v1689_v29 = vsel %vm1679_vm2, %v1686_v46, %v1688_v18  ;;  %v1813_v40 = vmax.f32 %v1573_v49, %v1688_v18 }
 0x13e   : > { %v1862_v55 = vsel %vm1856_vm3, %v1860_v27, %v1861_v12  ;;  %v2025_v58 = vsel %vm2017_vm4, %v2023_v35, %v2024_v61  ;;  %v7078_v11 = vpop.eup %7077  ;;  %v1812_v57 = vmax.f32 %v7887_v21, %v1689_v29  ;;  %v10520_v5 = vrot.slane %v7427_v17, 3 }
 0x13f   : > { %v1687_v13 = vsel %vm1679_vm2, %v10519_v43, %v1686_v46  ;;  %v2202_v30 = vsel %vm2194_vm5, %v2200_v23, %v2201_v63  ;;  %v10521_v14 = vrot.slane %v7427_v17, 4  ;;  %v7080_v33 = vpop.eup %7079  ;;  %v931_v39 = vmul.f32 %v7078_v11, %v7779_v2 }
 0x140   : > { %v2027_v47 = vsel %vm2017_vm4, %v2024_v61, %v10520_v5  ;;  %v1958_v0 = vmax.f32 %v1813_v40, %v1861_v12  ;;  %v1811_v19 = vmax.f32 %v7431_v20, %v1687_v13  ;;  %v1447_v21 = vmax.f32 %v1318_v45, %v7870_v54 }
 0x141   : > { %v2204_v7 = vsel %vm2194_vm5, %v2201_v63, %v10521_v14  ;;  %v934_v51 = vmul.f32 %v7080_v33, %v7792_v44  ;;  %v1957_v62 = vmax.f32 %v1812_v57, %v1862_v55  ;;  %v1448_v10 = vmax.f32 %v1319_v26, %v7878_v59  ;;  %1046 = vst.msk [vmem:[#allocation2 + $0x1e8] sm:$0xff] %vm937_vm1, %v931_v39 }
 0x142   : > { %v1194_v17 = vmax.f32 %v7716_v50, %v7742_v53  ;;  %964 = vst.msk [vmem:[#allocation3 + $0xd0] sm:$0xff] %vm937_vm1, %v931_v39  ;;  %v2151_v2 = vmax.f32 %v1958_v0, %v2027_v47  ;;  %v1956_v49 = vmax.f32 %v1811_v19, %v1860_v27  ;;  %v7936_v20 = vmax.f32 %v1447_v21, %v7922_v3  ;;  %v7082_v46 = vpop.eup %7081  ;;  %v7972_v19 = vld [vmem:[#allocation2 + $0xe8] sm:$0xff] }
 0x143   : > { %v1195_v45 = vmax.f32 %v7714_v56, %v7744_v36  ;;  %1049 = vst.msk [vmem:[#allocation2 + $0x210] sm:$0xff] %vm937_vm1, %v934_v51  ;;  %967 = vst.msk [vmem:[#allocation3 + $0xe8] sm:$0xff] %vm937_vm1, %v934_v51  ;;  %v2150_v44 = vmax.f32 %v1957_v62, %v2025_v58  ;;  %v1577_v50 = vmax.f32 %v1448_v10, %v7927_v22  ;;  %v7084_v6 = vpop.eup %7083  ;;  %v10522_v14 = vrot.slane %v7437_v25, 3 }
 0x144   : > { %v1322_v26 = vmax.f32 %v1194_v17, %v7870_v54  ;;  %v1198_v16 = vmax.f32 %v7742_v53, %v7870_v54  ;;  %v933_v24 = vmul.f32 %v7082_v46, %v7798_v34  ;;  %v2328_v27 = vmax.f32 %v2151_v2, %v2204_v7 }
 0x145   : > { %v2149_v38 = vmax.f32 %v1956_v49, %v2023_v35  ;;  %v1691_v56 = vrot.slane %v7936_v20, 1  ;;  %v936_v18 = vmul.f32 %v7084_v6, %v7812_v52  ;;  %v2327_v12 = vmax.f32 %v2150_v44, %v2202_v30 }
 0x146   : > { %v1693_v61 = vrot.slane %v1577_v50, 1  ;;  %v1863_v63 = vrot.slane %v7936_v20, 2  ;;  %1048 = vst.msk [vmem:[#allocation2 + $0x208] sm:$0xff] %vm937_vm1, %v933_v24  ;;  %966 = vst.msk [vmem:[#allocation3 + $0xe0] sm:$0xff] %vm937_vm1, %v933_v24  ;;  %v2428_v43 = vrot.slane %v2328_v27, 6  ;;  %v1864_v13 = vrot.slane %v1577_v50, 2  ;;  %v7086_v35 = vpop.eup %7085 }
 0x147   : > { %2636 = vst.msk [vmem:[#allocation2 + $0x72] sm:$0x3f] %vm2632_vm8, %v2328_v27  ;;  %v2326_v53 = vmax.f32 %v2149_v38, %v2200_v23  ;;  %v2028_v34 = vrot.slane %v7936_v20, 3  ;;  %v2426_v52 = vrot.slane %v2327_v12, 6  ;;  %v2029_v55 = vrot.slane %v1577_v50, 3 }
 0x148   : > { %1051 = vst.msk [vmem:[#allocation2 + $0x230] sm:$0xff] %vm937_vm1, %v936_v18  ;;  %969 = vst.msk [vmem:[#allocation3 + $0xf8] sm:$0xff] %vm937_vm1, %v936_v18  ;;  %v1694_v29 = vsel %vm1679_vm2, %v1691_v56, %v1693_v61  ;;  %v1816_v40 = vmax.f32 %v1577_v50, %v1693_v61  ;;  %v935_v58 = vmul.f32 %v7086_v35, %v7818_v37  ;;  %v2205_v39 = vrot.slane %v7936_v20, 4 }
 0x149   : > { %2635 = vst.msk [vmem:[#allocation2 + $0x6a] sm:$0xff] %vm937_vm1, %v2327_v12  ;;  %v2425_v11 = vrot.slane %v2326_v53, 6  ;;  %v1815_v23 = vmax.f32 %v7936_v20, %v1694_v29  ;;  %v1865_v57 = vsel %vm1856_vm3, %v1863_v63, %v1864_v13  ;;  %v2429_v5 = vsel %vm2419_vm7, %v2426_v52, %v2428_v43 }
 0x14a   : > { %2634 = vst.msk [vmem:[#allocation2 + $0x62] sm:$0xc0] %vm2629_vm6, %v2326_v53  ;;  %v1961_v47 = vmax.f32 %v1816_v40, %v1864_v13  ;;  %v2030_v30 = vsel %vm2017_vm4, %v2028_v34, %v2029_v55  ;;  %v2032_v7 = vsel %vm2017_vm4, %v2029_v55, %v10522_v14  ;;  %2506 = vrot.lane.b32.xlu1 %v2429_v5, %s7240_s15  ;;  %v2206_v0 = vrot.slane %v1577_v50, 4  ;;  %v7985_v50 = vld [vmem:[#allocation2 + $0xf0] sm:$0xff] }
 0x14b   : > { %1050 = vst.msk [vmem:[#allocation2 + $0x228] sm:$0xff] %vm937_vm1, %v935_v58  ;;  %968 = vst.msk [vmem:[#allocation3 + $0xf0] sm:$0xff] %vm937_vm1, %v935_v58  ;;  %v2427_v37 = vsel %vm2419_vm7, %v2425_v11, %v2426_v52  ;;  %v1960_v33 = vmax.f32 %v1815_v23, %v1865_v57  ;;  %v10523_v51 = vrot.slane %v7449_v31, 1  ;;  %v1323_v10 = vmax.f32 %v1195_v45, %v7878_v59 }
 0x14c   : > { %2504 = vrot.lane.b32.xlu0 %v2427_v37, %s7240_s15  ;;  %v2154_v21 = vmax.f32 %v1961_v47, %v2032_v7  ;;  %v1451_v17 = vmax.f32 %v1322_v26, %v7922_v3  ;;  %v2207_v49 = vsel %vm2194_vm5, %v2205_v39, %v2206_v0  ;;  %v10524_v46 = vrot.slane %v7437_v25, 4  ;;  %v8017_v37 = vld [vmem:[#allocation2 + $0x108] sm:$0xff] }
 0x14d   : > { %v1692_v62 = vsel %vm1679_vm2, %v10523_v51, %v1691_v56  ;;  %v2153_v2 = vmax.f32 %v1960_v33, %v2030_v30  ;;  %v1452_v24 = vmax.f32 %v1323_v10, %v7927_v22  ;;  %v1199_v45 = vmax.f32 %v7744_v36, %v7878_v59 }
 0x14e   : > { %v2209_v20 = vsel %vm2194_vm5, %v2206_v0, %v10524_v46  ;;  %v1814_v44 = vmax.f32 %v7449_v31, %v1692_v62  ;;  %v7989_v27 = vmax.f32 %v1451_v17, %v7972_v19  ;;  %v1326_v56 = vmax.f32 %v1198_v16, %v7922_v3  ;;  %v8025_v62 = vld [vmem:[#allocation2 + $0x110] sm:$0xff] }
 0x14f   : > { %v2331_v6 = vmax.f32 %v2154_v21, %v2209_v20  ;;  %v2330_v26 = vmax.f32 %v2153_v2, %v2207_v49  ;;  %v1202_v25 = vmax.f32 %v7870_v54, %v7922_v3  ;;  %v1581_v31 = vmax.f32 %v1452_v24, %v7985_v50 }
 0x150   : > { %v1959_v38 = vmax.f32 %v1814_v44, %v1863_v63  ;;  %v1696_v12 = vrot.slane %v7989_v27, 1  ;;  %v1866_v61 = vrot.slane %v7989_v27, 2  ;;  %v2033_v36 = vrot.slane %v7989_v27, 3 }
 0x151   : > { %v2433_v18 = vrot.slane %v2331_v6, 6  ;;  %2639 = vst.msk [vmem:[#allocation2 + $0x92] sm:$0x3f] %vm2632_vm8, %v2331_v6  ;;  %v2431_v43 = vrot.slane %v2330_v26, 6  ;;  %v2210_v63 = vrot.slane %v7989_v27, 4  ;;  %v1698_v16 = vrot.slane %v1581_v31, 1 }
 0x152   : > { %v2152_v53 = vmax.f32 %v1959_v38, %v2028_v34  ;;  %2638 = vst.msk [vmem:[#allocation2 + $0x8a] sm:$0xff] %vm937_vm1, %v2330_v26  ;;  %v1867_v13 = vrot.slane %v1581_v31, 2  ;;  %v2034_v54 = vrot.slane %v1581_v31, 3  ;;  %v2211_v35 = vrot.slane %v1581_v31, 4 }
 0x153   : > { %v2434_v52 = vsel %vm2419_vm7, %v2431_v43, %v2433_v18  ;;  %v10525_v40 = vrot.slane %v7466_v41, 1  ;;  %v1327_v58 = vmax.f32 %v1199_v45, %v7927_v22  ;;  %v1699_v34 = vsel %vm1679_vm2, %v1696_v12, %v1698_v16 }
 0x154   : > { %v2329_v29 = vmax.f32 %v2152_v53, %v2205_v39  ;;  %2510 = vrot.lane.b32.xlu1 %v2434_v52, %s7240_s15  ;;  %v1819_v11 = vmax.f32 %v1581_v31, %v1698_v16  ;;  %v1868_v23 = vsel %vm1856_vm3, %v1866_v61, %v1867_v13  ;;  %v2035_v57 = vsel %vm2017_vm4, %v2033_v36, %v2034_v54 }
 0x155   : > { %v1697_v55 = vsel %vm1679_vm2, %v10525_v40, %v1696_v12  ;;  %v1818_v47 = vmax.f32 %v7989_v27, %v1699_v34  ;;  %v10526_v30 = vrot.slane %v7452_v32, 3  ;;  %v2212_v7 = vsel %vm2194_vm5, %v2210_v63, %v2211_v35 }
 0x156   : > { %v2430_v5 = vrot.slane %v2329_v29, 6  ;;  %2637 = vst.msk [vmem:[#allocation2 + $0x82] sm:$0xc0] %vm2629_vm6, %v2329_v29  ;;  %v1964_v33 = vmax.f32 %v1819_v11, %v1867_v13  ;;  %v10527_v39 = vrot.slane %v7452_v32, 4  ;;  %v1817_v21 = vmax.f32 %v7466_v41, %v1697_v55 }
 0x157   : > { %v2037_v14 = vsel %vm2017_vm4, %v2034_v54, %v10526_v30  ;;  %v1455_v51 = vmax.f32 %v1326_v56, %v7972_v19  ;;  %v1963_v17 = vmax.f32 %v1818_v47, %v1868_v23  ;;  %v1456_v2 = vmax.f32 %v1327_v58, %v7985_v50  ;;  %v8058_v23 = vld [vmem:[#allocation2 + $0x128] sm:$0xff] }
 0x158   : > { %v2214_v0 = vsel %vm2194_vm5, %v2211_v35, %v10527_v39  ;;  %v2432_v10 = vsel %vm2419_vm7, %v2430_v5, %v2431_v43  ;;  %v1203_v49 = vmax.f32 %v7878_v59, %v7927_v22  ;;  %v2157_v46 = vmax.f32 %v1964_v33, %v2037_v14  ;;  %v8064_v14 = vld [vmem:[#allocation2 + $0x130] sm:$0xff] }
 0x159   : > { %2508 = vrot.lane.b32.xlu0 %v2432_v10, %s7240_s15  ;;  %v1962_v32 = vmax.f32 %v1817_v21, %v1866_v61  ;;  %v8033_v20 = vmax.f32 %v1455_v51, %v8017_v37  ;;  %v1330_v41 = vmax.f32 %v1202_v25, %v7972_v19  ;;  %v2156_v44 = vmax.f32 %v1963_v17, %v2035_v57 }
 0x15a   : > { %v1585_v6 = vmax.f32 %v1456_v2, %v8025_v62  ;;  %v1331_v24 = vmax.f32 %v1203_v49, %v7985_v50  ;;  %v1206_v27 = vmax.f32 %v7922_v3, %v7972_v19  ;;  %v2334_v45 = vmax.f32 %v2157_v46, %v2214_v0 }
 0x15b   : > { %v2155_v26 = vmax.f32 %v1962_v32, %v2033_v36  ;;  %v1701_v59 = vrot.slane %v8033_v20, 1  ;;  %v1869_v38 = vrot.slane %v8033_v20, 2  ;;  %v2333_v56 = vmax.f32 %v2156_v44, %v2212_v7 }
 0x15c   : > { %v1703_v18 = vrot.slane %v1585_v6, 1  ;;  %v1870_v31 = vrot.slane %v1585_v6, 2  ;;  %v2038_v12 = vrot.slane %v8033_v20, 3  ;;  %v2438_v25 = vrot.slane %v2334_v45, 6  ;;  %2642 = vst.msk [vmem:[#allocation2 + $0xb2] sm:$0x3f] %vm2632_vm8, %v2334_v45 }
 0x15d   : > { %v2332_v61 = vmax.f32 %v2155_v26, %v2210_v63  ;;  %v2039_v43 = vrot.slane %v1585_v6, 3  ;;  %v2215_v53 = vrot.slane %v8033_v20, 4  ;;  %v2436_v16 = vrot.slane %v2333_v56, 6  ;;  %2641 = vst.msk [vmem:[#allocation2 + $0xaa] sm:$0xff] %vm937_vm1, %v2333_v56 }
 0x15e   : > { %v1704_v3 = vsel %vm1679_vm2, %v1701_v59, %v1703_v18  ;;  %v1822_v36 = vmax.f32 %v1585_v6, %v1703_v18  ;;  %v1871_v13 = vsel %vm1856_vm3, %v1869_v38, %v1870_v31  ;;  %v10528_v63 = vrot.slane %v7469_v42, 3 }
 0x15f   : > { %v2435_v54 = vrot.slane %v2332_v61, 6  ;;  %v1821_v35 = vmax.f32 %v8033_v20, %v1704_v3  ;;  %v2040_v52 = vsel %vm2017_vm4, %v2038_v12, %v2039_v43  ;;  %2640 = vst.msk [vmem:[#allocation2 + $0xa2] sm:$0xc0] %vm2629_vm6, %v2332_v61  ;;  %v2439_v40 = vsel %vm2419_vm7, %v2436_v16, %v2438_v25 }
 0x160   : > { %v2042_v29 = vsel %vm2017_vm4, %v2039_v43, %v10528_v63  ;;  %v1967_v55 = vmax.f32 %v1822_v36, %v1870_v31  ;;  %v2216_v58 = vrot.slane %v1585_v6, 4  ;;  %v10529_v34 = vrot.slane %v7501_v4, 1  ;;  %2514 = vrot.lane.b32.xlu1 %v2439_v40, %s7240_s15 }
 0x161   : > { %v2437_v57 = vsel %vm2419_vm7, %v2435_v54, %v2436_v16  ;;  %v1966_v5 = vmax.f32 %v1821_v35, %v1871_v13  ;;  %v1459_v30 = vmax.f32 %v1330_v41, %v8017_v37  ;;  %v10530_v39 = vrot.slane %v7469_v42, 4  ;;  %v8101_v35 = vld [vmem:[#allocation2 + $0x48] sm:$0xff] }
 0x162   : > { %v1702_v11 = vsel %vm1679_vm2, %v10529_v34, %v1701_v59  ;;  %2512 = vrot.lane.b32.xlu0 %v2437_v57, %s7240_s15  ;;  %v2160_v7 = vmax.f32 %v1967_v55, %v2042_v29  ;;  %v2217_v33 = vsel %vm2194_vm5, %v2215_v53, %v2216_v58  ;;  %v1460_v21 = vmax.f32 %v1331_v24, %v8025_v62  ;;  %v8113_v57 = vld [vmem:[#allocation2 + $0x150] sm:$0xff] }
 0x163   : > { %v1820_v47 = vmax.f32 %v7501_v4, %v1702_v11  ;;  %v2219_v0 = vsel %vm2194_vm5, %v2216_v58, %v10530_v39  ;;  %v2159_v51 = vmax.f32 %v1966_v5, %v2040_v52  ;;  %v8073_v17 = vmax.f32 %v1459_v30, %v8058_v23  ;;  %v8108_v58 = vld [vmem:[#allocation2 + $0x148] sm:$0xff] }
 0x164   : > { %v1207_v4 = vmax.f32 %v7927_v22, %v7985_v50  ;;  %v2337_v2 = vmax.f32 %v2160_v7, %v2219_v0  ;;  %v1589_v49 = vmax.f32 %v1460_v21, %v8064_v14  ;;  %v1334_v46 = vmax.f32 %v1206_v27, %v8017_v37 }
 0x165   : > { %v1965_v10 = vmax.f32 %v1820_v47, %v1869_v38  ;;  %v1210_v42 = vmax.f32 %v7972_v19, %v8017_v37  ;;  %v2336_v32 = vmax.f32 %v2159_v51, %v2217_v33  ;;  %v1706_v41 = vrot.slane %v8073_v17, 1  ;;  %v8117_v47 = vld [vmem:[#allocation2 + $0x50] sm:$0xff] }
 0x166   : > { %v1872_v44 = vrot.slane %v8073_v17, 2  ;;  %v2443_v6 = vrot.slane %v2337_v2, 6  ;;  %v1708_v24 = vrot.slane %v1589_v49, 1  ;;  %v1873_v45 = vrot.slane %v1589_v49, 2  ;;  %2645 = vst.msk [vmem:[#allocation2 + $0xd2] sm:$0x3f] %vm2632_vm8, %v2337_v2 }
 0x167   : > { %v2158_v20 = vmax.f32 %v1965_v10, %v2038_v12  ;;  %v2043_v26 = vrot.slane %v8073_v17, 3  ;;  %v2441_v22 = vrot.slane %v2336_v32, 6  ;;  %v2044_v38 = vrot.slane %v1589_v49, 3  ;;  %2644 = vst.msk [vmem:[#allocation2 + $0xca] sm:$0xff] %vm937_vm1, %v2336_v32 }
 0x168   : > { %v2220_v27 = vrot.slane %v8073_v17, 4  ;;  %v1709_v19 = vsel %vm1679_vm2, %v1706_v41, %v1708_v24  ;;  %v1825_v56 = vmax.f32 %v1589_v49, %v1708_v24  ;;  %v1874_v18 = vsel %vm1856_vm3, %v1872_v44, %v1873_v45 }
 0x169   : > { %v2335_v59 = vmax.f32 %v2158_v20, %v2215_v53  ;;  %v2221_v31 = vrot.slane %v1589_v49, 4  ;;  %v2444_v12 = vsel %vm2419_vm7, %v2441_v22, %v2443_v6  ;;  %v1824_v61 = vmax.f32 %v8073_v17, %v1709_v19 }
 0x16a   : > { %v2045_v43 = vsel %vm2017_vm4, %v2043_v26, %v2044_v38  ;;  %2518 = vrot.lane.b32.xlu1 %v2444_v12, %s7240_s15  ;;  %v1970_v53 = vmax.f32 %v1825_v56, %v1873_v45  ;;  %v10531_v16 = vrot.slane %v7507_v9, 3  ;;  %v10532_v13 = vrot.slane %v7507_v9, 4  ;;  %v8157_v12 = vld [vmem:[#allocation2 + $0x68] sm:$0xff] }
 0x16b   : > { %v2440_v25 = vrot.slane %v2335_v59, 6  ;;  %2643 = vst.msk [vmem:[#allocation2 + $0xc2] sm:$0xc0] %vm2629_vm6, %v2335_v59  ;;  %v2222_v36 = vsel %vm2194_vm5, %v2220_v27, %v2221_v31  ;;  %v1969_v63 = vmax.f32 %v1824_v61, %v1874_v18  ;;  %v10533_v29 = vrot.slane %v7514_v15, 1 }
 0x16c   : > { %v2047_v3 = vsel %vm2017_vm4, %v2044_v38, %v10531_v16  ;;  %v2224_v54 = vsel %vm2194_vm5, %v2221_v31, %v10532_v13  ;;  %v1335_v55 = vmax.f32 %v1207_v4, %v8025_v62  ;;  %v1463_v11 = vmax.f32 %v1334_v46, %v8058_v23  ;;  %v8154_v31 = vld [vmem:[#allocation2 + $0x168] sm:$0xff] }
 0x16d   : > { %v2442_v52 = vsel %vm2419_vm7, %v2440_v25, %v2441_v22  ;;  %v1707_v40 = vsel %vm1679_vm2, %v10533_v29, %v1706_v41  ;;  %v2163_v34 = vmax.f32 %v1970_v53, %v2047_v3  ;;  %v1211_v5 = vmax.f32 %v7985_v50, %v8025_v62  ;;  %v8159_v25 = vld [vmem:[#allocation2 + $0x70] sm:$0xff]  ;;  %v10538_v3 = vld [vmem:[#allocation4_spill] sm:$0xff] }
 0x16e   : > { %2516 = vrot.lane.b32.xlu0 %v2442_v52, %s7240_s15  ;;  %v1823_v9 = vmax.f32 %v7514_v15, %v1707_v40  ;;  %v2162_v30 = vmax.f32 %v1969_v63, %v2045_v43  ;;  %v1464_v7 = vmax.f32 %v1335_v55, %v8064_v14  ;;  %v1338_v33 = vmax.f32 %v1210_v42, %v8058_v23 }
 0x16f   : > { %v10534_v39 = vmax.f32 %v7557_v1, %v7564_v28  ;;  %v2340_v15 = vmax.f32 %v2163_v34, %v2224_v54  ;;  %v8128_v51 = vmax.f32 %v1463_v11, %v8108_v58  ;;  %v1339_v50 = vmax.f32 %v1211_v5, %v8064_v14  ;;  %v8168_v54 = vld [vmem:[#allocation2 + $0x170] sm:$0xff] }
 0x170   : > { %v1968_v21 = vmax.f32 %v1823_v9, %v1872_v44  ;;  %v2339_v10 = vmax.f32 %v2162_v30, %v2222_v36  ;;  %v1593_v17 = vmax.f32 %v1464_v7, %v8113_v57  ;;  %v1467_v4 = vmax.f32 %v1338_v33, %v8108_v58 }
 0x171   : > { %v8125_v0 = vmax.f32 %v10534_v39, %v8101_v35  ;;  %v10535_v2 = vmax.f32 %v7559_v48, %v7566_v8  ;;  %v2448_v28 = vrot.slane %v2340_v15, 6  ;;  %v1711_v46 = vrot.slane %v8128_v51, 1  ;;  %2648 = vst.msk [vmem:[#allocation2 + $0xf2] sm:$0x3f] %vm2632_vm8, %v2340_v15 }
 0x172   : > { %v2161_v1 = vmax.f32 %v1968_v21, %v2043_v26  ;;  %v1875_v42 = vrot.slane %v8128_v51, 2  ;;  %v2446_v32 = vrot.slane %v2339_v10, 6  ;;  %v1713_v20 = vrot.slane %v1593_v17, 1  ;;  %2647 = vst.msk [vmem:[#allocation2 + $0xea] sm:$0xff] %vm937_vm1, %v2339_v10 }
 0x173   : > { %v8137_v49 = vmax.f32 %v10535_v2, %v8117_v47  ;;  %v1876_v41 = vrot.slane %v1593_v17, 2  ;;  %v2048_v44 = vrot.slane %v8128_v51, 3  ;;  %v2049_v24 = vrot.slane %v1593_v17, 3 }
 0x174   : > { %v2338_v6 = vmax.f32 %v2161_v1, %v2220_v27  ;;  %v2225_v48 = vrot.slane %v8128_v51, 4  ;;  %v2226_v8 = vrot.slane %v1593_v17, 4  ;;  %v2449_v45 = vsel %vm2419_vm7, %v2446_v32, %v2448_v28 }
 0x175   : > { %v1714_v26 = vsel %vm1679_vm2, %v1711_v46, %v1713_v20  ;;  %v1828_v22 = vmax.f32 %v1593_v17, %v1713_v20  ;;  %v1877_v59 = vsel %vm1856_vm3, %v1875_v42, %v1876_v41  ;;  %2522 = vrot.lane.b32.xlu1 %v2449_v45, %s7240_s15  ;;  %v2050_v56 = vsel %vm2017_vm4, %v2048_v44, %v2049_v24  ;;  %v8192_v20 = vld [vmem:[#allocation2 + $0x90] sm:$0xff] }
 0x176   : > { %v2445_v38 = vrot.slane %v2338_v6, 6  ;;  %v1827_v19 = vmax.f32 %v8128_v51, %v1714_v26  ;;  %v10536_v27 = vrot.slane %v7539_v60, 3  ;;  %2646 = vst.msk [vmem:[#allocation2 + $0xe2] sm:$0xc0] %vm2629_vm6, %v2338_v6  ;;  %v2227_v43 = vsel %vm2194_vm5, %v2225_v48, %v2226_v8 }
 0x177   : > { %v1973_v61 = vmax.f32 %v1828_v22, %v1876_v41  ;;  %v10537_v53 = vrot.slane %v7539_v60, 4  ;;  %v10539_v36 = vrot.slane %v10538_v3, 1  ;;  %v1468_v40 = vmax.f32 %v1339_v50, %v8113_v57 }
 0x178   : > { %v2052_v18 = vsel %vm2017_vm4, %v2049_v24, %v10536_v27  ;;  %v2447_v52 = vsel %vm2419_vm7, %v2445_v38, %v2446_v32  ;;  %v1972_v63 = vmax.f32 %v1827_v19, %v1877_v59  ;;  %v8175_v60 = vmax.f32 %v1467_v4, %v8154_v31  ;;  %v8190_v32 = vld [vmem:[#allocation2 + $0x88] sm:$0xff] }
 0x179   : > { %v2229_v16 = vsel %vm2194_vm5, %v2226_v8, %v10537_v53  ;;  %v1712_v13 = vsel %vm1679_vm2, %v10539_v36, %v1711_v46  ;;  %2520 = vrot.lane.b32.xlu0 %v2447_v52, %s7240_s15  ;;  %v2166_v55 = vmax.f32 %v1973_v61, %v2052_v18  ;;  %v3064_v34 = vmax.f32 %v8125_v0, %v8157_v12  ;;  %v10540_v24 = vld [vmem:[#allocation5_spill] sm:$0xff]  ;;  %v10543_v53 = vld [vmem:[#allocation8_spill] sm:$0xff] }
 0x17a   : > { %v1826_v29 = vmax.f32 %v10538_v3, %v1712_v13  ;;  %v3065_v9 = vmax.f32 %v8137_v49, %v8159_v25  ;;  %v2165_v11 = vmax.f32 %v1972_v63, %v2050_v56  ;;  %v1597_v30 = vmax.f32 %v1468_v40, %v8168_v54 }
 0x17b   : > { %v1214_v7 = vmax.f32 %v8017_v37, %v8058_v23  ;;  %v2343_v33 = vmax.f32 %v2166_v55, %v2229_v16  ;;  %v1716_v39 = vrot.slane %v8175_v60, 1  ;;  %v1878_v15 = vrot.slane %v8175_v60, 2 }
 0x17c   : > { %v1971_v5 = vmax.f32 %v1826_v29, %v1875_v42  ;;  %v2053_v21 = vrot.slane %v8175_v60, 3  ;;  %v2342_v51 = vmax.f32 %v2165_v11, %v2227_v43  ;;  %v1718_v0 = vrot.slane %v1597_v30, 1 }
 0x17d   : > { %v1879_v10 = vrot.slane %v1597_v30, 2  ;;  %v2453_v17 = vrot.slane %v2343_v33, 6  ;;  %v2054_v4 = vrot.slane %v1597_v30, 3  ;;  %v2230_v2 = vrot.slane %v8175_v60, 4  ;;  %2651 = vst.msk [vmem:[#allocation2 + $0x112] sm:$0x3f] %vm2632_vm8, %v2343_v33 }
 0x17e   : > { %v2164_v50 = vmax.f32 %v1971_v5, %v2048_v44  ;;  %v2231_v49 = vrot.slane %v1597_v30, 4  ;;  %v2451_v28 = vrot.slane %v2342_v51, 6  ;;  %v1719_v46 = vsel %vm1679_vm2, %v1716_v39, %v1718_v0  ;;  %2650 = vst.msk [vmem:[#allocation2 + $0x10a] sm:$0xff] %vm937_vm1, %v2342_v51  ;;  %v10545_v5 = vld [vmem:[#allocation6_spill] sm:$0xff] }
 0x17f   : > { %v1831_v42 = vmax.f32 %v1597_v30, %v1718_v0  ;;  %v1830_v41 = vmax.f32 %v8175_v60, %v1719_v46  ;;  %v1880_v44 = vsel %vm1856_vm3, %v1878_v15, %v1879_v10  ;;  %v2055_v6 = vsel %vm2017_vm4, %v2053_v21, %v2054_v4 }
 0x180   : > { %v2341_v1 = vmax.f32 %v2164_v50, %v2225_v48  ;;  %v10541_v48 = vrot.slane %v10540_v24, 3  ;;  %v2454_v45 = vsel %vm2419_vm7, %v2451_v28, %v2453_v17  ;;  %v2232_v59 = vsel %vm2194_vm5, %v2230_v2, %v2231_v49 }
 0x181   : > { %v1976_v22 = vmax.f32 %v1831_v42, %v1879_v10  ;;  %2526 = vrot.lane.b32.xlu1 %v2454_v45, %s7240_s15  ;;  %v1975_v38 = vmax.f32 %v1830_v41, %v1880_v44  ;;  %v10542_v19 = vrot.slane %v10540_v24, 4  ;;  %v3192_v27 = vmax.f32 %v3064_v34, %v8190_v32  ;;  %v10547_v41 = vld [vmem:[#allocation9_spill] sm:$0xff]  ;;  %v8240_v24 = vld [vmem:[#allocation2 + $0x180] sm:$0xff] }
 0x182   : > { %v2057_v8 = vsel %vm2017_vm4, %v2054_v4, %v10541_v48  ;;  %v2450_v26 = vrot.slane %v2341_v1, 6  ;;  %2649 = vst.msk [vmem:[#allocation2 + $0x102] sm:$0xc0] %vm2629_vm6, %v2341_v1  ;;  %v3193_v18 = vmax.f32 %v3065_v9, %v8192_v20  ;;  %v10544_v16 = vrot.slane %v10543_v53, 1 }
 0x183   : > { %v2234_v56 = vsel %vm2194_vm5, %v2231_v49, %v10542_v19  ;;  %v2169_v43 = vmax.f32 %v1976_v22, %v2057_v8  ;;  %v1215_v36 = vmax.f32 %v8025_v62, %v8064_v14  ;;  %v2168_v13 = vmax.f32 %v1975_v38, %v2055_v6 }
 0x184   : > { %v2452_v61 = vsel %vm2419_vm7, %v2450_v26, %v2451_v28  ;;  %v1717_v3 = vsel %vm1679_vm2, %v10544_v16, %v1716_v39  ;;  %v3304_v52 = vrot.slane %v3192_v27, 1  ;;  %v3306_v63 = vrot.slane %v3193_v18, 1 }
 0x185   : > { %2524 = vrot.lane.b32.xlu0 %v2452_v61, %s7240_s15  ;;  %v3479_v29 = vrot.slane %v3192_v27, 2  ;;  %v2346_v40 = vmax.f32 %v2169_v43, %v2234_v56  ;;  %v3480_v55 = vrot.slane %v3193_v18, 2  ;;  %v3639_v34 = vrot.slane %v3192_v27, 3  ;;  %v8259_v61 = vld [vmem:[#allocation2 + $0x188] sm:$0xff]  ;;  %v10550_v43 = vld [vmem:[#allocation10_spill] sm:$0xff] }
 0x186   : > { %v3640_v9 = vrot.slane %v3193_v18, 3  ;;  %v8223_v11 = vmax.f32 %v2168_v13, %v2232_v59  ;;  %v10546_v30 = vrot.slane %v10545_v5, 1  ;;  %v3307_v39 = vsel %vm1679_vm2, %v3304_v52, %v3306_v63  ;;  %v8265_v13 = vld [vmem:[#allocation2 + $0x178] sm:$0xff] }
 0x187   : > { %v3815_v51 = vrot.slane %v3192_v27, 4  ;;  %v2458_v62 = vrot.slane %v2346_v40, 6  ;;  %v3432_v0 = vmax.f32 %v3192_v27, %v3307_v39  ;;  %v3481_v10 = vsel %vm1856_vm3, %v3479_v29, %v3480_v55  ;;  %2654 = vst.msk [vmem:[#allocation2 + $0x132] sm:$0x3f] %vm2632_vm8, %v2346_v40  ;;  %v8254_v27 = vld [vmem:[#allocation2 + $0x198] sm:$0xff] }
 0x188   : > { %v3305_v33 = vsel %vm1679_vm2, %v10546_v30, %v3304_v52  ;;  %v2456_v17 = vrot.slane %v8223_v11, 6  ;;  %v3641_v4 = vsel %vm2017_vm4, %v3639_v34, %v3640_v9  ;;  %v3816_v49 = vrot.slane %v3193_v18, 4  ;;  %2653 = vst.msk [vmem:[#allocation2 + $0x12a] sm:$0xff] %vm937_vm1, %v8223_v11  ;;  %v10553_v52 = vld [vmem:[#allocation11_spill] sm:$0xff] }
 0x189   : > { %v3431_v50 = vmax.f32 %v10545_v5, %v3305_v33  ;;  %v1829_v28 = vmax.f32 %v10543_v53, %v1717_v3  ;;  %v3576_v46 = vmax.f32 %v3432_v0, %v3481_v10  ;;  %v3433_v42 = vmax.f32 %v3193_v18, %v3306_v63  ;;  %v10551_v53 = vld [vmem:[#allocation7_spill] sm:$0xff] }
 0x18a   : > { %v10548_v44 = vrot.slane %v10547_v41, 3  ;;  %v2459_v48 = vsel %vm2419_vm7, %v2456_v17, %v2458_v62  ;;  %v3817_v8 = vsel %vm2194_vm5, %v3815_v51, %v3816_v49  ;;  %v10549_v26 = vrot.slane %v10547_v41, 4 }
 0x18b   : > { %v3575_v1 = vmax.f32 %v3431_v50, %v3479_v29  ;;  %v1974_v45 = vmax.f32 %v1829_v28, %v1878_v15  ;;  %2530 = vrot.lane.b32.xlu1 %v2459_v48, %s7240_s15  ;;  %v3768_v38 = vmax.f32 %v3576_v46, %v3641_v4  ;;  %v3577_v19 = vmax.f32 %v3433_v42, %v3480_v55 }
 0x18c   : > { %v3643_v6 = vsel %vm2017_vm4, %v3640_v9, %v10548_v44  ;;  %v3819_v22 = vsel %vm2194_vm5, %v3816_v49, %v10549_v26  ;;  %v1342_v56 = vmax.f32 %v1214_v7, %v8108_v58  ;;  %v1343_v15 = vmax.f32 %v1215_v36, %v8113_v57 }
 0x18d   : > { %v3767_v59 = vmax.f32 %v3575_v1, %v3639_v34  ;;  %v2167_v18 = vmax.f32 %v1974_v45, %v2053_v21  ;;  %v10552_v16 = vmax.f32 %v10550_v43, %v10551_v53  ;;  %v1473_v37 = vmax.f32 %v10553_v52, %v8265_v13  ;;  %v8270_v21 = vld [vmem:[#allocation2 + $0x190] sm:$0xff] }
 0x18e   : > { %v3944_v63 = vmax.f32 %v3768_v38, %v3817_v8  ;;  %v3769_v29 = vmax.f32 %v3577_v19, %v3643_v6  ;;  %v1471_v40 = vmax.f32 %v1342_v56, %v8154_v31  ;;  %v1472_v55 = vmax.f32 %v1343_v15, %v8168_v54  ;;  %v8295_v15 = vld [vmem:[#allocation2 + $0x40] sm:$0xff] }
 0x18f   : > { %v1599_v3 = vmax.f32 %v10552_v16, %v8240_v24  ;;  %v3943_v7 = vmax.f32 %v3767_v59, %v3815_v51  ;;  %v2344_v36 = vmax.f32 %v2167_v18, %v2230_v2  ;;  %v1602_v9 = vmax.f32 %v1473_v37, %v8254_v27  ;;  %v7216_v18 = vld [vmem:[#allocation2 + $0x20] sm:$0xff]  ;;  %v7219_v37 = vld [vmem:[#allocation2 + $0x30] sm:$0xff] }
 0x190   : > { %v4040_v5 = vrot.slane %v3944_v63, 6  ;;  %v3945_v30 = vmax.f32 %v3769_v29, %v3819_v22  ;;  %v1600_v33 = vmax.f32 %v1471_v40, %v8259_v61  ;;  %4249 = vst.msk [vmem:[#allocation2 + $0x4a] sm:$0xff] %vm937_vm1, %v3944_v63  ;;  %v1601_v51 = vmax.f32 %v1472_v55, %v8270_v21  ;;  %v8300_v29 = vld [vmem:[#allocation2 + $0x60] sm:$0xff]  ;;  %v8303_v55 = vld [vmem:[#allocation2 + $0x58] sm:$0xff] }
 0x191   : > { %v1720_v34 = vrot.slane %v1599_v3, 1  ;;  %v4039_v11 = vrot.slane %v3943_v7, 6  ;;  %4248 = vst.msk [vmem:[#allocation2 + $0x42] sm:$0xc0] %vm2629_vm6, %v3943_v7  ;;  %v2455_v39 = vrot.slane %v2344_v36, 6  ;;  %v2061_v62 = vrot.slane %v1602_v9, 3 }
 0x192   : > { %v2238_v60 = vrot.slane %v1602_v9, 4  ;;  %2652 = vst.msk [vmem:[#allocation2 + $0x122] sm:$0xc0] %vm2629_vm6, %v2344_v36  ;;  %v4042_v50 = vrot.slane %v3945_v30, 6  ;;  %v1721_v0 = vrot.slane %v1600_v33, 1  ;;  %v1881_v10 = vrot.slane %v1600_v33, 2 }
 0x193   : > { %v4041_v2 = vsel %vm2419_vm7, %v4039_v11, %v4040_v5  ;;  %4250 = vst.msk [vmem:[#allocation2 + $0x52] sm:$0x3f] %vm2632_vm8, %v3945_v30  ;;  %v2457_v4 = vsel %vm2419_vm7, %v2455_v39, %v2456_v17  ;;  %v1723_v49 = vrot.slane %v1601_v51, 1  ;;  %v1882_v28 = vrot.slane %v1601_v51, 2  ;;  %v7221_v36 = vld [vmem:[#allocation2 + $0x38] sm:$0xff]  ;;  %v7223_v9 = vld [vmem:[#allocation2 + $0x120] sm:$0xff] }
 0x194   : > { %4119 = vrot.lane.b32.xlu1 %v4041_v2, %s7241_s16  ;;  %v2058_v1 = vrot.slane %v1600_v33, 3  ;;  %2528 = vrot.lane.b32.xlu0 %v2457_v4, %s7240_s15  ;;  %v4043_v46 = vsel %vm2419_vm7, %v4040_v5, %v4042_v50  ;;  %v1722_v42 = vsel %vm1679_vm2, %v1720_v34, %v1721_v0  ;;  %v2059_v41 = vrot.slane %v1601_v51, 3  ;;  %v8306_v11 = vld [vmem:[#allocation2 + $0x140] sm:$0xff]  ;;  %v8320_v4 = vld [vmem:[#allocation2 + $0x78] sm:$0xff] }
 0x195   : > { %v2235_v44 = vrot.slane %v1600_v33, 4  ;;  %v1724_v6 = vsel %vm1679_vm2, %v1721_v0, %v1723_v49  ;;  %v1832_v48 = vmax.f32 %v1599_v3, %v1722_v42  ;;  %v1883_v8 = vsel %vm1856_vm3, %v1881_v10, %v1882_v28  ;;  %v7218_v3 = vld [vmem:[#allocation2 + $0x28] sm:$0xff]  ;;  %v8313_v2 = vld [vmem:[#allocation2 + $0x80] sm:$0xff] }
 0x196   : > { %v2236_v45 = vrot.slane %v1601_v51, 4  ;;  %v1833_v26 = vmax.f32 %v1600_v33, %v1724_v6  ;;  %v2060_v17 = vsel %vm2017_vm4, %v2058_v1, %v2059_v41  ;;  %v1834_v22 = vmax.f32 %v1601_v51, %v1723_v49  ;;  %v8316_v0 = vld [vmem:[#allocation2 + $0xa8] sm:$0xff] }
 0x197   : > { %v2062_v59 = vsel %vm2017_vm4, %v2059_v41, %v2061_v62  ;;  %v1977_v38 = vmax.f32 %v1832_v48, %v1881_v10  ;;  %v2811_v43 = vmax.f32 %v7216_v18, %v8295_v15  ;;  %v2812_v52 = vmax.f32 %v7218_v3, %v8101_v35  ;;  %v8311_v62 = vld [vmem:[#allocation2 + $0xa0] sm:$0xff]  ;;  %v8318_v10 = vld [vmem:[#allocation2 + $0xb0] sm:$0xff] }
 0x198   : > { %4121 = vrot.lane.b32.xlu1 %v4043_v46, %s7241_s16  ;;  %v2237_v19 = vsel %vm2194_vm5, %v2235_v44, %v2236_v45  ;;  %v2239_v56 = vsel %vm2194_vm5, %v2236_v45, %v2238_v60  ;;  %v1978_v53 = vmax.f32 %v1833_v26, %v1883_v8  ;;  %v1979_v16 = vmax.f32 %v1834_v22, %v1882_v28  ;;  %v8330_v8 = vld [vmem:[#allocation2 + $0x98] sm:$0xff] }
 0x199   : > { %v2813_v7 = vmax.f32 %v7219_v37, %v8117_v47  ;;  %v2170_v63 = vmax.f32 %v1977_v38, %v2058_v1  ;;  %v2939_v40 = vmax.f32 %v2811_v43, %v8300_v29  ;;  %v2814_v34 = vmax.f32 %v7221_v36, %v8303_v55 }
 0x19a   : > { %v1217_v5 = vmax.f32 %v7223_v9, %v8306_v11  ;;  %v2171_v30 = vmax.f32 %v1978_v53, %v2060_v17  ;;  %v2172_v33 = vmax.f32 %v1979_v16, %v2062_v59  ;;  %v2940_v39 = vmax.f32 %v2812_v52, %v8157_v12 }
 0x19b   : > { %v2941_v51 = vmax.f32 %v2813_v7, %v8159_v25  ;;  %v2347_v60 = vmax.f32 %v2170_v63, %v2235_v44  ;;  %v3067_v50 = vmax.f32 %v2939_v40, %v8313_v2  ;;  %v2942_v49 = vmax.f32 %v2814_v34, %v8320_v4  ;;  %v8327_v44 = vld [vmem:[#allocation2 + $0xb8] sm:$0xff] }
 0x19c   : > { %v1218_v28 = vmax.f32 %v8058_v23, %v8108_v58  ;;  %v2348_v1 = vmax.f32 %v2171_v30, %v2237_v19  ;;  %v2349_v46 = vmax.f32 %v2172_v33, %v2239_v56  ;;  %v3068_v42 = vmax.f32 %v2940_v39, %v8190_v32  ;;  %v8341_v56 = vld [vmem:[#allocation2 + $0x160] sm:$0xff] }
 0x19d   : > { %v3069_v41 = vmax.f32 %v2941_v51, %v8192_v20  ;;  %v2460_v6 = vrot.slane %v2347_v60, 6  ;;  %v3195_v48 = vmax.f32 %v3067_v50, %v8311_v62  ;;  %v3070_v45 = vmax.f32 %v2942_v49, %v8330_v8  ;;  %2655 = vst.msk [vmem:[#allocation2 + $0x142] sm:$0xc0] %vm2629_vm6, %v2347_v60 }
 0x19e   : > { %v1219_v26 = vmax.f32 %v8064_v14, %v8113_v57  ;;  %v2461_v23 = vrot.slane %v2348_v1, 6  ;;  %v2463_v17 = vrot.slane %v2349_v46, 6  ;;  %v3196_v22 = vmax.f32 %v3068_v42, %v8316_v0  ;;  %2657 = vst.msk [vmem:[#allocation2 + $0x152] sm:$0x3f] %vm2632_vm8, %v2349_v46 }
 0x19f   : > { %v3197_v59 = vmax.f32 %v3069_v41, %v8318_v10  ;;  %2656 = vst.msk [vmem:[#allocation2 + $0x14a] sm:$0xff] %vm937_vm1, %v2348_v1  ;;  %v3308_v38 = vrot.slane %v3195_v48, 1  ;;  %v3198_v19 = vmax.f32 %v3070_v45, %v8327_v44  ;;  %v1345_v18 = vmax.f32 %v1217_v5, %v8341_v56 }
 0x1a0   : > { %v1346_v14 = vmax.f32 %v1218_v28, %v8154_v31  ;;  %v2462_v43 = vsel %vm2419_vm7, %v2460_v6, %v2461_v23  ;;  %v2464_v53 = vsel %vm2419_vm7, %v2461_v23, %v2463_v17  ;;  %v3309_v16 = vrot.slane %v3196_v22, 1  ;;  %v8354_v28 = vld [vmem:[#allocation2 + $0x1a0] sm:$0xff]  ;;  %v8358_v6 = vld [vmem:[#allocation2 + $0x1a8] sm:$0xff] }
 0x1a1   : > { %v3311_v3 = vrot.slane %v3197_v59, 1  ;;  %2532 = vrot.lane.b32.xlu0 %v2462_v43, %s7240_s15  ;;  %2534 = vrot.lane.b32.xlu1 %v2464_v53, %s7240_s15  ;;  %v3482_v52 = vrot.slane %v3196_v22, 2  ;;  %v3483_v37 = vrot.slane %v3197_v59, 2  ;;  %v3644_v7 = vrot.slane %v3196_v22, 3  ;;  %v7229_v53 = vld [vmem:[#allocation2 + $0x138] sm:$0xff] }
 0x1a2   : > { %v3645_v63 = vrot.slane %v3197_v59, 3  ;;  %v3310_v40 = vsel %vm1679_vm2, %v3308_v38, %v3309_v16  ;;  %v3820_v34 = vrot.slane %v3196_v22, 4  ;;  %v3821_v9 = vrot.slane %v3197_v59, 4 }
 0x1a3   : > { %v3312_v36 = vsel %vm1679_vm2, %v3309_v16, %v3311_v3  ;;  %v3434_v5 = vmax.f32 %v3195_v48, %v3310_v40  ;;  %v3484_v33 = vsel %vm1856_vm3, %v3482_v52, %v3483_v37  ;;  %v3436_v60 = vmax.f32 %v3197_v59, %v3311_v3  ;;  %v7230_v16 = vld [vmem:[#allocation2 + $0x158] sm:$0xff] }
 0x1a4   : > { %v3435_v30 = vmax.f32 %v3196_v22, %v3312_v36  ;;  %v3646_v39 = vsel %vm2017_vm4, %v3644_v7, %v3645_v63  ;;  %v3822_v51 = vsel %vm2194_vm5, %v3820_v34, %v3821_v9  ;;  %v3647_v50 = vrot.slane %v3198_v19, 3  ;;  %v8363_v22 = vld [vmem:[#allocation2 + $0x1b0] sm:$0xff] }
 0x1a5   : > { %v3823_v49 = vrot.slane %v3198_v19, 4  ;;  %v3578_v1 = vmax.f32 %v3434_v5, %v3482_v52  ;;  %v1347_v42 = vmax.f32 %v1219_v26, %v8168_v54  ;;  %v1474_v41 = vmax.f32 %v1345_v18, %v8240_v24 }
 0x1a6   : > { %v3579_v46 = vmax.f32 %v3435_v30, %v3484_v33  ;;  %v3580_v48 = vmax.f32 %v3436_v60, %v3483_v37  ;;  %v3648_v45 = vsel %vm2017_vm4, %v3645_v63, %v3647_v50  ;;  %v1475_v17 = vmax.f32 %v1346_v14, %v8259_v61 }
 0x1a7   : > { %v3824_v23 = vsel %vm2194_vm5, %v3821_v9, %v3823_v49  ;;  %v3770_v59 = vmax.f32 %v3578_v1, %v3644_v7  ;;  %v1476_v19 = vmax.f32 %v1347_v42, %v8270_v21  ;;  %v1603_v43 = vmax.f32 %v1474_v41, %v8354_v28 }
 0x1a8   : > { %v3771_v38 = vmax.f32 %v3579_v46, %v3646_v39  ;;  %v3772_v26 = vmax.f32 %v3580_v48, %v3648_v45  ;;  %v1604_v18 = vmax.f32 %v1475_v17, %v8358_v6  ;;  %v1220_v3 = vmax.f32 %v7229_v53, %v7230_v16  ;;  %v8393_v53 = vld [vmem:[#allocation2 + $0x1b8] sm:$0xff] }
 0x1a9   : > { %v2815_v52 = vmax.f32 %v8295_v15, %v8300_v29  ;;  %v3946_v37 = vmax.f32 %v3770_v59, %v3820_v34  ;;  %v8371_v14 = vmax.f32 %v1476_v19, %v8363_v22  ;;  %v1725_v7 = vrot.slane %v1603_v43, 1 }
 0x1aa   : > { %v3947_v63 = vmax.f32 %v3771_v38, %v3822_v51  ;;  %v3948_v40 = vmax.f32 %v3772_v26, %v3824_v23  ;;  %v1726_v36 = vrot.slane %v1604_v18, 1  ;;  %v1884_v9 = vrot.slane %v1604_v18, 2 }
 0x1ab   : > { %v2063_v5 = vrot.slane %v1604_v18, 3  ;;  %v4044_v30 = vrot.slane %v3946_v37, 6  ;;  %v1728_v39 = vrot.slane %v8371_v14, 1  ;;  %v1885_v60 = vrot.slane %v8371_v14, 2  ;;  %4251 = vst.msk [vmem:[#allocation2 + $0x62] sm:$0xc0] %vm2629_vm6, %v3946_v37 }
 0x1ac   : > { %v4045_v33 = vrot.slane %v3947_v63, 6  ;;  %4252 = vst.msk [vmem:[#allocation2 + $0x6a] sm:$0xff] %vm937_vm1, %v3947_v63  ;;  %v4047_v15 = vrot.slane %v3948_v40, 6  ;;  %v1727_v34 = vsel %vm1679_vm2, %v1725_v7, %v1726_v36  ;;  %v2064_v51 = vrot.slane %v8371_v14, 3 }
 0x1ad   : > { %v2240_v50 = vrot.slane %v1604_v18, 4  ;;  %4253 = vst.msk [vmem:[#allocation2 + $0x72] sm:$0x3f] %vm2632_vm8, %v3948_v40  ;;  %v1729_v1 = vsel %vm1679_vm2, %v1726_v36, %v1728_v39  ;;  %v1835_v46 = vmax.f32 %v1603_v43, %v1727_v34  ;;  %v1886_v42 = vsel %vm1856_vm3, %v1884_v9, %v1885_v60 }
 0x1ae   : > { %v4046_v49 = vsel %vm2419_vm7, %v4044_v30, %v4045_v33  ;;  %v4048_v41 = vsel %vm2419_vm7, %v4045_v33, %v4047_v15  ;;  %v1836_v48 = vmax.f32 %v1604_v18, %v1729_v1  ;;  %v2065_v45 = vsel %vm2017_vm4, %v2063_v5, %v2064_v51  ;;  %v8410_v33 = vld [vmem:[#allocation2 + $0xd0] sm:$0xff]  ;;  %v8417_v1 = vld [vmem:[#allocation2 + $0x168] sm:$0xff] }
 0x1af   : > { %4123 = vrot.lane.b32.xlu0 %v4046_v49, %s7241_s16  ;;  %v2241_v23 = vrot.slane %v8371_v14, 4  ;;  %4125 = vrot.lane.b32.xlu1 %v4048_v41, %s7241_s16  ;;  %v1980_v17 = vmax.f32 %v1835_v46, %v1884_v9  ;;  %v1348_v59 = vmax.f32 %v1220_v3, %v8265_v13  ;;  %v1837_v38 = vmax.f32 %v8371_v14, %v1728_v39  ;;  %v8400_v14 = vld [vmem:[#allocation2 + $0xc0] sm:$0xff]  ;;  %v8404_v9 = vld [vmem:[#allocation2 + $0xc8] sm:$0xff]  ;;  %v8420_v41 = vld [vmem:[#allocation2 + $0x170] sm:$0xff] }
 0x1b0   : > { %v2816_v19 = vmax.f32 %v8101_v35, %v8157_v12  ;;  %v1981_v43 = vmax.f32 %v1836_v48, %v1886_v42  ;;  %v2817_v18 = vmax.f32 %v8117_v47, %v8159_v25  ;;  %v2943_v16 = vmax.f32 %v2815_v52, %v8313_v2 }
 0x1b1   : > { %v2242_v26 = vsel %vm2194_vm5, %v2240_v50, %v2241_v23  ;;  %v2173_v37 = vmax.f32 %v1980_v17, %v2063_v5  ;;  %v1477_v63 = vmax.f32 %v1348_v59, %v8254_v27  ;;  %v1982_v7 = vmax.f32 %v1837_v38, %v1885_v60 }
 0x1b2   : > { %v2944_v3 = vmax.f32 %v2816_v19, %v8190_v32  ;;  %v2174_v40 = vmax.f32 %v1981_v43, %v2065_v45  ;;  %v2945_v35 = vmax.f32 %v2817_v18, %v8192_v20  ;;  %v3071_v36 = vmax.f32 %v2943_v16, %v8311_v62 }
 0x1b3   : > { %v2818_v47 = vmax.f32 %v8303_v55, %v8320_v4  ;;  %v2350_v30 = vmax.f32 %v2173_v37, %v2240_v50  ;;  %v1606_v52 = vmax.f32 %v1477_v63, %v8393_v53  ;;  %v1221_v39 = vmax.f32 %v8306_v11, %v8341_v56  ;;  %v8429_v63 = vld [vmem:[#allocation2 + $0xd8] sm:$0xff] }
 0x1b4   : > { %v3072_v5 = vmax.f32 %v2944_v3, %v8316_v0  ;;  %v2351_v60 = vmax.f32 %v2174_v40, %v2242_v26  ;;  %v3073_v15 = vmax.f32 %v2945_v35, %v8318_v10  ;;  %v3199_v34 = vmax.f32 %v3071_v36, %v8400_v14 }
 0x1b5   : > { %v2946_v49 = vmax.f32 %v2818_v47, %v8330_v8  ;;  %v2465_v55 = vrot.slane %v2350_v30, 6  ;;  %v2066_v50 = vrot.slane %v1606_v52, 3  ;;  %v2243_v46 = vrot.slane %v1606_v52, 4  ;;  %2658 = vst.msk [vmem:[#allocation2 + $0x162] sm:$0xc0] %vm2629_vm6, %v2350_v30 }
 0x1b6   : > { %v3200_v42 = vmax.f32 %v3072_v5, %v8404_v9  ;;  %v2466_v48 = vrot.slane %v2351_v60, 6  ;;  %v3201_v11 = vmax.f32 %v3073_v15, %v8410_v33  ;;  %v3313_v45 = vrot.slane %v3199_v34, 1  ;;  %2659 = vst.msk [vmem:[#allocation2 + $0x16a] sm:$0xff] %vm937_vm1, %v2351_v60 }
 0x1b7   : > { %v3074_v17 = vmax.f32 %v2946_v49, %v8327_v44  ;;  %v2067_v59 = vsel %vm2017_vm4, %v2064_v51, %v2066_v50  ;;  %v2244_v38 = vsel %vm2194_vm5, %v2241_v23, %v2243_v46  ;;  %v1222_v50 = vmax.f32 %v8108_v58, %v8154_v31 }
 0x1b8   : > { %v3314_v19 = vrot.slane %v3200_v42, 1  ;;  %v3485_v43 = vrot.slane %v3200_v42, 2  ;;  %v2467_v26 = vsel %vm2419_vm7, %v2465_v55, %v2466_v48  ;;  %v2175_v18 = vmax.f32 %v1982_v7, %v2067_v59 }
 0x1b9   : > { %v3316_v16 = vrot.slane %v3201_v11, 1  ;;  %v3486_v37 = vrot.slane %v3201_v11, 2  ;;  %2536 = vrot.lane.b32.xlu0 %v2467_v26, %s7240_s15  ;;  %v3649_v40 = vrot.slane %v3200_v42, 3  ;;  %v3650_v35 = vrot.slane %v3201_v11, 3  ;;  %v1095_v26 = vld [vmem:[#allocation2 + $0x158] sm:$0xff] }
 0x1ba   : > { %v3315_v3 = vsel %vm1679_vm2, %v3313_v45, %v3314_v19  ;;  %v3825_v36 = vrot.slane %v3200_v42, 4  ;;  %v2352_v47 = vmax.f32 %v2175_v18, %v2244_v38  ;;  %v3826_v5 = vrot.slane %v3201_v11, 4 }
 0x1bb   : > { %v3317_v51 = vsel %vm1679_vm2, %v3314_v19, %v3316_v16  ;;  %v3437_v23 = vmax.f32 %v3199_v34, %v3315_v3  ;;  %v3487_v30 = vsel %vm1856_vm3, %v3485_v43, %v3486_v37  ;;  %v3651_v7 = vsel %vm2017_vm4, %v3649_v40, %v3650_v35 }
 0x1bc   : > { %v3438_v52 = vmax.f32 %v3200_v42, %v3317_v51  ;;  %v3202_v60 = vmax.f32 %v3074_v17, %v8429_v63  ;;  %v2468_v15 = vrot.slane %v2352_v47, 6  ;;  %v3439_v55 = vmax.f32 %v3201_v11, %v3316_v16  ;;  %2660 = vst.msk [vmem:[#allocation2 + $0x172] sm:$0x3f] %vm2632_vm8, %v2352_v47  ;;  %v8455_v47 = vld [vmem:[#allocation2 + $0x1d0] sm:$0xff] }
 0x1bd   : > { %v3581_v49 = vmax.f32 %v3437_v23, %v3485_v43  ;;  %v3827_v45 = vsel %vm2194_vm5, %v3825_v36, %v3826_v5  ;;  %v1223_v17 = vmax.f32 %v8113_v57, %v8168_v54  ;;  %v1349_v43 = vmax.f32 %v1221_v39, %v8240_v24  ;;  %v8453_v54 = vld [vmem:[#allocation2 + $0x1c8] sm:$0xff] }
 0x1be   : > { %v3582_v46 = vmax.f32 %v3438_v52, %v3487_v30  ;;  %v3652_v34 = vrot.slane %v3202_v60, 3  ;;  %v3828_v59 = vrot.slane %v3202_v60, 4  ;;  %v2469_v42 = vsel %vm2419_vm7, %v2466_v48, %v2468_v15 }
 0x1bf   : > { %v3773_v38 = vmax.f32 %v3581_v49, %v3649_v40  ;;  %v3583_v19 = vmax.f32 %v3439_v55, %v3486_v37  ;;  %2538 = vrot.lane.b32.xlu1 %v2469_v42, %s7240_s15  ;;  %v1350_v3 = vmax.f32 %v1222_v50, %v8259_v61  ;;  %v1351_v48 = vmax.f32 %v1223_v17, %v8270_v21  ;;  %v8450_v37 = vld [vmem:[#allocation2 + $0x1c0] sm:$0xff] }
 0x1c0   : > { %v3774_v11 = vmax.f32 %v3582_v46, %v3651_v7  ;;  %v3653_v58 = vsel %vm2017_vm4, %v3650_v35, %v3652_v34  ;;  %v3829_v31 = vsel %vm2194_vm5, %v3826_v5, %v3828_v59  ;;  %v1478_v57 = vmax.f32 %v1349_v43, %v8354_v28  ;;  %v8464_v7 = vld [vmem:[#allocation2 + $0x90] sm:$0xff]  ;;  %v8479_v34 = vld [vmem:[#allocation2 + $0x1d8] sm:$0xff] }
 0x1c1   : > { %v3949_v18 = vmax.f32 %v3773_v38, %v3825_v36  ;;  %v3775_v16 = vmax.f32 %v3583_v19, %v3653_v58  ;;  %v1224_v35 = vmax.f32 %v1095_v26, %v8265_v13  ;;  %v2819_v39 = vmax.f32 %v8300_v29, %v8313_v2  ;;  %v8460_v36 = vld [vmem:[#allocation2 + $0x88] sm:$0xff] }
 0x1c2   : > { %v3950_v40 = vmax.f32 %v3774_v11, %v3827_v45  ;;  %v1479_v30 = vmax.f32 %v1350_v3, %v8358_v6  ;;  %v1480_v52 = vmax.f32 %v1351_v48, %v8363_v22  ;;  %v1607_v60 = vmax.f32 %v1478_v57, %v8450_v37 }
 0x1c3   : > { %v4049_v51 = vrot.slane %v3949_v18, 6  ;;  %v3951_v23 = vmax.f32 %v3775_v16, %v3829_v31  ;;  %4254 = vst.msk [vmem:[#allocation2 + $0x82] sm:$0xc0] %vm2629_vm6, %v3949_v18  ;;  %v1352_v13 = vmax.f32 %v1224_v35, %v8254_v27  ;;  %v2820_v29 = vmax.f32 %v8157_v12, %v8190_v32 }
 0x1c4   : > { %v4050_v5 = vrot.slane %v3950_v40, 6  ;;  %4255 = vst.msk [vmem:[#allocation2 + $0x8a] sm:$0xff] %vm937_vm1, %v3950_v40  ;;  %v1608_v15 = vmax.f32 %v1479_v30, %v8453_v54  ;;  %v1609_v49 = vmax.f32 %v1480_v52, %v8455_v47  ;;  %v2821_v55 = vmax.f32 %v8159_v25, %v8192_v20  ;;  %v8493_v52 = vld [vmem:[#allocation2 + $0xe0] sm:$0xff] }
 0x1c5   : > { %v4052_v2 = vrot.slane %v3951_v23, 6  ;;  %4256 = vst.msk [vmem:[#allocation2 + $0x92] sm:$0x3f] %vm2632_vm8, %v3951_v23  ;;  %v1730_v46 = vrot.slane %v1607_v60, 1  ;;  %v1481_v45 = vmax.f32 %v1352_v13, %v8393_v53  ;;  %v2947_v12 = vmax.f32 %v2819_v39, %v8311_v62 }
 0x1c6   : > { %v4051_v50 = vsel %vm2419_vm7, %v4049_v51, %v4050_v5  ;;  %v1731_v59 = vrot.slane %v1608_v15, 1  ;;  %v1733_v42 = vrot.slane %v1609_v49, 1  ;;  %v1887_v38 = vrot.slane %v1608_v15, 2 }
 0x1c7   : > { %4127 = vrot.lane.b32.xlu0 %v4051_v50, %s7241_s16  ;;  %v4053_v32 = vsel %vm2419_vm7, %v4050_v5, %v4052_v2  ;;  %v1888_v25 = vrot.slane %v1609_v49, 2  ;;  %v2068_v20 = vrot.slane %v1608_v15, 3  ;;  %v2069_v19 = vrot.slane %v1609_v49, 3 }
 0x1c8   : > { %4129 = vrot.lane.b32.xlu1 %v4053_v32, %s7241_s16  ;;  %v2245_v17 = vrot.slane %v1608_v15, 4  ;;  %v1732_v26 = vsel %vm1679_vm2, %v1730_v46, %v1731_v59  ;;  %v1734_v11 = vsel %vm1679_vm2, %v1731_v59, %v1733_v42  ;;  %v2246_v58 = vrot.slane %v1609_v49, 4 }
 0x1c9   : > { %v1610_v31 = vmax.f32 %v1481_v45, %v8479_v34  ;;  %v1838_v43 = vmax.f32 %v1607_v60, %v1732_v26  ;;  %v1839_v18 = vmax.f32 %v1608_v15, %v1734_v11  ;;  %v1889_v16 = vsel %vm1856_vm3, %v1887_v38, %v1888_v25  ;;  %v8498_v15 = vld [vmem:[#allocation2 + $0xe8] sm:$0xff] }
 0x1ca   : > { %v2070_v3 = vsel %vm2017_vm4, %v2068_v20, %v2069_v19  ;;  %v2247_v48 = vsel %vm2194_vm5, %v2245_v17, %v2246_v58  ;;  %v1840_v40 = vmax.f32 %v1609_v49, %v1733_v42  ;;  %v2948_v23 = vmax.f32 %v2820_v29, %v8316_v0  ;;  %v8500_v49 = vld [vmem:[#allocation2 + $0xf0] sm:$0xff] }
 0x1cb   : > { %v2071_v57 = vrot.slane %v1610_v31, 3  ;;  %v2248_v35 = vrot.slane %v1610_v31, 4  ;;  %v1983_v39 = vmax.f32 %v1838_v43, %v1887_v38  ;;  %v1984_v51 = vmax.f32 %v1839_v18, %v1889_v16  ;;  %v8514_v31 = vld [vmem:[#allocation2 + $0x188] sm:$0xff]  ;;  %v8516_v43 = vld [vmem:[#allocation2 + $0x190] sm:$0xff] }
 0x1cc   : > { %v2949_v30 = vmax.f32 %v2821_v55, %v8318_v10  ;;  %v1985_v5 = vmax.f32 %v1840_v40, %v1888_v25  ;;  %v3075_v2 = vmax.f32 %v2947_v12, %v8400_v14  ;;  %v3076_v45 = vmax.f32 %v2948_v23, %v8404_v9  ;;  %v8527_v23 = vld [vmem:[#allocation2 + $0xf8] sm:$0xff] }
 0x1cd   : > { %v2072_v60 = vsel %vm2017_vm4, %v2069_v19, %v2071_v57  ;;  %v2249_v13 = vsel %vm2194_vm5, %v2246_v58, %v2248_v35  ;;  %v2176_v50 = vmax.f32 %v1983_v39, %v2068_v20  ;;  %v2177_v46 = vmax.f32 %v1984_v51, %v2070_v3 }
 0x1ce   : > { %v3077_v29 = vmax.f32 %v2949_v30, %v8410_v33  ;;  %v2178_v55 = vmax.f32 %v1985_v5, %v2072_v60  ;;  %v3203_v32 = vmax.f32 %v3075_v2, %v8493_v52  ;;  %v2822_v59 = vmax.f32 %v8320_v4, %v8330_v8 }
 0x1cf   : > { %v1225_v42 = vmax.f32 %v8341_v56, %v8240_v24  ;;  %v2353_v12 = vmax.f32 %v2176_v50, %v2245_v17  ;;  %v2354_v38 = vmax.f32 %v2177_v46, %v2247_v48  ;;  %v3204_v25 = vmax.f32 %v3076_v45, %v8498_v15 }
 0x1d0   : > { %v3205_v20 = vmax.f32 %v3077_v29, %v8500_v49  ;;  %v2355_v19 = vmax.f32 %v2178_v55, %v2249_v13  ;;  %v3318_v26 = vrot.slane %v3203_v32, 1  ;;  %v2950_v11 = vmax.f32 %v2822_v59, %v8327_v44 }
 0x1d1   : > { %v1226_v58 = vmax.f32 %v8417_v1, %v8259_v61  ;;  %v2470_v4 = vrot.slane %v2353_v12, 6  ;;  %v2471_v8 = vrot.slane %v2354_v38, 6  ;;  %v3319_v24 = vrot.slane %v3204_v25, 1  ;;  %2661 = vst.msk [vmem:[#allocation2 + $0x182] sm:$0xc0] %vm2629_vm6, %v2353_v12  ;;  %v1099_v12 = vld [vmem:[#allocation2 + $0x178] sm:$0xff] }
 0x1d2   : > { %v3321_v56 = vrot.slane %v3205_v20, 1  ;;  %2662 = vst.msk [vmem:[#allocation2 + $0x18a] sm:$0xff] %vm937_vm1, %v2354_v38  ;;  %v2473_v17 = vrot.slane %v2355_v19, 6  ;;  %v3488_v18 = vrot.slane %v3204_v25, 2  ;;  %v3489_v16 = vrot.slane %v3205_v20, 2 }
 0x1d3   : > { %v3654_v3 = vrot.slane %v3204_v25, 3  ;;  %2663 = vst.msk [vmem:[#allocation2 + $0x192] sm:$0x3f] %vm2632_vm8, %v2355_v19  ;;  %v2472_v61 = vsel %vm2419_vm7, %v2470_v4, %v2471_v8  ;;  %v3320_v1 = vsel %vm1679_vm2, %v3318_v26, %v3319_v24  ;;  %v3655_v40 = vrot.slane %v3205_v20, 3 }
 0x1d4   : > { %v3322_v48 = vsel %vm1679_vm2, %v3319_v24, %v3321_v56  ;;  %2540 = vrot.lane.b32.xlu0 %v2472_v61, %s7240_s15  ;;  %v2474_v57 = vsel %vm2419_vm7, %v2471_v8, %v2473_v17  ;;  %v3440_v35 = vmax.f32 %v3203_v32, %v3320_v1  ;;  %v3490_v51 = vsel %vm1856_vm3, %v3488_v18, %v3489_v16  ;;  %v8545_v24 = vld [vmem:[#allocation2 + $0x1f0] sm:$0xff]  ;;  %v8553_v1 = vld [vmem:[#allocation2 + $0xa8] sm:$0xff] }
 0x1d5   : > { %v3441_v39 = vmax.f32 %v3204_v25, %v3322_v48  ;;  %2542 = vrot.lane.b32.xlu1 %v2474_v57, %s7240_s15  ;;  %v3656_v30 = vsel %vm2017_vm4, %v3654_v3, %v3655_v40  ;;  %v3830_v5 = vrot.slane %v3204_v25, 4  ;;  %v3831_v60 = vrot.slane %v3205_v20, 4  ;;  %v8555_v48 = vld [vmem:[#allocation2 + $0xb0] sm:$0xff] }
 0x1d6   : > { %v3078_v13 = vmax.f32 %v2950_v11, %v8429_v63  ;;  %v3584_v2 = vmax.f32 %v3440_v35, %v3488_v18  ;;  %v3442_v46 = vmax.f32 %v3205_v20, %v3321_v56  ;;  %v1227_v45 = vmax.f32 %v8420_v41, %v8270_v21  ;;  %v8539_v11 = vld [vmem:[#allocation2 + $0x1e0] sm:$0xff]  ;;  %v8541_v20 = vld [vmem:[#allocation2 + $0x1e8] sm:$0xff] }
 0x1d7   : > { %v3585_v50 = vmax.f32 %v3441_v39, %v3490_v51  ;;  %v3832_v29 = vsel %vm2194_vm5, %v3830_v5, %v3831_v60  ;;  %v1353_v32 = vmax.f32 %v1225_v42, %v8354_v28  ;;  %v1354_v59 = vmax.f32 %v1226_v58, %v8358_v6 }
 0x1d8   : > { %v3206_v55 = vmax.f32 %v3078_v13, %v8527_v23  ;;  %v3776_v38 = vmax.f32 %v3584_v2, %v3654_v3  ;;  %v3586_v19 = vmax.f32 %v3442_v46, %v3489_v16  ;;  %v1355_v26 = vmax.f32 %v1227_v45, %v8363_v22 }
 0x1d9   : > { %v3777_v25 = vmax.f32 %v3585_v50, %v3656_v30  ;;  %v1482_v41 = vmax.f32 %v1353_v32, %v8450_v37  ;;  %v1483_v8 = vmax.f32 %v1354_v59, %v8453_v54  ;;  %v1228_v17 = vmax.f32 %v1099_v12, %v8254_v27  ;;  %v2695_v32 = vld [vmem:[#allocation2 + $0x80] sm:$0xff] }
 0x1da   : > { %v3657_v4 = vrot.slane %v3206_v55, 3  ;;  %v3833_v21 = vrot.slane %v3206_v55, 4  ;;  %v3952_v42 = vmax.f32 %v3776_v38, %v3830_v5  ;;  %v1484_v56 = vmax.f32 %v1355_v26, %v8455_v47 }
 0x1db   : > { %v3953_v58 = vmax.f32 %v3777_v25, %v3832_v29  ;;  %v1611_v3 = vmax.f32 %v1482_v41, %v8539_v11  ;;  %v1612_v61 = vmax.f32 %v1483_v8, %v8541_v20  ;;  %v2698_v41 = vld [vmem:[#allocation2 + $0x98] sm:$0xff] }
 0x1dc   : > { %v3658_v18 = vsel %vm2017_vm4, %v3655_v40, %v3657_v4  ;;  %v3834_v16 = vsel %vm2194_vm5, %v3831_v60, %v3833_v21  ;;  %v4054_v57 = vrot.slane %v3952_v42, 6  ;;  %v8558_v51 = vmax.f32 %v1484_v56, %v8545_v24  ;;  %4257 = vst.msk [vmem:[#allocation2 + $0xa2] sm:$0xc0] %vm2629_vm6, %v3952_v42 }
 0x1dd   : > { %v4055_v35 = vrot.slane %v3953_v58, 6  ;;  %v3778_v39 = vmax.f32 %v3586_v19, %v3658_v18  ;;  %4258 = vst.msk [vmem:[#allocation2 + $0xaa] sm:$0xff] %vm937_vm1, %v3953_v58  ;;  %v1735_v27 = vrot.slane %v1611_v3, 1  ;;  %v1736_v40 = vrot.slane %v1612_v61, 1  ;;  %v8576_v58 = vld [vmem:[#allocation2 + $0x1f8] sm:$0xff] }
 0x1de   : > { %v1890_v30 = vrot.slane %v1612_v61, 2  ;;  %v2073_v5 = vrot.slane %v1612_v61, 3  ;;  %v1738_v2 = vrot.slane %v8558_v51, 1  ;;  %v1891_v50 = vrot.slane %v8558_v51, 2 }
 0x1df   : > { %v4056_v60 = vsel %vm2419_vm7, %v4054_v57, %v4055_v35  ;;  %v3954_v13 = vmax.f32 %v3778_v39, %v3834_v16  ;;  %v1737_v46 = vsel %vm1679_vm2, %v1735_v27, %v1736_v40  ;;  %v2074_v45 = vrot.slane %v8558_v51, 3  ;;  %v8586_v57 = vld [vmem:[#allocation2 + $0x180] sm:$0xff] }
 0x1e0   : > { %4131 = vrot.lane.b32.xlu0 %v4056_v60, %s7241_s16  ;;  %v2250_v29 = vrot.slane %v1612_v61, 4  ;;  %v2251_v55 = vrot.slane %v8558_v51, 4  ;;  %v1739_v12 = vsel %vm1679_vm2, %v1736_v40, %v1738_v2  ;;  %v1841_v38 = vmax.f32 %v1611_v3, %v1737_v46 }
 0x1e1   : > { %v4057_v59 = vrot.slane %v3954_v13, 6  ;;  %v1892_v25 = vsel %vm1856_vm3, %v1890_v30, %v1891_v50  ;;  %4259 = vst.msk [vmem:[#allocation2 + $0xb2] sm:$0x3f] %vm2632_vm8, %v3954_v13  ;;  %v1842_v19 = vmax.f32 %v1612_v61, %v1739_v12  ;;  %v2075_v26 = vsel %vm2017_vm4, %v2073_v5, %v2074_v45  ;;  %v8593_v13 = vld [vmem:[#allocation2 + $0x100] sm:$0xff]  ;;  %v8606_v12 = vld [vmem:[#allocation2 + $0x1a8] sm:$0xff] }
 0x1e2   : > { %v2252_v4 = vsel %vm2194_vm5, %v2250_v29, %v2251_v55  ;;  %v1356_v21 = vmax.f32 %v1228_v17, %v8393_v53  ;;  %v1986_v42 = vmax.f32 %v1841_v38, %v1890_v30  ;;  %v1843_v56 = vmax.f32 %v8558_v51, %v1738_v2 }
 0x1e3   : > { %v4058_v8 = vsel %vm2419_vm7, %v4055_v35, %v4057_v59  ;;  %v2823_v18 = vmax.f32 %v2695_v32, %v8311_v62  ;;  %v1987_v16 = vmax.f32 %v1842_v19, %v1892_v25  ;;  %v2824_v61 = vmax.f32 %v8460_v36, %v8316_v0  ;;  %v8596_v36 = vld [vmem:[#allocation2 + $0x108] sm:$0xff]  ;;  %v8602_v32 = vld [vmem:[#allocation2 + $0x110] sm:$0xff]  ;;  %v8604_v59 = vld [vmem:[#allocation2 + $0x118] sm:$0xff] }
 0x1e4   : > { %4133 = vrot.lane.b32.xlu1 %v4058_v8, %s7241_s16  ;;  %v1485_v3 = vmax.f32 %v1356_v21, %v8479_v34  ;;  %v2825_v17 = vmax.f32 %v8464_v7, %v8318_v10  ;;  %v2179_v35 = vmax.f32 %v1986_v42, %v2073_v5  ;;  %v1988_v39 = vmax.f32 %v1843_v56, %v1891_v50 }
 0x1e5   : > { %v2951_v27 = vmax.f32 %v2823_v18, %v8400_v14  ;;  %v2826_v51 = vmax.f32 %v2698_v41, %v8327_v44  ;;  %v2180_v62 = vmax.f32 %v1987_v16, %v2075_v26  ;;  %v2952_v30 = vmax.f32 %v2824_v61, %v8404_v9  ;;  %v8611_v26 = vld [vmem:[#allocation2 + $0x1b0] sm:$0xff] }
 0x1e6   : > { %v1614_v40 = vmax.f32 %v1485_v3, %v8576_v58  ;;  %v2953_v60 = vmax.f32 %v2825_v17, %v8410_v33  ;;  %v2356_v0 = vmax.f32 %v2179_v35, %v2250_v29  ;;  %v1229_v5 = vmax.f32 %v8586_v57, %v8354_v28 }
 0x1e7   : > { %v3079_v10 = vmax.f32 %v2951_v27, %v8493_v52  ;;  %v2954_v7 = vmax.f32 %v2826_v51, %v8429_v63  ;;  %v2357_v44 = vmax.f32 %v2180_v62, %v2252_v4  ;;  %v3080_v46 = vmax.f32 %v2952_v30, %v8498_v15 }
 0x1e8   : > { %v2076_v2 = vrot.slane %v1614_v40, 3  ;;  %v2253_v50 = vrot.slane %v1614_v40, 4  ;;  %v2475_v29 = vrot.slane %v2356_v0, 6  ;;  %v3081_v38 = vmax.f32 %v2953_v60, %v8500_v49  ;;  %2664 = vst.msk [vmem:[#allocation2 + $0x1a2] sm:$0xc0] %vm2629_vm6, %v2356_v0 }
 0x1e9   : > { %v3207_v25 = vmax.f32 %v3079_v10, %v8593_v13  ;;  %v3082_v19 = vmax.f32 %v2954_v7, %v8527_v23  ;;  %v2476_v28 = vrot.slane %v2357_v44, 6  ;;  %v3208_v41 = vmax.f32 %v3080_v46, %v8596_v36  ;;  %2665 = vst.msk [vmem:[#allocation2 + $0x1aa] sm:$0xff] %vm937_vm1, %v2357_v44 }
 0x1ea   : > { %v2077_v4 = vsel %vm2017_vm4, %v2074_v45, %v2076_v2  ;;  %v2254_v21 = vsel %vm2194_vm5, %v2251_v55, %v2253_v50  ;;  %v3209_v42 = vmax.f32 %v3081_v38, %v8602_v32  ;;  %v1103_v50 = vld [vmem:[#allocation2 + $0x198] sm:$0xff] }
 0x1eb   : > { %v2181_v8 = vmax.f32 %v1988_v39, %v2077_v4  ;;  %v3323_v56 = vrot.slane %v3207_v25, 1  ;;  %v3210_v18 = vmax.f32 %v3082_v19, %v8604_v59  ;;  %v2477_v16 = vsel %vm2419_vm7, %v2475_v29, %v2476_v28 }
 0x1ec   : > { %v3324_v3 = vrot.slane %v3208_v41, 1  ;;  %v3491_v61 = vrot.slane %v3208_v41, 2  ;;  %v3659_v17 = vrot.slane %v3208_v41, 3  ;;  %2544 = vrot.lane.b32.xlu0 %v2477_v16, %s7240_s15  ;;  %v3326_v57 = vrot.slane %v3209_v42, 1 }
 0x1ed   : > { %v2358_v45 = vmax.f32 %v2181_v8, %v2254_v21  ;;  %v3492_v55 = vrot.slane %v3209_v42, 2  ;;  %v3660_v35 = vrot.slane %v3209_v42, 3  ;;  %v3835_v51 = vrot.slane %v3208_v41, 4  ;;  %v2699_v8 = vld [vmem:[#allocation2 + $0xa0] sm:$0xff] }
 0x1ee   : > { %v3325_v27 = vsel %vm1679_vm2, %v3323_v56, %v3324_v3  ;;  %v3836_v39 = vrot.slane %v3209_v42, 4  ;;  %v3662_v62 = vrot.slane %v3210_v18, 3  ;;  %v3327_v30 = vsel %vm1679_vm2, %v3324_v3, %v3326_v57 }
 0x1ef   : > { %v2478_v40 = vrot.slane %v2358_v45, 6  ;;  %v3443_v60 = vmax.f32 %v3207_v25, %v3325_v27  ;;  %v3493_v0 = vsel %vm1856_vm3, %v3491_v61, %v3492_v55  ;;  %2666 = vst.msk [vmem:[#allocation2 + $0x1b2] sm:$0x3f] %vm2632_vm8, %v2358_v45  ;;  %v3444_v10 = vmax.f32 %v3208_v41, %v3327_v30 }
 0x1f0   : > { %v3661_v7 = vsel %vm2017_vm4, %v3659_v17, %v3660_v35  ;;  %v3837_v44 = vsel %vm2194_vm5, %v3835_v51, %v3836_v39  ;;  %v3445_v2 = vmax.f32 %v3209_v42, %v3326_v57  ;;  %v3663_v38 = vsel %vm2017_vm4, %v3660_v35, %v3662_v62  ;;  %v8640_v57 = vld [vmem:[#allocation2 + $0x200] sm:$0xff]  ;;  %v8653_v62 = vld [vmem:[#allocation2 + $0xc8] sm:$0xff] }
 0x1f1   : > { %v2479_v46 = vsel %vm2419_vm7, %v2476_v28, %v2478_v40  ;;  %v3587_v29 = vmax.f32 %v3443_v60, %v3491_v61  ;;  %v3838_v19 = vrot.slane %v3210_v18, 4  ;;  %v3588_v25 = vmax.f32 %v3444_v10, %v3493_v0  ;;  %v8659_v0 = vld [vmem:[#allocation2 + $0xd0] sm:$0xff] }
 0x1f2   : > { %2546 = vrot.lane.b32.xlu1 %v2479_v46, %s7240_s15  ;;  %v3589_v4 = vmax.f32 %v3445_v2, %v3492_v55  ;;  %v1230_v21 = vmax.f32 %v8514_v31, %v8358_v6  ;;  %v1231_v41 = vmax.f32 %v8516_v43, %v8363_v22  ;;  %v1357_v28 = vmax.f32 %v1229_v5, %v8450_v37  ;;  %v8643_v22 = vld [vmem:[#allocation2 + $0x208] sm:$0xff]  ;;  %v8645_v43 = vld [vmem:[#allocation2 + $0x210] sm:$0xff] }
 0x1f3   : > { %v3779_v56 = vmax.f32 %v3587_v29, %v3659_v17  ;;  %v3839_v42 = vsel %vm2194_vm5, %v3836_v39, %v3838_v19  ;;  %v1232_v16 = vmax.f32 %v1103_v50, %v8393_v53  ;;  %v3780_v3 = vmax.f32 %v3588_v25, %v3661_v7  ;;  %v8651_v39 = vld [vmem:[#allocation2 + $0x218] sm:$0xff] }
 0x1f4   : > { %v3781_v18 = vmax.f32 %v3589_v4, %v3663_v38  ;;  %v1358_v61 = vmax.f32 %v1230_v21, %v8453_v54  ;;  %v1359_v45 = vmax.f32 %v1231_v41, %v8455_v47  ;;  %v1486_v31 = vmax.f32 %v1357_v28, %v8539_v11 }
 0x1f5   : > { %v3955_v6 = vmax.f32 %v3779_v56, %v3835_v51  ;;  %v1360_v17 = vmax.f32 %v1232_v16, %v8479_v34  ;;  %v2827_v5 = vmax.f32 %v2699_v8, %v8400_v14  ;;  %v3956_v53 = vmax.f32 %v3780_v3, %v3837_v44 }
 0x1f6   : > { %v3957_v55 = vmax.f32 %v3781_v18, %v3839_v42  ;;  %v1487_v35 = vmax.f32 %v1358_v61, %v8541_v20  ;;  %v1488_v27 = vmax.f32 %v1359_v45, %v8545_v24  ;;  %v1615_v40 = vmax.f32 %v1486_v31, %v8640_v57 }
 0x1f7   : > { %v4059_v51 = vrot.slane %v3955_v6, 6  ;;  %v1489_v30 = vmax.f32 %v1360_v17, %v8576_v58  ;;  %v2828_v60 = vmax.f32 %v8553_v1, %v8404_v9  ;;  %4260 = vst.msk [vmem:[#allocation2 + $0xc2] sm:$0xc0] %vm2629_vm6, %v3955_v6  ;;  %v4060_v14 = vrot.slane %v3956_v53, 6 }
 0x1f8   : > { %v4062_v10 = vrot.slane %v3957_v55, 6  ;;  %v1616_v7 = vmax.f32 %v1487_v35, %v8643_v22  ;;  %v1617_v44 = vmax.f32 %v1488_v27, %v8645_v43  ;;  %4261 = vst.msk [vmem:[#allocation2 + $0xca] sm:$0xff] %vm937_vm1, %v3956_v53  ;;  %v1740_v2 = vrot.slane %v1615_v40, 1  ;;  %v2702_v35 = vld [vmem:[#allocation2 + $0xb8] sm:$0xff]  ;;  %v1104_v27 = vld [vmem:[#allocation2 + $0x1a0] sm:$0xff] }
 0x1f9   : > { %4262 = vst.msk [vmem:[#allocation2 + $0xd2] sm:$0x3f] %vm2632_vm8, %v3957_v55  ;;  %v1618_v50 = vmax.f32 %v1489_v30, %v8651_v39  ;;  %v2829_v9 = vmax.f32 %v8555_v48, %v8410_v33  ;;  %v2955_v1 = vmax.f32 %v2827_v5, %v8493_v52  ;;  %v4061_v46 = vsel %vm2419_vm7, %v4059_v51, %v4060_v14  ;;  %v8681_v55 = vld [vmem:[#allocation2 + $0x120] sm:$0xff] }
 0x1fa   : > { %v4063_v29 = vsel %vm2419_vm7, %v4060_v14, %v4062_v10  ;;  %v1741_v38 = vrot.slane %v1616_v7, 1  ;;  %v1743_v19 = vrot.slane %v1617_v44, 1  ;;  %4135 = vrot.lane.b32.xlu0 %v4061_v46, %s7241_s16  ;;  %v1893_v25 = vrot.slane %v1616_v7, 2  ;;  %v8686_v10 = vld [vmem:[#allocation2 + $0x128] sm:$0xff] }
 0x1fb   : > { %4137 = vrot.lane.b32.xlu1 %v4063_v29, %s7241_s16  ;;  %v1894_v4 = vrot.slane %v1617_v44, 2  ;;  %v2078_v21 = vrot.slane %v1616_v7, 3  ;;  %v2079_v41 = vrot.slane %v1617_v44, 3  ;;  %v2255_v48 = vrot.slane %v1616_v7, 4 }
 0x1fc   : > { %v1742_v8 = vsel %vm1679_vm2, %v1740_v2, %v1741_v38  ;;  %v1744_v33 = vsel %vm1679_vm2, %v1741_v38, %v1743_v19  ;;  %v2256_v56 = vrot.slane %v1617_v44, 4  ;;  %v1846_v61 = vmax.f32 %v1617_v44, %v1743_v19 }
 0x1fd   : > { %v1844_v42 = vmax.f32 %v1615_v40, %v1742_v8  ;;  %v1845_v28 = vmax.f32 %v1616_v7, %v1744_v33  ;;  %v1895_v16 = vsel %vm1856_vm3, %v1893_v25, %v1894_v4  ;;  %v2080_v3 = vsel %vm2017_vm4, %v2078_v21, %v2079_v41  ;;  %v8688_v7 = vld [vmem:[#allocation2 + $0x130] sm:$0xff] }
 0x1fe   : > { %v2257_v18 = vsel %vm2194_vm5, %v2255_v48, %v2256_v56  ;;  %v2081_v45 = vrot.slane %v1618_v50, 3  ;;  %v2258_v6 = vrot.slane %v1618_v50, 4  ;;  %v2956_v5 = vmax.f32 %v2828_v60, %v8498_v15 }
 0x1ff   : > { %v1989_v31 = vmax.f32 %v1844_v42, %v1893_v25  ;;  %v1990_v17 = vmax.f32 %v1845_v28, %v1895_v16  ;;  %v2957_v53 = vmax.f32 %v2829_v9, %v8500_v49  ;;  %v1991_v51 = vmax.f32 %v1846_v61, %v1894_v4  ;;  %v8702_v42 = vld [vmem:[#allocation2 + $0x1d0] sm:$0xff] }
 0x200   : > { %v2082_v40 = vsel %vm2017_vm4, %v2079_v41, %v2081_v45  ;;  %v2259_v30 = vsel %vm2194_vm5, %v2256_v56, %v2258_v6  ;;  %v3083_v14 = vmax.f32 %v2955_v1, %v8593_v13  ;;  %v3084_v60 = vmax.f32 %v2956_v5, %v8596_v36  ;;  %v8700_v56 = vld [vmem:[#allocation2 + $0x1c8] sm:$0xff] }
 0x201   : > { %v2182_v44 = vmax.f32 %v1989_v31, %v2078_v21  ;;  %v2183_v2 = vmax.f32 %v1990_v17, %v2080_v3  ;;  %v3085_v50 = vmax.f32 %v2957_v53, %v8602_v32  ;;  %v2184_v9 = vmax.f32 %v1991_v51, %v2082_v40 }
 0x202   : > { %v3211_v46 = vmax.f32 %v3083_v14, %v8681_v55  ;;  %v2830_v29 = vmax.f32 %v2702_v35, %v8429_v63  ;;  %v1233_v38 = vmax.f32 %v1104_v27, %v8450_v37  ;;  %v3212_v1 = vmax.f32 %v3084_v60, %v8686_v10  ;;  %v8713_v35 = vld [vmem:[#allocation2 + $0x138] sm:$0xff] }
 0x203   : > { %v2359_v19 = vmax.f32 %v2182_v44, %v2255_v48  ;;  %v2360_v25 = vmax.f32 %v2183_v2, %v2257_v18  ;;  %v3213_v4 = vmax.f32 %v3085_v50, %v8688_v7  ;;  %v2361_v41 = vmax.f32 %v2184_v9, %v2259_v30 }
 0x204   : > { %v3328_v21 = vrot.slane %v3211_v46, 1  ;;  %v2958_v8 = vmax.f32 %v2830_v29, %v8527_v23  ;;  %v1234_v33 = vmax.f32 %v8606_v12, %v8453_v54  ;;  %v3329_v37 = vrot.slane %v3212_v1, 1 }
 0x205   : > { %v2480_v63 = vrot.slane %v2359_v19, 6  ;;  %v2481_v28 = vrot.slane %v2360_v25, 6  ;;  %v3331_v48 = vrot.slane %v3213_v4, 1  ;;  %2667 = vst.msk [vmem:[#allocation2 + $0x1c2] sm:$0xc0] %vm2629_vm6, %v2359_v19  ;;  %v2483_v16 = vrot.slane %v2361_v41, 6 }
 0x206   : > { %2668 = vst.msk [vmem:[#allocation2 + $0x1ca] sm:$0xff] %vm937_vm1, %v2360_v25  ;;  %v3494_v3 = vrot.slane %v3212_v1, 2  ;;  %v3495_v18 = vrot.slane %v3213_v4, 2  ;;  %v3664_v61 = vrot.slane %v3212_v1, 3  ;;  %v3330_v12 = vsel %vm1679_vm2, %v3328_v21, %v3329_v37  ;;  %v1107_v19 = vld [vmem:[#allocation2 + $0x1b8] sm:$0xff] }
 0x207   : > { %2669 = vst.msk [vmem:[#allocation2 + $0x1d2] sm:$0x3f] %vm2632_vm8, %v2361_v41  ;;  %v2482_v54 = vsel %vm2419_vm7, %v2480_v63, %v2481_v28  ;;  %v3332_v45 = vsel %vm1679_vm2, %v3329_v37, %v3331_v48  ;;  %v3665_v6 = vrot.slane %v3213_v4, 3  ;;  %v2484_v31 = vsel %vm2419_vm7, %v2481_v28, %v2483_v16  ;;  %v8731_v37 = vld [vmem:[#allocation2 + $0x230] sm:$0xff] }
 0x208   : > { %2548 = vrot.lane.b32.xlu0 %v2482_v54, %s7240_s15  ;;  %v3446_v17 = vmax.f32 %v3211_v46, %v3330_v12  ;;  %v3447_v5 = vmax.f32 %v3212_v1, %v3332_v45  ;;  %v3496_v53 = vsel %vm1856_vm3, %v3494_v3, %v3495_v18  ;;  %2550 = vrot.lane.b32.xlu1 %v2484_v31, %s7240_s15  ;;  %v3840_v51 = vrot.slane %v3212_v1, 4  ;;  %v8739_v12 = vld [vmem:[#allocation2 + $0xe8] sm:$0xff]  ;;  %v8741_v45 = vld [vmem:[#allocation2 + $0xf0] sm:$0xff] }
 0x209   : > { %v3666_v27 = vsel %vm2017_vm4, %v3664_v61, %v3665_v6  ;;  %v3841_v40 = vrot.slane %v3213_v4, 4  ;;  %v3086_v30 = vmax.f32 %v2958_v8, %v8604_v59  ;;  %v3448_v2 = vmax.f32 %v3213_v4, %v3331_v48  ;;  %v8725_v8 = vld [vmem:[#allocation2 + $0x220] sm:$0xff]  ;;  %v8727_v4 = vld [vmem:[#allocation2 + $0x228] sm:$0xff] }
 0x20a   : > { %v3590_v14 = vmax.f32 %v3446_v17, %v3494_v3  ;;  %v3591_v44 = vmax.f32 %v3447_v5, %v3496_v53  ;;  %v1235_v60 = vmax.f32 %v8611_v26, %v8455_v47  ;;  %v1361_v46 = vmax.f32 %v1233_v38, %v8539_v11 }
 0x20b   : > { %v3842_v50 = vsel %vm2194_vm5, %v3840_v51, %v3841_v40  ;;  %v3214_v9 = vmax.f32 %v3086_v30, %v8713_v35  ;;  %v1362_v29 = vmax.f32 %v1234_v33, %v8541_v20  ;;  %v3592_v41 = vmax.f32 %v3448_v2, %v3495_v18 }
 0x20c   : > { %v3782_v25 = vmax.f32 %v3590_v14, %v3664_v61  ;;  %v3783_v1 = vmax.f32 %v3591_v44, %v3666_v27  ;;  %v1363_v21 = vmax.f32 %v1235_v60, %v8545_v24  ;;  %v1490_v26 = vmax.f32 %v1361_v46, %v8640_v57  ;;  %v2703_v46 = vld [vmem:[#allocation2 + $0xc0] sm:$0xff] }
 0x20d   : > { %v3667_v63 = vrot.slane %v3214_v9, 3  ;;  %v3843_v47 = vrot.slane %v3214_v9, 4  ;;  %v1491_v28 = vmax.f32 %v1362_v29, %v8643_v22  ;;  %v1236_v16 = vmax.f32 %v1107_v19, %v8479_v34 }
 0x20e   : > { %v3958_v38 = vmax.f32 %v3782_v25, %v3840_v51  ;;  %v3959_v33 = vmax.f32 %v3783_v1, %v3842_v50  ;;  %v1492_v48 = vmax.f32 %v1363_v21, %v8645_v43  ;;  %v1619_v61 = vmax.f32 %v1490_v26, %v8725_v8  ;;  %v2706_v26 = vld [vmem:[#allocation2 + $0xd8] sm:$0xff] }
 0x20f   : > { %v3668_v3 = vsel %vm2017_vm4, %v3665_v6, %v3667_v63  ;;  %v3844_v18 = vsel %vm2194_vm5, %v3841_v40, %v3843_v47  ;;  %v1620_v54 = vmax.f32 %v1491_v28, %v8727_v4  ;;  %v1364_v47 = vmax.f32 %v1236_v16, %v8576_v58 }
 0x210   : > { %v4064_v31 = vrot.slane %v3958_v38, 6  ;;  %v4065_v17 = vrot.slane %v3959_v33, 6  ;;  %v3784_v5 = vmax.f32 %v3592_v41, %v3668_v3  ;;  %v8744_v53 = vmax.f32 %v1492_v48, %v8731_v37  ;;  %4263 = vst.msk [vmem:[#allocation2 + $0xe2] sm:$0xc0] %vm2629_vm6, %v3958_v38 }
 0x211   : > { %4264 = vst.msk [vmem:[#allocation2 + $0xea] sm:$0xff] %vm937_vm1, %v3959_v33  ;;  %v1745_v34 = vrot.slane %v1619_v61, 1  ;;  %v1746_v6 = vrot.slane %v1620_v54, 1  ;;  %v1896_v27 = vrot.slane %v1620_v54, 2  ;;  %v2083_v51 = vrot.slane %v1620_v54, 3  ;;  %v8762_v33 = vld [vmem:[#allocation2 + $0x238] sm:$0xff] }
 0x212   : > { %v4066_v40 = vsel %vm2419_vm7, %v4064_v31, %v4065_v17  ;;  %v3960_v30 = vmax.f32 %v3784_v5, %v3844_v18  ;;  %v1748_v14 = vrot.slane %v8744_v53, 1  ;;  %v1897_v44 = vrot.slane %v8744_v53, 2  ;;  %v8772_v31 = vld [vmem:[#allocation2 + $0x1c0] sm:$0xff] }
 0x213   : > { %4139 = vrot.lane.b32.xlu0 %v4066_v40, %s7241_s16  ;;  %v1747_v2 = vsel %vm1679_vm2, %v1745_v34, %v1746_v6  ;;  %v2084_v60 = vrot.slane %v8744_v53, 3  ;;  %v2260_v50 = vrot.slane %v1620_v54, 4  ;;  %v2261_v9 = vrot.slane %v8744_v53, 4 }
 0x214   : > { %v4067_v29 = vrot.slane %v3960_v30, 6  ;;  %v1749_v19 = vsel %vm1679_vm2, %v1746_v6, %v1748_v14  ;;  %v1847_v25 = vmax.f32 %v1619_v61, %v1747_v2  ;;  %v1898_v1 = vsel %vm1856_vm3, %v1896_v27, %v1897_v44  ;;  %4265 = vst.msk [vmem:[#allocation2 + $0xf2] sm:$0x3f] %vm2632_vm8, %v3960_v30  ;;  %v8779_v30 = vld [vmem:[#allocation2 + $0x140] sm:$0xff]  ;;  %v8792_v2 = vld [vmem:[#allocation2 + $0x1e8] sm:$0xff] }
 0x215   : > { %v1848_v41 = vmax.f32 %v1620_v54, %v1749_v19  ;;  %v2085_v21 = vsel %vm2017_vm4, %v2083_v51, %v2084_v60  ;;  %v2262_v63 = vsel %vm2194_vm5, %v2260_v50, %v2261_v9  ;;  %v1849_v48 = vmax.f32 %v8744_v53, %v1748_v14  ;;  %v8797_v19 = vld [vmem:[#allocation2 + $0x1f0] sm:$0xff] }
 0x216   : > { %v4068_v28 = vsel %vm2419_vm7, %v4065_v17, %v4067_v29  ;;  %v1992_v38 = vmax.f32 %v1847_v25, %v1896_v27  ;;  %v2831_v3 = vmax.f32 %v2703_v46, %v8493_v52  ;;  %v1493_v61 = vmax.f32 %v1364_v47, %v8651_v39 }
 0x217   : > { %4141 = vrot.lane.b32.xlu1 %v4068_v28, %s7241_s16  ;;  %v1993_v18 = vmax.f32 %v1848_v41, %v1898_v1  ;;  %v2832_v54 = vmax.f32 %v8653_v62, %v8498_v15  ;;  %v2833_v16 = vmax.f32 %v8659_v0, %v8500_v49  ;;  %v1994_v5 = vmax.f32 %v1849_v48, %v1897_v44  ;;  %v8782_v62 = vld [vmem:[#allocation2 + $0x148] sm:$0xff] }
 0x218   : > { %v2185_v17 = vmax.f32 %v1992_v38, %v2083_v51  ;;  %v2959_v34 = vmax.f32 %v2831_v3, %v8593_v13  ;;  %v2834_v53 = vmax.f32 %v2706_v26, %v8527_v23  ;;  %v1622_v6 = vmax.f32 %v1493_v61, %v8762_v33 }
 0x219   : > { %v2186_v52 = vmax.f32 %v1993_v18, %v2085_v21  ;;  %v2960_v27 = vmax.f32 %v2832_v54, %v8596_v36  ;;  %v2961_v40 = vmax.f32 %v2833_v16, %v8602_v32  ;;  %v1237_v13 = vmax.f32 %v8772_v31, %v8539_v11  ;;  %v8788_v36 = vld [vmem:[#allocation2 + $0x150] sm:$0xff]  ;;  %v8790_v32 = vld [vmem:[#allocation2 + $0x158] sm:$0xff] }
 0x21a   : > { %v2362_v15 = vmax.f32 %v2185_v17, %v2260_v50  ;;  %v3087_v49 = vmax.f32 %v2959_v34, %v8681_v55  ;;  %v2962_v0 = vmax.f32 %v2834_v53, %v8604_v59  ;;  %v2086_v51 = vrot.slane %v1622_v6, 3 }
 0x21b   : > { %v2363_v23 = vmax.f32 %v2186_v52, %v2262_v63  ;;  %v2263_v14 = vrot.slane %v1622_v6, 4  ;;  %v3088_v44 = vmax.f32 %v2960_v27, %v8686_v10  ;;  %v3089_v46 = vmax.f32 %v2961_v40, %v8688_v7 }
 0x21c   : > { %v2485_v50 = vrot.slane %v2362_v15, 6  ;;  %v3215_v29 = vmax.f32 %v3087_v49, %v8779_v30  ;;  %v3090_v59 = vmax.f32 %v2962_v0, %v8713_v35  ;;  %2670 = vst.msk [vmem:[#allocation2 + $0x1e2] sm:$0xc0] %vm2629_vm6, %v2362_v15  ;;  %v2087_v25 = vsel %vm2017_vm4, %v2084_v60, %v2086_v51  ;;  %v1111_v49 = vld [vmem:[#allocation2 + $0x1d8] sm:$0xff] }
 0x21d   : > { %v2486_v11 = vrot.slane %v2363_v23, 6  ;;  %v2264_v1 = vsel %vm2194_vm5, %v2261_v9, %v2263_v14  ;;  %v3216_v41 = vmax.f32 %v3088_v44, %v8782_v62  ;;  %2671 = vst.msk [vmem:[#allocation2 + $0x1ea] sm:$0xff] %vm937_vm1, %v2363_v23  ;;  %v2187_v21 = vmax.f32 %v1994_v5, %v2087_v25 }
 0x21e   : > { %v3217_v63 = vmax.f32 %v3089_v46, %v8788_v36  ;;  %v3333_v47 = vrot.slane %v3215_v29, 1  ;;  %v3218_v26 = vmax.f32 %v3090_v59, %v8790_v32  ;;  %v1238_v46 = vmax.f32 %v8700_v56, %v8541_v20  ;;  %v1112_v59 = vld [vmem:[#allocation2 + $0x1e0] sm:$0xff]  ;;  %v8829_v56 = vld [vmem:[#allocation2 + $0x248] sm:$0xff] }
 0x21f   : > { %v2487_v28 = vsel %vm2419_vm7, %v2485_v50, %v2486_v11  ;;  %v3334_v38 = vrot.slane %v3216_v41, 1  ;;  %v3497_v48 = vrot.slane %v3216_v41, 2  ;;  %v3669_v3 = vrot.slane %v3216_v41, 3 }
 0x220   : > { %2552 = vrot.lane.b32.xlu0 %v2487_v28, %s7240_s15  ;;  %v2364_v60 = vmax.f32 %v2187_v21, %v2264_v1  ;;  %v3336_v18 = vrot.slane %v3217_v63, 1  ;;  %v3498_v9 = vrot.slane %v3217_v63, 2  ;;  %v3670_v61 = vrot.slane %v3217_v63, 3  ;;  %v1178_v21 = vld [vmem:[#allocation2 + $0x208] sm:$0xff] }
 0x221   : > { %v3335_v54 = vsel %vm1679_vm2, %v3333_v47, %v3334_v38  ;;  %v3845_v16 = vrot.slane %v3216_v41, 4  ;;  %v3846_v31 = vrot.slane %v3217_v63, 4  ;;  %v3672_v17 = vrot.slane %v3218_v26, 3 }
 0x222   : > { %v2488_v5 = vrot.slane %v2364_v60, 6  ;;  %v3337_v34 = vsel %vm1679_vm2, %v3334_v38, %v3336_v18  ;;  %v3449_v53 = vmax.f32 %v3215_v29, %v3335_v54  ;;  %v3499_v52 = vsel %vm1856_vm3, %v3497_v48, %v3498_v9  ;;  %2672 = vst.msk [vmem:[#allocation2 + $0x1f2] sm:$0x3f] %vm2632_vm8, %v2364_v60  ;;  %v8826_v38 = vld [vmem:[#allocation2 + $0x240] sm:$0xff] }
 0x223   : > { %v3450_v6 = vmax.f32 %v3216_v41, %v3337_v34  ;;  %v3671_v27 = vsel %vm2017_vm4, %v3669_v3, %v3670_v61  ;;  %v3847_v40 = vsel %vm2194_vm5, %v3845_v16, %v3846_v31  ;;  %v3451_v15 = vmax.f32 %v3217_v63, %v3336_v18  ;;  %v8837_v18 = vld [vmem:[#allocation2 + $0x258] sm:$0xff] }
 0x224   : > { %v2489_v0 = vsel %vm2419_vm7, %v2486_v11, %v2488_v5  ;;  %v3593_v23 = vmax.f32 %v3449_v53, %v3497_v48  ;;  %v3673_v51 = vsel %vm2017_vm4, %v3670_v61, %v3672_v17  ;;  %v3848_v14 = vrot.slane %v3218_v26, 4  ;;  %v1179_v48 = vld [vmem:[#allocation2 + $0x210] sm:$0xff] }
 0x225   : > { %2554 = vrot.lane.b32.xlu1 %v2489_v0, %s7240_s15  ;;  %v3594_v44 = vmax.f32 %v3450_v6, %v3499_v52  ;;  %v3595_v50 = vmax.f32 %v3451_v15, %v3498_v9  ;;  %v1239_v29 = vmax.f32 %v8702_v42, %v8545_v24  ;;  %v1365_v11 = vmax.f32 %v1237_v13, %v8640_v57  ;;  %v8831_v42 = vld [vmem:[#allocation2 + $0x250] sm:$0xff]  ;;  %v8839_v9 = vld [vmem:[#allocation2 + $0x108] sm:$0xff] }
 0x226   : > { %v3785_v25 = vmax.f32 %v3593_v23, %v3669_v3  ;;  %v3849_v1 = vsel %vm2194_vm5, %v3846_v31, %v3848_v14  ;;  %v1240_v41 = vmax.f32 %v1111_v49, %v8576_v58  ;;  %v1366_v26 = vmax.f32 %v1238_v46, %v8643_v22  ;;  %v8844_v17 = vld [vmem:[#allocation2 + $0x110] sm:$0xff] }
 0x227   : > { %v3786_v63 = vmax.f32 %v3594_v44, %v3671_v27  ;;  %v3787_v47 = vmax.f32 %v3595_v50, %v3673_v51  ;;  %v1367_v28 = vmax.f32 %v1239_v29, %v8645_v43  ;;  %v1494_v24 = vmax.f32 %v1365_v11, %v8725_v8 }
 0x228   : > { %v3961_v20 = vmax.f32 %v3785_v25, %v3845_v16  ;;  %v1368_v13 = vmax.f32 %v1240_v41, %v8651_v39  ;;  %v1241_v58 = vmax.f32 %v1112_v59, %v8640_v57  ;;  %v1495_v22 = vmax.f32 %v1366_v26, %v8727_v4 }
 0x229   : > { %v3962_v3 = vmax.f32 %v3786_v63, %v3847_v40  ;;  %v3963_v60 = vmax.f32 %v3787_v47, %v3849_v1  ;;  %v1496_v43 = vmax.f32 %v1367_v28, %v8731_v37  ;;  %v1623_v54 = vmax.f32 %v1494_v24, %v8826_v38  ;;  %v1115_v47 = vld [vmem:[#allocation2 + $0x1f8] sm:$0xff] }
 0x22a   : > { %v4069_v61 = vrot.slane %v3961_v20, 6  ;;  %v1497_v16 = vmax.f32 %v1368_v13, %v8762_v33  ;;  %v1242_v31 = vmax.f32 %v8792_v2, %v1178_v21  ;;  %4266 = vst.msk [vmem:[#allocation2 + $0x102] sm:$0xc0] %vm2629_vm6, %v3961_v20  ;;  %v1624_v34 = vmax.f32 %v1495_v22, %v8829_v56  ;;  %v1563_v13 = vld [vmem:[#allocation2 + $0x260] sm:$0xff] }
 0x22b   : > { %v4070_v57 = vrot.slane %v3962_v3, 6  ;;  %v4072_v5 = vrot.slane %v3963_v60, 6  ;;  %v1625_v53 = vmax.f32 %v1496_v43, %v8831_v42  ;;  %4267 = vst.msk [vmem:[#allocation2 + $0x10a] sm:$0xff] %vm937_vm1, %v3962_v3  ;;  %v1750_v52 = vrot.slane %v1623_v54, 1 }
 0x22c   : > { %4268 = vst.msk [vmem:[#allocation2 + $0x112] sm:$0x3f] %vm2632_vm8, %v3963_v60  ;;  %v1626_v6 = vmax.f32 %v1497_v16, %v8837_v18  ;;  %v1243_v27 = vmax.f32 %v8797_v19, %v1179_v48  ;;  %v1369_v2 = vmax.f32 %v1241_v58, %v8725_v8  ;;  %v1751_v49 = vrot.slane %v1624_v34, 1  ;;  %v2707_v58 = vld [vmem:[#allocation2 + $0xe0] sm:$0xff] }
 0x22d   : > { %v4071_v40 = vsel %vm2419_vm7, %v4069_v61, %v4070_v57  ;;  %v4073_v15 = vsel %vm2419_vm7, %v4070_v57, %v4072_v5  ;;  %v1753_v0 = vrot.slane %v1625_v53, 1  ;;  %v1899_v23 = vrot.slane %v1624_v34, 2  ;;  %v8865_v48 = vld [vmem:[#allocation2 + $0x100] sm:$0xff]  ;;  %v1564_v61 = vld [vmem:[#allocation2 + $0x268] sm:$0xff] }
 0x22e   : > { %4143 = vrot.lane.b32.xlu0 %v4071_v40, %s7241_s16  ;;  %4145 = vrot.lane.b32.xlu1 %v4073_v15, %s7241_s16  ;;  %v1900_v51 = vrot.slane %v1625_v53, 2  ;;  %v2088_v14 = vrot.slane %v1624_v34, 3  ;;  %v2089_v44 = vrot.slane %v1625_v53, 3  ;;  %v1752_v50 = vsel %vm1679_vm2, %v1750_v52, %v1751_v49 }
 0x22f   : > { %v1754_v19 = vsel %vm1679_vm2, %v1751_v49, %v1753_v0  ;;  %v2265_v46 = vrot.slane %v1624_v34, 4  ;;  %v2266_v8 = vrot.slane %v1625_v53, 4  ;;  %v1850_v29 = vmax.f32 %v1623_v54, %v1752_v50  ;;  %v1565_v54 = vld [vmem:[#allocation2 + $0x270] sm:$0xff] }
 0x230   : > { %v1851_v59 = vmax.f32 %v1624_v34, %v1754_v19  ;;  %v1901_v25 = vsel %vm1856_vm3, %v1899_v23, %v1900_v51  ;;  %v2090_v1 = vsel %vm2017_vm4, %v2088_v14, %v2089_v44  ;;  %v1852_v41 = vmax.f32 %v1625_v53, %v1753_v0 }
 0x231   : > { %v2267_v11 = vsel %vm2194_vm5, %v2265_v46, %v2266_v8  ;;  %v2091_v21 = vrot.slane %v1626_v6, 3  ;;  %v2268_v63 = vrot.slane %v1626_v6, 4  ;;  %v1995_v26 = vmax.f32 %v1850_v29, %v1899_v23 }
 0x232   : > { %v1996_v28 = vmax.f32 %v1851_v59, %v1901_v25  ;;  %v1370_v20 = vmax.f32 %v1242_v31, %v8727_v4  ;;  %v1371_v24 = vmax.f32 %v1243_v27, %v8731_v37  ;;  %v1997_v3 = vmax.f32 %v1852_v41, %v1900_v51  ;;  %v1566_v25 = vld [vmem:[#allocation2 + $0x278] sm:$0xff] }
 0x233   : > { %v2092_v60 = vsel %vm2017_vm4, %v2089_v44, %v2091_v21  ;;  %v2269_v22 = vsel %vm2194_vm5, %v2266_v8, %v2268_v63  ;;  %v1498_v43 = vmax.f32 %v1369_v2, %v8826_v38  ;;  %v2188_v16 = vmax.f32 %v1995_v26, %v2088_v14 }
 0x234   : > { %v2189_v57 = vmax.f32 %v1996_v28, %v2090_v1  ;;  %v1499_v5 = vmax.f32 %v1370_v20, %v8829_v56  ;;  %v1500_v4 = vmax.f32 %v1371_v24, %v8831_v42  ;;  %v2190_v37 = vmax.f32 %v1997_v3, %v2092_v60  ;;  %v2710_v3 = vld [vmem:[#allocation2 + $0xf8] sm:$0xff] }
 0x235   : > { %v1627_v31 = vmax.f32 %v1498_v43, %v1563_v13  ;;  %v1244_v34 = vmax.f32 %v1115_v47, %v8651_v39  ;;  %v2835_v53 = vmax.f32 %v2707_v58, %v8865_v48  ;;  %v2365_v52 = vmax.f32 %v2188_v16, %v2265_v46  ;;  %v8894_v60 = vld [vmem:[#allocation2 + $0x118] sm:$0xff]  ;;  %v8899_v16 = vld [vmem:[#allocation2 + $0x168] sm:$0xff] }
 0x236   : > { %v2366_v6 = vmax.f32 %v2189_v57, %v2267_v11  ;;  %v1628_v27 = vmax.f32 %v1499_v5, %v1564_v61  ;;  %v1629_v40 = vmax.f32 %v1500_v4, %v1565_v54  ;;  %v2367_v15 = vmax.f32 %v2190_v37, %v2269_v22  ;;  %v8897_v54 = vld [vmem:[#allocation2 + $0x160] sm:$0xff]  ;;  %10554 = vst [vmem:[#allocation4_spill] sm:$0xff] %v8899_v16  ;;  %v8903_v4 = vld [vmem:[#allocation2 + $0x170] sm:$0xff] }
 0x237   : > { %v1755_v38 = vrot.slane %v1627_v31, 1  ;;  %v1372_v2 = vmax.f32 %v1244_v34, %v8762_v33  ;;  %v2836_v49 = vmax.f32 %v8739_v12, %v8839_v9  ;;  %v2490_v56 = vrot.slane %v2365_v52, 6  ;;  %2673 = vst.msk [vmem:[#allocation2 + $0x202] sm:$0xc0] %vm2629_vm6, %v2365_v52 }
 0x238   : > { %v2491_v0 = vrot.slane %v2366_v6, 6  ;;  %2674 = vst.msk [vmem:[#allocation2 + $0x20a] sm:$0xff] %vm937_vm1, %v2366_v6  ;;  %v1756_v39 = vrot.slane %v1628_v27, 1  ;;  %v1758_v42 = vrot.slane %v1629_v40, 1  ;;  %v2493_v23 = vrot.slane %v2367_v15, 6 }
 0x239   : > { %2675 = vst.msk [vmem:[#allocation2 + $0x212] sm:$0x3f] %vm2632_vm8, %v2367_v15  ;;  %v1902_v51 = vrot.slane %v1628_v27, 2  ;;  %v1903_v14 = vrot.slane %v1629_v40, 2  ;;  %v2093_v44 = vrot.slane %v1628_v27, 3  ;;  %v2094_v19 = vrot.slane %v1629_v40, 3 }
 0x23a   : > { %v2492_v50 = vsel %vm2419_vm7, %v2490_v56, %v2491_v0  ;;  %v1757_v33 = vsel %vm1679_vm2, %v1755_v38, %v1756_v39  ;;  %v1759_v12 = vsel %vm1679_vm2, %v1756_v39, %v1758_v42  ;;  %v2494_v46 = vsel %vm2419_vm7, %v2491_v0, %v2493_v23 }
 0x23b   : > { %2556 = vrot.lane.b32.xlu0 %v2492_v50, %s7240_s15  ;;  %v1853_v8 = vmax.f32 %v1627_v31, %v1757_v33  ;;  %v1854_v29 = vmax.f32 %v1628_v27, %v1759_v12  ;;  %v1904_v59 = vsel %vm1856_vm3, %v1902_v51, %v1903_v14  ;;  %2558 = vrot.lane.b32.xlu1 %v2494_v46, %s7240_s15  ;;  %v2270_v11 = vrot.slane %v1628_v27, 4  ;;  %v4296_v12 = vld [vmem:[#allocation2] sm:$0xff] }
 0x23c   : > { %v2095_v1 = vsel %vm2017_vm4, %v2093_v44, %v2094_v19  ;;  %v2271_v41 = vrot.slane %v1629_v40, 4  ;;  %v1501_v21 = vmax.f32 %v1372_v2, %v8837_v18  ;;  %v1855_v26 = vmax.f32 %v1629_v40, %v1758_v42  ;;  %v8929_v46 = vld [vmem:[#allocation2 + $0x20] sm:$0xff] }
 0x23d   : > { %v1998_v63 = vmax.f32 %v1853_v8, %v1902_v51  ;;  %v1999_v47 = vmax.f32 %v1854_v29, %v1904_v59  ;;  %v2837_v28 = vmax.f32 %v8741_v45, %v8844_v17  ;;  %v2963_v13 = vmax.f32 %v2835_v53, %v8681_v55 }
 0x23e   : > { %v2272_v20 = vsel %vm2194_vm5, %v2270_v11, %v2271_v41  ;;  %v1630_v24 = vmax.f32 %v1501_v21, %v1566_v25  ;;  %v2964_v58 = vmax.f32 %v2836_v49, %v8686_v10  ;;  %v2000_v61 = vmax.f32 %v1855_v26, %v1903_v14 }
 0x23f   : > { %v2191_v22 = vmax.f32 %v1998_v63, %v2093_v44  ;;  %v2192_v43 = vmax.f32 %v1999_v47, %v2095_v1  ;;  %v2965_v18 = vmax.f32 %v2837_v28, %v8688_v7  ;;  %v3091_v5 = vmax.f32 %v2963_v13, %v8779_v30  ;;  %v4298_v1 = vld [vmem:[#allocation2 + $0x10] sm:$0xff]  ;;  %v8946_v28 = vld [vmem:[#allocation2 + $0x40] sm:$0xff] }
 0x240   : > { %v2096_v45 = vrot.slane %v1630_v24, 3  ;;  %v2273_v57 = vrot.slane %v1630_v24, 4  ;;  %v3092_v55 = vmax.f32 %v2964_v58, %v8782_v62  ;;  %v2838_v34 = vmax.f32 %v2710_v3, %v8894_v60  ;;  %v8948_v24 = vld [vmem:[#allocation2 + $0x38] sm:$0xff] }
 0x241   : > { %v2368_v10 = vmax.f32 %v2191_v22, %v2270_v11  ;;  %v2369_v37 = vmax.f32 %v2192_v43, %v2272_v20  ;;  %v3093_v31 = vmax.f32 %v2965_v18, %v8788_v36  ;;  %v3219_v52 = vmax.f32 %v3091_v5, %v8897_v54  ;;  %v8934_v11 = vld [vmem:[#allocation2 + $0x28] sm:$0xff]  ;;  %v4299_v20 = vld [vmem:[#allocation2 + $0x18] sm:$0xff]  ;;  %v8957_v18 = vld [vmem:[#allocation2 + $0x50] sm:$0xff] }
 0x242   : > { %v2097_v7 = vsel %vm2017_vm4, %v2094_v19, %v2096_v45  ;;  %v2274_v53 = vsel %vm2194_vm5, %v2271_v41, %v2273_v57  ;;  %v8911_v6 = vmax.f32 %v3092_v55, %v8899_v16  ;;  %v4297_v19 = vld [vmem:[#allocation2 + $0x8] sm:$0xff]  ;;  %v8936_v41 = vld [vmem:[#allocation2 + $0x30] sm:$0xff]  ;;  %v2966_v26 = vmax.f32 %v2838_v34, %v8713_v35  ;;  %v8951_v3 = vld [vmem:[#allocation2 + $0x178] sm:$0xff] }
 0x243   : > { %v2495_v27 = vrot.slane %v2368_v10, 6  ;;  %v2496_v40 = vrot.slane %v2369_v37, 6  ;;  %2676 = vst.msk [vmem:[#allocation2 + $0x222] sm:$0xc0] %vm2629_vm6, %v2368_v10  ;;  %v2193_v15 = vmax.f32 %v2000_v61, %v2097_v7  ;;  %v8916_v38 = vmax.f32 %v3093_v31, %v8903_v4  ;;  %v8955_v61 = vld [vmem:[#allocation2 + $0x48] sm:$0xff]  ;;  %v8963_v55 = vld [vmem:[#allocation2 + $0x60] sm:$0xff] }
 0x244   : > { %2677 = vst.msk [vmem:[#allocation2 + $0x22a] sm:$0xff] %vm937_vm1, %v2369_v37  ;;  %v3338_v2 = vrot.slane %v3219_v52, 1  ;;  %v3339_v49 = vrot.slane %v8911_v6, 1  ;;  %v3500_v56 = vrot.slane %v8911_v6, 2  ;;  %v3674_v0 = vrot.slane %v8911_v6, 3  ;;  %v8965_v10 = vld [vmem:[#allocation2 + $0x58] sm:$0xff] }
 0x245   : > { %v2497_v39 = vsel %vm2419_vm7, %v2495_v27, %v2496_v40  ;;  %v2370_v42 = vmax.f32 %v2193_v15, %v2274_v53  ;;  %v3341_v23 = vrot.slane %v8916_v38, 1  ;;  %v3501_v51 = vrot.slane %v8916_v38, 2  ;;  %v8967_v37 = vld [vmem:[#allocation2 + $0x120] sm:$0xff]  ;;  %v8970_v53 = vld [vmem:[#allocation2 + $0x68] sm:$0xff] }
 0x246   : > { %2560 = vrot.lane.b32.xlu0 %v2497_v39, %s7240_s15  ;;  %v3340_v14 = vsel %vm1679_vm2, %v3338_v2, %v3339_v49  ;;  %v3675_v44 = vrot.slane %v8916_v38, 3  ;;  %v3850_v50 = vrot.slane %v8911_v6, 4  ;;  %v3851_v33 = vrot.slane %v8916_v38, 4  ;;  %v8976_v2 = vld [vmem:[#allocation2 + $0x70] sm:$0xff] }
 0x247   : > { %v2498_v8 = vrot.slane %v2370_v42, 6  ;;  %2678 = vst.msk [vmem:[#allocation2 + $0x232] sm:$0x3f] %vm2632_vm8, %v2370_v42  ;;  %v3342_v29 = vsel %vm1679_vm2, %v3339_v49, %v3341_v23  ;;  %v3452_v59 = vmax.f32 %v3219_v52, %v3340_v14  ;;  %v3502_v25 = vsel %vm1856_vm3, %v3500_v56, %v3501_v51  ;;  %v8978_v49 = vld [vmem:[#allocation2 + $0x80] sm:$0xff] }
 0x248   : > { %v3453_v21 = vmax.f32 %v8911_v6, %v3342_v29  ;;  %v3676_v63 = vsel %vm2017_vm4, %v3674_v0, %v3675_v44  ;;  %v3852_v47 = vsel %vm2194_vm5, %v3850_v50, %v3851_v33  ;;  %v3454_v22 = vmax.f32 %v8916_v38, %v3341_v23  ;;  %v8985_v23 = vld [vmem:[#allocation2 + $0x88] sm:$0xff] }
 0x249   : > { %v2499_v13 = vsel %vm2419_vm7, %v2496_v40, %v2498_v8  ;;  %v3596_v58 = vmax.f32 %v3452_v59, %v3500_v56  ;;  %v4424_v43 = vmax.f32 %v4296_v12, %v8929_v46  ;;  %v3094_v45 = vmax.f32 %v2966_v26, %v8790_v32  ;;  %v8980_v56 = vld [vmem:[#allocation2 + $0x78] sm:$0xff]  ;;  %v8991_v59 = vld [vmem:[#allocation2 + $0x90] sm:$0xff] }
 0x24a   : > { %2562 = vrot.lane.b32.xlu1 %v2499_v13, %s7240_s15  ;;  %v3597_v35 = vmax.f32 %v3453_v21, %v3502_v25  ;;  %v4425_v57 = vmax.f32 %v4297_v19, %v8934_v11  ;;  %v4426_v5 = vmax.f32 %v4298_v1, %v8936_v41  ;;  %v3598_v34 = vmax.f32 %v3454_v22, %v3501_v51  ;;  %v8993_v25 = vld [vmem:[#allocation2 + $0x98] sm:$0xff]  ;;  %v8995_v1 = vld [vmem:[#allocation2 + $0x128] sm:$0xff] }
 0x24b   : > { %v3788_v31 = vmax.f32 %v3596_v58, %v3674_v0  ;;  %v4552_v7 = vmax.f32 %v4424_v43, %v8946_v28  ;;  %v4427_v52 = vmax.f32 %v4299_v20, %v8948_v24  ;;  %v3222_v27 = vmax.f32 %v3094_v45, %v8951_v3  ;;  %v8982_v0 = vpop.permute.xlu0 %2500  ;;  %10555 = vst [vmem:[#allocation5_spill] sm:$0xff] %v8993_v25  ;;  %v9000_v20 = vld [vmem:[#allocation2 + $0x130] sm:$0xff] }
 0x24c   : > { %v3789_v6 = vmax.f32 %v3597_v35, %v3676_v63  ;;  %v4553_v40 = vmax.f32 %v4425_v57, %v8955_v61  ;;  %v4554_v15 = vmax.f32 %v4426_v5, %v8957_v18  ;;  %v2839_v14 = vmax.f32 %v8865_v48, %v8967_v37  ;;  %2597 = vst.msk [vmem:[#allocation3] sm:$0xff] %vm2596_vm9, %v8982_v0  ;;  %v9238_v0 = vld [vmem:[#allocation2 + $0xc8] sm:$0xff] }
 0x24d   : > { %v3964_v39 = vmax.f32 %v3788_v31, %v3850_v50  ;;  %v4680_v42 = vmax.f32 %v4552_v7, %v8963_v55  ;;  %v4555_v51 = vmax.f32 %v4427_v52, %v8965_v10  ;;  %v3677_v19 = vrot.slane %v3222_v27, 3 }
 0x24e   : > { %v3965_v12 = vmax.f32 %v3789_v6, %v3852_v47  ;;  %v3853_v8 = vrot.slane %v3222_v27, 4  ;;  %v4681_v29 = vmax.f32 %v4553_v40, %v8970_v53  ;;  %v4682_v21 = vmax.f32 %v4554_v15, %v8976_v2 }
 0x24f   : > { %v4074_v50 = vrot.slane %v3964_v39, 6  ;;  %v4808_v63 = vmax.f32 %v4680_v42, %v8978_v49  ;;  %v4683_v26 = vmax.f32 %v4555_v51, %v8980_v56  ;;  %4269 = vst.msk [vmem:[#allocation2 + $0x122] sm:$0xc0] %vm2629_vm6, %v3964_v39  ;;  %v3678_v47 = vsel %vm2017_vm4, %v3675_v44, %v3677_v19  ;;  %v9014_v44 = vpop.permute.xlu0 %2502 }
 0x250   : > { %v4075_v48 = vrot.slane %v3965_v12, 6  ;;  %v3854_v13 = vsel %vm2194_vm5, %v3851_v33, %v3853_v8  ;;  %v4809_v58 = vmax.f32 %v4681_v29, %v8985_v23  ;;  %4270 = vst.msk [vmem:[#allocation2 + $0x12a] sm:$0xff] %vm937_vm1, %v3965_v12  ;;  %v3790_v22 = vmax.f32 %v3598_v34, %v3678_v47 }
 0x251   : > { %v4810_v43 = vmax.f32 %v4682_v21, %v8991_v59  ;;  %v4920_v35 = vrot.slane %v4808_v63, 1  ;;  %v4811_v45 = vmax.f32 %v4683_v26, %v8993_v25  ;;  %v9023_v21 = vld [vmem:[#allocation2 + $0x138] sm:$0xff]  ;;  %2598 = vst.msk [vmem:[#allocation3 + $0x8] sm:$0xff] %vm2596_vm9, %v9014_v44  ;;  %v4435_v44 = vmax.f32 %v8965_v10, %v8980_v56 }
 0x252   : > { %v4076_v57 = vsel %vm2419_vm7, %v4074_v50, %v4075_v48  ;;  %v4921_v5 = vrot.slane %v4809_v58, 1  ;;  %v5096_v31 = vrot.slane %v4809_v58, 2  ;;  %v5256_v7 = vrot.slane %v4809_v58, 3 }
 0x253   : > { %4147 = vrot.lane.b32.xlu0 %v4076_v57, %s7241_s16  ;;  %v3966_v38 = vmax.f32 %v3790_v22, %v3854_v13  ;;  %v4923_v33 = vrot.slane %v4810_v43, 1  ;;  %v5097_v52 = vrot.slane %v4810_v43, 2  ;;  %v5257_v6 = vrot.slane %v4810_v43, 3 }
 0x254   : > { %v4922_v34 = vsel %vm1679_vm2, %v4920_v35, %v4921_v5  ;;  %v5432_v27 = vrot.slane %v4809_v58, 4  ;;  %v5433_v40 = vrot.slane %v4810_v43, 4  ;;  %v5259_v15 = vrot.slane %v4811_v45, 3 }
 0x255   : > { %v4077_v39 = vrot.slane %v3966_v38, 6  ;;  %v4924_v42 = vsel %vm1679_vm2, %v4921_v5, %v4923_v33  ;;  %v5048_v51 = vmax.f32 %v4808_v63, %v4922_v34  ;;  %v5098_v12 = vsel %vm1856_vm3, %v5096_v31, %v5097_v52  ;;  %4271 = vst.msk [vmem:[#allocation2 + $0x132] sm:$0x3f] %vm2632_vm8, %v3966_v38  ;;  %v9032_v5 = vpop.permute.xlu1 %2506  ;;  %v9042_v34 = vld [vmem:[#allocation2 + $0x180] sm:$0xff] }
 0x256   : > { %v5049_v19 = vmax.f32 %v4809_v58, %v4924_v42  ;;  %v5258_v8 = vsel %vm2017_vm4, %v5256_v7, %v5257_v6  ;;  %v5434_v29 = vsel %vm2194_vm5, %v5432_v27, %v5433_v40  ;;  %v5050_v50 = vmax.f32 %v4810_v43, %v4923_v33  ;;  %v9034_v43 = vpop.permute.xlu0 %2504  ;;  %v9054_v42 = vld [vmem:[#allocation2 + $0x198] sm:$0xff]  ;;  %2600 = vst.msk [vmem:[#allocation3 + $0x18] sm:$0xff] %vm2596_vm9, %v9032_v5 }
 0x257   : > { %v4078_v26 = vsel %vm2419_vm7, %v4075_v48, %v4077_v39  ;;  %v5192_v47 = vmax.f32 %v5048_v51, %v5096_v31  ;;  %v5260_v13 = vsel %vm2017_vm4, %v5257_v6, %v5259_v15  ;;  %v5435_v22 = vrot.slane %v4811_v45, 4  ;;  %v9045_v39 = vld [vmem:[#allocation2 + $0x188] sm:$0xff]  ;;  %2599 = vst.msk [vmem:[#allocation3 + $0x10] sm:$0xff] %vm2596_vm9, %v9034_v43 }
 0x258   : > { %4149 = vrot.lane.b32.xlu1 %v4078_v26, %s7241_s16  ;;  %v5193_v63 = vmax.f32 %v5049_v19, %v5098_v12  ;;  %v5194_v35 = vmax.f32 %v5050_v50, %v5097_v52  ;;  %v2840_v58 = vmax.f32 %v8839_v9, %v8995_v1  ;;  %v2841_v57 = vmax.f32 %v8844_v17, %v9000_v20 }
 0x259   : > { %v5384_v38 = vmax.f32 %v5192_v47, %v5256_v7  ;;  %v5436_v48 = vsel %vm2194_vm5, %v5433_v40, %v5435_v22  ;;  %v2967_v31 = vmax.f32 %v2839_v14, %v8779_v30  ;;  %v2842_v45 = vmax.f32 %v8894_v60, %v9023_v21  ;;  %v9047_v7 = vld [vmem:[#allocation2 + $0x190] sm:$0xff]  ;;  %v9062_v50 = vpop.permute.xlu1 %2510 }
 0x25a   : > { %v5385_v33 = vmax.f32 %v5193_v63, %v5258_v8  ;;  %v5386_v52 = vmax.f32 %v5194_v35, %v5260_v13  ;;  %v2968_v6 = vmax.f32 %v2840_v58, %v8782_v62  ;;  %v2969_v9 = vmax.f32 %v2841_v57, %v8788_v36  ;;  %v9064_v26 = vpop.permute.xlu0 %2508  ;;  %2602 = vst.msk [vmem:[#allocation3 + $0x28] sm:$0xff] %vm2596_vm9, %v9062_v50 }
 0x25b   : > { %v5560_v17 = vmax.f32 %v5384_v38, %v5432_v27  ;;  %v3095_v15 = vmax.f32 %v2967_v31, %v8897_v54  ;;  %v2970_v30 = vmax.f32 %v2842_v45, %v8790_v32  ;;  %v4428_v60 = vmax.f32 %v8929_v46, %v8946_v28  ;;  %2601 = vst.msk [vmem:[#allocation3 + $0x20] sm:$0xff] %vm2596_vm9, %v9064_v26 }
 0x25c   : > { %v5561_v14 = vmax.f32 %v5385_v33, %v5434_v29  ;;  %v5562_v40 = vmax.f32 %v5386_v52, %v5436_v48  ;;  %v3096_v62 = vmax.f32 %v2968_v6, %v8899_v16  ;;  %v3097_v36 = vmax.f32 %v2969_v9, %v8903_v4 }
 0x25d   : > { %v5656_v27 = vrot.slane %v5560_v17, 6  ;;  %v3223_v51 = vmax.f32 %v3095_v15, %v9042_v34  ;;  %v3098_v12 = vmax.f32 %v2970_v30, %v8951_v3  ;;  %v4429_v19 = vmax.f32 %v8934_v11, %v8955_v61 }
 0x25e   : > { %v5657_v32 = vrot.slane %v5561_v14, 6  ;;  %v5659_v8 = vrot.slane %v5562_v40, 6  ;;  %v3224_v46 = vmax.f32 %v3096_v62, %v9045_v39  ;;  %v3225_v29 = vmax.f32 %v3097_v36, %v9047_v7  ;;  %v9079_v36 = vpop.permute.xlu1 %2514 }
 0x25f   : > { %v3343_v47 = vrot.slane %v3223_v51, 1  ;;  %v3226_v13 = vmax.f32 %v3098_v12, %v9054_v42  ;;  %v4430_v22 = vmax.f32 %v8936_v41, %v8957_v18  ;;  %v4556_v63 = vmax.f32 %v4428_v60, %v8963_v55  ;;  %2604 = vst.msk [vmem:[#allocation3 + $0x38] sm:$0xff] %vm2596_vm9, %v9079_v36 }
 0x260   : > { %v5658_v11 = vsel %vm2419_vm7, %v5656_v27, %v5657_v32  ;;  %v5660_v35 = vsel %vm2419_vm7, %v5657_v32, %v5659_v8  ;;  %v3344_v58 = vrot.slane %v3224_v46, 1  ;;  %v3346_v57 = vrot.slane %v3225_v29, 1  ;;  %v9081_v27 = vpop.permute.xlu0 %2512 }
 0x261   : > { %5736 = vrot.lane.b32.xlu0 %v5658_v11, %s7242_s17  ;;  %5738 = vrot.lane.b32.xlu1 %v5660_v35, %s7242_s17  ;;  %v3503_v38 = vrot.slane %v3224_v46, 2  ;;  %v3504_v48 = vrot.slane %v3225_v29, 2  ;;  %v3679_v31 = vrot.slane %v3224_v46, 3  ;;  %v3680_v45 = vrot.slane %v3225_v29, 3  ;;  %2603 = vst.msk [vmem:[#allocation3 + $0x30] sm:$0xff] %vm2596_vm9, %v9081_v27  ;;  %v9245_v27 = vld [vmem:[#allocation2 + $0xd0] sm:$0xff] }
 0x262   : > { %v3345_v33 = vsel %vm1679_vm2, %v3343_v47, %v3344_v58  ;;  %v3347_v41 = vsel %vm1679_vm2, %v3344_v58, %v3346_v57  ;;  %v3855_v52 = vrot.slane %v3224_v46, 4  ;;  %v3856_v6 = vrot.slane %v3225_v29, 4  ;;  %v9087_v47 = vld [vmem:[#allocation2 + $0x140] sm:$0xff]  ;;  %v9092_v58 = vld [vmem:[#allocation2 + $0xa8] sm:$0xff] }
 0x263   : > { %v3455_v9 = vmax.f32 %v3223_v51, %v3345_v33  ;;  %v3456_v17 = vmax.f32 %v3224_v46, %v3347_v41  ;;  %v3505_v15 = vsel %vm1856_vm3, %v3503_v38, %v3504_v48  ;;  %v3681_v30 = vsel %vm2017_vm4, %v3679_v31, %v3680_v45  ;;  %v9085_v46 = vld [vmem:[#allocation2 + $0xa0] sm:$0xff]  ;;  %v9098_v41 = vld [vmem:[#allocation2 + $0x148] sm:$0xff] }
 0x264   : > { %v3857_v60 = vsel %vm2194_vm5, %v3855_v52, %v3856_v6  ;;  %v3457_v14 = vmax.f32 %v3225_v29, %v3346_v57  ;;  %v3682_v40 = vrot.slane %v3226_v13, 3  ;;  %v3858_v62 = vrot.slane %v3226_v13, 4  ;;  %v9094_v57 = vld [vmem:[#allocation2 + $0xb0] sm:$0xff]  ;;  %10556 = vst [vmem:[#allocation8_spill] sm:$0xff] %v9098_v41 }
 0x265   : > { %v3599_v12 = vmax.f32 %v3455_v9, %v3503_v38  ;;  %v3600_v32 = vmax.f32 %v3456_v17, %v3505_v15  ;;  %v4557_v8 = vmax.f32 %v4429_v19, %v8970_v53  ;;  %v4558_v51 = vmax.f32 %v4430_v22, %v8976_v2 }
 0x266   : > { %v3601_v11 = vmax.f32 %v3457_v14, %v3504_v48  ;;  %v3683_v35 = vsel %vm2017_vm4, %v3680_v45, %v3682_v40  ;;  %v3859_v29 = vsel %vm2194_vm5, %v3856_v6, %v3858_v62  ;;  %v4684_v13 = vmax.f32 %v4556_v63, %v8978_v49  ;;  %v9110_v62 = vld [vmem:[#allocation2 + $0x150] sm:$0xff] }
 0x267   : > { %v3791_v38 = vmax.f32 %v3599_v12, %v3679_v31  ;;  %v3792_v33 = vmax.f32 %v3600_v32, %v3681_v30  ;;  %v4685_v19 = vmax.f32 %v4557_v8, %v8985_v23  ;;  %v4686_v22 = vmax.f32 %v4558_v51, %v8991_v59  ;;  %10557 = vst [vmem:[#allocation6_spill] sm:$0xff] %v9110_v62  ;;  %v9116_v32 = vpop.permute.xlu0 %2516 }
 0x268   : > { %v3793_v9 = vmax.f32 %v3601_v11, %v3683_v35  ;;  %v4812_v48 = vmax.f32 %v4684_v13, %v9085_v46  ;;  %v4431_v45 = vmax.f32 %v8948_v24, %v8965_v10  ;;  %v2843_v63 = vmax.f32 %v8967_v37, %v9087_v47  ;;  %v9114_v24 = vpop.permute.xlu1 %2518  ;;  %2605 = vst.msk [vmem:[#allocation3 + $0x40] sm:$0xff] %vm2596_vm9, %v9116_v32  ;;  %v9252_v10 = vld [vmem:[#allocation2 + $0x170] sm:$0xff] }
 0x269   : > { %v3967_v6 = vmax.f32 %v3791_v38, %v3855_v52  ;;  %v3968_v17 = vmax.f32 %v3792_v33, %v3857_v60  ;;  %v4813_v31 = vmax.f32 %v4685_v19, %v9092_v58  ;;  %v9107_v15 = vmax.f32 %v4686_v22, %v9094_v57  ;;  %2606 = vst.msk [vmem:[#allocation3 + $0x48] sm:$0xff] %vm2596_vm9, %v9114_v24  ;;  %v9247_v24 = vld [vmem:[#allocation2 + $0x168] sm:$0xff] }
 0x26a   : > { %v3969_v30 = vmax.f32 %v3793_v9, %v3859_v29  ;;  %v4925_v14 = vrot.slane %v4812_v48, 1  ;;  %v4559_v40 = vmax.f32 %v4431_v45, %v8980_v56  ;;  %v2844_v12 = vmax.f32 %v8995_v1, %v9098_v41 }
 0x26b   : > { %v4079_v37 = vrot.slane %v3967_v6, 6  ;;  %v4080_v52 = vrot.slane %v3968_v17, 6  ;;  %v4926_v60 = vrot.slane %v4813_v31, 1  ;;  %v4928_v8 = vrot.slane %v9107_v15, 1  ;;  %4272 = vst.msk [vmem:[#allocation2 + $0x142] sm:$0xc0] %vm2629_vm6, %v3967_v6 }
 0x26c   : > { %4273 = vst.msk [vmem:[#allocation2 + $0x14a] sm:$0xff] %vm937_vm1, %v3968_v17  ;;  %v4082_v51 = vrot.slane %v3969_v30, 6  ;;  %v5099_v11 = vrot.slane %v4813_v31, 2  ;;  %v5100_v35 = vrot.slane %v9107_v15, 2  ;;  %v5261_v29 = vrot.slane %v4813_v31, 3  ;;  %v9130_v6 = vld [vmem:[#allocation2 + $0xb8] sm:$0xff] }
 0x26d   : > { %4274 = vst.msk [vmem:[#allocation2 + $0x152] sm:$0x3f] %vm2632_vm8, %v3969_v30  ;;  %v4081_v1 = vsel %vm2419_vm7, %v4079_v37, %v4080_v52  ;;  %v4927_v13 = vsel %vm1679_vm2, %v4925_v14, %v4926_v60  ;;  %v4929_v38 = vsel %vm1679_vm2, %v4926_v60, %v4928_v8  ;;  %v5262_v33 = vrot.slane %v9107_v15, 3 }
 0x26e   : > { %4151 = vrot.lane.b32.xlu0 %v4081_v1, %s7241_s16  ;;  %v4083_v19 = vsel %vm2419_vm7, %v4080_v52, %v4082_v51  ;;  %v5051_v22 = vmax.f32 %v4812_v48, %v4927_v13  ;;  %v5052_v9 = vmax.f32 %v4813_v31, %v4929_v38  ;;  %v5101_v45 = vsel %vm1856_vm3, %v5099_v11, %v5100_v35  ;;  %v9139_v52 = vpop.permute.xlu1 %2522  ;;  %v9141_v51 = vpop.permute.xlu0 %2520 }
 0x26f   : > { %4153 = vrot.lane.b32.xlu1 %v4083_v19, %s7241_s16  ;;  %v5263_v17 = vsel %vm2017_vm4, %v5261_v29, %v5262_v33  ;;  %v5437_v30 = vrot.slane %v4813_v31, 4  ;;  %v5438_v14 = vrot.slane %v9107_v15, 4  ;;  %v4687_v37 = vmax.f32 %v4559_v40, %v8993_v25  ;;  %v9147_v40 = vld [vmem:[#allocation2 + $0x158] sm:$0xff]  ;;  %2608 = vst.msk [vmem:[#allocation3 + $0x58] sm:$0xff] %vm2596_vm9, %v9139_v52  ;;  %2607 = vst.msk [vmem:[#allocation3 + $0x50] sm:$0xff] %vm2596_vm9, %v9141_v51 }
 0x270   : > { %v5195_v60 = vmax.f32 %v5051_v22, %v5099_v11  ;;  %v5196_v41 = vmax.f32 %v5052_v9, %v5101_v45  ;;  %v5053_v1 = vmax.f32 %v9107_v15, %v4928_v8  ;;  %v2845_v48 = vmax.f32 %v9000_v20, %v9110_v62  ;;  %v9150_v20 = vld [vmem:[#allocation2 + $0x1a0] sm:$0xff]  ;;  %v9152_v9 = vld [vmem:[#allocation2 + $0x1a8] sm:$0xff] }
 0x271   : > { %v5439_v13 = vsel %vm2194_vm5, %v5437_v30, %v5438_v14  ;;  %v4815_v38 = vmax.f32 %v4687_v37, %v9130_v6  ;;  %v2971_v31 = vmax.f32 %v2843_v63, %v8897_v54  ;;  %v2972_v19 = vmax.f32 %v2844_v12, %v8899_v16  ;;  %10558 = vst [vmem:[#allocation9_spill] sm:$0xff] %v9152_v9  ;;  %v9156_v63 = vld [vmem:[#allocation2 + $0x1b0] sm:$0xff] }
 0x272   : > { %v5387_v11 = vmax.f32 %v5195_v60, %v5261_v29  ;;  %v5388_v22 = vmax.f32 %v5196_v41, %v5263_v17  ;;  %v5197_v15 = vmax.f32 %v5053_v1, %v5100_v35  ;;  %v2973_v8 = vmax.f32 %v2845_v48, %v8903_v4  ;;  %10559 = vst [vmem:[#allocation10_spill] sm:$0xff] %v9156_v63 }
 0x273   : > { %v5264_v45 = vrot.slane %v4815_v38, 3  ;;  %v5440_v62 = vrot.slane %v4815_v38, 4  ;;  %v3099_v25 = vmax.f32 %v2971_v31, %v9042_v34  ;;  %v3100_v37 = vmax.f32 %v2972_v19, %v9045_v39  ;;  %v2525_v19 = vpop.permute.xlu0 %2524 }
 0x274   : > { %v5563_v12 = vmax.f32 %v5387_v11, %v5437_v30  ;;  %v5564_v16 = vmax.f32 %v5388_v22, %v5439_v13  ;;  %v3101_v29 = vmax.f32 %v2973_v8, %v9047_v7  ;;  %v2846_v41 = vmax.f32 %v9023_v21, %v9147_v40  ;;  %v2527_v13 = vpop.permute.xlu1 %2526  ;;  %2609 = vst.msk [vmem:[#allocation3 + $0x60] sm:$0xff] %vm2596_vm9, %v2525_v19 }
 0x275   : > { %v5265_v35 = vsel %vm2017_vm4, %v5262_v33, %v5264_v45  ;;  %v5441_v17 = vsel %vm2194_vm5, %v5438_v14, %v5440_v62  ;;  %v3227_v60 = vmax.f32 %v3099_v25, %v9150_v20  ;;  %v9165_v1 = vmax.f32 %v3100_v37, %v9152_v9  ;;  %v9192_v9 = vld [vmem:[#allocation2 + $0x1b8] sm:$0xff]  ;;  %2610 = vst.msk [vmem:[#allocation3 + $0x68] sm:$0xff] %vm2596_vm9, %v2527_v13  ;;  %v10560_v13 = vld [vmem:[#allocation5_spill] sm:$0xff] }
 0x276   : > { %v5661_v48 = vrot.slane %v5563_v12, 6  ;;  %v5662_v38 = vrot.slane %v5564_v16, 6  ;;  %v5389_v31 = vmax.f32 %v5197_v15, %v5265_v35  ;;  %v9168_v30 = vmax.f32 %v3101_v29, %v9156_v63 }
 0x277   : > { %v3348_v11 = vrot.slane %v3227_v60, 1  ;;  %v3349_v21 = vrot.slane %v9165_v1, 1  ;;  %v3506_v33 = vrot.slane %v9165_v1, 2  ;;  %v3684_v62 = vrot.slane %v9165_v1, 3 }
 0x278   : > { %v5663_v25 = vsel %vm2419_vm7, %v5661_v48, %v5662_v38  ;;  %v5565_v14 = vmax.f32 %v5389_v31, %v5441_v17  ;;  %v3351_v22 = vrot.slane %v9168_v30, 1  ;;  %v3507_v16 = vrot.slane %v9168_v30, 2 }
 0x279   : > { %5740 = vrot.lane.b32.xlu0 %v5663_v25, %s7242_s17  ;;  %v3350_v15 = vsel %vm1679_vm2, %v3348_v11, %v3349_v21  ;;  %v10501_v8 = vrot.slane %v9168_v30, 3  ;;  %v3860_v45 = vrot.slane %v9165_v1, 4  ;;  %v10502_v37 = vrot.slane %v9168_v30, 4 }
 0x27a   : > { %v5664_v12 = vrot.slane %v5565_v14, 6  ;;  %v3352_v29 = vsel %vm1679_vm2, %v3349_v21, %v3351_v22  ;;  %v3458_v35 = vmax.f32 %v3227_v60, %v3350_v15  ;;  %v3508_v17 = vsel %vm1856_vm3, %v3506_v33, %v3507_v16  ;;  %v2531_v21 = vpop.permute.xlu1 %2530  ;;  %v2529_v15 = vpop.permute.xlu0 %2528 }
 0x27b   : > { %v3459_v48 = vmax.f32 %v9165_v1, %v3352_v29  ;;  %v3686_v31 = vsel %vm2017_vm4, %v3684_v62, %v10501_v8  ;;  %v3862_v11 = vsel %vm2194_vm5, %v3860_v45, %v10502_v37  ;;  %v2974_v25 = vmax.f32 %v2846_v41, %v8951_v3  ;;  %2612 = vst.msk [vmem:[#allocation3 + $0x78] sm:$0xff] %vm2596_vm9, %v2531_v21 }
 0x27c   : > { %v5665_v63 = vsel %vm2419_vm7, %v5662_v38, %v5664_v12  ;;  %v3602_v14 = vmax.f32 %v3458_v35, %v3506_v33  ;;  %v3460_v60 = vmax.f32 %v9168_v30, %v3351_v22  ;;  %v4432_v1 = vmax.f32 %v8946_v28, %v8963_v55  ;;  %2611 = vst.msk [vmem:[#allocation3 + $0x70] sm:$0xff] %vm2596_vm9, %v2529_v15 }
 0x27d   : > { %5742 = vrot.lane.b32.xlu1 %v5665_v63, %s7242_s17  ;;  %v3603_v29 = vmax.f32 %v3459_v48, %v3508_v17  ;;  %v3102_v8 = vmax.f32 %v2974_v25, %v9054_v42  ;;  %v4433_v41 = vmax.f32 %v8955_v61, %v8970_v53  ;;  %v4434_v38 = vmax.f32 %v8957_v18, %v8976_v2  ;;  %v9207_v17 = vld [vmem:[#allocation2 + $0xc0] sm:$0xff]  ;;  %v9265_v25 = vld [vmem:[#allocation2 + $0xd8] sm:$0xff] }
 0x27e   : > { %v3794_v33 = vmax.f32 %v3602_v14, %v3684_v62  ;;  %v3604_v12 = vmax.f32 %v3460_v60, %v3507_v16  ;;  %v4560_v22 = vmax.f32 %v4432_v1, %v8978_v49  ;;  %v2847_v5 = vmax.f32 %v9087_v47, %v8897_v54 }
 0x27f   : > { %v3795_v35 = vmax.f32 %v3603_v29, %v3686_v31  ;;  %v3230_v28 = vmax.f32 %v3102_v8, %v9192_v9  ;;  %v4561_v37 = vmax.f32 %v4433_v41, %v8985_v23  ;;  %v4562_v63 = vmax.f32 %v4434_v38, %v8991_v59 }
 0x280   : > { %v3970_v61 = vmax.f32 %v3794_v33, %v3860_v45  ;;  %v4688_v18 = vmax.f32 %v4560_v22, %v9085_v46  ;;  %v4563_v19 = vmax.f32 %v4435_v44, %v10560_v13  ;;  %v10561_v47 = vrot.slane %v9168_v30, 3  ;;  %v9274_v44 = vpop.permute.xlu1 %4119 }
 0x281   : > { %v3971_v43 = vmax.f32 %v3795_v35, %v3862_v11  ;;  %v3687_v50 = vrot.slane %v3230_v28, 3  ;;  %v3863_v26 = vrot.slane %v3230_v28, 4  ;;  %v4689_v36 = vmax.f32 %v4561_v37, %v9092_v58  ;;  %v2533_v35 = vpop.permute.xlu0 %2532  ;;  %4216 = vst.msk [vmem:[#allocation3] sm:$0xff] %vm4215_vm10, %v9274_v44 }
 0x282   : > { %v4084_v32 = vrot.slane %v3970_v61, 6  ;;  %v4690_v52 = vmax.f32 %v4562_v63, %v9094_v57  ;;  %v4816_v51 = vmax.f32 %v4688_v18, %v9207_v17  ;;  %4275 = vst.msk [vmem:[#allocation2 + $0x162] sm:$0xc0] %vm2629_vm6, %v3970_v61  ;;  %v10562_v16 = vrot.slane %v9168_v30, 4 }
 0x283   : > { %v4085_v54 = vrot.slane %v3971_v43, 6  ;;  %v3688_v62 = vsel %vm2017_vm4, %v10561_v47, %v3687_v50  ;;  %v4817_v45 = vmax.f32 %v4689_v36, %v9238_v0  ;;  %4276 = vst.msk [vmem:[#allocation2 + $0x16a] sm:$0xff] %vm937_vm1, %v3971_v43  ;;  %v4691_v11 = vmax.f32 %v4563_v19, %v9130_v6 }
 0x284   : > { %v3864_v8 = vsel %vm2194_vm5, %v10562_v16, %v3863_v26  ;;  %v3796_v37 = vmax.f32 %v3604_v12, %v3688_v62  ;;  %v4818_v48 = vmax.f32 %v4690_v52, %v9245_v27  ;;  %v4930_v31 = vrot.slane %v4816_v51, 1  ;;  %2613 = vst.msk [vmem:[#allocation3 + $0x80] sm:$0xff] %vm2596_vm9, %v2533_v35  ;;  %v10563_v16 = vld [vmem:[#allocation4_spill] sm:$0xff]  ;;  %v9293_v35 = vld [vmem:[#allocation2 + $0x1c8] sm:$0xff] }
 0x285   : > { %v4086_v14 = vsel %vm2419_vm7, %v4084_v32, %v4085_v54  ;;  %v4931_v60 = vrot.slane %v4817_v45, 1  ;;  %v5102_v1 = vrot.slane %v4817_v45, 2  ;;  %v5266_v21 = vrot.slane %v4817_v45, 3 }
 0x286   : > { %4155 = vrot.lane.b32.xlu0 %v4086_v14, %s7241_s16  ;;  %v3972_v30 = vmax.f32 %v3796_v37, %v3864_v8  ;;  %v4933_v15 = vrot.slane %v4818_v48, 1  ;;  %v5103_v29 = vrot.slane %v4818_v48, 2  ;;  %v5267_v41 = vrot.slane %v4818_v48, 3  ;;  %v10564_v8 = vld [vmem:[#allocation8_spill] sm:$0xff] }
 0x287   : > { %v4932_v38 = vsel %vm1679_vm2, %v4930_v31, %v4931_v60  ;;  %v5442_v33 = vrot.slane %v4817_v45, 4  ;;  %v5443_v12 = vrot.slane %v4818_v48, 4  ;;  %v4819_v22 = vmax.f32 %v4691_v11, %v9265_v25  ;;  %v10565_v31 = vld [vmem:[#allocation6_spill] sm:$0xff] }
 0x288   : > { %v4087_v28 = vrot.slane %v3972_v30, 6  ;;  %v4934_v63 = vsel %vm1679_vm2, %v4931_v60, %v4933_v15  ;;  %v5054_v61 = vmax.f32 %v4816_v51, %v4932_v38  ;;  %v5104_v18 = vsel %vm1856_vm3, %v5102_v1, %v5103_v29  ;;  %4277 = vst.msk [vmem:[#allocation2 + $0x172] sm:$0x3f] %vm2632_vm8, %v3972_v30 }
 0x289   : > { %v5055_v43 = vmax.f32 %v4817_v45, %v4934_v63  ;;  %v5268_v50 = vsel %vm2017_vm4, %v5266_v21, %v5267_v41  ;;  %v5444_v26 = vsel %vm2194_vm5, %v5442_v33, %v5443_v12  ;;  %v5056_v36 = vmax.f32 %v4818_v48, %v4933_v15  ;;  %v10566_v63 = vld [vmem:[#allocation9_spill] sm:$0xff] }
 0x28a   : > { %v4088_v32 = vsel %vm2419_vm7, %v4085_v54, %v4087_v28  ;;  %v5198_v52 = vmax.f32 %v5054_v61, %v5102_v1  ;;  %v5269_v19 = vrot.slane %v4819_v22, 3  ;;  %v5445_v47 = vrot.slane %v4819_v22, 4 }
 0x28b   : > { %4157 = vrot.lane.b32.xlu1 %v4088_v32, %s7241_s16  ;;  %v5199_v51 = vmax.f32 %v5055_v43, %v5104_v18  ;;  %v5200_v62 = vmax.f32 %v5056_v36, %v5103_v29  ;;  %v2848_v37 = vmax.f32 %v10564_v8, %v10563_v16  ;;  %v2849_v45 = vmax.f32 %v10565_v31, %v8903_v4  ;;  %v9290_v29 = vld [vmem:[#allocation2 + $0x1c0] sm:$0xff]  ;;  %v9295_v4 = vld [vmem:[#allocation2 + $0x1d0] sm:$0xff] }
 0x28c   : > { %v5390_v11 = vmax.f32 %v5198_v52, %v5266_v21  ;;  %v5270_v14 = vsel %vm2017_vm4, %v5267_v41, %v5269_v19  ;;  %v5446_v48 = vsel %vm2194_vm5, %v5443_v12, %v5445_v47  ;;  %v2975_v54 = vmax.f32 %v2847_v5, %v9042_v34  ;;  %v9301_v41 = vpop.permute.xlu1 %4121  ;;  %v10567_v18 = vld [vmem:[#allocation10_spill] sm:$0xff] }
 0x28d   : > { %v5391_v60 = vmax.f32 %v5199_v51, %v5268_v50  ;;  %v5392_v1 = vmax.f32 %v5200_v62, %v5270_v14  ;;  %v2976_v30 = vmax.f32 %v2848_v37, %v9045_v39  ;;  %v2977_v15 = vmax.f32 %v2849_v45, %v9047_v7  ;;  %v9319_v45 = vld [vmem:[#allocation2 + $0x1d8] sm:$0xff]  ;;  %4217 = vst.msk [vmem:[#allocation3 + $0x8] sm:$0xff] %vm4215_vm10, %v9301_v41 }
 0x28e   : > { %v5566_v38 = vmax.f32 %v5390_v11, %v5442_v33  ;;  %v3103_v22 = vmax.f32 %v2975_v54, %v9150_v20  ;;  %v2850_v21 = vmax.f32 %v9147_v40, %v8951_v3  ;;  %v4436_v5 = vmax.f32 %v8963_v55, %v8978_v49 }
 0x28f   : > { %v5567_v12 = vmax.f32 %v5391_v60, %v5444_v26  ;;  %v5568_v28 = vmax.f32 %v5392_v1, %v5446_v48  ;;  %v3104_v61 = vmax.f32 %v2976_v30, %v10566_v63  ;;  %v3105_v33 = vmax.f32 %v2977_v15, %v10567_v18 }
 0x290   : > { %v5666_v43 = vrot.slane %v5566_v38, 6  ;;  %v3231_v50 = vmax.f32 %v3103_v22, %v9290_v29  ;;  %v2978_v36 = vmax.f32 %v2850_v21, %v9054_v42  ;;  %v4437_v32 = vmax.f32 %v8970_v53, %v8985_v23  ;;  %v2535_v11 = vpop.permute.xlu1 %2534 }
 0x291   : > { %v5667_v3 = vrot.slane %v5567_v12, 6  ;;  %v5669_v40 = vrot.slane %v5568_v28, 6  ;;  %v3232_v55 = vmax.f32 %v3104_v61, %v9293_v35  ;;  %v3233_v49 = vmax.f32 %v3105_v33, %v9295_v4  ;;  %2614 = vst.msk [vmem:[#allocation3 + $0x88] sm:$0xff] %vm2596_vm9, %v2535_v11 }
 0x292   : > { %v3353_v26 = vrot.slane %v3231_v50, 1  ;;  %v3106_v52 = vmax.f32 %v2978_v36, %v9192_v9  ;;  %v4438_v19 = vmax.f32 %v8976_v2, %v8991_v59  ;;  %v4564_v47 = vmax.f32 %v4436_v5, %v9085_v46  ;;  %v9329_v5 = vld [vmem:[#allocation2 + $0xe0] sm:$0xff] }
 0x293   : > { %v5668_v51 = vsel %vm2419_vm7, %v5666_v43, %v5667_v3  ;;  %v5670_v62 = vsel %vm2419_vm7, %v5667_v3, %v5669_v40  ;;  %v3354_v16 = vrot.slane %v3232_v55, 1  ;;  %v3356_v53 = vrot.slane %v3233_v49, 1  ;;  %v9333_v43 = vld [vmem:[#allocation2 + $0xe8] sm:$0xff] }
 0x294   : > { %5744 = vrot.lane.b32.xlu0 %v5668_v51, %s7242_s17  ;;  %5746 = vrot.lane.b32.xlu1 %v5670_v62, %s7242_s17  ;;  %v3509_v23 = vrot.slane %v3232_v55, 2  ;;  %v3510_v8 = vrot.slane %v3233_v49, 2  ;;  %v3689_v37 = vrot.slane %v3232_v55, 3  ;;  %v3690_v31 = vrot.slane %v3233_v49, 3 }
 0x295   : > { %v3355_v2 = vsel %vm1679_vm2, %v3353_v26, %v3354_v16  ;;  %v3357_v59 = vsel %vm1679_vm2, %v3354_v16, %v3356_v53  ;;  %v3865_v14 = vrot.slane %v3232_v55, 4  ;;  %v3866_v48 = vrot.slane %v3233_v49, 4 }
 0x296   : > { %v3461_v54 = vmax.f32 %v3231_v50, %v3355_v2  ;;  %v3462_v60 = vmax.f32 %v3232_v55, %v3357_v59  ;;  %v3511_v1 = vsel %vm1856_vm3, %v3509_v23, %v3510_v8  ;;  %v3691_v30 = vsel %vm2017_vm4, %v3689_v37, %v3690_v31  ;;  %v9336_v55 = vld [vmem:[#allocation2 + $0xf0] sm:$0xff] }
 0x297   : > { %v3867_v15 = vsel %vm2194_vm5, %v3865_v14, %v3866_v48  ;;  %v3234_v38 = vmax.f32 %v3106_v52, %v9319_v45  ;;  %v3463_v22 = vmax.f32 %v3233_v49, %v3356_v53  ;;  %v4565_v21 = vmax.f32 %v4437_v32, %v9092_v58  ;;  %v9338_v49 = vpop.permute.xlu0 %4123 }
 0x298   : > { %v3605_v12 = vmax.f32 %v3461_v54, %v3509_v23  ;;  %v3606_v28 = vmax.f32 %v3462_v60, %v3511_v1  ;;  %v4566_v61 = vmax.f32 %v4438_v19, %v9094_v57  ;;  %v4692_v33 = vmax.f32 %v4564_v47, %v9207_v17  ;;  %v9350_v60 = vld [vmem:[#allocation2 + $0x188] sm:$0xff]  ;;  %4218 = vst.msk [vmem:[#allocation3 + $0x10] sm:$0xff] %vm4215_vm10, %v9338_v49 }
 0x299   : > { %v3607_v50 = vmax.f32 %v3463_v22, %v3510_v8  ;;  %v3692_v36 = vrot.slane %v3234_v38, 3  ;;  %v3868_v3 = vrot.slane %v3234_v38, 4  ;;  %v4693_v40 = vmax.f32 %v4565_v21, %v9238_v0 }
 0x29a   : > { %v3797_v32 = vmax.f32 %v3605_v12, %v3689_v37  ;;  %v3798_v26 = vmax.f32 %v3606_v28, %v3691_v30  ;;  %v4694_v52 = vmax.f32 %v4566_v61, %v9245_v27  ;;  %v4820_v51 = vmax.f32 %v4692_v33, %v9329_v5  ;;  %v2723_v33 = vld [vmem:[#allocation2 + $0x160] sm:$0xff] }
 0x29b   : > { %v3693_v19 = vsel %vm2017_vm4, %v3690_v31, %v3692_v36  ;;  %v3869_v47 = vsel %vm2194_vm5, %v3866_v48, %v3868_v3  ;;  %v4821_v62 = vmax.f32 %v4693_v40, %v9333_v43  ;;  %v4439_v16 = vmax.f32 %v8980_v56, %v10560_v13  ;;  %v9352_v31 = vld [vmem:[#allocation2 + $0x190] sm:$0xff]  ;;  %v2537_v22 = vpop.permute.xlu0 %2536 }
 0x29c   : > { %v3973_v53 = vmax.f32 %v3797_v32, %v3865_v14  ;;  %v3974_v23 = vmax.f32 %v3798_v26, %v3867_v15  ;;  %v3799_v8 = vmax.f32 %v3607_v50, %v3693_v19  ;;  %v9348_v11 = vmax.f32 %v4694_v52, %v9336_v55  ;;  %2615 = vst.msk [vmem:[#allocation3 + $0x90] sm:$0xff] %vm2596_vm9, %v2537_v22  ;;  %v2726_v19 = vld [vmem:[#allocation2 + $0x178] sm:$0xff] }
 0x29d   : > { %v4935_v37 = vrot.slane %v4820_v51, 1  ;;  %v4936_v2 = vrot.slane %v4821_v62, 1  ;;  %v5105_v59 = vrot.slane %v4821_v62, 2  ;;  %v5271_v54 = vrot.slane %v4821_v62, 3 }
 0x29e   : > { %v4089_v48 = vrot.slane %v3973_v53, 6  ;;  %v4090_v1 = vrot.slane %v3974_v23, 6  ;;  %v3975_v30 = vmax.f32 %v3799_v8, %v3869_v47  ;;  %v4938_v38 = vrot.slane %v9348_v11, 1  ;;  %4278 = vst.msk [vmem:[#allocation2 + $0x182] sm:$0xc0] %vm2629_vm6, %v3973_v53 }
 0x29f   : > { %4279 = vst.msk [vmem:[#allocation2 + $0x18a] sm:$0xff] %vm937_vm1, %v3974_v23  ;;  %v4937_v56 = vsel %vm1679_vm2, %v4935_v37, %v4936_v2  ;;  %v5106_v13 = vrot.slane %v9348_v11, 2  ;;  %v5272_v14 = vrot.slane %v9348_v11, 3  ;;  %v5447_v15 = vrot.slane %v4821_v62, 4  ;;  %v9378_v37 = vld [vmem:[#allocation2 + $0x80] sm:$0xff] }
 0x2a0   : > { %v4091_v21 = vsel %vm2419_vm7, %v4089_v48, %v4090_v1  ;;  %v4092_v12 = vrot.slane %v3975_v30, 6  ;;  %v4939_v28 = vsel %vm1679_vm2, %v4936_v2, %v4938_v38  ;;  %v5057_v61 = vmax.f32 %v4820_v51, %v4937_v56  ;;  %4280 = vst.msk [vmem:[#allocation2 + $0x192] sm:$0x3f] %vm2632_vm8, %v3975_v30 }
 0x2a1   : > { %4159 = vrot.lane.b32.xlu0 %v4091_v21, %s7241_s16  ;;  %v5058_v50 = vmax.f32 %v4821_v62, %v4939_v28  ;;  %v5107_v36 = vsel %vm1856_vm3, %v5105_v59, %v5106_v13  ;;  %v5273_v3 = vsel %vm2017_vm4, %v5271_v54, %v5272_v14  ;;  %v5448_v40 = vrot.slane %v9348_v11, 4  ;;  %v9373_v62 = vld [vmem:[#allocation2 + $0xf8] sm:$0xff]  ;;  %v9396_v21 = vld [vmem:[#allocation2 + $0x1f0] sm:$0xff] }
 0x2a2   : > { %v4093_v32 = vsel %vm2419_vm7, %v4090_v1, %v4092_v12  ;;  %v5201_v26 = vmax.f32 %v5057_v61, %v5105_v59  ;;  %v4567_v52 = vmax.f32 %v4439_v16, %v9130_v6  ;;  %v5059_v51 = vmax.f32 %v9348_v11, %v4938_v38 }
 0x2a3   : > { %4161 = vrot.lane.b32.xlu1 %v4093_v32, %s7241_s16  ;;  %v5202_v47 = vmax.f32 %v5058_v50, %v5107_v36  ;;  %v5449_v53 = vsel %vm2194_vm5, %v5447_v15, %v5448_v40  ;;  %v2851_v23 = vmax.f32 %v2723_v33, %v9042_v34  ;;  %v2852_v8 = vmax.f32 %v9247_v24, %v9045_v39  ;;  %v9388_v24 = vld [vmem:[#allocation2 + $0x1e0] sm:$0xff]  ;;  %v4313_v32 = vld [vmem:[#allocation2 + $0x88] sm:$0xff] }
 0x2a4   : > { %v5393_v2 = vmax.f32 %v5201_v26, %v5271_v54  ;;  %v4695_v16 = vmax.f32 %v4567_v52, %v9265_v25  ;;  %v5203_v59 = vmax.f32 %v5059_v51, %v5106_v13  ;;  %v2853_v11 = vmax.f32 %v9252_v10, %v9047_v7  ;;  %v9390_v54 = vld [vmem:[#allocation2 + $0x1e8] sm:$0xff] }
 0x2a5   : > { %v5394_v48 = vmax.f32 %v5202_v47, %v5273_v3  ;;  %v2979_v1 = vmax.f32 %v2851_v23, %v9150_v20  ;;  %v2980_v30 = vmax.f32 %v2852_v8, %v10566_v63  ;;  %v2854_v38 = vmax.f32 %v2726_v19, %v9054_v42 }
 0x2a6   : > { %v5569_v34 = vmax.f32 %v5393_v2, %v5447_v15  ;;  %v4823_v56 = vmax.f32 %v4695_v16, %v9373_v62  ;;  %v2981_v39 = vmax.f32 %v2853_v11, %v10567_v18  ;;  %v4440_v13 = vmax.f32 %v9378_v37, %v9085_v46  ;;  %v9399_v15 = vpop.permute.xlu1 %4125 }
 0x2a7   : > { %v5570_v7 = vmax.f32 %v5394_v48, %v5449_v53  ;;  %v3107_v10 = vmax.f32 %v2979_v1, %v9290_v29  ;;  %v3108_v22 = vmax.f32 %v2980_v30, %v9293_v35  ;;  %v2982_v42 = vmax.f32 %v2854_v38, %v9192_v9  ;;  %v9411_v48 = vld [vmem:[#allocation2 + $0x1f8] sm:$0xff]  ;;  %4219 = vst.msk [vmem:[#allocation3 + $0x18] sm:$0xff] %vm4215_vm10, %v9399_v15 }
 0x2a8   : > { %v5671_v12 = vrot.slane %v5569_v34, 6  ;;  %v5274_v28 = vrot.slane %v4823_v56, 3  ;;  %v5450_v61 = vrot.slane %v4823_v56, 4  ;;  %v3109_v33 = vmax.f32 %v2981_v39, %v9295_v4 }
 0x2a9   : > { %v5672_v50 = vrot.slane %v5570_v7, 6  ;;  %v3235_v36 = vmax.f32 %v3107_v10, %v9388_v24  ;;  %v3236_v46 = vmax.f32 %v3108_v22, %v9390_v54  ;;  %v3110_v3 = vmax.f32 %v2982_v42, %v9319_v45  ;;  %v4314_v42 = vld [vmem:[#allocation2 + $0x90] sm:$0xff] }
 0x2aa   : > { %v5275_v26 = vsel %vm2017_vm4, %v5272_v14, %v5274_v28  ;;  %v5451_v52 = vsel %vm2194_vm5, %v5448_v40, %v5450_v61  ;;  %v3237_v51 = vmax.f32 %v3109_v33, %v9396_v21  ;;  %v4441_v19 = vmax.f32 %v4313_v32, %v9092_v58  ;;  %v2539_v38 = vpop.permute.xlu1 %2538 }
 0x2ab   : > { %v5673_v47 = vsel %vm2419_vm7, %v5671_v12, %v5672_v50  ;;  %v5395_v53 = vmax.f32 %v5203_v59, %v5275_v26  ;;  %v3358_v23 = vrot.slane %v3235_v36, 1  ;;  %v3359_v8 = vrot.slane %v3236_v46, 1  ;;  %2616 = vst.msk [vmem:[#allocation3 + $0x98] sm:$0xff] %vm2596_vm9, %v2539_v38 }
 0x2ac   : > { %5748 = vrot.lane.b32.xlu0 %v5673_v47, %s7242_s17  ;;  %v3361_v37 = vrot.slane %v3237_v51, 1  ;;  %v3512_v2 = vrot.slane %v3236_v46, 2  ;;  %v3513_v16 = vrot.slane %v3237_v51, 2  ;;  %v3694_v11 = vrot.slane %v3236_v46, 3 }
 0x2ad   : > { %v5571_v14 = vmax.f32 %v5395_v53, %v5451_v52  ;;  %v3360_v40 = vsel %vm1679_vm2, %v3358_v23, %v3359_v8  ;;  %v3695_v1 = vrot.slane %v3237_v51, 3  ;;  %v3870_v30 = vrot.slane %v3236_v46, 4  ;;  %v4315_v23 = vld [vmem:[#allocation2 + $0x98] sm:$0xff] }
 0x2ae   : > { %v3362_v58 = vsel %vm1679_vm2, %v3359_v8, %v3361_v37  ;;  %v3464_v34 = vmax.f32 %v3235_v36, %v3360_v40  ;;  %v3514_v59 = vsel %vm1856_vm3, %v3512_v2, %v3513_v16  ;;  %v3871_v56 = vrot.slane %v3237_v51, 4  ;;  %v2727_v8 = vld [vmem:[#allocation2 + $0x180] sm:$0xff] }
 0x2af   : > { %v5674_v39 = vrot.slane %v5571_v14, 6  ;;  %v3465_v7 = vmax.f32 %v3236_v46, %v3362_v58  ;;  %v3696_v10 = vsel %vm2017_vm4, %v3694_v11, %v3695_v1  ;;  %v3238_v22 = vmax.f32 %v3110_v3, %v9411_v48  ;;  %v9430_v14 = vld [vmem:[#allocation2 + $0x108] sm:$0xff] }
 0x2b0   : > { %v3608_v12 = vmax.f32 %v3464_v34, %v3512_v2  ;;  %v3872_v28 = vsel %vm2194_vm5, %v3870_v30, %v3871_v56  ;;  %v3466_v61 = vmax.f32 %v3237_v51, %v3361_v37  ;;  %v4442_v33 = vmax.f32 %v4314_v42, %v9094_v57  ;;  %v9428_v37 = vld [vmem:[#allocation2 + $0x100] sm:$0xff]  ;;  %v9441_v58 = vld [vmem:[#allocation2 + $0x1a8] sm:$0xff] }
 0x2b1   : > { %v5675_v36 = vsel %vm2419_vm7, %v5672_v50, %v5674_v39  ;;  %v3609_v32 = vmax.f32 %v3465_v7, %v3514_v59  ;;  %v3697_v26 = vrot.slane %v3238_v22, 3  ;;  %v3873_v52 = vrot.slane %v3238_v22, 4  ;;  %v9445_v39 = vld [vmem:[#allocation2 + $0x1b0] sm:$0xff] }
 0x2b2   : > { %5750 = vrot.lane.b32.xlu1 %v5675_v36, %s7242_s17  ;;  %v3800_v47 = vmax.f32 %v3608_v12, %v3694_v11  ;;  %v3610_v46 = vmax.f32 %v3466_v61, %v3513_v16  ;;  %v4568_v53 = vmax.f32 %v4440_v13, %v9207_v17  ;;  %v4569_v3 = vmax.f32 %v4441_v19, %v9238_v0  ;;  %v9434_v0 = vld [vmem:[#allocation2 + $0x110] sm:$0xff]  ;;  %v9436_v13 = vpop.permute.xlu0 %4127 }
 0x2b3   : > { %v3801_v2 = vmax.f32 %v3609_v32, %v3696_v10  ;;  %v3698_v51 = vsel %vm2017_vm4, %v3695_v1, %v3697_v26  ;;  %v3874_v57 = vsel %vm2194_vm5, %v3871_v56, %v3873_v52  ;;  %v4570_v50 = vmax.f32 %v4442_v33, %v9245_v27  ;;  %4220 = vst.msk [vmem:[#allocation3 + $0x20] sm:$0xff] %vm4215_vm10, %v9436_v13 }
 0x2b4   : > { %v3976_v40 = vmax.f32 %v3800_v47, %v3870_v30  ;;  %v3802_v11 = vmax.f32 %v3610_v46, %v3698_v51  ;;  %v4696_v16 = vmax.f32 %v4568_v53, %v9329_v5  ;;  %v4697_v17 = vmax.f32 %v4569_v3, %v9333_v43 }
 0x2b5   : > { %v3977_v19 = vmax.f32 %v3801_v2, %v3872_v28  ;;  %v4698_v1 = vmax.f32 %v4570_v50, %v9336_v55  ;;  %v4443_v38 = vmax.f32 %v4315_v23, %v9130_v6  ;;  %v2855_v27 = vmax.f32 %v2727_v8, %v9150_v20  ;;  %v9461_v23 = vld [vmem:[#allocation2 + $0x118] sm:$0xff] }
 0x2b6   : > { %v4094_v34 = vrot.slane %v3976_v40, 6  ;;  %v3978_v30 = vmax.f32 %v3802_v11, %v3874_v57  ;;  %v4824_v59 = vmax.f32 %v4696_v16, %v9428_v37  ;;  %v4825_v56 = vmax.f32 %v4697_v17, %v9430_v14  ;;  %4281 = vst.msk [vmem:[#allocation2 + $0x1a2] sm:$0xc0] %vm2629_vm6, %v3976_v40  ;;  %v2541_v52 = vpop.permute.xlu0 %2540  ;;  %v2730_v50 = vld [vmem:[#allocation2 + $0x198] sm:$0xff] }
 0x2b7   : > { %v4095_v7 = vrot.slane %v3977_v19, 6  ;;  %v4826_v10 = vmax.f32 %v4698_v1, %v9434_v0  ;;  %v4571_v22 = vmax.f32 %v4443_v38, %v9265_v25  ;;  %v2856_v6 = vmax.f32 %v9350_v60, %v10566_v63  ;;  %4282 = vst.msk [vmem:[#allocation2 + $0x1aa] sm:$0xff] %vm937_vm1, %v3977_v19 }
 0x2b8   : > { %v4097_v20 = vrot.slane %v3978_v30, 6  ;;  %v4940_v42 = vrot.slane %v4824_v59, 1  ;;  %v4941_v12 = vrot.slane %v4825_v56, 1  ;;  %v5108_v28 = vrot.slane %v4825_v56, 2  ;;  %4283 = vst.msk [vmem:[#allocation2 + $0x1b2] sm:$0x3f] %vm2632_vm8, %v3978_v30 }
 0x2b9   : > { %v4096_v61 = vsel %vm2419_vm7, %v4094_v34, %v4095_v7  ;;  %v4943_v33 = vrot.slane %v4826_v10, 1  ;;  %v5109_v36 = vrot.slane %v4826_v10, 2  ;;  %v5276_v32 = vrot.slane %v4825_v56, 3  ;;  %2617 = vst.msk [vmem:[#allocation3 + $0xa0] sm:$0xff] %vm2596_vm9, %v2541_v52  ;;  %v9472_v30 = vld [vmem:[#allocation2 + $0x200] sm:$0xff] }
 0x2ba   : > { %4163 = vrot.lane.b32.xlu0 %v4096_v61, %s7241_s16  ;;  %v4098_v25 = vsel %vm2419_vm7, %v4095_v7, %v4097_v20  ;;  %v4942_v26 = vsel %vm1679_vm2, %v4940_v42, %v4941_v12  ;;  %v5277_v63 = vrot.slane %v4826_v10, 3  ;;  %v5452_v60 = vrot.slane %v4825_v56, 4  ;;  %v9480_v42 = vld [vmem:[#allocation2 + $0x210] sm:$0xff] }
 0x2bb   : > { %4165 = vrot.lane.b32.xlu1 %v4098_v25, %s7241_s16  ;;  %v4944_v47 = vsel %vm1679_vm2, %v4941_v12, %v4943_v33  ;;  %v5060_v46 = vmax.f32 %v4824_v59, %v4942_v26  ;;  %v5110_v53 = vsel %vm1856_vm3, %v5108_v28, %v5109_v36  ;;  %v5453_v3 = vrot.slane %v4826_v10, 4  ;;  %v9482_v12 = vpop.permute.xlu1 %4129 }
 0x2bc   : > { %v5061_v8 = vmax.f32 %v4825_v56, %v4944_v47  ;;  %v5278_v2 = vsel %vm2017_vm4, %v5276_v32, %v5277_v63  ;;  %v4699_v51 = vmax.f32 %v4571_v22, %v9373_v62  ;;  %v5062_v57 = vmax.f32 %v4826_v10, %v4943_v33  ;;  %v9476_v10 = vld [vmem:[#allocation2 + $0x208] sm:$0xff]  ;;  %4221 = vst.msk [vmem:[#allocation3 + $0x28] sm:$0xff] %vm4215_vm10, %v9482_v12 }
 0x2bd   : > { %v5204_v40 = vmax.f32 %v5060_v46, %v5108_v28  ;;  %v5454_v11 = vsel %vm2194_vm5, %v5452_v60, %v5453_v3  ;;  %v2857_v16 = vmax.f32 %v9352_v31, %v10567_v18  ;;  %v2983_v17 = vmax.f32 %v2855_v27, %v9290_v29 }
 0x2be   : > { %v5205_v19 = vmax.f32 %v5061_v8, %v5110_v53  ;;  %v4827_v1 = vmax.f32 %v4699_v51, %v9461_v23  ;;  %v5206_v38 = vmax.f32 %v5062_v57, %v5109_v36  ;;  %v2984_v34 = vmax.f32 %v2856_v6, %v9293_v35 }
 0x2bf   : > { %v5396_v59 = vmax.f32 %v5204_v40, %v5276_v32  ;;  %v2985_v56 = vmax.f32 %v2857_v16, %v9295_v4  ;;  %v3111_v7 = vmax.f32 %v2983_v17, %v9388_v24  ;;  %v2858_v22 = vmax.f32 %v2730_v50, %v9192_v9  ;;  %v2731_v17 = vld [vmem:[#allocation2 + $0x1a0] sm:$0xff] }
 0x2c0   : > { %v5397_v18 = vmax.f32 %v5205_v19, %v5278_v2  ;;  %v5279_v31 = vrot.slane %v4827_v1, 3  ;;  %v5455_v27 = vrot.slane %v4827_v1, 4  ;;  %v3112_v20 = vmax.f32 %v2984_v34, %v9390_v54  ;;  %v2543_v19 = vpop.permute.xlu1 %2542 }
 0x2c1   : > { %v5572_v6 = vmax.f32 %v5396_v59, %v5452_v60  ;;  %v3113_v28 = vmax.f32 %v2985_v56, %v9396_v21  ;;  %v3239_v61 = vmax.f32 %v3111_v7, %v9472_v30  ;;  %v2986_v33 = vmax.f32 %v2858_v22, %v9319_v45  ;;  %v9496_v56 = vld [vmem:[#allocation2 + $0x218] sm:$0xff]  ;;  %2618 = vst.msk [vmem:[#allocation3 + $0xa8] sm:$0xff] %vm2596_vm9, %v2543_v19  ;;  %v9529_v19 = vld [vmem:[#allocation2 + $0x1c8] sm:$0xff] }
 0x2c2   : > { %v5573_v36 = vmax.f32 %v5397_v18, %v5454_v11  ;;  %v5280_v32 = vsel %vm2017_vm4, %v5277_v63, %v5279_v31  ;;  %v5456_v9 = vsel %vm2194_vm5, %v5453_v3, %v5455_v27  ;;  %v3240_v25 = vmax.f32 %v3112_v20, %v9476_v10  ;;  %v2734_v27 = vld [vmem:[#allocation2 + $0x1b8] sm:$0xff] }
 0x2c3   : > { %v5676_v26 = vrot.slane %v5572_v6, 6  ;;  %v5398_v52 = vmax.f32 %v5206_v38, %v5280_v32  ;;  %v3241_v47 = vmax.f32 %v3113_v28, %v9480_v42  ;;  %v3363_v46 = vrot.slane %v3239_v61, 1 }
 0x2c4   : > { %v5677_v53 = vrot.slane %v5573_v36, 6  ;;  %v3364_v60 = vrot.slane %v3240_v25, 1  ;;  %v3515_v8 = vrot.slane %v3240_v25, 2  ;;  %v3699_v2 = vrot.slane %v3240_v25, 3 }
 0x2c5   : > { %v5574_v51 = vmax.f32 %v5398_v52, %v5456_v9  ;;  %v3366_v57 = vrot.slane %v3241_v47, 1  ;;  %v3516_v50 = vrot.slane %v3241_v47, 2  ;;  %v3700_v40 = vrot.slane %v3241_v47, 3 }
 0x2c6   : > { %v5678_v11 = vsel %vm2419_vm7, %v5676_v26, %v5677_v53  ;;  %v3365_v63 = vsel %vm1679_vm2, %v3363_v46, %v3364_v60  ;;  %v3875_v3 = vrot.slane %v3240_v25, 4  ;;  %v3876_v16 = vrot.slane %v3241_v47, 4 }
 0x2c7   : > { %5752 = vrot.lane.b32.xlu0 %v5678_v11, %s7242_s17  ;;  %v5679_v1 = vrot.slane %v5574_v51, 6  ;;  %v3367_v38 = vsel %vm1679_vm2, %v3364_v60, %v3366_v57  ;;  %v3467_v34 = vmax.f32 %v3239_v61, %v3365_v63  ;;  %v3517_v59 = vsel %vm1856_vm3, %v3515_v8, %v3516_v50 }
 0x2c8   : > { %v3468_v7 = vmax.f32 %v3240_v25, %v3367_v38  ;;  %v3701_v22 = vsel %vm2017_vm4, %v3699_v2, %v3700_v40  ;;  %v3877_v18 = vsel %vm2194_vm5, %v3875_v3, %v3876_v16  ;;  %v3114_v31 = vmax.f32 %v2986_v33, %v9411_v48 }
 0x2c9   : > { %v5680_v20 = vsel %vm2419_vm7, %v5677_v53, %v5679_v1  ;;  %v3611_v6 = vmax.f32 %v3467_v34, %v3515_v8  ;;  %v3469_v28 = vmax.f32 %v3241_v47, %v3366_v57  ;;  %v2859_v61 = vmax.f32 %v2731_v17, %v9290_v29  ;;  %v9513_v8 = vld [vmem:[#allocation2 + $0x220] sm:$0xff]  ;;  %v9525_v17 = vld [vmem:[#allocation2 + $0x230] sm:$0xff]  ;;  %v9531_v1 = vpop.permute.xlu0 %4131 }
 0x2ca   : > { %5754 = vrot.lane.b32.xlu1 %v5680_v20, %s7242_s17  ;;  %v3612_v36 = vmax.f32 %v3468_v7, %v3517_v59  ;;  %v3242_v32 = vmax.f32 %v3114_v31, %v9496_v56  ;;  %v2860_v9 = vmax.f32 %v9441_v58, %v9293_v35  ;;  %v2861_v25 = vmax.f32 %v9445_v39, %v9295_v4  ;;  %v9517_v58 = vld [vmem:[#allocation2 + $0x228] sm:$0xff]  ;;  %v4316_v39 = vld [vmem:[#allocation2 + $0xa0] sm:$0xff] }
 0x2cb   : > { %v3803_v26 = vmax.f32 %v3611_v6, %v3699_v2  ;;  %v3613_v33 = vmax.f32 %v3469_v28, %v3516_v50  ;;  %v2987_v52 = vmax.f32 %v2859_v61, %v9388_v24  ;;  %v2862_v46 = vmax.f32 %v2734_v27, %v9319_v45  ;;  %v9520_v2 = vld [vmem:[#allocation2 + $0xc0] sm:$0xff]  ;;  %v4317_v31 = vld [vmem:[#allocation2 + $0xa8] sm:$0xff]  ;;  %v9543_v61 = vld [vmem:[#allocation2 + $0x238] sm:$0xff]  ;;  %4222 = vst.msk [vmem:[#allocation3 + $0x30] sm:$0xff] %vm4215_vm10, %v9531_v1 }
 0x2cc   : > { %v3804_v47 = vmax.f32 %v3612_v36, %v3701_v22  ;;  %v3702_v53 = vrot.slane %v3242_v32, 3  ;;  %v3878_v29 = vrot.slane %v3242_v32, 4  ;;  %v2988_v60 = vmax.f32 %v2860_v9, %v9390_v54  ;;  %v9535_v22 = vld [vmem:[#allocation2 + $0x1d0] sm:$0xff] }
 0x2cd   : > { %v3979_v51 = vmax.f32 %v3803_v26, %v3875_v3  ;;  %v2989_v57 = vmax.f32 %v2861_v25, %v9396_v21  ;;  %v3115_v35 = vmax.f32 %v2987_v52, %v9472_v30  ;;  %v2990_v4 = vmax.f32 %v2862_v46, %v9411_v48  ;;  %v9527_v3 = vld [vmem:[#allocation2 + $0xc8] sm:$0xff] }
 0x2ce   : > { %v3980_v45 = vmax.f32 %v3804_v47, %v3877_v18  ;;  %v3703_v50 = vsel %vm2017_vm4, %v3700_v40, %v3702_v53  ;;  %v3879_v11 = vsel %vm2194_vm5, %v3876_v16, %v3878_v29  ;;  %v3116_v63 = vmax.f32 %v2988_v60, %v9476_v10 }
 0x2cf   : > { %v4099_v38 = vrot.slane %v3979_v51, 6  ;;  %v3805_v34 = vmax.f32 %v3613_v33, %v3703_v50  ;;  %v3117_v59 = vmax.f32 %v2989_v57, %v9480_v42  ;;  %v3243_v7 = vmax.f32 %v3115_v35, %v9513_v8  ;;  %4284 = vst.msk [vmem:[#allocation2 + $0x1c2] sm:$0xc0] %vm2629_vm6, %v3979_v51  ;;  %v9551_v57 = vld [vmem:[#allocation2 + $0xd0] sm:$0xff]  ;;  %v2545_v35 = vpop.permute.xlu0 %2544 }
 0x2d0   : > { %v4100_v40 = vrot.slane %v3980_v45, 6  ;;  %v3244_v16 = vmax.f32 %v3116_v63, %v9517_v58  ;;  %v3118_v18 = vmax.f32 %v2990_v4, %v9496_v56  ;;  %v4444_v27 = vmax.f32 %v4316_v39, %v9520_v2  ;;  %4285 = vst.msk [vmem:[#allocation2 + $0x1ca] sm:$0xff] %vm937_vm1, %v3980_v45 }
 0x2d1   : > { %v3981_v20 = vmax.f32 %v3805_v34, %v3879_v11  ;;  %v3245_v6 = vmax.f32 %v3117_v59, %v9525_v17  ;;  %v3368_v28 = vrot.slane %v3243_v7, 1  ;;  %v4445_v36 = vmax.f32 %v4317_v31, %v9527_v3  ;;  %2619 = vst.msk [vmem:[#allocation3 + $0xb0] sm:$0xff] %vm2596_vm9, %v2545_v35  ;;  %v4318_v59 = vld [vmem:[#allocation2 + $0xb0] sm:$0xff] }
 0x2d2   : > { %v4101_v32 = vsel %vm2419_vm7, %v4099_v38, %v4100_v40  ;;  %v3369_v9 = vrot.slane %v3244_v16, 1  ;;  %v3518_v25 = vrot.slane %v3244_v16, 2  ;;  %v3704_v26 = vrot.slane %v3244_v16, 3 }
 0x2d3   : > { %4167 = vrot.lane.b32.xlu0 %v4101_v32, %s7241_s16  ;;  %v4102_v33 = vrot.slane %v3981_v20, 6  ;;  %v3371_v52 = vrot.slane %v3245_v6, 1  ;;  %v3519_v46 = vrot.slane %v3245_v6, 2  ;;  %v3705_v47 = vrot.slane %v3245_v6, 3  ;;  %4286 = vst.msk [vmem:[#allocation2 + $0x1d2] sm:$0x3f] %vm2632_vm8, %v3981_v20 }
 0x2d4   : > { %v3370_v53 = vsel %vm1679_vm2, %v3368_v28, %v3369_v9  ;;  %v3880_v29 = vrot.slane %v3244_v16, 4  ;;  %v3881_v60 = vrot.slane %v3245_v6, 4  ;;  %v3246_v51 = vmax.f32 %v3118_v18, %v9543_v61 }
 0x2d5   : > { %v4103_v4 = vsel %vm2419_vm7, %v4100_v40, %v4102_v33  ;;  %v3372_v39 = vsel %vm1679_vm2, %v3369_v9, %v3371_v52  ;;  %v3470_v45 = vmax.f32 %v3243_v7, %v3370_v53  ;;  %v3520_v50 = vsel %vm1856_vm3, %v3518_v25, %v3519_v46  ;;  %v4319_v33 = vld [vmem:[#allocation2 + $0xb8] sm:$0xff] }
 0x2d6   : > { %4169 = vrot.lane.b32.xlu1 %v4103_v4, %s7241_s16  ;;  %v3471_v11 = vmax.f32 %v3244_v16, %v3372_v39  ;;  %v3706_v63 = vsel %vm2017_vm4, %v3704_v26, %v3705_v47  ;;  %v3882_v38 = vsel %vm2194_vm5, %v3880_v29, %v3881_v60  ;;  %v3472_v34 = vmax.f32 %v3245_v6, %v3371_v52  ;;  %v9563_v53 = vld [vmem:[#allocation2 + $0xd8] sm:$0xff]  ;;  %v9565_v16 = vld [vmem:[#allocation2 + $0x1c0] sm:$0xff]  ;;  %v9572_v4 = vld [vmem:[#allocation2 + $0x128] sm:$0xff]  ;;  %v9578_v39 = vpop.permute.xlu1 %4133 }
 0x2d7   : > { %v3614_v18 = vmax.f32 %v3470_v45, %v3518_v25  ;;  %v3707_v31 = vrot.slane %v3246_v51, 3  ;;  %v3883_v20 = vrot.slane %v3246_v51, 4  ;;  %v4446_v40 = vmax.f32 %v4318_v59, %v9551_v57  ;;  %v9570_v51 = vld [vmem:[#allocation2 + $0x120] sm:$0xff]  ;;  %4223 = vst.msk [vmem:[#allocation3 + $0x38] sm:$0xff] %vm4215_vm10, %v9578_v39  ;;  %v9648_v39 = vld [vmem:[#allocation2 + $0x1d8] sm:$0xff] }
 0x2d8   : > { %v3615_v28 = vmax.f32 %v3471_v11, %v3520_v50  ;;  %v3616_v7 = vmax.f32 %v3472_v34, %v3519_v46  ;;  %v4572_v32 = vmax.f32 %v4444_v27, %v9329_v5  ;;  %v4573_v9 = vmax.f32 %v4445_v36, %v9333_v43  ;;  %v9576_v36 = vld [vmem:[#allocation2 + $0x130] sm:$0xff] }
 0x2d9   : > { %v3806_v35 = vmax.f32 %v3614_v18, %v3704_v26  ;;  %v3708_v6 = vsel %vm2017_vm4, %v3705_v47, %v3707_v31  ;;  %v3884_v25 = vsel %vm2194_vm5, %v3881_v60, %v3883_v20  ;;  %v4574_v52 = vmax.f32 %v4446_v40, %v9336_v55 }
 0x2da   : > { %v3807_v46 = vmax.f32 %v3615_v28, %v3706_v63  ;;  %v3808_v5 = vmax.f32 %v3616_v7, %v3708_v6  ;;  %v4700_v43 = vmax.f32 %v4572_v32, %v9428_v37  ;;  %v4701_v27 = vmax.f32 %v4573_v9, %v9430_v14  ;;  %v2547_v6 = vpop.permute.xlu1 %2546 }
 0x2db   : > { %v3982_v26 = vmax.f32 %v3806_v35, %v3880_v29  ;;  %v4702_v47 = vmax.f32 %v4574_v52, %v9434_v0  ;;  %v4447_v60 = vmax.f32 %v4319_v33, %v9563_v53  ;;  %v2863_v55 = vmax.f32 %v9565_v16, %v9388_v24  ;;  %2620 = vst.msk [vmem:[#allocation3 + $0xb8] sm:$0xff] %vm2596_vm9, %v2547_v6 }
 0x2dc   : > { %v3983_v45 = vmax.f32 %v3807_v46, %v3882_v38  ;;  %v3984_v50 = vmax.f32 %v3808_v5, %v3884_v25  ;;  %v4828_v11 = vmax.f32 %v4700_v43, %v9570_v51  ;;  %v4829_v63 = vmax.f32 %v4701_v27, %v9572_v4  ;;  %v9600_v43 = vld [vmem:[#allocation2 + $0x138] sm:$0xff] }
 0x2dd   : > { %v4104_v34 = vrot.slane %v3982_v26, 6  ;;  %v4830_v59 = vmax.f32 %v4702_v47, %v9576_v36  ;;  %v4575_v18 = vmax.f32 %v4447_v60, %v9373_v62  ;;  %v2864_v29 = vmax.f32 %v9529_v19, %v9390_v54  ;;  %4287 = vst.msk [vmem:[#allocation2 + $0x1e2] sm:$0xc0] %vm2629_vm6, %v3982_v26 }
 0x2de   : > { %v4105_v31 = vrot.slane %v3983_v45, 6  ;;  %v4107_v20 = vrot.slane %v3984_v50, 6  ;;  %v4945_v40 = vrot.slane %v4828_v11, 1  ;;  %v4946_v28 = vrot.slane %v4829_v63, 1  ;;  %4288 = vst.msk [vmem:[#allocation2 + $0x1ea] sm:$0xff] %vm937_vm1, %v3983_v45 }
 0x2df   : > { %4289 = vst.msk [vmem:[#allocation2 + $0x1f2] sm:$0x3f] %vm2632_vm8, %v3984_v50  ;;  %v4948_v38 = vrot.slane %v4830_v59, 1  ;;  %v5111_v7 = vrot.slane %v4829_v63, 2  ;;  %v5112_v32 = vrot.slane %v4830_v59, 2  ;;  %v5281_v9 = vrot.slane %v4829_v63, 3 }
 0x2e0   : > { %v4106_v33 = vsel %vm2419_vm7, %v4104_v34, %v4105_v31  ;;  %v4108_v62 = vsel %vm2419_vm7, %v4105_v31, %v4107_v20  ;;  %v4947_v19 = vsel %vm1679_vm2, %v4945_v40, %v4946_v28  ;;  %v5282_v35 = vrot.slane %v4830_v59, 3 }
 0x2e1   : > { %4171 = vrot.lane.b32.xlu0 %v4106_v33, %s7241_s16  ;;  %4173 = vrot.lane.b32.xlu1 %v4108_v62, %s7241_s16  ;;  %v4949_v25 = vsel %vm1679_vm2, %v4946_v28, %v4948_v38  ;;  %v5063_v52 = vmax.f32 %v4828_v11, %v4947_v19  ;;  %v5113_v46 = vsel %vm1856_vm3, %v5111_v7, %v5112_v32  ;;  %v5457_v5 = vrot.slane %v4829_v63, 4 }
 0x2e2   : > { %v5064_v27 = vmax.f32 %v4829_v63, %v4949_v25  ;;  %v5283_v26 = vsel %vm2017_vm4, %v5281_v9, %v5282_v35  ;;  %v5458_v47 = vrot.slane %v4830_v59, 4  ;;  %v4703_v60 = vmax.f32 %v4575_v18, %v9461_v23  ;;  %v9611_v63 = vld [vmem:[#allocation2 + $0x240] sm:$0xff]  ;;  %v9618_v25 = vld [vmem:[#allocation2 + $0x250] sm:$0xff] }
 0x2e3   : > { %v5207_v45 = vmax.f32 %v5063_v52, %v5111_v7  ;;  %v5065_v50 = vmax.f32 %v4830_v59, %v4948_v38  ;;  %v2865_v34 = vmax.f32 %v9535_v22, %v9396_v21  ;;  %v2991_v11 = vmax.f32 %v2863_v55, %v9472_v30  ;;  %v9615_v38 = vld [vmem:[#allocation2 + $0x248] sm:$0xff]  ;;  %v4136_v22 = vpop.permute.xlu0 %4135 }
 0x2e4   : > { %v5208_v31 = vmax.f32 %v5064_v27, %v5113_v46  ;;  %v5459_v20 = vsel %vm2194_vm5, %v5457_v5, %v5458_v47  ;;  %v4831_v40 = vmax.f32 %v4703_v60, %v9600_v43  ;;  %v2992_v28 = vmax.f32 %v2864_v29, %v9476_v10  ;;  %4224 = vst.msk [vmem:[#allocation3 + $0x40] sm:$0xff] %vm4215_vm10, %v4136_v22 }
 0x2e5   : > { %v5399_v33 = vmax.f32 %v5207_v45, %v5281_v9  ;;  %v5209_v62 = vmax.f32 %v5065_v50, %v5112_v32  ;;  %v2993_v18 = vmax.f32 %v2865_v34, %v9480_v42  ;;  %v3119_v59 = vmax.f32 %v2991_v11, %v9513_v8 }
 0x2e6   : > { %v5400_v7 = vmax.f32 %v5208_v31, %v5283_v26  ;;  %v5284_v55 = vrot.slane %v4831_v40, 3  ;;  %v5460_v19 = vrot.slane %v4831_v40, 4  ;;  %v3120_v6 = vmax.f32 %v2992_v28, %v9517_v58 }
 0x2e7   : > { %v5575_v52 = vmax.f32 %v5399_v33, %v5457_v5  ;;  %v3121_v29 = vmax.f32 %v2993_v18, %v9525_v17  ;;  %v3247_v9 = vmax.f32 %v3119_v59, %v9611_v63  ;;  %v2549_v40 = vpop.permute.xlu0 %2548 }
 0x2e8   : > { %v5576_v32 = vmax.f32 %v5400_v7, %v5459_v20  ;;  %v5285_v46 = vsel %vm2017_vm4, %v5282_v35, %v5284_v55  ;;  %v5461_v27 = vsel %vm2194_vm5, %v5458_v47, %v5460_v19  ;;  %v3248_v60 = vmax.f32 %v3120_v6, %v9615_v38  ;;  %v4138_v20 = vpop.permute.xlu1 %4137  ;;  %2621 = vst.msk [vmem:[#allocation3 + $0xc0] sm:$0xff] %vm2596_vm9, %v2549_v40 }
 0x2e9   : > { %v5681_v44 = vrot.slane %v5575_v52, 6  ;;  %v5401_v41 = vmax.f32 %v5209_v62, %v5285_v46  ;;  %v9643_v49 = vmax.f32 %v3121_v29, %v9618_v25  ;;  %v3373_v15 = vrot.slane %v3247_v9, 1  ;;  %4225 = vst.msk [vmem:[#allocation3 + $0x48] sm:$0xff] %vm4215_vm10, %v4138_v20 }
 0x2ea   : > { %v5682_v35 = vrot.slane %v5576_v32, 6  ;;  %v3374_v5 = vrot.slane %v3248_v60, 1  ;;  %v3521_v13 = vrot.slane %v3248_v60, 2  ;;  %v3709_v26 = vrot.slane %v3248_v60, 3 }
 0x2eb   : > { %v5577_v47 = vmax.f32 %v5401_v41, %v5461_v27  ;;  %v3376_v12 = vrot.slane %v9643_v49, 1  ;;  %v3522_v1 = vrot.slane %v9643_v49, 2  ;;  %v3710_v45 = vrot.slane %v9643_v49, 3  ;;  %v3186_v41 = vld [vmem:[#allocation2 + $0x258] sm:$0xff] }
 0x2ec   : > { %v5683_v50 = vsel %vm2419_vm7, %v5681_v44, %v5682_v35  ;;  %v3375_v34 = vsel %vm1679_vm2, %v3373_v15, %v3374_v5  ;;  %v3885_v11 = vrot.slane %v3248_v60, 4  ;;  %v3886_v31 = vrot.slane %v9643_v49, 4 }
 0x2ed   : > { %5756 = vrot.lane.b32.xlu0 %v5683_v50, %s7242_s17  ;;  %v5684_v28 = vrot.slane %v5577_v47, 6  ;;  %v3377_v33 = vsel %vm1679_vm2, %v3374_v5, %v3376_v12  ;;  %v3473_v62 = vmax.f32 %v3247_v9, %v3375_v34  ;;  %v3523_v18 = vsel %vm1856_vm3, %v3521_v13, %v3522_v1  ;;  %v9684_v47 = vld [vmem:[#allocation2 + $0xe8] sm:$0xff]  ;;  %v3189_v50 = vld [vmem:[#allocation2 + $0x270] sm:$0xff] }
 0x2ee   : > { %v3474_v59 = vmax.f32 %v3248_v60, %v3377_v33  ;;  %v3711_v22 = vsel %vm2017_vm4, %v3709_v26, %v3710_v45  ;;  %v3887_v7 = vsel %vm2194_vm5, %v3885_v11, %v3886_v31  ;;  %v2866_v55 = vmax.f32 %v9648_v39, %v9411_v48  ;;  %v9676_v60 = vld [vmem:[#allocation2 + $0xe0] sm:$0xff]  ;;  %v9692_v34 = vld [vmem:[#allocation2 + $0xf0] sm:$0xff] }
 0x2ef   : > { %v5685_v19 = vsel %vm2419_vm7, %v5682_v35, %v5684_v28  ;;  %v3617_v6 = vmax.f32 %v3473_v62, %v3521_v13  ;;  %v3475_v52 = vmax.f32 %v9643_v49, %v3376_v12  ;;  %v2867_v29 = vmax.f32 %v9388_v24, %v9472_v30 }
 0x2f0   : > { %5758 = vrot.lane.b32.xlu1 %v5685_v19, %s7242_s17  ;;  %v3618_v9 = vmax.f32 %v3474_v59, %v3523_v18  ;;  %v2994_v32 = vmax.f32 %v2866_v55, %v9496_v56  ;;  %v2868_v46 = vmax.f32 %v9390_v54, %v9476_v10  ;;  %v2869_v27 = vmax.f32 %v9396_v21, %v9480_v42  ;;  %v3187_v10 = vld [vmem:[#allocation2 + $0x260] sm:$0xff] }
 0x2f1   : > { %v3809_v44 = vmax.f32 %v3617_v6, %v3709_v26  ;;  %v3619_v15 = vmax.f32 %v3475_v52, %v3522_v1  ;;  %v2995_v35 = vmax.f32 %v2867_v29, %v9513_v8  ;;  %v2870_v24 = vmax.f32 %v9411_v48, %v9496_v56  ;;  %v3188_v26 = vld [vmem:[#allocation2 + $0x268] sm:$0xff] }
 0x2f2   : > { %v3810_v30 = vmax.f32 %v3618_v9, %v3711_v22  ;;  %v3122_v5 = vmax.f32 %v2994_v32, %v9543_v61  ;;  %v2996_v13 = vmax.f32 %v2868_v46, %v9517_v58  ;;  %v2997_v54 = vmax.f32 %v2869_v27, %v9525_v17  ;;  %v3190_v17 = vld [vmem:[#allocation2 + $0x278] sm:$0xff]  ;;  %v2551_v46 = vpop.permute.xlu1 %2550  ;;  %v4140_v27 = vpop.permute.xlu0 %4139 }
 0x2f3   : > { %v3985_v21 = vmax.f32 %v3809_v44, %v3885_v11  ;;  %v3123_v42 = vmax.f32 %v2995_v35, %v9611_v63  ;;  %v2998_v12 = vmax.f32 %v2870_v24, %v9543_v61  ;;  %v4448_v8 = vmax.f32 %v9520_v2, %v9676_v60  ;;  %2622 = vst.msk [vmem:[#allocation3 + $0xc8] sm:$0xff] %vm2596_vm9, %v2551_v46 }
 0x2f4   : > { %v3986_v48 = vmax.f32 %v3810_v30, %v3887_v7  ;;  %v3250_v56 = vmax.f32 %v3122_v5, %v3186_v41  ;;  %v3124_v1 = vmax.f32 %v2996_v13, %v9615_v38  ;;  %v3125_v58 = vmax.f32 %v2997_v54, %v9618_v25  ;;  %4226 = vst.msk [vmem:[#allocation3 + $0x50] sm:$0xff] %vm4215_vm10, %v4140_v27 }
 0x2f5   : > { %v4109_v20 = vrot.slane %v3985_v21, 6  ;;  %v3251_v11 = vmax.f32 %v3123_v42, %v3187_v10  ;;  %4290 = vst.msk [vmem:[#allocation2 + $0x202] sm:$0xc0] %vm2629_vm6, %v3985_v21  ;;  %v3126_v63 = vmax.f32 %v2998_v12, %v3186_v41  ;;  %v4449_v61 = vmax.f32 %v9527_v3, %v9684_v47  ;;  %v9717_v12 = vld [vmem:[#allocation2 + $0xf8] sm:$0xff] }
 0x2f6   : > { %v4110_v40 = vrot.slane %v3986_v48, 6  ;;  %v3712_v2 = vrot.slane %v3250_v56, 3  ;;  %v3888_v28 = vrot.slane %v3250_v56, 4  ;;  %v3252_v33 = vmax.f32 %v3124_v1, %v3188_v26  ;;  %4291 = vst.msk [vmem:[#allocation2 + $0x20a] sm:$0xff] %vm937_vm1, %v3986_v48  ;;  %v9719_v48 = vld [vmem:[#allocation2 + $0x100] sm:$0xff] }
 0x2f7   : > { %v3253_v38 = vmax.f32 %v3125_v58, %v3189_v50  ;;  %v3378_v25 = vrot.slane %v3251_v11, 1  ;;  %v3254_v62 = vmax.f32 %v3126_v63, %v3190_v17  ;;  %v4450_v18 = vmax.f32 %v9551_v57, %v9692_v34 }
 0x2f8   : > { %v4111_v59 = vsel %vm2419_vm7, %v4109_v20, %v4110_v40  ;;  %v3713_v22 = vsel %vm2017_vm4, %v3710_v45, %v3712_v2  ;;  %v3889_v3 = vsel %vm2194_vm5, %v3886_v31, %v3888_v28  ;;  %v3379_v7 = vrot.slane %v3252_v33, 1  ;;  %v9732_v28 = vld [vmem:[#allocation2 + $0x148] sm:$0xff] }
 0x2f9   : > { %4175 = vrot.lane.b32.xlu0 %v4111_v59, %s7241_s16  ;;  %v3811_v55 = vmax.f32 %v3619_v15, %v3713_v22  ;;  %v3381_v19 = vrot.slane %v3253_v38, 1  ;;  %v3524_v6 = vrot.slane %v3252_v33, 2  ;;  %v3525_v52 = vrot.slane %v3253_v38, 2 }
 0x2fa   : > { %v3380_v29 = vsel %vm1679_vm2, %v3378_v25, %v3379_v7  ;;  %v3714_v57 = vrot.slane %v3252_v33, 3  ;;  %v3715_v9 = vrot.slane %v3253_v38, 3  ;;  %v3890_v32 = vrot.slane %v3252_v33, 4 }
 0x2fb   : > { %v3987_v44 = vmax.f32 %v3811_v55, %v3889_v3  ;;  %v3382_v45 = vsel %vm1679_vm2, %v3379_v7, %v3381_v19  ;;  %v3476_v49 = vmax.f32 %v3251_v11, %v3380_v29  ;;  %v3526_v31 = vsel %vm1856_vm3, %v3524_v6, %v3525_v52 }
 0x2fc   : > { %v3477_v41 = vmax.f32 %v3252_v33, %v3382_v45  ;;  %v3716_v15 = vsel %vm2017_vm4, %v3714_v57, %v3715_v9  ;;  %v3891_v35 = vrot.slane %v3253_v38, 4  ;;  %v3478_v24 = vmax.f32 %v3253_v38, %v3381_v19  ;;  %v9734_v33 = vld [vmem:[#allocation2 + $0x150] sm:$0xff] }
 0x2fd   : > { %v4112_v30 = vrot.slane %v3987_v44, 6  ;;  %v3620_v5 = vmax.f32 %v3476_v49, %v3524_v6  ;;  %4292 = vst.msk [vmem:[#allocation2 + $0x212] sm:$0x3f] %vm2632_vm8, %v3987_v44  ;;  %v3717_v13 = vrot.slane %v3254_v62, 3  ;;  %v3893_v54 = vrot.slane %v3254_v62, 4  ;;  %v9761_v49 = vld [vmem:[#allocation2 + $0x158] sm:$0xff] }
 0x2fe   : > { %v3621_v10 = vmax.f32 %v3477_v41, %v3526_v31  ;;  %v3892_v21 = vsel %vm2194_vm5, %v3890_v32, %v3891_v35  ;;  %v3622_v42 = vmax.f32 %v3478_v24, %v3525_v52  ;;  %v4576_v26 = vmax.f32 %v4448_v8, %v9428_v37  ;;  %v9727_v37 = vld [vmem:[#allocation2 + $0x140] sm:$0xff]  ;;  %v9729_v8 = vld [vmem:[#allocation2 + $0x108] sm:$0xff]  ;;  %v4142_v31 = vpop.permute.xlu1 %4141 }
 0x2ff   : > { %v4113_v56 = vsel %vm2419_vm7, %v4110_v40, %v4112_v30  ;;  %v3812_v1 = vmax.f32 %v3620_v5, %v3714_v57  ;;  %v3718_v58 = vsel %vm2017_vm4, %v3715_v9, %v3717_v13  ;;  %v3894_v50 = vsel %vm2194_vm5, %v3891_v35, %v3893_v54  ;;  %4227 = vst.msk [vmem:[#allocation3 + $0x58] sm:$0xff] %vm4215_vm10, %v4142_v31 }
 0x300   : > { %4177 = vrot.lane.b32.xlu1 %v4113_v56, %s7241_s16  ;;  %v3813_v17 = vmax.f32 %v3621_v10, %v3716_v15  ;;  %v3814_v20 = vmax.f32 %v3622_v42, %v3718_v58  ;;  %v4577_v11 = vmax.f32 %v4449_v61, %v9430_v14  ;;  %v4578_v63 = vmax.f32 %v4450_v18, %v9434_v0  ;;  %v9742_v18 = vld [vmem:[#allocation2 + $0x110] sm:$0xff]  ;;  %v9772_v56 = vld [vmem:[#allocation2 + $0x160] sm:$0xff] }
 0x301   : > { %v3988_v2 = vmax.f32 %v3812_v1, %v3890_v32  ;;  %v4704_v40 = vmax.f32 %v4576_v26, %v9570_v51  ;;  %v4451_v38 = vmax.f32 %v9563_v53, %v9717_v12  ;;  %v4452_v25 = vmax.f32 %v9676_v60, %v9719_v48 }
 0x302   : > { %v3989_v14 = vmax.f32 %v3813_v17, %v3892_v21  ;;  %v3990_v61 = vmax.f32 %v3814_v20, %v3894_v50  ;;  %v4705_v0 = vmax.f32 %v4577_v11, %v9572_v4  ;;  %v4706_v62 = vmax.f32 %v4578_v63, %v9576_v36  ;;  %v9776_v20 = vld [vmem:[#allocation2 + $0x168] sm:$0xff]  ;;  %v9778_v11 = vld [vmem:[#allocation2 + $0x118] sm:$0xff]  ;;  %v2555_v63 = vpop.permute.xlu1 %2554 }
 0x303   : > { %v4114_v59 = vrot.slane %v3988_v2, 6  ;;  %4293 = vst.msk [vmem:[#allocation2 + $0x222] sm:$0xc0] %vm2629_vm6, %v3988_v2  ;;  %v4832_v22 = vmax.f32 %v4704_v40, %v9727_v37  ;;  %v4579_v3 = vmax.f32 %v4451_v38, %v9461_v23  ;;  %v4453_v53 = vmax.f32 %v9684_v47, %v9729_v8 }
 0x304   : > { %v4115_v7 = vrot.slane %v3989_v14, 6  ;;  %4294 = vst.msk [vmem:[#allocation2 + $0x22a] sm:$0xff] %vm937_vm1, %v3989_v14  ;;  %v4117_v60 = vrot.slane %v3990_v61, 6  ;;  %v4833_v55 = vmax.f32 %v4705_v0, %v9732_v28  ;;  %v4834_v19 = vmax.f32 %v4706_v62, %v9734_v33 }
 0x305   : > { %4295 = vst.msk [vmem:[#allocation2 + $0x232] sm:$0x3f] %vm2632_vm8, %v3990_v61  ;;  %v4950_v6 = vrot.slane %v4832_v22, 1  ;;  %v4707_v52 = vmax.f32 %v4579_v3, %v9600_v43  ;;  %v4454_v29 = vmax.f32 %v9692_v34, %v9742_v18  ;;  %v4580_v23 = vmax.f32 %v4452_v25, %v9570_v51  ;;  %v2553_v34 = vpop.permute.xlu0 %2552  ;;  %v9781_v61 = vld [vmem:[#allocation2 + $0x170] sm:$0xff] }
 0x306   : > { %v4116_v47 = vsel %vm2419_vm7, %v4114_v59, %v4115_v7  ;;  %v4118_v57 = vsel %vm2419_vm7, %v4115_v7, %v4117_v60  ;;  %v4951_v9 = vrot.slane %v4833_v55, 1  ;;  %v4953_v32 = vrot.slane %v4834_v19, 1  ;;  %2623 = vst.msk [vmem:[#allocation3 + $0xd0] sm:$0xff] %vm2596_vm9, %v2553_v34  ;;  %2624 = vst.msk [vmem:[#allocation3 + $0xd8] sm:$0xff] %vm2596_vm9, %v2555_v63 }
 0x307   : > { %4179 = vrot.lane.b32.xlu0 %v4116_v47, %s7241_s16  ;;  %4181 = vrot.lane.b32.xlu1 %v4118_v57, %s7241_s16  ;;  %v5114_v46 = vrot.slane %v4833_v55, 2  ;;  %v5115_v27 = vrot.slane %v4834_v19, 2  ;;  %v5286_v44 = vrot.slane %v4833_v55, 3  ;;  %v5287_v45 = vrot.slane %v4834_v19, 3 }
 0x308   : > { %v4952_v41 = vsel %vm1679_vm2, %v4950_v6, %v4951_v9  ;;  %v4954_v15 = vsel %vm1679_vm2, %v4951_v9, %v4953_v32  ;;  %v5462_v35 = vrot.slane %v4833_v55, 4  ;;  %v5463_v24 = vrot.slane %v4834_v19, 4 }
 0x309   : > { %v5066_v30 = vmax.f32 %v4832_v22, %v4952_v41  ;;  %v5067_v5 = vmax.f32 %v4833_v55, %v4954_v15  ;;  %v5116_v13 = vsel %vm1856_vm3, %v5114_v46, %v5115_v27  ;;  %v5288_v54 = vsel %vm2017_vm4, %v5286_v44, %v5287_v45  ;;  %v4144_v2 = vpop.permute.xlu0 %4143 }
 0x30a   : > { %v5464_v10 = vsel %vm2194_vm5, %v5462_v35, %v5463_v24  ;;  %v4835_v21 = vmax.f32 %v4707_v52, %v9761_v49  ;;  %v5068_v42 = vmax.f32 %v4834_v19, %v4953_v32  ;;  %v4581_v26 = vmax.f32 %v4453_v53, %v9572_v4  ;;  %4228 = vst.msk [vmem:[#allocation3 + $0x60] sm:$0xff] %vm4215_vm10, %v4144_v2  ;;  %v9814_v2 = vld [vmem:[#allocation2 + $0x178] sm:$0xff] }
 0x30b   : > { %v5210_v1 = vmax.f32 %v5066_v30, %v5114_v46  ;;  %v5211_v58 = vmax.f32 %v5067_v5, %v5116_v13  ;;  %v4582_v50 = vmax.f32 %v4454_v29, %v9576_v36  ;;  %v4708_v17 = vmax.f32 %v4580_v23, %v9727_v37  ;;  %v4146_v29 = vpop.permute.xlu1 %4145 }
 0x30c   : > { %v5212_v40 = vmax.f32 %v5068_v42, %v5115_v27  ;;  %v5289_v38 = vrot.slane %v4835_v21, 3  ;;  %v5465_v25 = vrot.slane %v4835_v21, 4  ;;  %v4709_v14 = vmax.f32 %v4581_v26, %v9732_v28  ;;  %4229 = vst.msk [vmem:[#allocation3 + $0x68] sm:$0xff] %vm4215_vm10, %v4146_v29 }
 0x30d   : > { %v5402_v0 = vmax.f32 %v5210_v1, %v5286_v44  ;;  %v5403_v62 = vmax.f32 %v5211_v58, %v5288_v54  ;;  %v4710_v59 = vmax.f32 %v4582_v50, %v9734_v33  ;;  %v4836_v22 = vmax.f32 %v4708_v17, %v9772_v56  ;;  %v2557_v23 = vpop.permute.xlu0 %2556 }
 0x30e   : > { %v5290_v3 = vsel %vm2017_vm4, %v5287_v45, %v5289_v38  ;;  %v5466_v53 = vsel %vm2194_vm5, %v5463_v24, %v5465_v25  ;;  %v4837_v7 = vmax.f32 %v4709_v14, %v9776_v20  ;;  %v4455_v60 = vmax.f32 %v9717_v12, %v9778_v11  ;;  %2625 = vst.msk [vmem:[#allocation3 + $0xe0] sm:$0xff] %vm2596_vm9, %v2557_v23  ;;  %v9839_v23 = vld [vmem:[#allocation2 + $0x190] sm:$0xff] }
 0x30f   : > { %v5578_v55 = vmax.f32 %v5402_v0, %v5462_v35  ;;  %v5579_v19 = vmax.f32 %v5403_v62, %v5464_v10  ;;  %v5404_v6 = vmax.f32 %v5212_v40, %v5290_v3  ;;  %v9793_v52 = vmax.f32 %v4710_v59, %v9781_v61  ;;  %v2559_v5 = vpop.permute.xlu1 %2558 }
 0x310   : > { %v4955_v47 = vrot.slane %v4836_v22, 1  ;;  %v4956_v57 = vrot.slane %v4837_v7, 1  ;;  %v5117_v9 = vrot.slane %v4837_v7, 2  ;;  %v5291_v32 = vrot.slane %v4837_v7, 3  ;;  %2626 = vst.msk [vmem:[#allocation3 + $0xe8] sm:$0xff] %vm2596_vm9, %v2559_v5 }
 0x311   : > { %v5686_v46 = vrot.slane %v5578_v55, 6  ;;  %v5687_v27 = vrot.slane %v5579_v19, 6  ;;  %v5580_v44 = vmax.f32 %v5404_v6, %v5466_v53  ;;  %v4958_v12 = vrot.slane %v9793_v52, 1  ;;  %v2561_v13 = vpop.permute.xlu0 %2560  ;;  %v9833_v19 = vld [vmem:[#allocation2 + $0x188] sm:$0xff] }
 0x312   : > { %v4957_v45 = vsel %vm1679_vm2, %v4955_v47, %v4956_v57  ;;  %v5118_v31 = vrot.slane %v9793_v52, 2  ;;  %v5292_v34 = vrot.slane %v9793_v52, 3  ;;  %v5467_v41 = vrot.slane %v4837_v7, 4  ;;  %2627 = vst.msk [vmem:[#allocation3 + $0xf0] sm:$0xff] %vm2596_vm9, %v2561_v13 }
 0x313   : > { %v5688_v15 = vsel %vm2419_vm7, %v5686_v46, %v5687_v27  ;;  %v5689_v35 = vrot.slane %v5580_v44, 6  ;;  %v4959_v24 = vsel %vm1679_vm2, %v4956_v57, %v4958_v12  ;;  %v5069_v30 = vmax.f32 %v4836_v22, %v4957_v45  ;;  %v2563_v59 = vpop.permute.xlu1 %2562 }
 0x314   : > { %5760 = vrot.lane.b32.xlu0 %v5688_v15, %s7242_s17  ;;  %v5070_v54 = vmax.f32 %v4837_v7, %v4959_v24  ;;  %v5119_v10 = vsel %vm1856_vm3, %v5117_v9, %v5118_v31  ;;  %v5293_v21 = vsel %vm2017_vm4, %v5291_v32, %v5292_v34  ;;  %v5468_v42 = vrot.slane %v9793_v52, 4  ;;  %2628 = vst.msk [vmem:[#allocation3 + $0xf8] sm:$0xff] %vm2596_vm9, %v2563_v59 }
 0x315   : > { %v5690_v26 = vsel %vm2419_vm7, %v5687_v27, %v5689_v35  ;;  %v5213_v1 = vmax.f32 %v5069_v30, %v5117_v9  ;;  %v4583_v58 = vmax.f32 %v4455_v60, %v9600_v43  ;;  %v5071_v50 = vmax.f32 %v9793_v52, %v4958_v12  ;;  %v4148_v22 = vpop.permute.xlu0 %4147 }
 0x316   : > { %5762 = vrot.lane.b32.xlu1 %v5690_v26, %s7242_s17  ;;  %v5214_v17 = vmax.f32 %v5070_v54, %v5119_v10  ;;  %v5469_v63 = vsel %vm2194_vm5, %v5467_v41, %v5468_v42  ;;  %v4456_v40 = vmax.f32 %v9719_v48, %v9570_v51  ;;  %v4457_v38 = vmax.f32 %v9729_v8, %v9572_v4 }
 0x317   : > { %v5405_v25 = vmax.f32 %v5213_v1, %v5291_v32  ;;  %v4711_v14 = vmax.f32 %v4583_v58, %v9761_v49  ;;  %v5215_v0 = vmax.f32 %v5071_v50, %v5118_v31  ;;  %v4458_v62 = vmax.f32 %v9742_v18, %v9576_v36  ;;  %4230 = vst.msk [vmem:[#allocation3 + $0x70] sm:$0xff] %vm4215_vm10, %v4148_v22  ;;  %v9831_v18 = vld [vmem:[#allocation2 + $0x180] sm:$0xff]  ;;  %v4150_v27 = vpop.permute.xlu1 %4149  ;;  %v9856_v58 = vld [vmem:[#allocation2 + $0x198] sm:$0xff] }
 0x318   : > { %v5406_v3 = vmax.f32 %v5214_v17, %v5293_v21  ;;  %v4584_v53 = vmax.f32 %v4456_v40, %v9727_v37  ;;  %v4585_v7 = vmax.f32 %v4457_v38, %v9732_v28  ;;  %v4459_v48 = vmax.f32 %v9778_v11, %v9600_v43  ;;  %4231 = vst.msk [vmem:[#allocation3 + $0x78] sm:$0xff] %vm4215_vm10, %v4150_v27 }
 0x319   : > { %v5581_v8 = vmax.f32 %v5405_v25, %v5467_v41  ;;  %v4839_v60 = vmax.f32 %v4711_v14, %v9814_v2  ;;  %v4586_v55 = vmax.f32 %v4458_v62, %v9734_v33  ;;  %v4460_v6 = vmax.f32 %v9570_v51, %v9727_v37  ;;  %v9843_v44 = vpop.permute.xlu0 %5736 }
 0x31a   : > { %v5582_v52 = vmax.f32 %v5406_v3, %v5469_v63  ;;  %v4712_v29 = vmax.f32 %v4584_v53, %v9772_v56  ;;  %v4713_v11 = vmax.f32 %v4585_v7, %v9776_v20  ;;  %v4587_v47 = vmax.f32 %v4459_v48, %v9761_v49  ;;  %5833 = vst.msk [vmem:[#allocation3] sm:$0xff] %vm5832_vm11, %v9843_v44 }
 0x31b   : > { %v5691_v57 = vrot.slane %v5581_v8, 6  ;;  %v5294_v9 = vrot.slane %v4839_v60, 3  ;;  %v5470_v32 = vrot.slane %v4839_v60, 4  ;;  %v4714_v46 = vmax.f32 %v4586_v55, %v9781_v61 }
 0x31c   : > { %v5692_v12 = vrot.slane %v5582_v52, 6  ;;  %v4840_v51 = vmax.f32 %v4712_v29, %v9831_v18  ;;  %v4841_v45 = vmax.f32 %v4713_v11, %v9833_v19  ;;  %v4715_v31 = vmax.f32 %v4587_v47, %v9814_v2 }
 0x31d   : > { %v5295_v41 = vsel %vm2017_vm4, %v5292_v34, %v5294_v9  ;;  %v5471_v15 = vsel %vm2194_vm5, %v5468_v42, %v5470_v32  ;;  %v4842_v35 = vmax.f32 %v4714_v46, %v9839_v23  ;;  %v4461_v24 = vmax.f32 %v9572_v4, %v9732_v28  ;;  %v9858_v34 = vpop.permute.xlu1 %5738  ;;  %v4152_v42 = vpop.permute.xlu0 %4151 }
 0x31e   : > { %v5693_v30 = vsel %vm2419_vm7, %v5691_v57, %v5692_v12  ;;  %v5407_v5 = vmax.f32 %v5215_v0, %v5295_v41  ;;  %v4960_v13 = vrot.slane %v4840_v51, 1  ;;  %v4961_v54 = vrot.slane %v4841_v45, 1  ;;  %4232 = vst.msk [vmem:[#allocation3 + $0x80] sm:$0xff] %vm4215_vm10, %v4152_v42 }
 0x31f   : > { %5764 = vrot.lane.b32.xlu0 %v5693_v30, %s7242_s17  ;;  %v4963_v10 = vrot.slane %v4842_v35, 1  ;;  %v5120_v21 = vrot.slane %v4841_v45, 2  ;;  %v5121_v26 = vrot.slane %v4842_v35, 2  ;;  %v5296_v1 = vrot.slane %v4841_v45, 3  ;;  %5834 = vst.msk [vmem:[#allocation3 + $0x8] sm:$0xff] %vm5832_vm11, %v9858_v34 }
 0x320   : > { %v5583_v50 = vmax.f32 %v5407_v5, %v5471_v15  ;;  %v4962_v17 = vsel %vm1679_vm2, %v4960_v13, %v4961_v54  ;;  %v5297_v4 = vrot.slane %v4842_v35, 3  ;;  %v5472_v63 = vrot.slane %v4841_v45, 4 }
 0x321   : > { %v4964_v40 = vsel %vm1679_vm2, %v4961_v54, %v4963_v10  ;;  %v5072_v38 = vmax.f32 %v4840_v51, %v4962_v17  ;;  %v5122_v25 = vsel %vm1856_vm3, %v5120_v21, %v5121_v26  ;;  %v5473_v14 = vrot.slane %v4842_v35, 4  ;;  %v4154_v8 = vpop.permute.xlu1 %4153  ;;  %v9869_v60 = vpop.permute.xlu0 %5740  ;;  %v9879_v51 = vld [vmem:[#allocation2 + $0x1a0] sm:$0xff] }
 0x322   : > { %v5694_v0 = vrot.slane %v5583_v50, 6  ;;  %v5073_v62 = vmax.f32 %v4841_v45, %v4964_v40  ;;  %v5298_v59 = vsel %vm2017_vm4, %v5296_v1, %v5297_v4  ;;  %v4843_v22 = vmax.f32 %v4715_v31, %v9856_v58  ;;  %4233 = vst.msk [vmem:[#allocation3 + $0x88] sm:$0xff] %vm4215_vm10, %v4154_v8  ;;  %v9881_v45 = vld [vmem:[#allocation2 + $0x1a8] sm:$0xff] }
 0x323   : > { %v5216_v3 = vmax.f32 %v5072_v38, %v5120_v21  ;;  %v5474_v53 = vsel %vm2194_vm5, %v5472_v63, %v5473_v14  ;;  %v5074_v7 = vmax.f32 %v4842_v35, %v4963_v10  ;;  %v4462_v48 = vmax.f32 %v9576_v36, %v9734_v33  ;;  %5835 = vst.msk [vmem:[#allocation3 + $0x10] sm:$0xff] %vm5832_vm11, %v9869_v60 }
 0x324   : > { %v5695_v55 = vsel %vm2419_vm7, %v5692_v12, %v5694_v0  ;;  %v5217_v52 = vmax.f32 %v5073_v62, %v5122_v25  ;;  %v5299_v29 = vrot.slane %v4843_v22, 3  ;;  %v5475_v11 = vrot.slane %v4843_v22, 4 }
 0x325   : > { %5766 = vrot.lane.b32.xlu1 %v5695_v55, %s7242_s17  ;;  %v5408_v47 = vmax.f32 %v5216_v3, %v5296_v1  ;;  %v5218_v57 = vmax.f32 %v5074_v7, %v5121_v26  ;;  %v4588_v9 = vmax.f32 %v4460_v6, %v9772_v56  ;;  %v4589_v32 = vmax.f32 %v4461_v24, %v9776_v20  ;;  %v9885_v6 = vld [vmem:[#allocation2 + $0x1b0] sm:$0xff]  ;;  %v9887_v24 = vpop.permute.xlu1 %5742  ;;  %v4156_v30 = vpop.permute.xlu0 %4155 }
 0x326   : > { %v5409_v46 = vmax.f32 %v5217_v52, %v5298_v59  ;;  %v5300_v36 = vsel %vm2017_vm4, %v5297_v4, %v5299_v29  ;;  %v5476_v27 = vsel %vm2194_vm5, %v5473_v14, %v5475_v11  ;;  %v4590_v12 = vmax.f32 %v4462_v48, %v9781_v61  ;;  %4234 = vst.msk [vmem:[#allocation3 + $0x90] sm:$0xff] %vm4215_vm10, %v4156_v30  ;;  %v9911_v29 = vld [vmem:[#allocation2 + $0x1b8] sm:$0xff] }
 0x327   : > { %v5584_v31 = vmax.f32 %v5408_v47, %v5472_v63  ;;  %v5410_v41 = vmax.f32 %v5218_v57, %v5300_v36  ;;  %v4716_v15 = vmax.f32 %v4588_v9, %v9831_v18  ;;  %v4717_v35 = vmax.f32 %v4589_v32, %v9833_v19  ;;  %5836 = vst.msk [vmem:[#allocation3 + $0x18] sm:$0xff] %vm5832_vm11, %v9887_v24 }
 0x328   : > { %v5585_v5 = vmax.f32 %v5409_v46, %v5474_v53  ;;  %v4718_v13 = vmax.f32 %v4590_v12, %v9839_v23  ;;  %v4463_v54 = vmax.f32 %v9600_v43, %v9761_v49  ;;  %v4464_v10 = vmax.f32 %v9727_v37, %v9772_v56 }
 0x329   : > { %v5696_v21 = vrot.slane %v5584_v31, 6  ;;  %v5586_v26 = vmax.f32 %v5410_v41, %v5476_v27  ;;  %v4844_v1 = vmax.f32 %v4716_v15, %v9879_v51  ;;  %v4845_v42 = vmax.f32 %v4717_v35, %v9881_v45  ;;  %v4158_v25 = vpop.permute.xlu1 %4157  ;;  %v9901_v14 = vpop.permute.xlu0 %5744 }
 0x32a   : > { %v5697_v50 = vrot.slane %v5585_v5, 6  ;;  %v4846_v17 = vmax.f32 %v4718_v13, %v9885_v6  ;;  %v4591_v4 = vmax.f32 %v4463_v54, %v9814_v2  ;;  %v4465_v63 = vmax.f32 %v9732_v28, %v9776_v20  ;;  %4235 = vst.msk [vmem:[#allocation3 + $0x98] sm:$0xff] %vm4215_vm10, %v4158_v25 }
 0x32b   : > { %v5699_v43 = vrot.slane %v5586_v26, 6  ;;  %v4965_v40 = vrot.slane %v4844_v1, 1  ;;  %v4966_v38 = vrot.slane %v4845_v42, 1  ;;  %v5123_v37 = vrot.slane %v4845_v42, 2  ;;  %5837 = vst.msk [vmem:[#allocation3 + $0x20] sm:$0xff] %vm5832_vm11, %v9901_v14 }
 0x32c   : > { %v5698_v0 = vsel %vm2419_vm7, %v5696_v21, %v5697_v50  ;;  %v4968_v62 = vrot.slane %v4846_v17, 1  ;;  %v5124_v59 = vrot.slane %v4846_v17, 2  ;;  %v5301_v22 = vrot.slane %v4845_v42, 3  ;;  %v9926_v21 = vld [vmem:[#allocation2 + $0x1c8] sm:$0xff] }
 0x32d   : > { %5768 = vrot.lane.b32.xlu0 %v5698_v0, %s7242_s17  ;;  %v5700_v3 = vsel %vm2419_vm7, %v5697_v50, %v5699_v43  ;;  %v4967_v28 = vsel %vm1679_vm2, %v4965_v40, %v4966_v38  ;;  %v5302_v53 = vrot.slane %v4846_v17, 3  ;;  %v5477_v7 = vrot.slane %v4845_v42, 4  ;;  %v9915_v32 = vpop.permute.xlu1 %5746  ;;  %v4160_v46 = vpop.permute.xlu0 %4159  ;;  %v9931_v50 = vld [vmem:[#allocation2 + $0x1d0] sm:$0xff] }
 0x32e   : > { %5770 = vrot.lane.b32.xlu1 %v5700_v3, %s7242_s17  ;;  %v4969_v48 = vsel %vm1679_vm2, %v4966_v38, %v4968_v62  ;;  %v5075_v8 = vmax.f32 %v4844_v1, %v4967_v28  ;;  %v5125_v55 = vsel %vm1856_vm3, %v5123_v37, %v5124_v59  ;;  %v5478_v52 = vrot.slane %v4846_v17, 4  ;;  %4236 = vst.msk [vmem:[#allocation3 + $0xa0] sm:$0xff] %vm4215_vm10, %v4160_v46 }
 0x32f   : > { %v5076_v11 = vmax.f32 %v4845_v42, %v4969_v48  ;;  %v5303_v47 = vsel %vm2017_vm4, %v5301_v22, %v5302_v53  ;;  %v4719_v57 = vmax.f32 %v4591_v4, %v9856_v58  ;;  %v5077_v9 = vmax.f32 %v4846_v17, %v4968_v62  ;;  %5838 = vst.msk [vmem:[#allocation3 + $0x28] sm:$0xff] %vm5832_vm11, %v9915_v32 }
 0x330   : > { %v5219_v36 = vmax.f32 %v5075_v8, %v5123_v37  ;;  %v5479_v27 = vsel %vm2194_vm5, %v5477_v7, %v5478_v52  ;;  %v4466_v12 = vmax.f32 %v9734_v33, %v9781_v61  ;;  %v4592_v31 = vmax.f32 %v4464_v10, %v9831_v18 }
 0x331   : > { %v5220_v41 = vmax.f32 %v5076_v11, %v5125_v55  ;;  %v4847_v15 = vmax.f32 %v4719_v57, %v9911_v29  ;;  %v5221_v35 = vmax.f32 %v5077_v9, %v5124_v59  ;;  %v4593_v30 = vmax.f32 %v4465_v63, %v9833_v19  ;;  %v4162_v17 = vpop.permute.xlu1 %4161  ;;  %v9933_v4 = vpop.permute.xlu0 %5748 }
 0x332   : > { %v5411_v5 = vmax.f32 %v5219_v36, %v5301_v22  ;;  %v4594_v13 = vmax.f32 %v4466_v12, %v9839_v23  ;;  %v4720_v54 = vmax.f32 %v4592_v31, %v9879_v51  ;;  %v4467_v33 = vmax.f32 %v9761_v49, %v9814_v2  ;;  %4237 = vst.msk [vmem:[#allocation3 + $0xa8] sm:$0xff] %vm4215_vm10, %v4162_v17 }
 0x333   : > { %v5412_v26 = vmax.f32 %v5220_v41, %v5303_v47  ;;  %v5304_v10 = vrot.slane %v4847_v15, 3  ;;  %v5480_v1 = vrot.slane %v4847_v15, 4  ;;  %v4721_v42 = vmax.f32 %v4593_v30, %v9881_v45  ;;  %5839 = vst.msk [vmem:[#allocation3 + $0x30] sm:$0xff] %vm5832_vm11, %v9933_v4 }
 0x334   : > { %v5587_v63 = vmax.f32 %v5411_v5, %v5477_v7  ;;  %v4722_v43 = vmax.f32 %v4594_v13, %v9885_v6  ;;  %v4848_v40 = vmax.f32 %v4720_v54, %v9565_v16  ;;  %v4595_v38 = vmax.f32 %v4467_v33, %v9856_v58 }
 0x335   : > { %v5588_v49 = vmax.f32 %v5412_v26, %v5479_v27  ;;  %v5305_v37 = vsel %vm2017_vm4, %v5302_v53, %v5304_v10  ;;  %v5481_v25 = vsel %vm2194_vm5, %v5478_v52, %v5480_v1  ;;  %v4849_v0 = vmax.f32 %v4721_v42, %v9926_v21  ;;  %v9943_v8 = vpop.permute.xlu1 %5750  ;;  %v4164_v55 = vpop.permute.xlu0 %4163 }
 0x336   : > { %v5701_v62 = vrot.slane %v5587_v63, 6  ;;  %v5413_v59 = vmax.f32 %v5221_v35, %v5305_v37  ;;  %v4850_v22 = vmax.f32 %v4722_v43, %v9931_v50  ;;  %v4970_v3 = vrot.slane %v4848_v40, 1  ;;  %4238 = vst.msk [vmem:[#allocation3 + $0xb0] sm:$0xff] %vm4215_vm10, %v4164_v55  ;;  %v9964_v43 = vld [vmem:[#allocation2 + $0x1c0] sm:$0xff] }
 0x337   : > { %v5702_v28 = vrot.slane %v5588_v49, 6  ;;  %v4971_v7 = vrot.slane %v4849_v0, 1  ;;  %v5126_v48 = vrot.slane %v4849_v0, 2  ;;  %v5306_v16 = vrot.slane %v4849_v0, 3  ;;  %5840 = vst.msk [vmem:[#allocation3 + $0x38] sm:$0xff] %vm5832_vm11, %v9943_v8 }
 0x338   : > { %v5589_v11 = vmax.f32 %v5413_v59, %v5481_v25  ;;  %v4973_v47 = vrot.slane %v4850_v22, 1  ;;  %v5127_v57 = vrot.slane %v4850_v22, 2  ;;  %v5307_v53 = vrot.slane %v4850_v22, 3 }
 0x339   : > { %v5703_v52 = vsel %vm2419_vm7, %v5701_v62, %v5702_v28  ;;  %v4972_v9 = vsel %vm1679_vm2, %v4970_v3, %v4971_v7  ;;  %v5482_v46 = vrot.slane %v4849_v0, 4  ;;  %v5483_v36 = vrot.slane %v4850_v22, 4  ;;  %v4166_v13 = vpop.permute.xlu1 %4165  ;;  %v9970_v62 = vld [vmem:[#allocation2 + $0x1e0] sm:$0xff]  ;;  %v9976_v3 = vld [vmem:[#allocation2 + $0x1e8] sm:$0xff] }
 0x33a   : > { %5772 = vrot.lane.b32.xlu0 %v5703_v52, %s7242_s17  ;;  %v5704_v27 = vrot.slane %v5589_v11, 6  ;;  %v4974_v12 = vsel %vm1679_vm2, %v4971_v7, %v4973_v47  ;;  %v5078_v31 = vmax.f32 %v4848_v40, %v4972_v9  ;;  %v5128_v41 = vsel %vm1856_vm3, %v5126_v48, %v5127_v57  ;;  %4239 = vst.msk [vmem:[#allocation3 + $0xb8] sm:$0xff] %vm4215_vm10, %v4166_v13  ;;  %v9979_v7 = vld [vmem:[#allocation2 + $0x1d8] sm:$0xff]  ;;  %v9984_v11 = vld [vmem:[#allocation2 + $0x1f0] sm:$0xff] }
 0x33b   : > { %v5079_v15 = vmax.f32 %v4849_v0, %v4974_v12  ;;  %v5308_v35 = vsel %vm2017_vm4, %v5306_v16, %v5307_v53  ;;  %v5484_v30 = vsel %vm2194_vm5, %v5482_v46, %v5483_v36  ;;  %v4723_v5 = vmax.f32 %v4595_v38, %v9911_v29 }
 0x33c   : > { %v5705_v54 = vsel %vm2419_vm7, %v5702_v28, %v5704_v27  ;;  %v5222_v33 = vmax.f32 %v5078_v31, %v5126_v48  ;;  %v5080_v26 = vmax.f32 %v4850_v22, %v4973_v47  ;;  %v4468_v10 = vmax.f32 %v9772_v56, %v9831_v18 }
 0x33d   : > { %5774 = vrot.lane.b32.xlu1 %v5705_v54, %s7242_s17  ;;  %v5223_v1 = vmax.f32 %v5079_v15, %v5128_v41  ;;  %v4851_v42 = vmax.f32 %v4723_v5, %v9648_v39  ;;  %v4469_v17 = vmax.f32 %v9776_v20, %v9833_v19  ;;  %v4470_v63 = vmax.f32 %v9781_v61, %v9839_v23  ;;  %v9972_v20 = vpop.permute.xlu0 %5752 }
 0x33e   : > { %v5414_v40 = vmax.f32 %v5222_v33, %v5306_v16  ;;  %v5224_v38 = vmax.f32 %v5080_v26, %v5127_v57  ;;  %v4596_v49 = vmax.f32 %v4468_v10, %v9879_v51  ;;  %v4471_v56 = vmax.f32 %v9814_v2, %v9856_v58  ;;  %5841 = vst.msk [vmem:[#allocation3 + $0x40] sm:$0xff] %vm5832_vm11, %v9972_v20 }
 0x33f   : > { %v5415_v37 = vmax.f32 %v5223_v1, %v5308_v35  ;;  %v5309_v25 = vrot.slane %v4851_v42, 3  ;;  %v5485_v0 = vrot.slane %v4851_v42, 4  ;;  %v4597_v39 = vmax.f32 %v4469_v17, %v9881_v45  ;;  %v9995_v35 = vld [vmem:[#allocation2 + $0x1f8] sm:$0xff] }
 0x340   : > { %v5590_v59 = vmax.f32 %v5414_v40, %v5482_v46  ;;  %v4598_v61 = vmax.f32 %v4470_v63, %v9885_v6  ;;  %v4724_v22 = vmax.f32 %v4596_v49, %v9964_v43  ;;  %v4599_v28 = vmax.f32 %v4471_v56, %v9911_v29  ;;  %v9988_v46 = vpop.permute.xlu1 %5754 }
 0x341   : > { %v5591_v2 = vmax.f32 %v5415_v37, %v5484_v30  ;;  %v5310_v48 = vsel %vm2017_vm4, %v5307_v53, %v5309_v25  ;;  %v5486_v16 = vsel %vm2194_vm5, %v5483_v36, %v5485_v0  ;;  %v4725_v55 = vmax.f32 %v4597_v39, %v9926_v21  ;;  %5842 = vst.msk [vmem:[#allocation3 + $0x48] sm:$0xff] %vm5832_vm11, %v9988_v46 }
 0x342   : > { %v5706_v47 = vrot.slane %v5590_v59, 6  ;;  %v5416_v57 = vmax.f32 %v5224_v38, %v5310_v48  ;;  %v4726_v52 = vmax.f32 %v4598_v61, %v9931_v50  ;;  %v4852_v9 = vmax.f32 %v4724_v22, %v9970_v62 }
 0x343   : > { %v5707_v27 = vrot.slane %v5591_v2, 6  ;;  %v4853_v12 = vmax.f32 %v4725_v55, %v9976_v3  ;;  %v4727_v31 = vmax.f32 %v4599_v28, %v9979_v7  ;;  %v4472_v53 = vmax.f32 %v9831_v18, %v9879_v51 }
 0x344   : > { %v5592_v36 = vmax.f32 %v5416_v57, %v5486_v16  ;;  %v4854_v41 = vmax.f32 %v4726_v52, %v9984_v11  ;;  %v4975_v15 = vrot.slane %v4852_v9, 1  ;;  %v4473_v30 = vmax.f32 %v9833_v19, %v9881_v45 }
 0x345   : > { %v5708_v5 = vsel %vm2419_vm7, %v5706_v47, %v5707_v27  ;;  %v4976_v13 = vrot.slane %v4853_v12, 1  ;;  %v5129_v54 = vrot.slane %v4853_v12, 2  ;;  %v5311_v33 = vrot.slane %v4853_v12, 3  ;;  %v4168_v26 = vpop.permute.xlu0 %4167 }
 0x346   : > { %5776 = vrot.lane.b32.xlu0 %v5708_v5, %s7242_s17  ;;  %v5709_v10 = vrot.slane %v5592_v36, 6  ;;  %v4978_v1 = vrot.slane %v4854_v41, 1  ;;  %v5130_v18 = vrot.slane %v4854_v41, 2  ;;  %v5312_v42 = vrot.slane %v4854_v41, 3  ;;  %4240 = vst.msk [vmem:[#allocation3 + $0xc0] sm:$0xff] %vm4215_vm10, %v4168_v26  ;;  %v10020_v36 = vld [vmem:[#allocation2 + $0x208] sm:$0xff] }
 0x347   : > { %v4977_v17 = vsel %vm1679_vm2, %v4975_v15, %v4976_v13  ;;  %v5487_v63 = vrot.slane %v4853_v12, 4  ;;  %v5488_v40 = vrot.slane %v4854_v41, 4  ;;  %v4855_v19 = vmax.f32 %v4727_v31, %v9995_v35  ;;  %v10018_v31 = vld [vmem:[#allocation2 + $0x200] sm:$0xff] }
 0x348   : > { %v5710_v38 = vsel %vm2419_vm7, %v5707_v27, %v5709_v10  ;;  %v4979_v49 = vsel %vm1679_vm2, %v4976_v13, %v4978_v1  ;;  %v5081_v56 = vmax.f32 %v4852_v9, %v4977_v17  ;;  %v5131_v37 = vsel %vm1856_vm3, %v5129_v54, %v5130_v18  ;;  %v4170_v25 = vpop.permute.xlu1 %4169 }
 0x349   : > { %5778 = vrot.lane.b32.xlu1 %v5710_v38, %s7242_s17  ;;  %v5082_v0 = vmax.f32 %v4853_v12, %v4979_v49  ;;  %v5313_v39 = vsel %vm2017_vm4, %v5311_v33, %v5312_v42  ;;  %v5489_v59 = vsel %vm2194_vm5, %v5487_v63, %v5488_v40  ;;  %v5083_v61 = vmax.f32 %v4854_v41, %v4978_v1 }
 0x34a   : > { %4241 = vst.msk [vmem:[#allocation3 + $0xc8] sm:$0xff] %vm4215_vm10, %v4170_v25  ;;  %v5225_v22 = vmax.f32 %v5081_v56, %v5129_v54  ;;  %v5314_v28 = vrot.slane %v4855_v19, 3  ;;  %v5490_v2 = vrot.slane %v4855_v19, 4  ;;  %v4474_v48 = vmax.f32 %v9839_v23, %v9885_v6 }
 0x34b   : > { %v5226_v16 = vmax.f32 %v5082_v0, %v5131_v37  ;;  %v5227_v55 = vmax.f32 %v5083_v61, %v5130_v18  ;;  %v4600_v47 = vmax.f32 %v4472_v53, %v9964_v43  ;;  %v4601_v57 = vmax.f32 %v4473_v30, %v9926_v21  ;;  %v10024_v53 = vld [vmem:[#allocation2 + $0x210] sm:$0xff] }
 0x34c   : > { %v5417_v52 = vmax.f32 %v5225_v22, %v5311_v33  ;;  %v5315_v9 = vsel %vm2017_vm4, %v5312_v42, %v5314_v28  ;;  %v5491_v27 = vsel %vm2194_vm5, %v5488_v40, %v5490_v2  ;;  %v4602_v12 = vmax.f32 %v4474_v48, %v9931_v50 }
 0x34d   : > { %v5418_v41 = vmax.f32 %v5226_v16, %v5313_v39  ;;  %v5419_v15 = vmax.f32 %v5227_v55, %v5315_v9  ;;  %v4728_v23 = vmax.f32 %v4600_v47, %v9970_v62  ;;  %v4729_v5 = vmax.f32 %v4601_v57, %v9976_v3  ;;  %v10044_v55 = vld [vmem:[#allocation2 + $0x218] sm:$0xff] }
 0x34e   : > { %v5593_v30 = vmax.f32 %v5417_v52, %v5487_v63  ;;  %v4730_v13 = vmax.f32 %v4602_v12, %v9984_v11  ;;  %v4475_v54 = vmax.f32 %v9856_v58, %v9911_v29  ;;  %v4476_v33 = vmax.f32 %v9879_v51, %v9964_v43 }
 0x34f   : > { %v5594_v26 = vmax.f32 %v5418_v41, %v5489_v59  ;;  %v5595_v10 = vmax.f32 %v5419_v15, %v5491_v27  ;;  %v4856_v1 = vmax.f32 %v4728_v23, %v10018_v31  ;;  %v4857_v18 = vmax.f32 %v4729_v5, %v10020_v36 }
 0x350   : > { %v5711_v42 = vrot.slane %v5593_v30, 6  ;;  %v4858_v17 = vmax.f32 %v4730_v13, %v10024_v53  ;;  %v4603_v40 = vmax.f32 %v4475_v54, %v9979_v7  ;;  %v4477_v63 = vmax.f32 %v9881_v45, %v9926_v21  ;;  %v10056_v54 = vld [vmem:[#allocation2 + $0x220] sm:$0xff] }
 0x351   : > { %v5712_v19 = vrot.slane %v5594_v26, 6  ;;  %v5714_v38 = vrot.slane %v5595_v10, 6  ;;  %v4980_v58 = vrot.slane %v4856_v1, 1  ;;  %v4981_v49 = vrot.slane %v4857_v18, 1 }
 0x352   : > { %v4983_v56 = vrot.slane %v4858_v17, 1  ;;  %v5132_v51 = vrot.slane %v4857_v18, 2  ;;  %v5133_v37 = vrot.slane %v4858_v17, 2  ;;  %v5316_v25 = vrot.slane %v4857_v18, 3 }
 0x353   : > { %v5713_v0 = vsel %vm2419_vm7, %v5711_v42, %v5712_v19  ;;  %v5715_v39 = vsel %vm2419_vm7, %v5712_v19, %v5714_v38  ;;  %v4982_v59 = vsel %vm1679_vm2, %v4980_v58, %v4981_v49  ;;  %v5317_v61 = vrot.slane %v4858_v17, 3  ;;  %v4172_v22 = vpop.permute.xlu0 %4171  ;;  %v4174_v28 = vpop.permute.xlu1 %4173  ;;  %v10060_v42 = vld [vmem:[#allocation2 + $0x228] sm:$0xff]  ;;  %v10063_v19 = vld [vmem:[#allocation2 + $0x230] sm:$0xff] }
 0x354   : > { %5780 = vrot.lane.b32.xlu0 %v5713_v0, %s7242_s17  ;;  %5782 = vrot.lane.b32.xlu1 %v5715_v39, %s7242_s17  ;;  %v4984_v45 = vsel %vm1679_vm2, %v4981_v49, %v4983_v56  ;;  %v5084_v2 = vmax.f32 %v4856_v1, %v4982_v59  ;;  %v5134_v48 = vsel %vm1856_vm3, %v5132_v51, %v5133_v37  ;;  %v5492_v16 = vrot.slane %v4857_v18, 4 }
 0x355   : > { %4242 = vst.msk [vmem:[#allocation3 + $0xd0] sm:$0xff] %vm4215_vm10, %v4172_v22  ;;  %4243 = vst.msk [vmem:[#allocation3 + $0xd8] sm:$0xff] %vm4215_vm10, %v4174_v28  ;;  %v5085_v47 = vmax.f32 %v4857_v18, %v4984_v45  ;;  %v5318_v57 = vsel %vm2017_vm4, %v5316_v25, %v5317_v61  ;;  %v5493_v52 = vrot.slane %v4858_v17, 4  ;;  %v4731_v9 = vmax.f32 %v4603_v40, %v9995_v35 }
 0x356   : > { %v5228_v27 = vmax.f32 %v5084_v2, %v5132_v51  ;;  %v5086_v12 = vmax.f32 %v4858_v17, %v4983_v56  ;;  %v4478_v41 = vmax.f32 %v9885_v6, %v9931_v50  ;;  %v4604_v15 = vmax.f32 %v4476_v33, %v9970_v62 }
 0x357   : > { %v5229_v23 = vmax.f32 %v5085_v47, %v5134_v48  ;;  %v5494_v5 = vsel %vm2194_vm5, %v5492_v16, %v5493_v52  ;;  %v4859_v30 = vmax.f32 %v4731_v9, %v10044_v55  ;;  %v4605_v13 = vmax.f32 %v4477_v63, %v9976_v3 }
 0x358   : > { %v5420_v26 = vmax.f32 %v5228_v27, %v5316_v25  ;;  %v5230_v10 = vmax.f32 %v5086_v12, %v5133_v37  ;;  %v4606_v1 = vmax.f32 %v4478_v41, %v9984_v11  ;;  %v4732_v18 = vmax.f32 %v4604_v15, %v10018_v31 }
 0x359   : > { %v5421_v6 = vmax.f32 %v5229_v23, %v5318_v57  ;;  %v5319_v17 = vrot.slane %v4859_v30, 3  ;;  %v5495_v33 = vrot.slane %v4859_v30, 4  ;;  %v4733_v40 = vmax.f32 %v4605_v13, %v10020_v36 }
 0x35a   : > { %v5596_v38 = vmax.f32 %v5420_v26, %v5492_v16  ;;  %v4734_v63 = vmax.f32 %v4606_v1, %v10024_v53  ;;  %v4860_v58 = vmax.f32 %v4732_v18, %v10056_v54  ;;  %v4479_v49 = vmax.f32 %v9911_v29, %v9979_v7  ;;  %v10082_v18 = vld [vmem:[#allocation2 + $0x238] sm:$0xff] }
 0x35b   : > { %v5597_v56 = vmax.f32 %v5421_v6, %v5494_v5  ;;  %v5320_v51 = vsel %vm2017_vm4, %v5317_v61, %v5319_v17  ;;  %v5496_v37 = vsel %vm2194_vm5, %v5493_v52, %v5495_v33  ;;  %v4861_v25 = vmax.f32 %v4733_v40, %v10060_v42 }
 0x35c   : > { %v5716_v0 = vrot.slane %v5596_v38, 6  ;;  %v5422_v39 = vmax.f32 %v5230_v10, %v5320_v51  ;;  %v4862_v59 = vmax.f32 %v4734_v63, %v10063_v19  ;;  %v4985_v22 = vrot.slane %v4860_v58, 1 }
 0x35d   : > { %v5717_v28 = vrot.slane %v5597_v56, 6  ;;  %v4986_v45 = vrot.slane %v4861_v25, 1  ;;  %v5135_v2 = vrot.slane %v4861_v25, 2  ;;  %v5321_v48 = vrot.slane %v4861_v25, 3 }
 0x35e   : > { %v5598_v16 = vmax.f32 %v5422_v39, %v5496_v37  ;;  %v4988_v47 = vrot.slane %v4862_v59, 1  ;;  %v5136_v57 = vrot.slane %v4862_v59, 2  ;;  %v5322_v29 = vrot.slane %v4862_v59, 3  ;;  %v10098_v39 = vld [vmem:[#allocation2 + $0x240] sm:$0xff] }
 0x35f   : > { %v5718_v9 = vsel %vm2419_vm7, %v5716_v0, %v5717_v28  ;;  %v4987_v61 = vsel %vm1679_vm2, %v4985_v22, %v4986_v45  ;;  %v5497_v52 = vrot.slane %v4861_v25, 4  ;;  %v5498_v27 = vrot.slane %v4862_v59, 4  ;;  %v10103_v22 = vld [vmem:[#allocation2 + $0x248] sm:$0xff] }
 0x360   : > { %5784 = vrot.lane.b32.xlu0 %v5718_v9, %s7242_s17  ;;  %v5719_v12 = vrot.slane %v5598_v16, 6  ;;  %v4989_v41 = vsel %vm1679_vm2, %v4986_v45, %v4988_v47  ;;  %v5087_v15 = vmax.f32 %v4860_v58, %v4987_v61  ;;  %v5137_v23 = vsel %vm1856_vm3, %v5135_v2, %v5136_v57 }
 0x361   : > { %v5088_v5 = vmax.f32 %v4861_v25, %v4989_v41  ;;  %v5323_v30 = vsel %vm2017_vm4, %v5321_v48, %v5322_v29  ;;  %v5499_v13 = vsel %vm2194_vm5, %v5497_v52, %v5498_v27  ;;  %v4607_v26 = vmax.f32 %v4479_v49, %v9995_v35 }
 0x362   : > { %v5720_v10 = vsel %vm2419_vm7, %v5717_v28, %v5719_v12  ;;  %v5231_v1 = vmax.f32 %v5087_v15, %v5135_v2  ;;  %v5089_v6 = vmax.f32 %v4862_v59, %v4988_v47  ;;  %v4480_v17 = vmax.f32 %v9964_v43, %v9970_v62  ;;  %v10109_v47 = vld [vmem:[#allocation2 + $0x250] sm:$0xff] }
 0x363   : > { %5786 = vrot.lane.b32.xlu1 %v5720_v10, %s7242_s17  ;;  %v5232_v33 = vmax.f32 %v5088_v5, %v5137_v23  ;;  %v4735_v40 = vmax.f32 %v4607_v26, %v10044_v55  ;;  %v4481_v38 = vmax.f32 %v9926_v21, %v9976_v3  ;;  %v4482_v63 = vmax.f32 %v9931_v50, %v9984_v11  ;;  %v10100_v21 = vpop.permute.xlu0 %5756 }
 0x364   : > { %v5423_v58 = vmax.f32 %v5231_v1, %v5321_v48  ;;  %v5233_v49 = vmax.f32 %v5089_v6, %v5136_v57  ;;  %v4608_v56 = vmax.f32 %v4480_v17, %v10018_v31  ;;  %v4483_v51 = vmax.f32 %v9979_v7, %v9995_v35  ;;  %v10111_v57 = vld [vmem:[#allocation2 + $0x258] sm:$0xff]  ;;  %5843 = vst.msk [vmem:[#allocation3 + $0x50] sm:$0xff] %vm5832_vm11, %v10100_v21 }
 0x365   : > { %v5424_v37 = vmax.f32 %v5232_v33, %v5323_v30  ;;  %v4863_v43 = vmax.f32 %v4735_v40, %v10082_v18  ;;  %v4609_v25 = vmax.f32 %v4481_v38, %v10020_v36  ;;  %v4610_v0 = vmax.f32 %v4482_v63, %v10024_v53  ;;  %v5759_v38 = vpop.permute.xlu1 %5758 }
 0x366   : > { %v5599_v59 = vmax.f32 %v5423_v58, %v5497_v52  ;;  %v4736_v50 = vmax.f32 %v4608_v56, %v10056_v54  ;;  %v4611_v28 = vmax.f32 %v4483_v51, %v10044_v55  ;;  %v4484_v7 = vmax.f32 %v9970_v62, %v10018_v31  ;;  %5844 = vst.msk [vmem:[#allocation3 + $0x58] sm:$0xff] %vm5832_vm11, %v5759_v38 }
 0x367   : > { %v5600_v45 = vmax.f32 %v5424_v37, %v5499_v13  ;;  %v5324_v2 = vrot.slane %v4863_v43, 3  ;;  %v5500_v48 = vrot.slane %v4863_v43, 4  ;;  %v4737_v16 = vmax.f32 %v4609_v25, %v10060_v42 }
 0x368   : > { %v5721_v9 = vrot.slane %v5599_v59, 6  ;;  %v4738_v61 = vmax.f32 %v4610_v0, %v10063_v19  ;;  %v4864_v52 = vmax.f32 %v4736_v50, %v10098_v39  ;;  %v4739_v12 = vmax.f32 %v4611_v28, %v10082_v18 }
 0x369   : > { %v5722_v41 = vrot.slane %v5600_v45, 6  ;;  %v5325_v15 = vsel %vm2017_vm4, %v5322_v29, %v5324_v2  ;;  %v5501_v62 = vsel %vm2194_vm5, %v5498_v27, %v5500_v48  ;;  %v4865_v31 = vmax.f32 %v4737_v16, %v10103_v22 }
 0x36a   : > { %v5425_v23 = vmax.f32 %v5233_v49, %v5325_v15  ;;  %v4866_v5 = vmax.f32 %v4738_v61, %v10109_v47  ;;  %v4990_v30 = vrot.slane %v4864_v52, 1  ;;  %v4867_v13 = vmax.f32 %v4739_v12, %v10111_v57 }
 0x36b   : > { %v5723_v26 = vsel %vm2419_vm7, %v5721_v9, %v5722_v41  ;;  %v4991_v10 = vrot.slane %v4865_v31, 1  ;;  %v5138_v1 = vrot.slane %v4865_v31, 2  ;;  %v5326_v6 = vrot.slane %v4865_v31, 3  ;;  %v4176_v17 = vpop.permute.xlu0 %4175 }
 0x36c   : > { %5788 = vrot.lane.b32.xlu0 %v5723_v26, %s7242_s17  ;;  %v5601_v33 = vmax.f32 %v5425_v23, %v5501_v62  ;;  %v4993_v29 = vrot.slane %v4866_v5, 1  ;;  %v5139_v40 = vrot.slane %v4866_v5, 2  ;;  %v5327_v27 = vrot.slane %v4866_v5, 3  ;;  %4244 = vst.msk [vmem:[#allocation3 + $0xe0] sm:$0xff] %vm4215_vm10, %v4176_v17 }
 0x36d   : > { %v4992_v63 = vsel %vm1679_vm2, %v4990_v30, %v4991_v10  ;;  %v5502_v58 = vrot.slane %v4865_v31, 4  ;;  %v5503_v49 = vrot.slane %v4866_v5, 4  ;;  %v5329_v56 = vrot.slane %v4867_v13, 3 }
 0x36e   : > { %v5724_v51 = vrot.slane %v5601_v33, 6  ;;  %v4994_v37 = vsel %vm1679_vm2, %v4991_v10, %v4993_v29  ;;  %v5090_v43 = vmax.f32 %v4864_v52, %v4992_v63  ;;  %v5140_v25 = vsel %vm1856_vm3, %v5138_v1, %v5139_v40  ;;  %v4804_v10 = vld [vmem:[#allocation2 + $0x260] sm:$0xff] }
 0x36f   : > { %v5091_v0 = vmax.f32 %v4865_v31, %v4994_v37  ;;  %v5328_v59 = vsel %vm2017_vm4, %v5326_v6, %v5327_v27  ;;  %v5504_v50 = vsel %vm2194_vm5, %v5502_v58, %v5503_v49  ;;  %v5092_v28 = vmax.f32 %v4866_v5, %v4993_v29 }
 0x370   : > { %v5725_v45 = vsel %vm2419_vm7, %v5722_v41, %v5724_v51  ;;  %v5234_v2 = vmax.f32 %v5090_v43, %v5138_v1  ;;  %v5330_v48 = vsel %vm2017_vm4, %v5327_v27, %v5329_v56  ;;  %v5505_v16 = vrot.slane %v4867_v13, 4  ;;  %v5865_v43 = vld [vmem:[#allocation3] sm:$0xff] }
 0x371   : > { %5790 = vrot.lane.b32.xlu1 %v5725_v45, %s7242_s17  ;;  %v5235_v9 = vmax.f32 %v5091_v0, %v5140_v25  ;;  %v5236_v61 = vmax.f32 %v5092_v28, %v5139_v40  ;;  %v4485_v52 = vmax.f32 %v9976_v3, %v10020_v36  ;;  %v4486_v12 = vmax.f32 %v9984_v11, %v10024_v53  ;;  %v5897_v3 = vld [vmem:[%s10476_s4] sm:$0xff]  ;;  %v5898_v11 = vld [vmem:[%s10476_s4 + $0x8] sm:$0xff] }
 0x372   : > { %v5426_v15 = vmax.f32 %v5234_v2, %v5326_v6  ;;  %v5506_v62 = vsel %vm2194_vm5, %v5503_v49, %v5505_v16  ;;  %v4612_v31 = vmax.f32 %v4484_v7, %v10056_v54  ;;  %v4487_v41 = vmax.f32 %v9995_v35, %v10044_v55  ;;  %v4178_v23 = vpop.permute.xlu1 %4177  ;;  %v4805_v53 = vld [vmem:[#allocation2 + $0x268] sm:$0xff]  ;;  %v4806_v55 = vld [vmem:[#allocation2 + $0x270] sm:$0xff]  ;;  %v4807_v6 = vld [vmem:[#allocation2 + $0x278] sm:$0xff]  ;;  %6887 = vmatprep.mubr.msk.f32.mxu1 %vm5901_vm12, %v5865_v43 }
 0x373   : > { %v5427_v5 = vmax.f32 %v5235_v9, %v5328_v59  ;;  %v5428_v30 = vmax.f32 %v5236_v61, %v5330_v48  ;;  %v4613_v13 = vmax.f32 %v4485_v52, %v10060_v42  ;;  %v4614_v26 = vmax.f32 %v4486_v12, %v10063_v19  ;;  %4245 = vst.msk [vmem:[#allocation3 + $0xe8] sm:$0xff] %vm4215_vm10, %v4178_v23  ;;  %v5866_v28 = vld [vmem:[#allocation3 + $0x8] sm:$0xff]  ;;  %v5867_v16 = vld [vmem:[#allocation3 + $0x10] sm:$0xff] }
 0x374   : > { %v5602_v36 = vmax.f32 %v5426_v15, %v5502_v58  ;;  %v4740_v35 = vmax.f32 %v4612_v31, %v10098_v39  ;;  %v4615_v54 = vmax.f32 %v4487_v41, %v10082_v18  ;;  %v5899_v18 = vld [vmem:[%s10476_s4 + $0x10] sm:$0xff]  ;;  %v5900_v39 = vld [vmem:[%s10476_s4 + $0x18] sm:$0xff]  ;;  %v6939_v24 = vpack.c.bf16 %v5898_v11, %v5897_v3 }
 0x375   : > { %v5603_v42 = vmax.f32 %v5427_v5, %v5504_v50  ;;  %v5604_v19 = vmax.f32 %v5428_v30, %v5506_v62  ;;  %v4741_v7 = vmax.f32 %v4613_v13, %v10103_v22  ;;  %v4742_v1 = vmax.f32 %v4614_v26, %v10109_v47  ;;  %v5868_v41 = vld [vmem:[#allocation3 + $0x18] sm:$0xff]  ;;  %v5869_v13 = vld [vmem:[#allocation3 + $0x20] sm:$0xff] }
 0x376   : > { %v5726_v44 = vrot.slane %v5602_v36, 6  ;;  %v4868_v34 = vmax.f32 %v4740_v35, %v4804_v10  ;;  %v4743_v60 = vmax.f32 %v4615_v54, %v10111_v57  ;;  %6940 = vmatprep.subr.bf16.mxu1 %v6939_v24  ;;  %v6943_v20 = vpack.c.bf16 %v5900_v39, %v5899_v18  ;;  %v5870_v36 = vld [vmem:[#allocation3 + $0x28] sm:$0xff]  ;;  %v5876_v18 = vld [vmem:[#allocation3 + $0x58] sm:$0xff] }
 0x377   : > { %v5727_v14 = vrot.slane %v5603_v42, 6  ;;  %v5729_v32 = vrot.slane %v5604_v19, 6  ;;  %v4869_v4 = vmax.f32 %v4741_v7, %v4805_v53  ;;  %v4870_v8 = vmax.f32 %v4742_v1, %v4806_v55  ;;  %6942 = vmatpush3.bf16.msra.mxu1 %v6939_v24  ;;  %v5871_v53 = vld [vmem:[#allocation3 + $0x30] sm:$0xff]  ;;  %v5872_v19 = vld [vmem:[#allocation3 + $0x38] sm:$0xff]  ;;  %v5873_v7 = vld [vmem:[#allocation3 + $0x40] sm:$0xff] }
 0x378   : > { %v4995_v22 = vrot.slane %v4868_v34, 1  ;;  %v4871_v47 = vmax.f32 %v4743_v60, %v4807_v6  ;;  %6944 = vmatprep.subr.bf16.mxu1 %v6943_v20  ;;  %v5874_v1 = vld [vmem:[#allocation3 + $0x48] sm:$0xff]  ;;  %v5875_v6 = vld [vmem:[#allocation3 + $0x50] sm:$0xff] }
 0x379   : > { %v5728_v46 = vsel %vm2419_vm7, %v5726_v44, %v5727_v14  ;;  %v5730_v17 = vsel %vm2419_vm7, %v5727_v14, %v5729_v32  ;;  %v4996_v21 = vrot.slane %v4869_v4, 1  ;;  %v4998_v33 = vrot.slane %v4870_v8, 1  ;;  %v4180_v29 = vpop.permute.xlu0 %4179  ;;  %v4182_v40 = vpop.permute.xlu1 %4181 }
 0x37a   : > { %5792 = vrot.lane.b32.xlu0 %v5728_v46, %s7242_s17  ;;  %5794 = vrot.lane.b32.xlu1 %v5730_v17, %s7242_s17  ;;  %v5141_v57 = vrot.slane %v4869_v4, 2  ;;  %v5142_v27 = vrot.slane %v4870_v8, 2  ;;  %4246 = vst.msk [vmem:[#allocation3 + $0xf0] sm:$0xff] %vm4215_vm10, %v4180_v29  ;;  %4247 = vst.msk [vmem:[#allocation3 + $0xf8] sm:$0xff] %vm4215_vm10, %v4182_v40  ;;  %v5331_v58 = vrot.slane %v4869_v4, 3  ;;  %v5332_v49 = vrot.slane %v4870_v8, 3 }
 0x37b   : > { %v4997_v38 = vsel %vm1679_vm2, %v4995_v22, %v4996_v21  ;;  %v4999_v63 = vsel %vm1679_vm2, %v4996_v21, %v4998_v33  ;;  %v5507_v37 = vrot.slane %v4869_v4, 4  ;;  %v5508_v0 = vrot.slane %v4870_v8, 4  ;;  %6946 = vmatpush3.bf16.msra.mxu1 %v6943_v20 }
 0x37c   : > { %v5093_v56 = vmax.f32 %v4868_v34, %v4997_v38  ;;  %v5094_v51 = vmax.f32 %v4869_v4, %v4999_v63  ;;  %v5143_v25 = vsel %vm1856_vm3, %v5141_v57, %v5142_v27  ;;  %v5095_v59 = vmax.f32 %v4870_v8, %v4998_v33 }
 0x37d   : > { %v5334_v50 = vrot.slane %v4871_v47, 3  ;;  %v5510_v48 = vrot.slane %v4871_v47, 4  ;;  %v5333_v9 = vsel %vm2017_vm4, %v5331_v58, %v5332_v49  ;;  %v5509_v62 = vsel %vm2194_vm5, %v5507_v37, %v5508_v0 }
 0x37e   : > { %v5237_v45 = vmax.f32 %v5093_v56, %v5141_v57  ;;  %v5238_v2 = vmax.f32 %v5094_v51, %v5143_v25  ;;  %v5239_v61 = vmax.f32 %v5095_v59, %v5142_v27  ;;  %6888 = vmatmul.mubr.msk.f32.vlgmr.msra.gmra.mrb[0].mxu1 %vm5901_vm12, %v5866_v28 }
 0x37f   : > { %v5335_v15 = vsel %vm2017_vm4, %v5332_v49, %v5334_v50  ;;  %6890 = vmatprep.mubr.msk.f32.mxu1 %vm5901_vm12, %v5867_v16  ;;  %v5511_v30 = vsel %vm2194_vm5, %v5508_v0, %v5510_v48 }
 0x380   : > { %v5429_v52 = vmax.f32 %v5237_v45, %v5331_v58  ;;  %v5430_v12 = vmax.f32 %v5238_v2, %v5333_v9  ;;  %v5431_v31 = vmax.f32 %v5239_v61, %v5335_v15  ;;  %v10255_v61 = vld [vmem:[%s10477_s5] ss:$0 sm:$0xff] }
 0x382   : > { %v5605_v23 = vmax.f32 %v5429_v52, %v5507_v37  ;;  %v5606_v5 = vmax.f32 %v5430_v12, %v5509_v62  ;;  %v5607_v26 = vmax.f32 %v5431_v31, %v5511_v30  ;;  %6891 = vmatmul.mubr.msk.f32.gmra.mrb[2].mxu1 %vm5901_vm12, %v5868_v41  ;;  %v10260_v12 = vld [vmem:[%s10478_s6] ss:$0 sm:$0xff] }
 0x383   : > { %6893 = vmatprep.mubr.msk.f32.mxu1 %vm5901_vm12, %v5869_v13 }
 0x384   : > { %v5731_v10 = vrot.slane %v5605_v23, 6  ;;  %v5732_v3 = vrot.slane %v5606_v5, 6  ;;  %v5734_v11 = vrot.slane %v5607_v26, 6 }
 0x386   : > { %v5733_v35 = vsel %vm2419_vm7, %v5731_v10, %v5732_v3  ;;  %v5761_v55 = vpop.permute.xlu0 %5760  ;;  %v5735_v54 = vsel %vm2419_vm7, %v5732_v3, %v5734_v11  ;;  %6894 = vmatmul.mubr.msk.f32.gmra.mrb[4].mxu1 %vm5901_vm12, %v5870_v36 }
 0x387   : > { %5796 = vrot.lane.b32.xlu0 %v5733_v35, %s7242_s17  ;;  %5845 = vst.msk [vmem:[#allocation3 + $0x60] sm:$0xff] %vm5832_vm11, %v5761_v55  ;;  %5798 = vrot.lane.b32.xlu1 %v5735_v54, %s7242_s17 }
 0x388   : > { %v5763_v42 = vpop.permute.xlu1 %5762  ;;  %6896 = vmatprep.mubr.msk.f32.mxu1 %vm5901_vm12, %v5871_v53 }
 0x389   : > { %5846 = vst.msk [vmem:[#allocation3 + $0x68] sm:$0xff] %vm5832_vm11, %v5763_v42 }
 0x38a   : > { %6897 = vmatmul.mubr.msk.f32.gmra.mrb[6].mxu1 %vm5901_vm12, %v5872_v19 }
 0x38b   : > { %6899 = vmatprep.mubr.msk.f32.mxu1 %vm5901_vm12, %v5873_v7 }
 0x38e   : > { %6900 = vmatmul.mubr.msk.f32.gmra.mrb[8].mxu1 %vm5901_vm12, %v5874_v1  ;;  %v5877_v44 = vld [vmem:[#allocation3 + $0x60] sm:$0xff] }
 0x38f   : > { %6902 = vmatprep.mubr.msk.f32.mxu1 %vm5901_vm12, %v5875_v6 }
 0x390   : > { %v5878_v34 = vld [vmem:[#allocation3 + $0x68] sm:$0xff] }
 0x391   : > { %v5765_v39 = vpop.permute.xlu0 %5764 }
 0x392   : > { %5847 = vst.msk [vmem:[#allocation3 + $0x70] sm:$0xff] %vm5832_vm11, %v5765_v39  ;;  %6903 = vmatmul.mubr.msk.f32.gmra.mrb[10].mxu1 %vm5901_vm12, %v5876_v18 }
 0x393   : > { %6905 = vmatprep.mubr.msk.f32.mxu1 %vm5901_vm12, %v5877_v44 }
 0x396   : > { %6906 = vmatmul.mubr.msk.f32.gmra.mrb[12].mxu1 %vm5901_vm12, %v5878_v34 }
 0x397   : > { %v5767_v60 = vpop.permute.xlu1 %5766 }
 0x398   : > { %5848 = vst.msk [vmem:[#allocation3 + $0x78] sm:$0xff] %vm5832_vm11, %v5767_v60 }
 0x399   : > { %v5879_v24 = vld [vmem:[#allocation3 + $0x70] sm:$0xff] }
 0x39a   : > { %6908 = vmatprep.mubr.msk.f32.mxu1 %vm5901_vm12, %v5879_v24 }
 0x39f   : > { %v5769_v14 = vpop.permute.xlu0 %5768  ;;  %v5880_v32 = vld [vmem:[#allocation3 + $0x78] sm:$0xff] }
 0x3a0   : > { %5849 = vst.msk [vmem:[#allocation3 + $0x80] sm:$0xff] %vm5832_vm11, %v5769_v14  ;;  %v5771_v4 = vpop.permute.xlu1 %5770  ;;  %6909 = vmatmul.mubr.msk.f32.gmra.mrb[14].mxu1 %vm5901_vm12, %v5880_v32 }
 0x3a1   : > { %5850 = vst.msk [vmem:[#allocation3 + $0x88] sm:$0xff] %vm5832_vm11, %v5771_v4 }
 0x3a7   : > { %v5881_v8 = vld [vmem:[#allocation3 + $0x80] sm:$0xff] }
 0x3a8   : > { %6911 = vmatprep.mubr.msk.f32.mxu1 %vm5901_vm12, %v5881_v8  ;;  %v5882_v22 = vld [vmem:[#allocation3 + $0x88] sm:$0xff] }
 0x3a9   : > { %6912 = vmatmul.mubr.msk.f32.gmra.mrb[16].mxu1 %vm5901_vm12, %v5882_v22 }
 0x3ac   : > { %v5773_v47 = vpop.permute.xlu0 %5772 }
 0x3ad   : > { %5851 = vst.msk [vmem:[#allocation3 + $0x90] sm:$0xff] %vm5832_vm11, %v5773_v47 }
 0x3af   : > { %v5775_v20 = vpop.permute.xlu1 %5774 }
 0x3b0   : > { %5852 = vst.msk [vmem:[#allocation3 + $0x98] sm:$0xff] %vm5832_vm11, %v5775_v20 }
 0x3b4   : > { %v5883_v46 = vld [vmem:[#allocation3 + $0x90] sm:$0xff] }
 0x3b5   : > { %6914 = vmatprep.mubr.msk.f32.mxu1 %vm5901_vm12, %v5883_v46 }
 0x3b7   : > { %v5884_v17 = vld [vmem:[#allocation3 + $0x98] sm:$0xff] }
 0x3b8   : > { %v5777_v21 = vpop.permute.xlu0 %5776  ;;  %6915 = vmatmul.mubr.msk.f32.gmra.mrb[18].mxu1 %vm5901_vm12, %v5884_v17 }
 0x3b9   : > { %5853 = vst.msk [vmem:[#allocation3 + $0xa0] sm:$0xff] %vm5832_vm11, %v5777_v21 }
 0x3bb   : > { %v5779_v33 = vpop.permute.xlu1 %5778 }
 0x3bc   : > { %5854 = vst.msk [vmem:[#allocation3 + $0xa8] sm:$0xff] %vm5832_vm11, %v5779_v33 }
 0x3c0   : > { %v5885_v29 = vld [vmem:[#allocation3 + $0xa0] sm:$0xff] }
 0x3c1   : > { %6917 = vmatprep.mubr.msk.f32.mxu1 %vm5901_vm12, %v5885_v29 }
 0x3c3   : > { %v5886_v40 = vld [vmem:[#allocation3 + $0xa8] sm:$0xff] }
 0x3c4   : > { %6918 = vmatmul.mubr.msk.f32.gmra.mrb[20].mxu1 %vm5901_vm12, %v5886_v40 }
 0x3c6   : > { %v5781_v57 = vpop.permute.xlu0 %5780  ;;  %v5783_v27 = vpop.permute.xlu1 %5782 }
 0x3c7   : > { %5855 = vst.msk [vmem:[#allocation3 + $0xb0] sm:$0xff] %vm5832_vm11, %v5781_v57  ;;  %5856 = vst.msk [vmem:[#allocation3 + $0xb8] sm:$0xff] %vm5832_vm11, %v5783_v27 }
 0x3ce   : > { %v5887_v38 = vld [vmem:[#allocation3 + $0xb0] sm:$0xff]  ;;  %v5888_v63 = vld [vmem:[#allocation3 + $0xb8] sm:$0xff] }
 0x3cf   : > { %6920 = vmatprep.mubr.msk.f32.mxu1 %vm5901_vm12, %v5887_v38 }
 0x3d0   : > { %6921 = vmatmul.mubr.msk.f32.gmra.mrb[22].mxu1 %vm5901_vm12, %v5888_v63 }
 0x3d2   : > { %v5785_v58 = vpop.permute.xlu0 %5784 }
 0x3d3   : > { %5857 = vst.msk [vmem:[#allocation3 + $0xc0] sm:$0xff] %vm5832_vm11, %v5785_v58 }
 0x3d5   : > { %v5787_v49 = vpop.permute.xlu1 %5786 }
 0x3d6   : > { %5858 = vst.msk [vmem:[#allocation3 + $0xc8] sm:$0xff] %vm5832_vm11, %v5787_v49 }
 0x3da   : > { %v5889_v56 = vld [vmem:[#allocation3 + $0xc0] sm:$0xff] }
 0x3db   : > { %6923 = vmatprep.mubr.msk.f32.mxu1 %vm5901_vm12, %v5889_v56 }
 0x3dd   : > { %v5890_v51 = vld [vmem:[#allocation3 + $0xc8] sm:$0xff] }
 0x3de   : > { %v5789_v37 = vpop.permute.xlu0 %5788  ;;  %6924 = vmatmul.mubr.msk.f32.gmra.mrb[24].mxu1 %vm5901_vm12, %v5890_v51 }
 0x3df   : > { %5859 = vst.msk [vmem:[#allocation3 + $0xd0] sm:$0xff] %vm5832_vm11, %v5789_v37 }
 0x3e3   : > { %v5791_v43 = vpop.permute.xlu1 %5790 }
 0x3e4   : > { %5860 = vst.msk [vmem:[#allocation3 + $0xd8] sm:$0xff] %vm5832_vm11, %v5791_v43 }
 0x3e6   : > { %v5891_v25 = vld [vmem:[#allocation3 + $0xd0] sm:$0xff] }
 0x3e7   : > { %6926 = vmatprep.mubr.msk.f32.mxu1 %vm5901_vm12, %v5891_v25 }
 0x3eb   : > { %v5892_v0 = vld [vmem:[#allocation3 + $0xd8] sm:$0xff] }
 0x3ec   : > { %v5793_v59 = vpop.permute.xlu0 %5792  ;;  %v5795_v50 = vpop.permute.xlu1 %5794  ;;  %6927 = vmatmul.mubr.msk.f32.gmra.mrb[26].mxu1 %vm5901_vm12, %v5892_v0 }
 0x3ed   : > { %5861 = vst.msk [vmem:[#allocation3 + $0xe0] sm:$0xff] %vm5832_vm11, %v5793_v59  ;;  %5862 = vst.msk [vmem:[#allocation3 + $0xe8] sm:$0xff] %vm5832_vm11, %v5795_v50 }
 0x3f4   : > { %v5893_v28 = vld [vmem:[#allocation3 + $0xe0] sm:$0xff]  ;;  %v5894_v45 = vld [vmem:[#allocation3 + $0xe8] sm:$0xff] }
 0x3f5   : > { %6929 = vmatprep.mubr.msk.f32.mxu1 %vm5901_vm12, %v5893_v28 }
 0x3f6   : > { %6930 = vmatmul.mubr.msk.f32.gmra.mrb[28].mxu1 %vm5901_vm12, %v5894_v45 }
 0x3f9   : > { %v5797_v2 = vpop.permute.xlu0 %5796  ;;  %v5799_v48 = vpop.permute.xlu1 %5798 }
 0x3fa   : > { %5863 = vst.msk [vmem:[#allocation3 + $0xf0] sm:$0xff] %vm5832_vm11, %v5797_v2  ;;  %5864 = vst.msk [vmem:[#allocation3 + $0xf8] sm:$0xff] %vm5832_vm11, %v5799_v48 }
 0x401   : > { %v5895_v16 = vld [vmem:[#allocation3 + $0xf0] sm:$0xff]  ;;  %v5896_v9 = vld [vmem:[#allocation3 + $0xf8] sm:$0xff] }
 0x402   : > { %6932 = vmatprep.mubr.msk.f32.mxu1 %vm5901_vm12, %v5895_v16 }
 0x403   : > { %6933 = vmatmul.mubr.msk.f32.gmra.mrb[30].mxu1 %vm5901_vm12, %v5896_v9 }
 0x451   : > { %v6889_v52 = vpop.f32.mrb[0].mxu1 }
 0x452   : > { %v6231_v15 = vmul.f32 %v6889_v52, %v10255_v61  ;;  %v6064_v62 = vpop.f32.mrb[1].mxu1 }
 0x453   : > { %v6230_v31 = vmul.f32 %v10255_v61, %v6064_v62 }
 0x454   : > { %v10265_v41 = vadd.f32 %v10260_v12, %v6231_v15 }
 0x455   : > { %v10268_v23 = vadd.f32 %v10260_v12, %v6230_v31  ;;  %v6892_v5 = vpop.f32.mrb[2].mxu1 }
 0x456   : > { %v6722_v30 = vmul.f32 -1.442695, %v10265_v41  ;;  %v6233_v13 = vmul.f32 %v6892_v5, %v10255_v61  ;;  %v6074_v26 = vpop.f32.mrb[3].mxu1 }
 0x457   : > { %v6721_v10 = vmul.f32 -1.442695, %v10268_v23  ;;  %v6232_v3 = vmul.f32 %v10255_v61, %v6074_v26 }
 0x458   : > { %7087 = vpow2.f32 %v6722_v30  ;;  %v10275_v11 = vadd.f32 %v10260_v12, %v6233_v13 }
 0x459   : > { %7089 = vpow2.f32 %v6721_v10  ;;  %v10278_v36 = vadd.f32 %v10260_v12, %v6232_v3  ;;  %v6895_v35 = vpop.f32.mrb[4].mxu1 }
 0x45a   : > { %v6724_v53 = vmul.f32 -1.442695, %v10275_v11  ;;  %v6235_v55 = vmul.f32 %v6895_v35, %v10255_v61  ;;  %v6084_v54 = vpop.f32.mrb[5].mxu1 }
 0x45b   : > { %v6723_v42 = vmul.f32 -1.442695, %v10278_v36  ;;  %v6234_v19 = vmul.f32 %v10255_v61, %v6084_v54 }
 0x45c   : > { %7091 = vpow2.f32 %v6724_v53  ;;  %v10285_v7 = vadd.f32 %v10260_v12, %v6235_v55 }
 0x45d   : > { %7093 = vpow2.f32 %v6723_v42  ;;  %v10288_v1 = vadd.f32 %v10260_v12, %v6234_v19  ;;  %v6898_v6 = vpop.f32.mrb[6].mxu1 }
 0x45e   : > { %v6726_v18 = vmul.f32 -1.442695, %v10285_v7  ;;  %v6237_v39 = vmul.f32 %v6898_v6, %v10255_v61  ;;  %v6094_v44 = vpop.f32.mrb[7].mxu1 }
 0x45f   : > { %v6725_v34 = vmul.f32 -1.442695, %v10288_v1  ;;  %v6236_v60 = vmul.f32 %v10255_v61, %v6094_v44 }
 0x460   : > { %7095 = vpow2.f32 %v6726_v18  ;;  %v10295_v24 = vadd.f32 %v10260_v12, %v6237_v39 }
 0x461   : > { %7097 = vpow2.f32 %v6725_v34  ;;  %v10298_v14 = vadd.f32 %v10260_v12, %v6236_v60  ;;  %v6901_v32 = vpop.f32.mrb[8].mxu1 }
 0x462   : > { %v7088_v4 = vpop.eup %7087  ;;  %v6728_v8 = vmul.f32 -1.442695, %v10295_v24  ;;  %v6239_v22 = vmul.f32 %v6901_v32, %v10255_v61  ;;  %v6104_v47 = vpop.f32.mrb[9].mxu1 }
 0x463   : > { %v7090_v20 = vpop.eup %7089  ;;  %v6398_v46 = vadd.f32 1.0, %v7088_v4  ;;  %v6727_v17 = vmul.f32 -1.442695, %v10298_v14  ;;  %v6238_v21 = vmul.f32 %v10255_v61, %v6104_v47 }
 0x464   : > { %v6397_v33 = vadd.f32 1.0, %v7090_v20  ;;  %7099 = vpow2.f32 %v6728_v8  ;;  %v10305_v29 = vadd.f32 %v10260_v12, %v6239_v22 }
 0x465   : > { %7101 = vrcp.f32 %v6398_v46  ;;  %v10308_v40 = vadd.f32 %v10260_v12, %v6238_v21  ;;  %v6904_v57 = vpop.f32.mrb[10].mxu1 }
 0x466   : > { %v7092_v27 = vpop.eup %7091  ;;  %7103 = vrcp.f32 %v6397_v33  ;;  %v6730_v38 = vmul.f32 -1.442695, %v10305_v29  ;;  %v6241_v63 = vmul.f32 %v6904_v57, %v10255_v61  ;;  %v6114_v58 = vpop.f32.mrb[11].mxu1 }
 0x467   : > { %v7094_v49 = vpop.eup %7093  ;;  %v6400_v56 = vadd.f32 1.0, %v7092_v27  ;;  %7105 = vpow2.f32 %v6727_v17  ;;  %v6729_v51 = vmul.f32 -1.442695, %v10308_v40  ;;  %v6240_v37 = vmul.f32 %v10255_v61, %v6114_v58 }
 0x468   : > { %v6399_v43 = vadd.f32 1.0, %v7094_v49  ;;  %7107 = vpow2.f32 %v6730_v38  ;;  %v10315_v25 = vadd.f32 %v10260_v12, %v6241_v63 }
 0x469   : > { %7109 = vrcp.f32 %v6400_v56  ;;  %v10318_v0 = vadd.f32 %v10260_v12, %v6240_v37  ;;  %v6907_v59 = vpop.f32.mrb[12].mxu1 }
 0x46a   : > { %v7096_v50 = vpop.eup %7095  ;;  %7111 = vrcp.f32 %v6399_v43  ;;  %v6732_v28 = vmul.f32 -1.442695, %v10315_v25  ;;  %v6243_v45 = vmul.f32 %v6907_v59, %v10255_v61  ;;  %v6124_v2 = vpop.f32.mrb[13].mxu1 }
 0x46b   : > { %v7098_v48 = vpop.eup %7097  ;;  %v6402_v16 = vadd.f32 1.0, %v7096_v50  ;;  %7113 = vpow2.f32 %v6729_v51  ;;  %v6731_v9 = vmul.f32 -1.442695, %v10318_v0  ;;  %v6242_v52 = vmul.f32 %v10255_v61, %v6124_v2 }
 0x46c   : > { %v6401_v15 = vadd.f32 1.0, %v7098_v48  ;;  %7115 = vpow2.f32 %v6732_v28  ;;  %v10325_v62 = vadd.f32 %v10260_v12, %v6243_v45 }
 0x46d   : > { %7117 = vrcp.f32 %v6402_v16  ;;  %v10328_v31 = vadd.f32 %v10260_v12, %v6242_v52 }
 0x46e   : > { %v7100_v5 = vpop.eup %7099  ;;  %7119 = vrcp.f32 %v6401_v15  ;;  %v6734_v30 = vmul.f32 -1.442695, %v10325_v62 }
 0x46f   : > { %v7102_v13 = vpop.eup %7101  ;;  %v6404_v26 = vadd.f32 1.0, %v7100_v5  ;;  %7121 = vpow2.f32 %v6731_v9  ;;  %v6733_v10 = vmul.f32 -1.442695, %v10328_v31 }
 0x470   : > { %v7104_v3 = vpop.eup %7103  ;;  %v6494_v35 = vmul.f32 %v7102_v13, %v10265_v41  ;;  %7123 = vpow2.f32 %v6734_v30 }
 0x471   : > { %v7106_v53 = vpop.eup %7105  ;;  %v6493_v55 = vmul.f32 %v7104_v3, %v10268_v23  ;;  %7125 = vrcp.f32 %v6404_v26 }
 0x472   : > { %v7108_v42 = vpop.eup %7107  ;;  %6526 = vst.msk [vmem:[%s10336_s12 + $0x8] sm:$0xff] %vm5901_vm12, %v6494_v35  ;;  %v6403_v19 = vadd.f32 1.0, %v7106_v53  ;;  %7127 = vpow2.f32 %v6733_v10 }
 0x473   : > { %v6910_v54 = vpop.f32.mrb[14].mxu1  ;;  %v7110_v39 = vpop.eup %7109  ;;  %6525 = vst.msk [vmem:[%s10336_s12] sm:$0xff] %vm5901_vm12, %v6493_v55  ;;  %v6406_v41 = vadd.f32 1.0, %v7108_v42 }
 0x474   : > { %v6245_v6 = vmul.f32 %v6910_v54, %v10255_v61  ;;  %v6134_v18 = vpop.f32.mrb[15].mxu1  ;;  %v7112_v34 = vpop.eup %7111  ;;  %v6496_v23 = vmul.f32 %v7110_v39, %v10275_v11  ;;  %7129 = vrcp.f32 %v6403_v19 }
 0x475   : > { %v6244_v44 = vmul.f32 %v10255_v61, %v6134_v18  ;;  %v7114_v32 = vpop.eup %7113  ;;  %v6495_v4 = vmul.f32 %v7112_v34, %v10278_v36  ;;  %7131 = vrcp.f32 %v6406_v41 }
 0x476   : > { %v10349_v60 = vadd.f32 %v10260_v12, %v6245_v6  ;;  %v7116_v22 = vpop.eup %7115  ;;  %6528 = vst.msk [vmem:[%s10336_s12 + $0x18] sm:$0xff] %vm5901_vm12, %v6496_v23  ;;  %v6405_v47 = vadd.f32 1.0, %v7114_v32 }
 0x477   : > { %v10353_v8 = vadd.f32 %v10260_v12, %v6244_v44  ;;  %v7118_v46 = vpop.eup %7117  ;;  %6527 = vst.msk [vmem:[%s10336_s12 + $0x10] sm:$0xff] %vm5901_vm12, %v6495_v4  ;;  %v6408_v11 = vadd.f32 1.0, %v7116_v22 }
 0x478   : > { %v6736_v20 = vmul.f32 -1.442695, %v10349_v60  ;;  %v7120_v21 = vpop.eup %7119  ;;  %v6498_v36 = vmul.f32 %v7118_v46, %v10285_v7  ;;  %7133 = vrcp.f32 %v6405_v47 }
 0x479   : > { %v6735_v17 = vmul.f32 -1.442695, %v10353_v8  ;;  %v7122_v33 = vpop.eup %7121  ;;  %v6497_v57 = vmul.f32 %v7120_v21, %v10288_v1  ;;  %7135 = vrcp.f32 %v6408_v11 }
 0x47a   : > { %v7124_v27 = vpop.eup %7123  ;;  %6530 = vst.msk [vmem:[%s10336_s12 + $0x28] sm:$0xff] %vm5901_vm12, %v6498_v36  ;;  %v6407_v38 = vadd.f32 1.0, %v7122_v33  ;;  %7137 = vpow2.f32 %v6736_v20 }
 0x47b   : > { %v7126_v58 = vpop.eup %7125  ;;  %6529 = vst.msk [vmem:[%s10336_s12 + $0x20] sm:$0xff] %vm5901_vm12, %v6497_v57  ;;  %v6410_v49 = vadd.f32 1.0, %v7124_v27  ;;  %7139 = vpow2.f32 %v6735_v17 }
 0x47c   : > { %v6913_v63 = vpop.f32.mrb[16].mxu1  ;;  %v7128_v51 = vpop.eup %7127  ;;  %v6500_v1 = vmul.f32 %v7126_v58, %v10295_v24  ;;  %7141 = vrcp.f32 %v6407_v38 }
 0x47d   : > { %v6247_v56 = vmul.f32 %v6913_v63, %v10255_v61  ;;  %v6144_v7 = vpop.f32.mrb[17].mxu1  ;;  %7143 = vrcp.f32 %v6410_v49  ;;  %v6409_v43 = vadd.f32 1.0, %v7128_v51 }
 0x47e   : > { %v6246_v37 = vmul.f32 %v10255_v61, %v6144_v7  ;;  %v7130_v50 = vpop.eup %7129  ;;  %6532 = vst.msk [vmem:[%s10336_s12 + $0x38] sm:$0xff] %vm5901_vm12, %v6500_v1 }
 0x47f   : > { %v10371_v59 = vadd.f32 %v10260_v12, %v6247_v56  ;;  %v7132_v45 = vpop.eup %7131  ;;  %v6499_v2 = vmul.f32 %v7130_v50, %v10298_v14  ;;  %7145 = vrcp.f32 %v6409_v43 }
 0x480   : > { %v10376_v28 = vadd.f32 %v10260_v12, %v6246_v37  ;;  %v6502_v48 = vmul.f32 %v7132_v45, %v10305_v29 }
 0x481   : > { %v6738_v24 = vmul.f32 -1.442695, %v10371_v59  ;;  %6531 = vst.msk [vmem:[%s10336_s12 + $0x30] sm:$0xff] %vm5901_vm12, %v6499_v2 }
 0x482   : > { %v6737_v16 = vmul.f32 -1.442695, %v10376_v28  ;;  %v7134_v9 = vpop.eup %7133  ;;  %6534 = vst.msk [vmem:[%s10336_s12 + $0x48] sm:$0xff] %vm5901_vm12, %v6502_v48 }
 0x483   : > { %7147 = vpow2.f32 %v6738_v24  ;;  %v7136_v52 = vpop.eup %7135  ;;  %v6501_v15 = vmul.f32 %v7134_v9, %v10308_v40 }
 0x484   : > { %7149 = vpow2.f32 %v6737_v16  ;;  %v7138_v14 = vpop.eup %7137  ;;  %v6504_v5 = vmul.f32 %v7136_v52, %v10315_v25 }
 0x485   : > { %v7140_v30 = vpop.eup %7139  ;;  %6533 = vst.msk [vmem:[%s10336_s12 + $0x40] sm:$0xff] %vm5901_vm12, %v6501_v15  ;;  %v6412_v29 = vadd.f32 1.0, %v7138_v14 }
 0x486   : > { %v7142_v13 = vpop.eup %7141  ;;  %6536 = vst.msk [vmem:[%s10336_s12 + $0x58] sm:$0xff] %vm5901_vm12, %v6504_v5  ;;  %v6411_v26 = vadd.f32 1.0, %v7140_v30 }
 0x487   : > { %v7144_v10 = vpop.eup %7143  ;;  %v6503_v3 = vmul.f32 %v7142_v13, %v10318_v0  ;;  %7151 = vrcp.f32 %v6412_v29 }
 0x488   : > { %v6506_v35 = vmul.f32 %v7144_v10, %v10325_v62  ;;  %7153 = vrcp.f32 %v6411_v26 }
 0x489   : > { %v7146_v40 = vpop.eup %7145  ;;  %6535 = vst.msk [vmem:[%s10336_s12 + $0x50] sm:$0xff] %vm5901_vm12, %v6503_v3 }
 0x48a   : > { %6538 = vst.msk [vmem:[%s10336_s12 + $0x68] sm:$0xff] %vm5901_vm12, %v6506_v35  ;;  %v6505_v53 = vmul.f32 %v7146_v40, %v10328_v31 }
 0x48b   : > { %v6916_v25 = vpop.f32.mrb[18].mxu1 }
 0x48c   : > { %v6249_v55 = vmul.f32 %v6916_v25, %v10255_v61  ;;  %v6154_v54 = vpop.f32.mrb[19].mxu1  ;;  %6537 = vst.msk [vmem:[%s10336_s12 + $0x60] sm:$0xff] %vm5901_vm12, %v6505_v53 }
 0x48d   : > { %v7148_v42 = vpop.eup %7147  ;;  %v6248_v19 = vmul.f32 %v10255_v61, %v6154_v54 }
 0x48e   : > { %v7150_v6 = vpop.eup %7149  ;;  %v6414_v0 = vadd.f32 1.0, %v7148_v42  ;;  %v6288_v62 = vadd.f32 %v10260_v12, %v6249_v55 }
 0x48f   : > { %v6413_v18 = vadd.f32 1.0, %v7150_v6  ;;  %v6287_v39 = vadd.f32 %v10260_v12, %v6248_v19 }
 0x490   : > { %7155 = vrcp.f32 %v6414_v0  ;;  %v6740_v41 = vmul.f32 -1.442695, %v6288_v62 }
 0x491   : > { %7157 = vrcp.f32 %v6413_v18  ;;  %v6739_v31 = vmul.f32 -1.442695, %v6287_v39  ;;  %v7152_v44 = vpop.eup %7151 }
 0x492   : > { %7159 = vpow2.f32 %v6740_v41  ;;  %v7154_v34 = vpop.eup %7153  ;;  %v6508_v23 = vmul.f32 %v7152_v44, %v10349_v60 }
 0x493   : > { %7161 = vpow2.f32 %v6739_v31  ;;  %v6507_v32 = vmul.f32 %v7154_v34, %v10353_v8 }
 0x494   : > { %6540 = vst.msk [vmem:[%s10336_s12 + $0x78] sm:$0xff] %vm5901_vm12, %v6508_v23 }
 0x495   : > { %6539 = vst.msk [vmem:[%s10336_s12 + $0x70] sm:$0xff] %vm5901_vm12, %v6507_v32 }
 0x497   : > { %v6919_v4 = vpop.f32.mrb[20].mxu1 }
 0x498   : > { %v6251_v22 = vmul.f32 %v6919_v4, %v10255_v61  ;;  %v6164_v47 = vpop.f32.mrb[21].mxu1 }
 0x499   : > { %v6250_v20 = vmul.f32 %v10255_v61, %v6164_v47 }
 0x49a   : > { %v7156_v46 = vpop.eup %7155  ;;  %v6290_v11 = vadd.f32 %v10260_v12, %v6251_v22 }
 0x49b   : > { %v7158_v17 = vpop.eup %7157  ;;  %v6510_v60 = vmul.f32 %v7156_v46, %v10371_v59  ;;  %v6289_v8 = vadd.f32 %v10260_v12, %v6250_v20 }
 0x49c   : > { %v7160_v21 = vpop.eup %7159  ;;  %v6509_v36 = vmul.f32 %v7158_v17, %v10376_v28  ;;  %v6742_v33 = vmul.f32 -1.442695, %v6290_v11 }
 0x49d   : > { %v7162_v57 = vpop.eup %7161  ;;  %6542 = vst.msk [vmem:[%s10336_s12 + $0x88] sm:$0xff] %vm5901_vm12, %v6510_v60  ;;  %v6416_v27 = vadd.f32 1.0, %v7160_v21  ;;  %v6741_v38 = vmul.f32 -1.442695, %v6289_v8 }
 0x49e   : > { %6541 = vst.msk [vmem:[%s10336_s12 + $0x80] sm:$0xff] %vm5901_vm12, %v6509_v36  ;;  %v6415_v63 = vadd.f32 1.0, %v7162_v57  ;;  %7163 = vpow2.f32 %v6742_v33 }
 0x49f   : > { %7165 = vrcp.f32 %v6416_v27 }
 0x4a0   : > { %7167 = vrcp.f32 %v6415_v63 }
 0x4a1   : > { %7169 = vpow2.f32 %v6741_v38 }
 0x4a3   : > { %v6922_v58 = vpop.f32.mrb[22].mxu1 }
 0x4a4   : > { %v6253_v49 = vmul.f32 %v6922_v58, %v10255_v61  ;;  %v6174_v56 = vpop.f32.mrb[23].mxu1 }
 0x4a5   : > { %v6252_v7 = vmul.f32 %v10255_v61, %v6174_v56 }
 0x4a6   : > { %v6292_v51 = vadd.f32 %v10260_v12, %v6253_v49 }
 0x4a7   : > { %v6291_v1 = vadd.f32 %v10260_v12, %v6252_v7 }
 0x4a8   : > { %v7164_v37 = vpop.eup %7163  ;;  %v6744_v43 = vmul.f32 -1.442695, %v6292_v51 }
 0x4a9   : > { %v7166_v59 = vpop.eup %7165  ;;  %v6418_v50 = vadd.f32 1.0, %v7164_v37  ;;  %v6743_v28 = vmul.f32 -1.442695, %v6291_v1 }
 0x4aa   : > { %v7168_v45 = vpop.eup %7167  ;;  %v6512_v2 = vmul.f32 %v7166_v59, %v6288_v62  ;;  %7171 = vpow2.f32 %v6744_v43 }
 0x4ab   : > { %v7170_v24 = vpop.eup %7169  ;;  %v6511_v48 = vmul.f32 %v7168_v45, %v6287_v39  ;;  %7173 = vrcp.f32 %v6418_v50 }
 0x4ac   : > { %6544 = vst.msk [vmem:[%s10336_s12 + $0x98] sm:$0xff] %vm5901_vm12, %v6512_v2  ;;  %v6417_v16 = vadd.f32 1.0, %v7170_v24  ;;  %7175 = vpow2.f32 %v6743_v28 }
 0x4ad   : > { %6543 = vst.msk [vmem:[%s10336_s12 + $0x90] sm:$0xff] %vm5901_vm12, %v6511_v48 }
 0x4ae   : > { %7177 = vrcp.f32 %v6417_v16 }
 0x4b1   : > { %v6925_v9 = vpop.f32.mrb[24].mxu1 }
 0x4b2   : > { %v6255_v52 = vmul.f32 %v6925_v9, %v10255_v61  ;;  %v6184_v15 = vpop.f32.mrb[25].mxu1 }
 0x4b3   : > { %v6254_v14 = vmul.f32 %v10255_v61, %v6184_v15 }
 0x4b4   : > { %v7172_v5 = vpop.eup %7171  ;;  %v6294_v30 = vadd.f32 %v10260_v12, %v6255_v52 }
 0x4b5   : > { %v7174_v29 = vpop.eup %7173  ;;  %v6420_v13 = vadd.f32 1.0, %v7172_v5  ;;  %v6293_v26 = vadd.f32 %v10260_v12, %v6254_v14 }
 0x4b6   : > { %v7176_v10 = vpop.eup %7175  ;;  %v6514_v3 = vmul.f32 %v7174_v29, %v6290_v11  ;;  %v6746_v35 = vmul.f32 -1.442695, %v6294_v30 }
 0x4b7   : > { %7179 = vrcp.f32 %v6420_v13  ;;  %v6419_v40 = vadd.f32 1.0, %v7176_v10  ;;  %v6745_v25 = vmul.f32 -1.442695, %v6293_v26 }
 0x4b8   : > { %v7178_v53 = vpop.eup %7177  ;;  %6546 = vst.msk [vmem:[%s10336_s12 + $0xa8] sm:$0xff] %vm5901_vm12, %v6514_v3  ;;  %7181 = vpow2.f32 %v6746_v35 }
 0x4b9   : > { %v6513_v55 = vmul.f32 %v7178_v53, %v6289_v8  ;;  %7183 = vrcp.f32 %v6419_v40 }
 0x4ba   : > { %7185 = vpow2.f32 %v6745_v25 }
 0x4bb   : > { %6545 = vst.msk [vmem:[%s10336_s12 + $0xa0] sm:$0xff] %vm5901_vm12, %v6513_v55 }
 0x4bf   : > { %v6928_v54 = vpop.f32.mrb[26].mxu1 }
 0x4c0   : > { %v6257_v42 = vmul.f32 %v6928_v54, %v10255_v61  ;;  %v6194_v19 = vpop.f32.mrb[27].mxu1 }
 0x4c1   : > { %v7180_v6 = vpop.eup %7179  ;;  %v6256_v0 = vmul.f32 %v10255_v61, %v6194_v19 }
 0x4c2   : > { %v7182_v62 = vpop.eup %7181  ;;  %v6516_v18 = vmul.f32 %v7180_v6, %v6292_v51  ;;  %v6296_v39 = vadd.f32 %v10260_v12, %v6257_v42 }
 0x4c3   : > { %v7184_v41 = vpop.eup %7183  ;;  %v6422_v31 = vadd.f32 1.0, %v7182_v62  ;;  %v6295_v44 = vadd.f32 %v10260_v12, %v6256_v0 }
 0x4c4   : > { %v7186_v34 = vpop.eup %7185  ;;  %6548 = vst.msk [vmem:[%s10336_s12 + $0xb8] sm:$0xff] %vm5901_vm12, %v6516_v18  ;;  %v6515_v23 = vmul.f32 %v7184_v41, %v6291_v1  ;;  %v6748_v32 = vmul.f32 -1.442695, %v6296_v39 }
 0x4c5   : > { %7187 = vrcp.f32 %v6422_v31  ;;  %v6421_v4 = vadd.f32 1.0, %v7186_v34  ;;  %v6747_v22 = vmul.f32 -1.442695, %v6295_v44 }
 0x4c6   : > { %6547 = vst.msk [vmem:[%s10336_s12 + $0xb0] sm:$0xff] %vm5901_vm12, %v6515_v23  ;;  %7189 = vpow2.f32 %v6748_v32 }
 0x4c7   : > { %7191 = vrcp.f32 %v6421_v4 }
 0x4c8   : > { %7193 = vpow2.f32 %v6747_v22 }
 0x4c9   : > { %v6931_v47 = vpop.f32.mrb[28].mxu1 }
 0x4ca   : > { %v6259_v20 = vmul.f32 %v6931_v47, %v10255_v61  ;;  %v6204_v46 = vpop.f32.mrb[29].mxu1 }
 0x4cb   : > { %v6258_v11 = vmul.f32 %v10255_v61, %v6204_v46 }
 0x4cc   : > { %v6298_v17 = vadd.f32 %v10260_v12, %v6259_v20 }
 0x4cd   : > { %v6297_v60 = vadd.f32 %v10260_v12, %v6258_v11 }
 0x4ce   : > { %v6750_v8 = vmul.f32 -1.442695, %v6298_v17 }
 0x4cf   : > { %v7188_v21 = vpop.eup %7187  ;;  %v6749_v36 = vmul.f32 -1.442695, %v6297_v60 }
 0x4d0   : > { %v7190_v33 = vpop.eup %7189  ;;  %v6518_v57 = vmul.f32 %v7188_v21, %v6294_v30  ;;  %7195 = vpow2.f32 %v6750_v8 }
 0x4d1   : > { %v7192_v27 = vpop.eup %7191  ;;  %v6424_v38 = vadd.f32 1.0, %v7190_v33  ;;  %7197 = vpow2.f32 %v6749_v36 }
 0x4d2   : > { %v7194_v63 = vpop.eup %7193  ;;  %6550 = vst.msk [vmem:[%s10336_s12 + $0xc8] sm:$0xff] %vm5901_vm12, %v6518_v57  ;;  %v6517_v58 = vmul.f32 %v7192_v27, %v6293_v26 }
 0x4d3   : > { %7199 = vrcp.f32 %v6424_v38  ;;  %v6423_v49 = vadd.f32 1.0, %v7194_v63 }
 0x4d4   : > { %6549 = vst.msk [vmem:[%s10336_s12 + $0xc0] sm:$0xff] %vm5901_vm12, %v6517_v58 }
 0x4d5   : > { %7201 = vrcp.f32 %v6423_v49 }
 0x4d6   : > { %v6934_v56 = vpop.f32.mrb[30].mxu1 }
 0x4d7   : > { %v6261_v7 = vmul.f32 %v6934_v56, %v10255_v61  ;;  %v6214_v51 = vpop.f32.mrb[31].mxu1 }
 0x4d8   : > { %v6260_v1 = vmul.f32 %v10255_v61, %v6214_v51 }
 0x4d9   : > { %v6300_v37 = vadd.f32 %v10260_v12, %v6261_v7 }
 0x4da   : > { %v7196_v43 = vpop.eup %7195  ;;  %v6299_v59 = vadd.f32 %v10260_v12, %v6260_v1 }
 0x4db   : > { %v7198_v50 = vpop.eup %7197  ;;  %v6426_v28 = vadd.f32 1.0, %v7196_v43  ;;  %v6752_v45 = vmul.f32 -1.442695, %v6300_v37 }
 0x4dc   : > { %v6425_v2 = vadd.f32 1.0, %v7198_v50  ;;  %v6751_v24 = vmul.f32 -1.442695, %v6299_v59 }
 0x4dd   : > { %v7200_v48 = vpop.eup %7199  ;;  %7203 = vrcp.f32 %v6426_v28 }
 0x4de   : > { %v6520_v16 = vmul.f32 %v7200_v48, %v6296_v39  ;;  %7205 = vrcp.f32 %v6425_v2 }
 0x4df   : > { %v7202_v9 = vpop.eup %7201  ;;  %7207 = vpow2.f32 %v6752_v45 }
 0x4e0   : > { %6552 = vst.msk [vmem:[%s10336_s12 + $0xd8] sm:$0xff] %vm5901_vm12, %v6520_v16  ;;  %v6519_v61 = vmul.f32 %v7202_v9, %v6295_v44  ;;  %7209 = vpow2.f32 %v6751_v24 }
 0x4e2   : > { %6551 = vst.msk [vmem:[%s10336_s12 + $0xd0] sm:$0xff] %vm5901_vm12, %v6519_v61 }
 0x4e7   : > { %v7204_v12 = vpop.eup %7203 }
 0x4e8   : > { %v7206_v52 = vpop.eup %7205  ;;  %v6522_v15 = vmul.f32 %v7204_v12, %v6298_v17 }
 0x4e9   : > { %v7208_v14 = vpop.eup %7207  ;;  %v6521_v5 = vmul.f32 %v7206_v52, %v6297_v60 }
 0x4ea   : > { %v7210_v30 = vpop.eup %7209  ;;  %6554 = vst.msk [vmem:[%s10336_s12 + $0xe8] sm:$0xff] %vm5901_vm12, %v6522_v15  ;;  %v6428_v29 = vadd.f32 1.0, %v7208_v14 }
 0x4eb   : > { %6553 = vst.msk [vmem:[%s10336_s12 + $0xe0] sm:$0xff] %vm5901_vm12, %v6521_v5  ;;  %v6427_v13 = vadd.f32 1.0, %v7210_v30 }
 0x4ec   : > { %7211 = vrcp.f32 %v6428_v29 }
 0x4ed   : > { %7213 = vrcp.f32 %v6427_v13 }
 0x4f6   : > { %v7212_v26 = vpop.eup %7211 }
 0x4f7   : > { %v7214_v10 = vpop.eup %7213  ;;  %v6524_v3 = vmul.f32 %v7212_v26, %v6300_v37 }
 0x4f8   : > { %v6523_v35 = vmul.f32 %v7214_v10, %v6299_v59 }
 0x4f9   : > { %6556 = vst.msk [vmem:[%s10336_s12 + $0xf8] sm:$0xff] %vm5901_vm12, %v6524_v3 }
 0x4fa   : > { %6555 = vst.msk [vmem:[%s10336_s12 + $0xf0] sm:$0xff] %vm5901_vm12, %v6523_v35 }
 0x4fb PF: > { %s17_s24 = sadd.s32 1, %s7237_s24  }
 0x4fc   : > { %p14_p4 = scmp.ge.s32.totalorder %s17_s24, 4  }
 0x4fe   :  { %16 = sbr.rel (!%p14_p4) target bundleno = 1 (0x1), region = 83 }

</bundles_post_ra>
